<compile_context>
chip_gen: v7x
topology: tpu7x:2x2x1
jax: 0.10.0
libtpu: 0.0.40
codegen_flags: <defaults>
</compile_context>

<pallas_src>
import functools

import jax
import jax.numpy as jnp
from jax.experimental import pallas as pl
from jax.experimental.pallas import tpu as pltpu

# ----------------------- DySat configuration (mirrors __init__) -----------------------
NUM_NODES      = 16
TIME_LENGTH    = 8
WINDOW         = -1
NUM_TIME_STEPS = TIME_LENGTH if WINDOW < 0 else min(TIME_LENGTH, WINDOW + 1)
ONE_HOT        = True
DIM_FEATURES   = NUM_NODES            # one_hot=True -> input feature dim == num_nodes
STRUCT_DIM     = 32                   # structural_layer_config = [32]
STRUCT_HEADS   = 4                    # structural_head_config  = [4]
TEMP_DIM       = 32                   # temporal_layer_config   = [32]
TEMP_HEADS     = 4                    # temporal_head_config    = [4]
RESIDUAL       = True
NEG_SLOPE      = 0.2                  # LeakyReLU slope in structural attention
MASK_VAL       = -(2.0 ** 32) + 1.0   # mask constant used by TemporalAttentionLayer


def _head_mask(n_heads, head_dim):
    """(n_heads, n_heads*head_dim) f32 mask; row h keeps columns h*head_dim..(h+1)*head_dim."""
    total = n_heads * head_dim
    hh = jax.lax.broadcasted_iota(jnp.int32, (n_heads, total), 0)
    cc = jax.lax.broadcasted_iota(jnp.int32, (n_heads, total), 1)
    lo = hh * head_dim
    return jnp.logical_and(cc >= lo, cc < lo + head_dim).astype(jnp.float32)


# ----------------------------------- fused kernel -------------------------------------
def dysat_fused_kernel(x_ref, adj_ref, wf_ref, pos_ref, wqkv_ref, lw_ref, lb_ref,
                       out_ref, *, t_steps, n_nodes, s_heads, s_hdim, t_heads, t_hdim):
    T, N = t_steps, n_nodes
    Ds = s_heads * s_hdim            # structural output dim (== temporal input dim)
    F = t_heads * t_hdim             # temporal model dim

    x = x_ref[...]                   # (T*N, Fin)  time-major rows (row = t*N + n)
    adj = adj_ref[...]               # (T, N, N);  adj[t, dst, src] (binary, self-loops)

    # --------------- structural GAT: one fused projection for all snapshots -----------
    # columns: [h (Ds) | residual (Ds) | alpha_l (H) | alpha_r (H) | zero-pad]
    proj = jnp.dot(x, wf_ref[...], preferred_element_type=jnp.float32)   # (T*N, 128)
    h2   = proj[:, :Ds]
    res  = proj[:, Ds:2 * Ds]
    alr3 = proj[:, 2 * Ds:2 * Ds + 2 * s_heads].reshape(T, N, 2 * s_heads)
    h3   = h2.reshape(T, N, Ds)

    # Per-head work is only the tiny (alpha_l + alpha_r) broadcast base; everything
    # heavy below runs once on the head-batched (T, H, N, N) tensor.
    bases = []
    for hd in range(s_heads):
        al = jnp.transpose(alr3[:, :, hd:hd + 1], (0, 2, 1))             # (T, 1, N) source
        ar = alr3[:, :, s_heads + hd:s_heads + hd + 1]                   # (T, N, 1) dest
        bases.append(al + ar)                                            # (T, N, N)
    base = jnp.stack(bases, axis=1)                                      # (T, H, N, N)

    adj4 = adj[:, None, :, :]                                            # (T, 1, N, N)
    is_edge = adj4 > 0.0
    # score[t, h, dst, src] = leaky_relu(edge_weight * (alpha_l[src] + alpha_r[dst]))
    score = adj4 * base
    score = jnp.where(score > 0, score, NEG_SLOPE * score)               # LeakyReLU(0.2)
    score = jnp.where(is_edge, score, MASK_VAL)                          # mask non-edges
    score = score - jnp.max(score, axis=-1, keepdims=True)
    e = jnp.exp(score)
    coeff = e * pl.reciprocal(jnp.sum(e, axis=-1, keepdims=True), approx=True)

    # One batched AV einsum (full-width), then head selection via mask-and-sum
    # (avoids per-head lane concatenates; extra MXU columns are free at this size).
    ctx = jnp.einsum('tbs,tsc->tbc', coeff.reshape(T, s_heads * N, N), h3,
                     preferred_element_type=jnp.float32)                 # (T, H*N, Ds)
    ctx4 = ctx.reshape(T, s_heads, N, Ds)
    hsel_s = _head_mask(s_heads, s_hdim)                                 # (H, Ds)
    s3 = jnp.sum(ctx4 * hsel_s[None, :, None, :], axis=1)                # (T, N, Ds)

    # ELU, then residual projection (already produced by the fused matmul).
    s3 = jnp.where(s3 > 0, s3, jnp.exp(jnp.minimum(s3, 0.0)) - 1.0)
    s_flat = s3.reshape(T * N, Ds)
    if RESIDUAL:
        s_flat = s_flat + res

    # ---- time-major (t*N+n) -> node-major (n*T+t) re-layout --------------------------
    # One-hot permutation built in-kernel from iotas (no HBM input, no div/mod), then a
    # single (N*T, T*N) x (T*N, Ds) MXU call.
    n_r = jax.lax.broadcasted_iota(jnp.int32, (N, T, T * N), 0).reshape(N * T, T * N)
    t_r = jax.lax.broadcasted_iota(jnp.int32, (N, T, T * N), 1).reshape(N * T, T * N)
    c_i = jax.lax.broadcasted_iota(jnp.int32, (N * T, T * N), 1)
    perm = (c_i == t_r * N + n_r).astype(jnp.float32)                    # (N*T, T*N)
    s_nm = jnp.dot(perm, s_flat, preferred_element_type=jnp.float32)     # (N*T, Ds)

    # ----------------------- temporal causal self-attention ---------------------------
    tin3 = s_nm.reshape(N, T, F) + pos_ref[...][None, :, :]              # + position emb
    tin_flat = tin3.reshape(N * T, F)
    qkv = jnp.dot(tin_flat, wqkv_ref[...],
                  preferred_element_type=jnp.float32)                    # fused QKV (N*T, 3F)
    q = qkv[:, :F].reshape(N, T, F)
    k = qkv[:, F:2 * F].reshape(N, T, F)
    v = qkv[:, 2 * F:].reshape(N, T, F)

    hsel_t = _head_mask(t_heads, t_hdim)                                 # (H, F)
    # Head-batched Q/K/V with batch index b = h*N + n.  q is masked to its head's columns
    # so contracting over full F gives the per-head dot product; v stays full-width and
    # the output columns are selected by hsel_t at the end (no lane concatenates).
    qb = (jnp.broadcast_to(q[None], (t_heads, N, T, F))
          * hsel_t[:, None, None, :]).reshape(t_heads * N, T, F)
    kb = jnp.broadcast_to(k[None], (t_heads, N, T, F)).reshape(t_heads * N, T, F)
    vb = jnp.broadcast_to(v[None], (t_heads, N, T, F)).reshape(t_heads * N, T, F)

    row = jax.lax.broadcasted_iota(jnp.int32, (T, T), 0)
    col = jax.lax.broadcasted_iota(jnp.int32, (T, T), 1)
    causal = (row >= col)[None, :, :]                                    # built once
    scale = 1.0 / (float(T) ** 0.5)                                      # DySat scales by sqrt(T)

    s = jnp.einsum('btc,bsc->bts', qb, kb,
                   preferred_element_type=jnp.float32) * scale           # (H*N, T, T)
    s = jnp.where(causal, s, MASK_VAL)
    s = s - jnp.max(s, axis=-1, keepdims=True)
    es = jnp.exp(s)
    attn = es * pl.reciprocal(jnp.sum(es, axis=-1, keepdims=True), approx=True)
    obf = jnp.einsum('bts,bsc->btc', attn, vb,
                     preferred_element_type=jnp.float32)                 # (H*N, T, F)
    obf4 = obf.reshape(t_heads, N, T, F)
    o = jnp.sum(obf4 * hsel_t[:, None, None, :], axis=0)                 # (N, T, F)

    # feedforward: relu(Linear(o)) + o ; residual: + temporal input
    o2 = o.reshape(N * T, F)
    ff = jnp.dot(o2, lw_ref[...], preferred_element_type=jnp.float32) + lb_ref[...]
    ff = jnp.maximum(ff, 0.0) + o2
    if RESIDUAL:
        ff = ff + tin_flat
    out_ref[...] = ff.reshape(N, T, F)


# ------------------------------------ DySat forward ------------------------------------
@jax.jit
def dysat_forward(x, adj, params):
    T, N, Fin = x.shape
    H, C = STRUCT_HEADS, STRUCT_DIM // STRUCT_HEADS
    Ds, F = STRUCT_DIM, TEMP_DIM
    TH, TC = TEMP_HEADS, TEMP_DIM // TEMP_HEADS
    assert Ds == F, "temporal input dim must equal structural output dim"

    # ---- wrapper-side weight fusion (free under jit; constant-folded) ----
    eye_h = jnp.eye(H, dtype=jnp.float32)
    a_l = (params["struct_att_l"][:, :, None] * eye_h[:, None, :]).reshape(Ds, H)
    a_r = (params["struct_att_r"][:, :, None] * eye_h[:, None, :]).reshape(Ds, H)
    # Fold the alpha projections into the structural matmul: (x@W)@a == x@(W@a).
    wl = params["struct_w"] @ a_l                                        # (Fin, H)
    wr = params["struct_w"] @ a_r                                        # (Fin, H)
    cols = 2 * Ds + 2 * H
    wcols = max(128, ((cols + 127) // 128) * 128)                        # lane-dense matmul output
    w_fused = jnp.concatenate(
        [params["struct_w"], params["struct_w_res"], wl, wr,
         jnp.zeros((Fin, wcols - cols), jnp.float32)], axis=1)           # (Fin, wcols)

    wqkv = jnp.concatenate([params["wq"], params["wk"], params["wv"]], axis=1)  # (F, 3F)

    x2 = x.reshape(T * N, Fin)      # 2D slab feeding one batched projection matmul

    kernel = functools.partial(
        dysat_fused_kernel, t_steps=T, n_nodes=N,
        s_heads=H, s_hdim=C, t_heads=TH, t_hdim=TC)

    return pl.pallas_call(
        kernel,
        out_shape=jax.ShapeDtypeStruct((N, T, F), jnp.float32),
        grid_spec=pltpu.PrefetchScalarGridSpec(
            num_scalar_prefetch=0,
            grid=(1,),
            in_specs=[
                pl.BlockSpec((T * N, Fin), lambda i: (0, 0)),
                pl.BlockSpec((T, N, N),    lambda i: (0, 0, 0)),
                pl.BlockSpec((Fin, wcols), lambda i: (0, 0)),
                pl.BlockSpec((T, F),       lambda i: (0, 0)),
                pl.BlockSpec((F, 3 * F),   lambda i: (0, 0)),
                pl.BlockSpec((F, F),       lambda i: (0, 0)),
                pl.BlockSpec((1, F),       lambda i: (0, 0)),
            ],
            out_specs=pl.BlockSpec((N, T, F), lambda i: (0, 0, 0)),
        ),
        compiler_params=pltpu.CompilerParams(dimension_semantics=("arbitrary",)),
    )(x2, adj, w_fused, params["pos_emb"], wqkv, params["lin_w"], params["lin_b"])


def init_params(key):
    ks = jax.random.split(key, 10)
    H, C = STRUCT_HEADS, STRUCT_DIM // STRUCT_HEADS

    def xavier(k, shape, fan_in):
        return jax.random.normal(k, shape, jnp.float32) / jnp.sqrt(float(fan_in))

    return {
        # StructuralAttentionLayer params
        "struct_w":     xavier(ks[0], (DIM_FEATURES, STRUCT_DIM), DIM_FEATURES),
        "struct_att_l": xavier(ks[1], (H, C), C),
        "struct_att_r": xavier(ks[2], (H, C), C),
        "struct_w_res": xavier(ks[3], (DIM_FEATURES, STRUCT_DIM), DIM_FEATURES),
        # TemporalAttentionLayer params
        "pos_emb": xavier(ks[4], (NUM_TIME_STEPS, TEMP_DIM), TEMP_DIM),
        "wq":      xavier(ks[5], (TEMP_DIM, TEMP_DIM), TEMP_DIM),
        "wk":      xavier(ks[6], (TEMP_DIM, TEMP_DIM), TEMP_DIM),
        "wv":      xavier(ks[7], (TEMP_DIM, TEMP_DIM), TEMP_DIM),
        "lin_w":   xavier(ks[8], (TEMP_DIM, TEMP_DIM), TEMP_DIM),
        "lin_b":   jnp.zeros((1, TEMP_DIM), jnp.float32),
    }


if __name__ == "__main__":
    key = jax.random.PRNGKey(0)
    k_x, k_a, k_p = jax.random.split(key, 3)

    # node features per snapshot: [T, N, DIM_FEATURES]
    x = jax.random.normal(k_x, (NUM_TIME_STEPS, NUM_NODES, DIM_FEATURES), jnp.float32)

    # dense adjacency per snapshot with self-loops: adj[t, dst, src] in {0, 1}
    # (binary adjacency required: the edge weight is folded inside the LeakyReLU,
    #  matching the reference scatter-softmax only for 0/1 weights.)
    rand_adj = (jax.random.uniform(k_a, (NUM_TIME_STEPS, NUM_NODES, NUM_NODES)) < 0.3)
    eye = jnp.eye(NUM_NODES, dtype=bool)[None, :, :]
    adj = (rand_adj | eye).astype(jnp.float32)

    params = init_params(k_p)

    out = dysat_forward(x, adj, params)
    out = jax.block_until_ready(out)
    assert out.shape == (NUM_NODES, NUM_TIME_STEPS, TEMP_DIM)
    assert bool(jnp.all(jnp.isfinite(out)))
    print("KERNEL_OK")
</pallas_src>

<mosaic_0001>
module attributes {stable_mosaic.version = 11 : i64} {
  func.func @dysat_fused_kernel(%arg0: i32, %arg1: memref<128x16xf32, #tpu.memory_space<vmem>>, %arg2: memref<8x16x16xf32, #tpu.memory_space<vmem>>, %arg3: memref<16x128xf32, #tpu.memory_space<vmem>>, %arg4: memref<8x32xf32, #tpu.memory_space<vmem>>, %arg5: memref<32x96xf32, #tpu.memory_space<vmem>>, %arg6: memref<32x32xf32, #tpu.memory_space<vmem>>, %arg7: memref<1x32xf32, #tpu.memory_space<vmem>>, %arg8: memref<16x8x32xf32, #tpu.memory_space<vmem>>) attributes {dimension_semantics = [#tpu.dimension_semantics<arbitrary>], iteration_bounds = array<i64: 1>, scalar_prefetch = 0 : i64, scratch_operands = 0 : i64, tpu.core_type = #tpu.core_type<tc>, window_params = [{pipeline_mode = #tpu.pipeline_mode<synchronous>, transform_indices = @transform_0, window_bounds = array<i64: 128, 16>}, {pipeline_mode = #tpu.pipeline_mode<synchronous>, transform_indices = @transform_1, window_bounds = array<i64: 8, 16, 16>}, {pipeline_mode = #tpu.pipeline_mode<synchronous>, transform_indices = @transform_2, window_bounds = array<i64: 16, 128>}, {pipeline_mode = #tpu.pipeline_mode<synchronous>, transform_indices = @transform_3, window_bounds = array<i64: 8, 32>}, {pipeline_mode = #tpu.pipeline_mode<synchronous>, transform_indices = @transform_4, window_bounds = array<i64: 32, 96>}, {pipeline_mode = #tpu.pipeline_mode<synchronous>, transform_indices = @transform_5, window_bounds = array<i64: 32, 32>}, {pipeline_mode = #tpu.pipeline_mode<synchronous>, transform_indices = @transform_6, window_bounds = array<i64: 1, 32>}, {pipeline_mode = #tpu.pipeline_mode<synchronous>, transform_indices = @transform_7, window_bounds = array<i64: 16, 8, 32>}]} {
    %c0 = arith.constant 0 : index
    %c0_0 = arith.constant 0 : index
    %0 = vector.load %arg1[%c0, %c0_0] : memref<128x16xf32, #tpu.memory_space<vmem>>, vector<128x16xf32>
    %c0_1 = arith.constant 0 : index
    %c0_2 = arith.constant 0 : index
    %c0_3 = arith.constant 0 : index
    %1 = vector.load %arg2[%c0_1, %c0_2, %c0_3] : memref<8x16x16xf32, #tpu.memory_space<vmem>>, vector<8x16x16xf32>
    %c0_4 = arith.constant 0 : index
    %c0_5 = arith.constant 0 : index
    %2 = vector.load %arg3[%c0_4, %c0_5] : memref<16x128xf32, #tpu.memory_space<vmem>>, vector<16x128xf32>
    %cst = arith.constant dense<0.000000e+00> : vector<128x128xf32>
    %3 = tpu.matmul %0, %2, %cst {dimension_numbers = #tpu.dot_dimension_numbers<[1], [0], [0], [1], [0, 0, 1, 1], [], []>} : vector<128x16xf32>, vector<16x128xf32>, vector<128x128xf32> -> vector<128x128xf32>
    %4 = vector.extract_strided_slice %3 {offsets = [0, 0], sizes = [128, 32], strides = [1, 1]} : vector<128x128xf32> to vector<128x32xf32>
    %5 = vector.extract_strided_slice %3 {offsets = [0, 32], sizes = [128, 32], strides = [1, 1]} : vector<128x128xf32> to vector<128x32xf32>
    %6 = vector.extract_strided_slice %3 {offsets = [0, 64], sizes = [128, 8], strides = [1, 1]} : vector<128x128xf32> to vector<128x8xf32>
    %7 = vector.shape_cast %6 : vector<128x8xf32> to vector<8x16x8xf32>
    %8 = vector.shape_cast %4 : vector<128x32xf32> to vector<8x16x32xf32>
    %9 = vector.extract_strided_slice %7 {offsets = [0, 0, 0], sizes = [8, 16, 1], strides = [1, 1, 1]} : vector<8x16x8xf32> to vector<8x16x1xf32>
    %10 = tpu.transpose %9, [0, 2, 1] : vector<8x16x1xf32> -> vector<8x1x16xf32>
    %11 = vector.extract_strided_slice %7 {offsets = [0, 0, 4], sizes = [8, 16, 1], strides = [1, 1, 1]} : vector<8x16x8xf32> to vector<8x16x1xf32>
    %12 = vector.broadcast %10 : vector<8x1x16xf32> to vector<8x16x16xf32>
    %13 = vector.broadcast %11 : vector<8x16x1xf32> to vector<8x16x16xf32>
    %14 = arith.addf %12, %13 : vector<8x16x16xf32>
    %15 = vector.extract_strided_slice %7 {offsets = [0, 0, 1], sizes = [8, 16, 1], strides = [1, 1, 1]} : vector<8x16x8xf32> to vector<8x16x1xf32>
    %16 = tpu.transpose %15, [0, 2, 1] : vector<8x16x1xf32> -> vector<8x1x16xf32>
    %17 = vector.extract_strided_slice %7 {offsets = [0, 0, 5], sizes = [8, 16, 1], strides = [1, 1, 1]} : vector<8x16x8xf32> to vector<8x16x1xf32>
    %18 = vector.broadcast %16 : vector<8x1x16xf32> to vector<8x16x16xf32>
    %19 = vector.broadcast %17 : vector<8x16x1xf32> to vector<8x16x16xf32>
    %20 = arith.addf %18, %19 : vector<8x16x16xf32>
    %21 = vector.extract_strided_slice %7 {offsets = [0, 0, 2], sizes = [8, 16, 1], strides = [1, 1, 1]} : vector<8x16x8xf32> to vector<8x16x1xf32>
    %22 = tpu.transpose %21, [0, 2, 1] : vector<8x16x1xf32> -> vector<8x1x16xf32>
    %23 = vector.extract_strided_slice %7 {offsets = [0, 0, 6], sizes = [8, 16, 1], strides = [1, 1, 1]} : vector<8x16x8xf32> to vector<8x16x1xf32>
    %24 = vector.broadcast %22 : vector<8x1x16xf32> to vector<8x16x16xf32>
    %25 = vector.broadcast %23 : vector<8x16x1xf32> to vector<8x16x16xf32>
    %26 = arith.addf %24, %25 : vector<8x16x16xf32>
    %27 = vector.extract_strided_slice %7 {offsets = [0, 0, 3], sizes = [8, 16, 1], strides = [1, 1, 1]} : vector<8x16x8xf32> to vector<8x16x1xf32>
    %28 = tpu.transpose %27, [0, 2, 1] : vector<8x16x1xf32> -> vector<8x1x16xf32>
    %29 = vector.extract_strided_slice %7 {offsets = [0, 0, 7], sizes = [8, 16, 1], strides = [1, 1, 1]} : vector<8x16x8xf32> to vector<8x16x1xf32>
    %30 = vector.broadcast %28 : vector<8x1x16xf32> to vector<8x16x16xf32>
    %31 = vector.broadcast %29 : vector<8x16x1xf32> to vector<8x16x16xf32>
    %32 = arith.addf %30, %31 : vector<8x16x16xf32>
    %33 = vector.shape_cast %14 : vector<8x16x16xf32> to vector<8x1x16x16xf32>
    %34 = vector.shape_cast %20 : vector<8x16x16xf32> to vector<8x1x16x16xf32>
    %35 = vector.shape_cast %26 : vector<8x16x16xf32> to vector<8x1x16x16xf32>
    %36 = vector.shape_cast %32 : vector<8x16x16xf32> to vector<8x1x16x16xf32>
    %37 = tpu.concatenate %33, %34, %35, %36 in 1 : vector<8x1x16x16xf32>, vector<8x1x16x16xf32>, vector<8x1x16x16xf32>, vector<8x1x16x16xf32> -> vector<8x4x16x16xf32>
    %38 = vector.shape_cast %1 : vector<8x16x16xf32> to vector<8x1x16x16xf32>
    %cst_6 = arith.constant 0.000000e+00 : f32
    %39 = vector.broadcast %cst_6 : f32 to vector<8x1x16x16xf32>
    %40 = arith.cmpf ogt, %38, %39 : vector<8x1x16x16xf32>
    %41 = vector.broadcast %38 : vector<8x1x16x16xf32> to vector<8x4x16x16xf32>
    %42 = arith.mulf %41, %37 : vector<8x4x16x16xf32>
    %cst_7 = arith.constant 0.000000e+00 : f32
    %43 = vector.broadcast %cst_7 : f32 to vector<8x4x16x16xf32>
    %44 = arith.cmpf ogt, %42, %43 : vector<8x4x16x16xf32>
    %cst_8 = arith.constant 2.000000e-01 : f32
    %45 = vector.broadcast %cst_8 : f32 to vector<8x4x16x16xf32>
    %46 = arith.mulf %45, %42 : vector<8x4x16x16xf32>
    %47 = arith.select %44, %42, %46 : vector<8x4x16x16xi1>, vector<8x4x16x16xf32>
    %cst_9 = arith.constant -4.2949673E+9 : f32
    %48 = vector.shape_cast %40 : vector<8x1x16x16xi1> to vector<8x1x16x16xi1>
    %49 = vector.broadcast %48 : vector<8x1x16x16xi1> to vector<8x4x16x16xi1>
    %50 = vector.broadcast %cst_9 : f32 to vector<8x4x16x16xf32>
    %51 = arith.select %49, %47, %50 : vector<8x4x16x16xi1>, vector<8x4x16x16xf32>
    %cst_10 = arith.constant dense<0xFF800000> : vector<8x4x16xf32>
    %52 = vector.multi_reduction <maximumf>, %51, %cst_10 [3] : vector<8x4x16x16xf32> to vector<8x4x16xf32>
    %53 = vector.shape_cast %52 : vector<8x4x16xf32> to vector<8x4x16x1xf32>
    %54 = vector.broadcast %53 : vector<8x4x16x1xf32> to vector<8x4x16x16xf32>
    %55 = arith.subf %51, %54 : vector<8x4x16x16xf32>
    %56 = math.exp %55 : vector<8x4x16x16xf32>
    %cst_11 = arith.constant dense<0.000000e+00> : vector<8x4x16xf32>
    %57 = vector.multi_reduction <add>, %56, %cst_11 [3] : vector<8x4x16x16xf32> to vector<8x4x16xf32>
    %58 = vector.shape_cast %57 : vector<8x4x16xf32> to vector<8x4x16x1xf32>
    %59 = tpu.reciprocal %58 {approx = true} : vector<8x4x16x1xf32> -> vector<8x4x16x1xf32>
    %60 = vector.broadcast %59 : vector<8x4x16x1xf32> to vector<8x4x16x16xf32>
    %61 = arith.mulf %56, %60 : vector<8x4x16x16xf32>
    %62 = vector.shape_cast %61 : vector<8x4x16x16xf32> to vector<8x64x16xf32>
    "tpu.trace_start"() <{level = 10 : i32, message = "tbs,tsc->tbc"}> : () -> ()
    %cst_12 = arith.constant dense<0.000000e+00> : vector<8x64x32xf32>
    %63 = tpu.matmul %62, %8, %cst_12 {dimension_numbers = #tpu.dot_dimension_numbers<[2], [1], [1], [2], [0, 0, 0, 1, 1, 2], [0], [0]>} : vector<8x64x16xf32>, vector<8x16x32xf32>, vector<8x64x32xf32> -> vector<8x64x32xf32>
    "tpu.trace_stop"() : () -> ()
    %64 = vector.shape_cast %63 : vector<8x64x32xf32> to vector<8x4x16x32xf32>
    %65 = tpu.iota {dimensions = array<i32: 0>} : vector<4x32xi32>
    %66 = tpu.iota {dimensions = array<i32: 1>} : vector<4x32xi32>
    %c8_i32 = arith.constant 8 : i32
    %67 = vector.broadcast %c8_i32 : i32 to vector<4x32xi32>
    %68 = arith.muli %65, %67 : vector<4x32xi32>
    %69 = arith.cmpi sge, %66, %68 : vector<4x32xi32>
    %c8_i32_13 = arith.constant 8 : i32
    %70 = vector.broadcast %c8_i32_13 : i32 to vector<4x32xi32>
    %71 = arith.addi %68, %70 : vector<4x32xi32>
    %72 = arith.cmpi slt, %66, %71 : vector<4x32xi32>
    %73 = arith.andi %69, %72 : vector<4x32xi1>
    %74 = arith.extui %73 : vector<4x32xi1> to vector<4x32xi32>
    %75 = arith.sitofp %74 : vector<4x32xi32> to vector<4x32xf32>
    %76 = vector.shape_cast %75 : vector<4x32xf32> to vector<1x4x1x32xf32>
    %77 = vector.broadcast %76 : vector<1x4x1x32xf32> to vector<8x4x16x32xf32>
    %78 = arith.mulf %64, %77 : vector<8x4x16x32xf32>
    %cst_14 = arith.constant dense<0.000000e+00> : vector<8x16x32xf32>
    %79 = vector.multi_reduction <add>, %78, %cst_14 [1] : vector<8x4x16x32xf32> to vector<8x16x32xf32>
    %cst_15 = arith.constant 0.000000e+00 : f32
    %80 = vector.broadcast %cst_15 : f32 to vector<8x16x32xf32>
    %81 = arith.cmpf ogt, %79, %80 : vector<8x16x32xf32>
    %cst_16 = arith.constant 0.000000e+00 : f32
    %82 = vector.broadcast %cst_16 : f32 to vector<8x16x32xf32>
    %83 = arith.minimumf %79, %82 : vector<8x16x32xf32>
    %84 = math.exp %83 : vector<8x16x32xf32>
    %cst_17 = arith.constant 1.000000e+00 : f32
    %85 = vector.broadcast %cst_17 : f32 to vector<8x16x32xf32>
    %86 = arith.subf %84, %85 : vector<8x16x32xf32>
    %87 = arith.select %81, %79, %86 : vector<8x16x32xi1>, vector<8x16x32xf32>
    %88 = vector.shape_cast %87 : vector<8x16x32xf32> to vector<128x32xf32>
    %89 = arith.addf %88, %5 : vector<128x32xf32>
    %90 = tpu.iota {dimensions = array<i32: 0>} : vector<16x8x128xi32>
    %91 = vector.shape_cast %90 : vector<16x8x128xi32> to vector<128x128xi32>
    %92 = tpu.iota {dimensions = array<i32: 1>} : vector<16x8x128xi32>
    %93 = vector.shape_cast %92 : vector<16x8x128xi32> to vector<128x128xi32>
    %94 = tpu.iota {dimensions = array<i32: 1>} : vector<128x128xi32>
    %c16_i32 = arith.constant 16 : i32
    %95 = vector.broadcast %c16_i32 : i32 to vector<128x128xi32>
    %96 = arith.muli %93, %95 : vector<128x128xi32>
    %97 = arith.addi %96, %91 : vector<128x128xi32>
    %98 = arith.cmpi eq, %94, %97 : vector<128x128xi32>
    %99 = arith.extui %98 : vector<128x128xi1> to vector<128x128xi32>
    %100 = arith.sitofp %99 : vector<128x128xi32> to vector<128x128xf32>
    %cst_18 = arith.constant dense<0.000000e+00> : vector<128x32xf32>
    %101 = tpu.matmul %100, %89, %cst_18 {dimension_numbers = #tpu.dot_dimension_numbers<[1], [0], [0], [1], [0, 0, 1, 1], [], []>} : vector<128x128xf32>, vector<128x32xf32>, vector<128x32xf32> -> vector<128x32xf32>
    %102 = vector.shape_cast %101 : vector<128x32xf32> to vector<16x8x32xf32>
    %c0_19 = arith.constant 0 : index
    %c0_20 = arith.constant 0 : index
    %103 = vector.load %arg4[%c0_19, %c0_20] : memref<8x32xf32, #tpu.memory_space<vmem>>, vector<8x32xf32>
    %104 = vector.shape_cast %103 : vector<8x32xf32> to vector<1x8x32xf32>
    %105 = vector.broadcast %104 : vector<1x8x32xf32> to vector<16x8x32xf32>
    %106 = arith.addf %102, %105 : vector<16x8x32xf32>
    %107 = vector.shape_cast %106 : vector<16x8x32xf32> to vector<128x32xf32>
    %c0_21 = arith.constant 0 : index
    %c0_22 = arith.constant 0 : index
    %108 = vector.load %arg5[%c0_21, %c0_22] : memref<32x96xf32, #tpu.memory_space<vmem>>, vector<32x96xf32>
    %cst_23 = arith.constant dense<0.000000e+00> : vector<128x96xf32>
    %109 = tpu.matmul %107, %108, %cst_23 {dimension_numbers = #tpu.dot_dimension_numbers<[1], [0], [0], [1], [0, 0, 1, 1], [], []>} : vector<128x32xf32>, vector<32x96xf32>, vector<128x96xf32> -> vector<128x96xf32>
    %110 = vector.extract_strided_slice %109 {offsets = [0, 0], sizes = [128, 32], strides = [1, 1]} : vector<128x96xf32> to vector<128x32xf32>
    %111 = vector.shape_cast %110 : vector<128x32xf32> to vector<16x8x32xf32>
    %112 = vector.extract_strided_slice %109 {offsets = [0, 32], sizes = [128, 32], strides = [1, 1]} : vector<128x96xf32> to vector<128x32xf32>
    %113 = vector.shape_cast %112 : vector<128x32xf32> to vector<16x8x32xf32>
    %114 = vector.extract_strided_slice %109 {offsets = [0, 64], sizes = [128, 32], strides = [1, 1]} : vector<128x96xf32> to vector<128x32xf32>
    %115 = vector.shape_cast %114 : vector<128x32xf32> to vector<16x8x32xf32>
    %116 = tpu.iota {dimensions = array<i32: 0>} : vector<4x32xi32>
    %117 = tpu.iota {dimensions = array<i32: 1>} : vector<4x32xi32>
    %c8_i32_24 = arith.constant 8 : i32
    %118 = vector.broadcast %c8_i32_24 : i32 to vector<4x32xi32>
    %119 = arith.muli %116, %118 : vector<4x32xi32>
    %120 = arith.cmpi sge, %117, %119 : vector<4x32xi32>
    %c8_i32_25 = arith.constant 8 : i32
    %121 = vector.broadcast %c8_i32_25 : i32 to vector<4x32xi32>
    %122 = arith.addi %119, %121 : vector<4x32xi32>
    %123 = arith.cmpi slt, %117, %122 : vector<4x32xi32>
    %124 = arith.andi %120, %123 : vector<4x32xi1>
    %125 = arith.extui %124 : vector<4x32xi1> to vector<4x32xi32>
    %126 = arith.sitofp %125 : vector<4x32xi32> to vector<4x32xf32>
    %127 = vector.shape_cast %111 : vector<16x8x32xf32> to vector<1x16x8x32xf32>
    %128 = vector.shape_cast %127 : vector<1x16x8x32xf32> to vector<1x16x8x32xf32>
    %129 = vector.broadcast %128 : vector<1x16x8x32xf32> to vector<4x16x8x32xf32>
    %130 = vector.shape_cast %126 : vector<4x32xf32> to vector<4x1x1x32xf32>
    %131 = vector.broadcast %130 : vector<4x1x1x32xf32> to vector<4x16x8x32xf32>
    %132 = arith.mulf %129, %131 : vector<4x16x8x32xf32>
    %133 = vector.shape_cast %132 : vector<4x16x8x32xf32> to vector<64x8x32xf32>
    %134 = vector.shape_cast %113 : vector<16x8x32xf32> to vector<1x16x8x32xf32>
    %135 = vector.shape_cast %134 : vector<1x16x8x32xf32> to vector<1x16x8x32xf32>
    %136 = vector.broadcast %135 : vector<1x16x8x32xf32> to vector<4x16x8x32xf32>
    %137 = vector.shape_cast %136 : vector<4x16x8x32xf32> to vector<64x8x32xf32>
    %138 = vector.shape_cast %115 : vector<16x8x32xf32> to vector<1x16x8x32xf32>
    %139 = vector.shape_cast %138 : vector<1x16x8x32xf32> to vector<1x16x8x32xf32>
    %140 = vector.broadcast %139 : vector<1x16x8x32xf32> to vector<4x16x8x32xf32>
    %141 = vector.shape_cast %140 : vector<4x16x8x32xf32> to vector<64x8x32xf32>
    %142 = tpu.iota {dimensions = array<i32: 0>} : vector<8x8xi32>
    %143 = tpu.iota {dimensions = array<i32: 1>} : vector<8x8xi32>
    %144 = arith.cmpi sge, %142, %143 : vector<8x8xi32>
    %145 = vector.shape_cast %144 : vector<8x8xi1> to vector<1x8x8xi1>
    "tpu.trace_start"() <{level = 10 : i32, message = "btc,bsc->bts"}> : () -> ()
    %cst_26 = arith.constant dense<0.000000e+00> : vector<64x8x8xf32>
    %146 = tpu.matmul %133, %137, %cst_26 {dimension_numbers = #tpu.dot_dimension_numbers<[2], [2], [1], [1], [0, 0, 0, 1, 1, 1], [0], [0]>} : vector<64x8x32xf32>, vector<64x8x32xf32>, vector<64x8x8xf32> -> vector<64x8x8xf32>
    "tpu.trace_stop"() : () -> ()
    %cst_27 = arith.constant 0.353553385 : f32
    %147 = vector.broadcast %cst_27 : f32 to vector<64x8x8xf32>
    %148 = arith.mulf %146, %147 : vector<64x8x8xf32>
    %cst_28 = arith.constant -4.2949673E+9 : f32
    %149 = vector.shape_cast %145 : vector<1x8x8xi1> to vector<1x8x8xi1>
    %150 = vector.broadcast %149 : vector<1x8x8xi1> to vector<64x8x8xi1>
    %151 = vector.broadcast %cst_28 : f32 to vector<64x8x8xf32>
    %152 = arith.select %150, %148, %151 : vector<64x8x8xi1>, vector<64x8x8xf32>
    %cst_29 = arith.constant dense<0xFF800000> : vector<64x8xf32>
    %153 = vector.multi_reduction <maximumf>, %152, %cst_29 [2] : vector<64x8x8xf32> to vector<64x8xf32>
    %154 = vector.shape_cast %153 : vector<64x8xf32> to vector<64x8x1xf32>
    %155 = vector.broadcast %154 : vector<64x8x1xf32> to vector<64x8x8xf32>
    %156 = arith.subf %152, %155 : vector<64x8x8xf32>
    %157 = math.exp %156 : vector<64x8x8xf32>
    %cst_30 = arith.constant dense<0.000000e+00> : vector<64x8xf32>
    %158 = vector.multi_reduction <add>, %157, %cst_30 [2] : vector<64x8x8xf32> to vector<64x8xf32>
    %159 = vector.shape_cast %158 : vector<64x8xf32> to vector<64x8x1xf32>
    %160 = tpu.reciprocal %159 {approx = true} : vector<64x8x1xf32> -> vector<64x8x1xf32>
    %161 = vector.broadcast %160 : vector<64x8x1xf32> to vector<64x8x8xf32>
    %162 = arith.mulf %157, %161 : vector<64x8x8xf32>
    "tpu.trace_start"() <{level = 10 : i32, message = "bts,bsc->btc"}> : () -> ()
    %cst_31 = arith.constant dense<0.000000e+00> : vector<64x8x32xf32>
    %163 = tpu.matmul %162, %141, %cst_31 {dimension_numbers = #tpu.dot_dimension_numbers<[2], [1], [1], [2], [0, 0, 0, 1, 1, 2], [0], [0]>} : vector<64x8x8xf32>, vector<64x8x32xf32>, vector<64x8x32xf32> -> vector<64x8x32xf32>
    "tpu.trace_stop"() : () -> ()
    %164 = vector.shape_cast %163 : vector<64x8x32xf32> to vector<4x16x8x32xf32>
    %165 = vector.shape_cast %126 : vector<4x32xf32> to vector<4x1x1x32xf32>
    %166 = vector.broadcast %165 : vector<4x1x1x32xf32> to vector<4x16x8x32xf32>
    %167 = arith.mulf %164, %166 : vector<4x16x8x32xf32>
    %cst_32 = arith.constant dense<0.000000e+00> : vector<16x8x32xf32>
    %168 = vector.multi_reduction <add>, %167, %cst_32 [0] : vector<4x16x8x32xf32> to vector<16x8x32xf32>
    %169 = vector.shape_cast %168 : vector<16x8x32xf32> to vector<128x32xf32>
    %c0_33 = arith.constant 0 : index
    %c0_34 = arith.constant 0 : index
    %170 = vector.load %arg6[%c0_33, %c0_34] : memref<32x32xf32, #tpu.memory_space<vmem>>, vector<32x32xf32>
    %cst_35 = arith.constant dense<0.000000e+00> : vector<128x32xf32>
    %171 = tpu.matmul %169, %170, %cst_35 {dimension_numbers = #tpu.dot_dimension_numbers<[1], [0], [0], [1], [0, 0, 1, 1], [], []>} : vector<128x32xf32>, vector<32x32xf32>, vector<128x32xf32> -> vector<128x32xf32>
    %c0_36 = arith.constant 0 : index
    %c0_37 = arith.constant 0 : index
    %172 = vector.load %arg7[%c0_36, %c0_37] : memref<1x32xf32, #tpu.memory_space<vmem>>, vector<1x32xf32>
    %173 = vector.broadcast %172 : vector<1x32xf32> to vector<128x32xf32>
    %174 = arith.addf %171, %173 : vector<128x32xf32>
    %cst_38 = arith.constant 0.000000e+00 : f32
    %175 = vector.broadcast %cst_38 : f32 to vector<128x32xf32>
    %176 = arith.maximumf %174, %175 : vector<128x32xf32>
    %177 = arith.addf %176, %169 : vector<128x32xf32>
    %178 = arith.addf %177, %107 : vector<128x32xf32>
    %179 = vector.shape_cast %178 : vector<128x32xf32> to vector<16x8x32xf32>
    %c0_39 = arith.constant 0 : index
    %c0_40 = arith.constant 0 : index
    %c0_41 = arith.constant 0 : index
    %180 = vector.load %arg8[%c0_39, %c0_40, %c0_41] : memref<16x8x32xf32, #tpu.memory_space<vmem>>, vector<16x8x32xf32>
    tpu.vector_store %arg8[%c0_39, %c0_40, %c0_41], %179 {strides = array<i32>} : memref<16x8x32xf32, #tpu.memory_space<vmem>>, vector<16x8x32xf32>,
    return
  }
  func.func @transform_0(%arg0: i32) -> (i32, i32) {
    %c0_i32 = arith.constant 0 : i32
    %c0_i32_0 = arith.constant 0 : i32
    %c0_i32_1 = arith.constant 0 : i32
    return %c0_i32, %c0_i32_0 : i32, i32
  }
  func.func @transform_1(%arg0: i32) -> (i32, i32, i32) {
    %c0_i32 = arith.constant 0 : i32
    %c0_i32_0 = arith.constant 0 : i32
    %c0_i32_1 = arith.constant 0 : i32
    %c0_i32_2 = arith.constant 0 : i32
    return %c0_i32, %c0_i32_0, %c0_i32_1 : i32, i32, i32
  }
  func.func @transform_2(%arg0: i32) -> (i32, i32) {
    %c0_i32 = arith.constant 0 : i32
    %c0_i32_0 = arith.constant 0 : i32
    %c0_i32_1 = arith.constant 0 : i32
    return %c0_i32, %c0_i32_0 : i32, i32
  }
  func.func @transform_3(%arg0: i32) -> (i32, i32) {
    %c0_i32 = arith.constant 0 : i32
    %c0_i32_0 = arith.constant 0 : i32
    %c0_i32_1 = arith.constant 0 : i32
    return %c0_i32, %c0_i32_0 : i32, i32
  }
  func.func @transform_4(%arg0: i32) -> (i32, i32) {
    %c0_i32 = arith.constant 0 : i32
    %c0_i32_0 = arith.constant 0 : i32
    %c0_i32_1 = arith.constant 0 : i32
    return %c0_i32, %c0_i32_0 : i32, i32
  }
  func.func @transform_5(%arg0: i32) -> (i32, i32) {
    %c0_i32 = arith.constant 0 : i32
    %c0_i32_0 = arith.constant 0 : i32
    %c0_i32_1 = arith.constant 0 : i32
    return %c0_i32, %c0_i32_0 : i32, i32
  }
  func.func @transform_6(%arg0: i32) -> (i32, i32) {
    %c0_i32 = arith.constant 0 : i32
    %c0_i32_0 = arith.constant 0 : i32
    %c0_i32_1 = arith.constant 0 : i32
    return %c0_i32, %c0_i32_0 : i32, i32
  }
  func.func @transform_7(%arg0: i32) -> (i32, i32, i32) {
    %c0_i32 = arith.constant 0 : i32
    %c0_i32_0 = arith.constant 0 : i32
    %c0_i32_1 = arith.constant 0 : i32
    %c0_i32_2 = arith.constant 0 : i32
    return %c0_i32, %c0_i32_0, %c0_i32_1 : i32, i32, i32
  }
}

</mosaic_0001>

<bundles_post_ra>
// kernel: dysat_forward.1
= control target key start
LH: loop header
LB: loop body
LE: loop exit
PB: predicated region body
PF: predicated region fallthrough
CT: control target
= control target key end

     0   :  { %12 = vsyncpa [#allocation3], 0  ;;  %s22857_s0 = inlined_call_operand.vmem [shape: f32[128,16], index: 0, kind: input, shape index: {}]   ;;  %s22858_s1 = inlined_call_operand.vmem [shape: f32[8,16,16], index: 1, kind: input, shape index: {}]   ;;  %s22859_s2 = inlined_call_operand.vmem [shape: f32[16,128], index: 2, kind: input, shape index: {}]   ;;  %s22860_s3 = inlined_call_operand.hbm [shape: f32[8,32], index: 3, kind: input, shape index: {}]   ;;  %s22861_s4 = inlined_call_operand.vmem [shape: f32[32,96], index: 4, kind: input, shape index: {}]   ;;  %s22862_s5 = inlined_call_operand.hbm [shape: f32[32,32], index: 5, kind: input, shape index: {}]   ;;  %s22863_s6 = inlined_call_operand.hbm [shape: f32[1,32], index: 6, kind: input, shape index: {}]   ;;  %s22864_s7 = inlined_call_operand.hbm [shape: f32[16,8,32], index: 7, kind: output, shape index: {}]  }
   0x1   :  { %13 = vsyncpa [#allocation6], 0 }
   0x2   :  { %14 = vsyncpa [#allocation4], 0  ;;  %s18186_s24 = smov [#allocation5]   ;;  %s18092_s28 = scalar_lea.hbm %s22862_s5, 512 }
   0x3   :  { %s38_s25 = sshll.u32 %s18186_s24, 4  ;;  %p18093_p0 = scmp.ne.s32.totalorder %s22862_s5, %s18092_s28  ;;  %s39_s25 = int_to_ptr.vmem [resolvable:$true] %s38_s25 }
   0x4   :  { %p18096_p1 = scmp.lt.u32.totalorder %s18092_s28, %s22862_s5 }
   0x6   :  { %p18098_p2 = pnand %p18096_p1, %p18093_p0 }
   0x8   :  { %18101 = shalt.err (!%p18098_p2)
}
   0x9   :  { %s18102_s10 = scalar_lea.vmem %s39_s25, 512  ;;  %p18107_p4 = scmp.lt.s32.totalorder %s39_s25, %s39_s25 }
   0xa   :  { %p18103_p3 = scmp.ne.s32.totalorder %s39_s25, %s18102_s10  ;;  %p18108_p5 = scmp.lt.s32.totalorder %s18102_s10, %s18102_s10 }
   0xc   :  { %p18109_p6 = por %p18108_p5, %p18107_p4 }
   0xe   :  { %p18110_p7 = pnand %p18109_p6, %p18103_p3 }
  0x10   :  { %18113 = shalt.err (!%p18110_p7)
}
  0x11   :  { %s18187_s11 = smov 128   ;;  %s18188_s12 = smov 8  }
  0x12   :  { %44 = dma.hbm_to_vmem [thread:$0]  %s22862_s5, 512, %s39_s25, [#allocation6], %s18187_s11, %s18187_s11, %s18188_s12  }
  0x13   :  { %s18189_s15 = smov [#allocation2]   ;;  %s18190_s17 = smov [#allocation7]  }
  0x14   :  { %s27_s16 = sshll.u32 %s18189_s15, 4  ;;  %s51_s18 = sshll.u32 %s18190_s17, 4  ;;  %s28_s16 = int_to_ptr.vmem [resolvable:$true] %s27_s16  ;;  %s52_s18 = int_to_ptr.vmem [resolvable:$true] %s51_s18 }
  0x15   :  { %s18114_s21 = scalar_lea.hbm %s22860_s3, 128 }
  0x16   :  { %p18115_p8 = scmp.ne.s32.totalorder %s22860_s3, %s18114_s21  ;;  %p18118_p9 = scmp.lt.u32.totalorder %s18114_s21, %s22860_s3 }
  0x18   :  { %p18120_p10 = pnand %p18118_p9, %p18115_p8 }
  0x1a   :  { %18123 = shalt.err (!%p18120_p10)
}
  0x1b   :  { %s18124_s5 = scalar_lea.vmem %s28_s16, 128  ;;  %p18129_p12 = scmp.lt.s32.totalorder %s28_s16, %s28_s16 }
  0x1c   :  { %p18125_p11 = scmp.ne.s32.totalorder %s28_s16, %s18124_s5  ;;  %p18130_p13 = scmp.lt.s32.totalorder %s18124_s5, %s18124_s5 }
  0x1e   :  { %p18131_p0 = por %p18130_p13, %p18129_p12 }
  0x20   :  { %p18132_p1 = pnand %p18131_p0, %p18125_p11 }
  0x22   :  { %18135 = shalt.err (!%p18132_p1)
}
  0x23   :  { %30 = dma.hbm_to_vmem [thread:$0]  %s22860_s3, 128, %s28_s16, [#allocation3]  }
  0x24   :  { %s18136_s30 = scalar_lea.hbm %s22863_s6, 16 }
  0x25   :  { %p18137_p2 = scmp.ne.s32.totalorder %s22863_s6, %s18136_s30  ;;  %p18140_p3 = scmp.lt.u32.totalorder %s18136_s30, %s22863_s6 }
  0x27   :  { %p18142_p4 = pnand %p18140_p3, %p18137_p2 }
  0x29   :  { %18145 = shalt.err (!%p18142_p4)
}
  0x2a   :  { %s18146_s14 = scalar_lea.vmem %s52_s18, 16  ;;  %s18150_s15 = scalar_lea.vmem %s52_s18, 32 }
  0x2b   :  { %p18147_p5 = scmp.ne.s32.totalorder %s52_s18, %s18146_s14  ;;  %p18151_p6 = scmp.lt.s32.totalorder %s52_s18, %s52_s18 }
  0x2c   :  { %p18152_p7 = scmp.lt.s32.totalorder %s18150_s15, %s18146_s14 }
  0x2e   :  { %p18153_p8 = por %p18152_p7, %p18151_p6 }
  0x30   :  { %p18154_p9 = pnand %p18153_p8, %p18147_p5 }
  0x32   :  { %18157 = shalt.err (!%p18154_p9)
}
  0x33   :  { %54 = dma.hbm_to_vmem [thread:$0]  %s22863_s6, 16, %s52_s18, [#allocation6]  }
  0x34   :  { %18180 = dma.done.wait [#allocation3], 128  }
  0x35   :  { %18181 = vsyncadd [#allocation3], 4294967168 }
  0x36   :  { %18182 = dma.done.wait [#allocation6], 528  }
  0x37   :  { %18183 = vsyncadd [#allocation6], 4294966768  ;;  %vm98_vm0 = vcmask 130048   ;;  %v96_v0 = vld [vmem:[%s22859_s2] sm:$0xff]  ;;  %v97_v1 = vld [vmem:[%s22859_s2 + $0x8] sm:$0xff]  ;;  %v22867_v19 = vmov 68  }
  0x38   :  { %v64_v2 = vld [vmem:[%s22857_s0] sm:$0xff]  ;;  %v17422_v3 = vpack.c.bf16 %v97_v1, %v96_v0  ;;  %v65_v5 = vld [vmem:[%s22857_s0 + $0x8] sm:$0xff]  ;;  %v66_v7 = vld [vmem:[%s22857_s0 + $0x10] sm:$0xff]  ;;  %17527 = vset.pattern.permute.xlu1 %v22867_v19  ;;  %v22865_v20 = vmov 70   ;;  %s18193_s5 = smov 63   ;;  %s18194_s25 = smov 64  }
  0x39   :  { %16510 = vmatprep.mubr.msk.f32.mxu0 %vm98_vm0, %v64_v2  ;;  %v72_v4 = vld [vmem:[%s22857_s0 + $0x40] sm:$0xff]  ;;  %v73_v6 = vld [vmem:[%s22857_s0 + $0x48] sm:$0xff]  ;;  %v74_v8 = vld [vmem:[%s22857_s0 + $0x50] sm:$0xff]  ;;  %17533 = vset.pattern.permute.xlu0 %v22865_v20  ;;  %s18196_s27 = smov 61  }
  0x3a   :  { %17423 = vmatprep.subr.bf16.mxu0 %v17422_v3  ;;  %17506 = vmatprep.subr.bf16.mxu1 %v17422_v3  ;;  %v67_v9 = vld [vmem:[%s22857_s0 + $0x18] sm:$0xff]  ;;  %v68_v11 = vld [vmem:[%s22857_s0 + $0x20] sm:$0xff]  ;;  %v69_v13 = vld [vmem:[%s22857_s0 + $0x28] sm:$0xff] }
  0x3b   :  { %17425 = vmatpush3.bf16.msra.mxu0 %v17422_v3  ;;  %17507 = vmatpush3.bf16.msra.mxu1 %v17422_v3  ;;  %v75_v10 = vld [vmem:[%s22857_s0 + $0x58] sm:$0xff]  ;;  %v76_v12 = vld [vmem:[%s22857_s0 + $0x60] sm:$0xff]  ;;  %v77_v14 = vld [vmem:[%s22857_s0 + $0x68] sm:$0xff] }
  0x3c   :  { %16522 = vmatprep.mubr.msk.f32.mxu1 %vm98_vm0, %v72_v4  ;;  %v70_v15 = vld [vmem:[%s22857_s0 + $0x30] sm:$0xff]  ;;  %v71_v17 = vld [vmem:[%s22857_s0 + $0x38] sm:$0xff] }
  0x3d   :  { %v78_v16 = vld [vmem:[%s22857_s0 + $0x70] sm:$0xff]  ;;  %v79_v18 = vld [vmem:[%s22857_s0 + $0x78] sm:$0xff]  ;;  %s18195_s0 = smov 62  }
  0x3e   :  { %16511 = vmatmul.mubr.msk.f32.vlgmr.msra.gmra.mrb[0].mxu0 %vm98_vm0, %v65_v5  ;;  %16523 = vmatmul.mubr.msk.f32.vlgmr.msra.gmra.mrb[0].mxu1 %vm98_vm0, %v73_v6 }
  0x3f   :  { %16513 = vmatprep.mubr.msk.f32.mxu0 %vm98_vm0, %v66_v7  ;;  %16525 = vmatprep.mubr.msk.f32.mxu1 %vm98_vm0, %v74_v8 }
  0x42   :  { %16514 = vmatmul.mubr.msk.f32.gmra.mrb[2].mxu0 %vm98_vm0, %v67_v9  ;;  %16526 = vmatmul.mubr.msk.f32.gmra.mrb[2].mxu1 %vm98_vm0, %v75_v10 }
  0x43   :  { %16516 = vmatprep.mubr.msk.f32.mxu0 %vm98_vm0, %v68_v11  ;;  %16528 = vmatprep.mubr.msk.f32.mxu1 %vm98_vm0, %v76_v12 }
  0x46   :  { %16517 = vmatmul.mubr.msk.f32.gmra.mrb[4].mxu0 %vm98_vm0, %v69_v13  ;;  %16529 = vmatmul.mubr.msk.f32.gmra.mrb[4].mxu1 %vm98_vm0, %v77_v14 }
  0x47   :  { %16519 = vmatprep.mubr.msk.f32.mxu0 %vm98_vm0, %v70_v15  ;;  %16531 = vmatprep.mubr.msk.f32.mxu1 %vm98_vm0, %v78_v16 }
  0x4a   :  { %16520 = vmatmul.mubr.msk.f32.gmra.mrb[6].mxu0 %vm98_vm0, %v71_v17  ;;  %16532 = vmatmul.mubr.msk.f32.gmra.mrb[6].mxu1 %vm98_vm0, %v79_v18 }
 0x111   :  { %v18356_v21 = vpop.f32.mrb[0].mxu0  ;;  %v18358_v22 = vpop.f32.mrb[0].mxu1 }
 0x112   :  { %23024 = vst [vmem:[#allocation12_spill] sm:$0xff] %v18356_v21  ;;  %23025 = vst [vmem:[#allocation13_spill] sm:$0xff] %v18358_v22  ;;  %726 = vrot.lane.b32.xlu1 %v18356_v21, %s18193_s5  ;;  %310 = vrot.lane.b32.xlu0 %v18356_v21, %s18194_s25  ;;  %v18364_v23 = vpop.f32.mrb[1].mxu0  ;;  %v18366_v24 = vpop.f32.mrb[1].mxu1 }
 0x113   :  { %23026 = vst [vmem:[#allocation14_spill] sm:$0xff] %v18364_v23  ;;  %23027 = vst [vmem:[#allocation15_spill] sm:$0xff] %v18366_v24  ;;  %v17426_v25 = vpack.c.bf16 %v18356_v21, %v18364_v23  ;;  %v18372_v26 = vpack.c.bf16 %v18358_v22, %v18366_v24 }
 0x115   :  { %23028 = vst [vmem:[#allocation16_spill] sm:$0xff] %v18372_v26  ;;  %17427 = vmatprep.subr.bf16.mxu1 %v17426_v25  ;;  %v18374_v27 = vpop.f32.mrb[2].mxu0  ;;  %v18376_v28 = vpop.f32.mrb[2].mxu1 }
 0x116   :  { %23029 = vst [vmem:[#allocation17_spill] sm:$0xff] %v18374_v27  ;;  %23030 = vst [vmem:[#allocation18_spill] sm:$0xff] %v18376_v28  ;;  %1142 = vrot.lane.b32.xlu1 %v18356_v21, %s18195_s0  ;;  %308 = vrot.lane.b32.xlu0 %v18364_v23, %s18194_s25  ;;  %v18382_v29 = vpop.f32.mrb[3].mxu0  ;;  %v18384_v30 = vpop.f32.mrb[3].mxu1 }
 0x117   :  { %23031 = vst [vmem:[#allocation19_spill] sm:$0xff] %v18382_v29  ;;  %23032 = vst [vmem:[#allocation20_spill] sm:$0xff] %v18384_v30  ;;  %17429 = vmatpush3.bf16.msra.mxu1 %v17426_v25  ;;  %v18388_v31 = vpack.c.bf16 %v18374_v27, %v18382_v29  ;;  %v18392_v32 = vpack.c.bf16 %v18376_v28, %v18384_v30 }
 0x119   :  { %23033 = vst [vmem:[#allocation21_spill] sm:$0xff] %v18388_v31  ;;  %23034 = vst [vmem:[#allocation22_spill] sm:$0xff] %v18392_v32  ;;  %v18394_v33 = vpop.f32.mrb[4].mxu0  ;;  %17431 = vmatprep.subr.bf16.mxu1 %v18388_v31  ;;  %v18397_v34 = vpop.f32.mrb[4].mxu1 }
 0x11a   :  { %23035 = vst [vmem:[#allocation23_spill] sm:$0xff] %v18394_v33  ;;  %23036 = vst [vmem:[#allocation24_spill] sm:$0xff] %v18397_v34  ;;  %1558 = vrot.lane.b32.xlu1 %v18356_v21, %s18196_s27  ;;  %1140 = vrot.lane.b32.xlu0 %v18364_v23, %s18195_s0  ;;  %v18403_v35 = vpop.f32.mrb[5].mxu0  ;;  %v18405_v36 = vpop.f32.mrb[5].mxu1 }
 0x11b   :  { %23037 = vst [vmem:[#allocation25_spill] sm:$0xff] %v18403_v35  ;;  %23038 = vst [vmem:[#allocation26_spill] sm:$0xff] %v18405_v36  ;;  %v17434_v37 = vpack.c.bf16 %v18394_v33, %v18403_v35  ;;  %v18411_v38 = vpack.c.bf16 %v18397_v34, %v18405_v36 }
 0x11d   :  { %23039 = vst [vmem:[#allocation27_spill] sm:$0xff] %v18411_v38  ;;  %17435 = vmatprep.subr.bf16.mxu0 %v17434_v37  ;;  %v18413_v39 = vpop.f32.mrb[6].mxu0  ;;  %v18415_v40 = vpop.f32.mrb[6].mxu1 }
 0x11e   :  { %23040 = vst [vmem:[#allocation28_spill] sm:$0xff] %v18413_v39  ;;  %23041 = vst [vmem:[#allocation29_spill] sm:$0xff] %v18415_v40  ;;  %649 = vperm.xlu1 %17527, %v18356_v21   ;;  %1556 = vrot.lane.b32.xlu0 %v18364_v23, %s18196_s27  ;;  %v18420_v41 = vpop.f32.mrb[7].mxu0  ;;  %v18422_v42 = vpop.f32.mrb[7].mxu1 }
 0x11f   :  { %23042 = vst [vmem:[#allocation30_spill] sm:$0xff] %v18420_v41  ;;  %23043 = vst [vmem:[#allocation31_spill] sm:$0xff] %v18422_v42  ;;  %17437 = vmatpush3.bf16.msra.mxu0 %v17434_v37  ;;  %v18426_v43 = vpack.c.bf16 %v18413_v39, %v18420_v41  ;;  %v18430_v44 = vpack.c.bf16 %v18415_v40, %v18422_v42 }
 0x120   :  { %17443 = vmatprep.subr.bf16.mxu0 %v18372_v26 }
 0x121   :  { %23044 = vst [vmem:[#allocation32_spill] sm:$0xff] %v18426_v43  ;;  %23045 = vst [vmem:[#allocation33_spill] sm:$0xff] %v18430_v44 }
 0x122   :  { %17528 = vset.pattern.permute.xlu1 %v22865_v20  ;;  %324 = vrot.lane.b32.xlu0 %v18366_v24, %s18194_s25 }
 0x123   :  { %1481 = vperm.xlu1 %17528, %v18356_v21  }
 0x126   :  { %1156 = vrot.lane.b32.xlu0 %v18366_v24, %s18195_s0 }
 0x127   :  { %326 = vrot.lane.b32.xlu1 %v18358_v22, %s18194_s25 }
 0x128   :  { %17529 = vset.pattern.permute.xlu1 %v22867_v19 }
 0x12a   :  { %1572 = vrot.lane.b32.xlu0 %v18366_v24, %s18196_s27 }
 0x12b   :  { %742 = vrot.lane.b32.xlu1 %v18358_v22, %s18193_s5 }
 0x12e   :  { %330 = vrot.lane.b32.xlu0 %v18376_v28, %s18194_s25 }
 0x12f   :  { %1158 = vrot.lane.b32.xlu1 %v18358_v22, %s18195_s0 }
 0x132   :  { %746 = vrot.lane.b32.xlu0 %v18376_v28, %s18193_s5 }
 0x133   :  { %1574 = vrot.lane.b32.xlu1 %v18358_v22, %s18196_s27 }
 0x136   :  { %1162 = vrot.lane.b32.xlu0 %v18376_v28, %s18195_s0 }
 0x137   :  { %724 = vrot.lane.b32.xlu1 %v18364_v23, %s18193_s5 }
 0x13a   :  { %1578 = vrot.lane.b32.xlu0 %v18376_v28, %s18196_s27 }
 0x13b   :  { %645 = vperm.xlu1 %17529, %v18364_v23  }
 0x13e   :  { %312 = vrot.lane.b32.xlu0 %v18382_v29, %s18194_s25 }
 0x13f   :  { %17530 = vset.pattern.permute.xlu1 %v22865_v20 }
 0x140   :  { %1477 = vperm.xlu1 %17530, %v18364_v23  }
 0x142   :  { %728 = vrot.lane.b32.xlu0 %v18382_v29, %s18193_s5 }
 0x144   :  { %740 = vrot.lane.b32.xlu1 %v18366_v24, %s18193_s5 }
 0x145   :  { %17531 = vset.pattern.permute.xlu1 %v22867_v19 }
 0x146   :  { %1144 = vrot.lane.b32.xlu0 %v18382_v29, %s18195_s0 }
 0x148   :  { %314 = vrot.lane.b32.xlu1 %v18374_v27, %s18194_s25 }
 0x14a   :  { %744 = vrot.lane.b32.xlu0 %v18384_v30, %s18193_s5 }
 0x14c   :  { %730 = vrot.lane.b32.xlu1 %v18374_v27, %s18193_s5 }
 0x14e   :  { %1160 = vrot.lane.b32.xlu0 %v18384_v30, %s18195_s0 }
 0x150   :  { %1146 = vrot.lane.b32.xlu1 %v18374_v27, %s18195_s0 }
 0x152   :  { %1576 = vrot.lane.b32.xlu0 %v18384_v30, %s18196_s27 }
 0x154   :  { %1562 = vrot.lane.b32.xlu1 %v18374_v27, %s18196_s27 }
 0x156   :  { %318 = vrot.lane.b32.xlu0 %v18394_v33, %s18194_s25 }
 0x158   :  { %657 = vperm.xlu1 %17531, %v18374_v27  }
 0x15a   :  { %334 = vrot.lane.b32.xlu0 %v18397_v34, %s18194_s25 }
 0x15c   :  { %17532 = vset.pattern.permute.xlu1 %v22865_v20 }
 0x15d   :  { %1489 = vperm.xlu1 %17532, %v18374_v27  }
 0x15e   :  { %1497 = vperm.xlu0 %17533, %v18394_v33  }
 0x161   :  { %1560 = vrot.lane.b32.xlu1 %v18382_v29, %s18196_s27 }
 0x162   :  { %1166 = vrot.lane.b32.xlu0 %v18397_v34, %s18195_s0 }
 0x165   :  { %328 = vrot.lane.b32.xlu1 %v18384_v30, %s18194_s25 }
 0x166   :  { %316 = vrot.lane.b32.xlu0 %v18403_v35, %s18194_s25 }
 0x169   :  { %1485 = vperm.xlu1 %17532, %v18382_v29  }
 0x16a   :  { %732 = vrot.lane.b32.xlu0 %v18403_v35, %s18193_s5 }
 0x16d   :  { %734 = vrot.lane.b32.xlu1 %v18394_v33, %s18193_s5 }
 0x16e   :  { %1148 = vrot.lane.b32.xlu0 %v18403_v35, %s18195_s0  ;;  %17534 = vset.pattern.permute.xlu1 %v22867_v19 }
 0x171   :  { %1150 = vrot.lane.b32.xlu1 %v18394_v33, %s18195_s0 }
 0x172   :  { %1564 = vrot.lane.b32.xlu0 %v18403_v35, %s18196_s27 }
 0x175   :  { %1566 = vrot.lane.b32.xlu1 %v18394_v33, %s18196_s27 }
 0x176   :  { %332 = vrot.lane.b32.xlu0 %v18405_v36, %s18194_s25 }
 0x179   :  { %750 = vrot.lane.b32.xlu1 %v18397_v34, %s18193_s5 }
 0x17a   :  { %748 = vrot.lane.b32.xlu0 %v18405_v36, %s18193_s5 }
 0x17d   :  { %1582 = vrot.lane.b32.xlu1 %v18397_v34, %s18196_s27 }
 0x17e   :  { %1493 = vperm.xlu0 %17533, %v18403_v35  }
 0x181   :  { %1164 = vrot.lane.b32.xlu1 %v18405_v36, %s18195_s0 }
 0x182   :  { %1580 = vrot.lane.b32.xlu0 %v18405_v36, %s18196_s27 }
 0x184   :  { %v311_v45 = vpop.permute.xlu0 %310  ;;  %v18537_v48 = vpop.permute.xlu1 %726 }
 0x185   :  { %673 = vperm.xlu1 %17534, %v18413_v39  }
 0x186   :  { %322 = vrot.lane.b32.xlu0 %v18413_v39, %s18194_s25 }
 0x188   :  { %v309_v46 = vpop.permute.xlu0 %308  ;;  %v1143_v50 = vpop.permute.xlu1 %1142 }
 0x189   :  { %754 = vrot.lane.b32.xlu1 %v18415_v40, %s18193_s5 }
 0x18a   :  { %738 = vrot.lane.b32.xlu0 %v18413_v39, %s18193_s5  ;;  %17535 = vset.pattern.permute.xlu1 %v22865_v20 }
 0x18c   :  { %v1141_v47 = vpop.permute.xlu0 %1140  ;;  %v18557_v53 = vpop.permute.xlu1 %1558 }
 0x18d   :  { %1505 = vperm.xlu1 %17535, %v18413_v39  }
 0x18e   :  { %1154 = vrot.lane.b32.xlu0 %v18413_v39, %s18195_s0 }
 0x190   :  { %v18542_v49 = vpop.permute.xlu0 %1556 }
 0x191   :  { %1170 = vrot.lane.b32.xlu1 %v18415_v40, %s18195_s0 }
 0x192   :  { %1570 = vrot.lane.b32.xlu0 %v18413_v39, %s18196_s27  ;;  %17536 = vset.pattern.permute.xlu1 %v22867_v19 }
 0x194   :  { %v18549_v51 = vpop.permute.xlu0 %324 }
 0x195   :  { %1568 = vrot.lane.b32.xlu1 %v18420_v41, %s18196_s27 }
 0x196   :  { %338 = vrot.lane.b32.xlu0 %v18415_v40, %s18194_s25 }
 0x198   :  { %v18555_v52 = vpop.permute.xlu0 %1156 }
 0x199   :  { %669 = vperm.xlu1 %17536, %v18420_v41  }
 0x19a   :  { %1586 = vrot.lane.b32.xlu0 %v18415_v40, %s18196_s27 }
 0x19c   :  { %v18562_v54 = vpop.permute.xlu0 %1572 }
 0x19d   :  { %v18564_v55 = vpop.permute.xlu1 %649  ;;  %752 = vrot.lane.b32.xlu1 %v18422_v42, %s18193_s5 }
 0x19e   :  { %320 = vrot.lane.b32.xlu0 %v18420_v41, %s18194_s25 }
 0x1a0   :  { %v18570_v56 = vpop.permute.xlu0 %330 }
 0x1a2   :  { %v18572_v57 = vpop.permute.xlu1 %1481  ;;  %736 = vrot.lane.b32.xlu0 %v18420_v41, %s18193_s5 }
 0x1a4   :  { %v18576_v58 = vpop.permute.xlu0 %746 }
 0x1a6   :  { %v18578_v59 = vpop.permute.xlu1 %326  ;;  %1152 = vrot.lane.b32.xlu0 %v18420_v41, %s18195_s0 }
 0x1a8   :  { %v18582_v60 = vpop.permute.xlu0 %1162 }
 0x1aa   :  { %v18584_v61 = vpop.permute.xlu1 %742  ;;  %336 = vrot.lane.b32.xlu0 %v18422_v42, %s18194_s25 }
 0x1ac   :  { %v18588_v62 = vpop.permute.xlu0 %1578 }
 0x1ae   :  { %v18590_v63 = vpop.permute.xlu1 %1158  ;;  %1168 = vrot.lane.b32.xlu0 %v18422_v42, %s18195_s0 }
 0x1b0   :  { %v313_v0 = vpop.permute.xlu0 %312 }
 0x1b2   :  { %v18594_v1 = vpop.permute.xlu1 %1574  ;;  %1501 = vperm.xlu0 %17533, %v18420_v41  }
 0x1b4   :  { %v18601_v3 = vpop.permute.xlu0 %728 }
 0x1b6   :  { %v18597_v2 = vpop.permute.xlu1 %724  ;;  %1584 = vrot.lane.b32.xlu0 %v18422_v42, %s18196_s27 }
 0x1b8   :  { %v1145_v5 = vpop.permute.xlu0 %1144 }
 0x1ba   :  { %v18603_v4 = vpop.permute.xlu1 %645  ;;  %1509 = vperm.xlu0 %17533, %v18366_v24  }
 0x1bc   :  { %v18610_v7 = vpop.permute.xlu0 %744 }
 0x1be   :  { %1513 = vperm.xlu0 %17533, %v18358_v22  }
 0x1bf   :  { %v18607_v6 = vpop.permute.xlu1 %1477 }
 0x1c0   :  { %v18616_v10 = vpop.permute.xlu0 %1160 }
 0x1c2   :  { %17537 = vset.pattern.permute.xlu0 %v22867_v19  ;;  %v22877_v19 = vmov 71  }
 0x1c3   :  { %v18612_v8 = vpop.permute.xlu1 %740  ;;  %653 = vperm.xlu0 %17537, %v18382_v29  }
 0x1c4   :  { %v18621_v12 = vpop.permute.xlu0 %1576 }
 0x1c6   :  { %356 = vxpose.xlu1.b32.start [1/2] (short) (narrow) %v309_v46, 8  ;;  %v22869_v46 = vmov 69  }
 0x1c7   :  { %v315_v9 = vpop.permute.xlu1 %314  ;;  %661 = vperm.xlu0 %17537, %v18403_v35  }
 0x1c8   :  { %v18624_v14 = vpop.permute.xlu0 %318 }
 0x1ca   :  { %357 = vxpose.xlu1.b32.end [2/2] (short) (narrow) %v311_v45, 8 }
 0x1cb   :  { %v18618_v11 = vpop.permute.xlu1 %730  ;;  %665 = vperm.xlu0 %17537, %v18394_v33  }
 0x1cc   :  { %v18630_v17 = vpop.permute.xlu0 %334 }
 0x1ce   :  { %1188 = vxpose.xlu1.b32.start [1/2] (short) (narrow) %v1141_v47, 8 }
 0x1cf   :  { %v1147_v13 = vpop.permute.xlu1 %1146  ;;  %677 = vperm.xlu0 %17537, %v18366_v24  }
 0x1d2   :  { %1189 = vxpose.xlu1.b32.end [2/2] (short) (narrow) %v1143_v50, 8 }
 0x1d3   :  { %v1563_v15 = vpop.permute.xlu1 %1562  ;;  %681 = vperm.xlu0 %17537, %v18358_v22  }
 0x1d6   :  { %388 = vxpose.xlu1.b32.start [1/2] (short) (narrow) %v313_v0, 8 }
 0x1d7   :  { %v18627_v16 = vpop.permute.xlu1 %657  ;;  %685 = vperm.xlu0 %17537, %v18384_v30  }
 0x1d8   :  { %23046 = vst [vmem:[#allocation34_spill] sm:$0xff] %v18627_v16 }
 0x1da   :  { %389 = vxpose.xlu1.b32.end [2/2] (short) (narrow) %v315_v9, 8 }
 0x1db   :  { %701 = vperm.xlu0 %17537, %v18422_v42  }
 0x1dc   :  { %v18633_v18 = vpop.permute.xlu1 %1489 }
 0x1dd   :  { %23047 = vst [vmem:[#allocation35_spill] sm:$0xff] %v18633_v18  ;;  %v18635_v25 = vpop.permute.xlu0 %1497 }
 0x1de   :  { %23048 = vst [vmem:[#allocation36_spill] sm:$0xff] %v18635_v25  ;;  %1220 = vxpose.xlu1.b32.start [1/2] (short) (narrow) %v1145_v5, 8 }
 0x1df   :  { %705 = vperm.xlu0 %17537, %v18415_v40  }
 0x1e0   :  { %v1561_v37 = vpop.permute.xlu1 %1560 }
 0x1e1   :  { %v18638_v45 = vpop.permute.xlu0 %1166 }
 0x1e2   :  { %1221 = vxpose.xlu1.b32.end [2/2] (short) (narrow) %v1147_v13, 8 }
 0x1e3   :  { %17538 = vset.pattern.permute.xlu0 %v22869_v46 }
 0x1e4   :  { %v18641_v47 = vpop.permute.xlu1 %328  ;;  %1089 = vperm.xlu0 %17538, %v18413_v39  }
 0x1e5   :  { %v18644_v50 = vpop.permute.xlu0 %316 }
 0x1e6   :  { %1636 = vxpose.xlu1.b32.start [1/2] (short) (narrow) %v1561_v37, 8 }
 0x1e8   :  { %v18646_v0 = vpop.permute.xlu1 %1485  ;;  %1117 = vperm.xlu0 %17538, %v18422_v42  }
 0x1e9   :  { %v733_v5 = vpop.permute.xlu0 %732 }
 0x1ea   :  { %1637 = vxpose.xlu1.b32.end [2/2] (short) (narrow) %v1563_v15, 8 }
 0x1ec   :  { %v735_v9 = vpop.permute.xlu1 %734  ;;  %1121 = vperm.xlu0 %17538, %v18415_v40  }
 0x1ed   :  { %v1149_v13 = vpop.permute.xlu0 %1148 }
 0x1ee   :  { %836 = vxpose.xlu1.b32.start [1/2] (short) (narrow) %v733_v5, 8 }
 0x1f0   :  { %v1151_v20 = vpop.permute.xlu1 %1150  ;;  %17539 = vset.pattern.permute.xlu0 %v22877_v19 }
 0x1f1   :  { %v1565_v46 = vpop.permute.xlu0 %1564 }
 0x1f2   :  { %837 = vxpose.xlu1.b32.end [2/2] (short) (narrow) %v735_v9, 8 }
 0x1f4   :  { %v1567_v44 = vpop.permute.xlu1 %1566 }
 0x1f5   :  { %v18651_v38 = vpop.permute.xlu0 %332 }
 0x1f6   :  { %1252 = vxpose.xlu1.b32.start [1/2] (short) (narrow) %v1149_v13, 8 }
 0x1f8   :  { %v751_v37 = vpop.permute.xlu1 %750 }
 0x1f9   :  { %v749_v26 = vpop.permute.xlu0 %748 }
 0x1fa   :  { %1253 = vxpose.xlu1.b32.end [2/2] (short) (narrow) %v1151_v20, 8 }
 0x1fc   :  { %v1583_v32 = vpop.permute.xlu1 %1582 }
 0x1fd   :  { %v18653_v15 = vpop.permute.xlu0 %1493 }
 0x1fe   :  { %1668 = vxpose.xlu1.b32.start [1/2] (short) (narrow) %v1565_v46, 8 }
 0x200   :  { %v1165_v43 = vpop.permute.xlu1 %1164 }
 0x201   :  { %v1581_v31 = vpop.permute.xlu0 %1580 }
 0x202   :  { %1669 = vxpose.xlu1.b32.end [2/2] (short) (narrow) %v1567_v44, 8  ;;  %v22878_v44 = vlaneseq }
 0x204   :  { %v18655_v5 = vpop.permute.xlu1 %673 }
 0x205   :  { %v18657_v25 = vpop.permute.xlu0 %322 }
 0x208   :  { %v18659_v19 = vpop.permute.xlu1 %754 }
 0x209   :  { %v18661_v9 = vpop.permute.xlu0 %738 }
 0x20c   :  { %v18663_v18 = vpop.permute.xlu1 %1505 }
 0x20d   :  { %v18667_v20 = vpop.permute.xlu0 %1154 }
 0x210   :  { %v18665_v13 = vpop.permute.xlu1 %1170 }
 0x211   :  { %v1571_v46 = vpop.permute.xlu0 %1570 }
 0x214   :  { %v1569_v16 = vpop.permute.xlu1 %1568 }
 0x215   :  { %1700 = vxpose.xlu1.b32.start [1/2] (short) (narrow) %v1569_v16, 8 }
 0x218   :  { %v18677_v16 = vpop.permute.xlu1 %669 }
 0x219   :  { %1701 = vxpose.xlu1.b32.end [2/2] (short) (narrow) %v1571_v46, 8 }
 0x21d   :  { %900 = vxpose.xlu1.b32.start [1/2] (short) (narrow) %v18612_v8, 8  ;;  %v18680_v8 = vshrl.u32 %v22878_v44, 7 }
 0x21f   :  { %23049 = vst [vmem:[#allocation37_spill] sm:$0xff] %v18680_v8 }
 0x221   :  { %901 = vxpose.xlu1.b32.end [2/2] (short) (narrow) %v18584_v61, 8  ;;  %v18682_v61 = vpop.permute.xlu1 %752 }
 0x225   :  { %1316 = vxpose.xlu1.b32.start [1/2] (short) (narrow) %v18555_v52, 8  ;;  %v18685_v52 = vsub.s32 0, %v18680_v8 }
 0x227   :  { %23050 = vst [vmem:[#allocation38_spill] sm:$0xff] %v18685_v52 }
 0x229   :  { %1317 = vxpose.xlu1.b32.end [2/2] (short) (narrow) %v18590_v63, 8 }
 0x22d   :  { %1732 = vxpose.xlu1.b32.start [1/2] (short) (narrow) %v18562_v54, 8 }
 0x231   :  { %1733 = vxpose.xlu1.b32.end [2/2] (short) (narrow) %v18594_v1, 8 }
 0x235   :  { %1764 = vxpose.xlu1.b32.start [1/2] (short) (narrow) %v18621_v12, 8 }
 0x239   :  { %1765 = vxpose.xlu1.b32.end [2/2] (short) (narrow) %v18588_v62, 8  ;;  %v18693_v62 = vld [vmem:[%s22858_s1] sm:$0xff] }
 0x23a   :  { %vm1972_vm1 = vcmp.gt.f32.partialorder %v18693_v62, 0.0 }
 0x23d   :  { %964 = vxpose.xlu1.b32.start [1/2] (short) (narrow) %v749_v26, 8 }
 0x241   :  { %965 = vxpose.xlu1.b32.end [2/2] (short) (narrow) %v751_v37, 8 }
 0x245   :  { %1380 = vxpose.xlu1.b32.start [1/2] (short) (narrow) %v1165_v43, 8 }
 0x246   :  { %v372_v54 = vpop.trf.xlu1 }
 0x247   :  { %v18688_v63 = vrot.slane %v372_v54, %v18685_v52 }
 0x249   :  { %v708_v26 = vadd.f32 %v18603_v4, %v18688_v63  ;;  %1381 = vxpose.xlu1.b32.end [2/2] (short) (narrow) %v18638_v45, 8  ;;  %v18706_v4 = vpop.permute.xlu0 %338  ;;  %v23051_v45 = vmov 69  }
 0x24b   :  { %v1988_v1 = vmul.f32 %v708_v26, %v18693_v62 }
 0x24d   :  { %1796 = vxpose.xlu1.b32.start [1/2] (short) (narrow) %v1581_v31, 8  ;;  %vm2052_vm2 = vcmp.gt.f32.partialorder %v1988_v1, 0.0  ;;  %v2116_v43 = vmul.f32 0.2, %v1988_v1  ;;  %v18710_v31 = vpop.permute.xlu0 %1586 }
 0x24f   :  { %v2180_v12 = vsel %vm2052_vm2, %v1988_v1, %v2116_v43 }
 0x250   :  { %v18702_v37 = vsel %vm1972_vm1, %v2180_v12, -4.2949673e+09  ;;  %v23052_v12 = vmov 68  }
 0x251   :  { %1797 = vxpose.xlu1.b32.end [2/2] (short) (narrow) %v1583_v32, 8  ;;  %v2340_v46 = vsel %vm98_vm0, %v18702_v37, -inf  ;;  %v18715_v54 = vpop.permute.xlu0 %320 }
 0x252   :  { %2341 = vmax.xlane.f32.xlu0 %v2340_v46 }
 0x255   :  { %v18721_v32 = vpop.permute.xlu0 %736 }
 0x259   :  { %v18725_v26 = vpop.permute.xlu0 %1152 }
 0x25d   :  { %v18731_v1 = vpop.permute.xlu0 %336 }
 0x261   :  { %v18735_v43 = vpop.permute.xlu0 %1168 }
 0x265   :  { %v18742_v46 = vpop.permute.xlu0 %1501 }
 0x268   :  { %1893 = vperm.xlu0 %17539, %v18364_v23  }
 0x269   :  { %v18746_v44 = vpop.permute.xlu0 %1584 }
 0x26c   :  { %1901 = vperm.xlu0 %17539, %v18382_v29  }
 0x26d   :  { %v18749_v8 = vpop.permute.xlu0 %1509 }
 0x26e   :  { %23053 = vst [vmem:[#allocation39_spill] sm:$0xff] %v18749_v8 }
 0x26f   :  { %17540 = vset.pattern.permute.xlu1 %v23051_v45 }
 0x270   :  { %1061 = vperm.xlu1 %17540, %v18364_v23   ;;  %1905 = vperm.xlu0 %17539, %v18374_v27  }
 0x274   :  { %1065 = vperm.xlu1 %17540, %v18356_v21   ;;  %1921 = vperm.xlu0 %17539, %v18413_v39   ;;  %v18754_v39 = vpop.permute.xlu0 %1513 }
 0x275   :  { %23055 = vst [vmem:[#allocation40_spill] sm:$0xff] %v18754_v39 }
 0x278   :  { %1069 = vperm.xlu1 %17540, %v18382_v29   ;;  %1925 = vperm.xlu0 %17539, %v18366_v24   ;;  %v18759_v29 = vpop.permute.xlu0 %653 }
 0x27c   :  { %1073 = vperm.xlu1 %17540, %v18374_v27   ;;  %1929 = vperm.xlu0 %17539, %v18358_v22   ;;  %v18757_v27 = vpop.trf.xlu1  ;;  %v18766_v23 = vpop.permute.xlu0 %661 }
 0x280   :  { %1077 = vperm.xlu1 %17540, %v18403_v35   ;;  %1933 = vperm.xlu0 %17539, %v18384_v30  }
 0x284   :  { %1081 = vperm.xlu1 %17540, %v18394_v33   ;;  %1937 = vperm.xlu0 %17539, %v18376_v28  }
 0x288   :  { %1085 = vperm.xlu1 %17540, %v18420_v41   ;;  %1941 = vperm.xlu0 %17539, %v18405_v36  }
 0x28c   :  { %1093 = vperm.xlu1 %17540, %v18366_v24   ;;  %1945 = vperm.xlu0 %17539, %v18397_v34   ;;  %v23054_v24 = vmov 70  }
 0x290   :  { %17541 = vset.pattern.permute.xlu1 %v23052_v12  ;;  %1949 = vperm.xlu0 %17539, %v18422_v42  }
 0x291   :  { %689 = vperm.xlu1 %17541, %v18376_v28  }
 0x295   :  { %17542 = vset.pattern.permute.xlu1 %v23051_v45 }
 0x296   :  { %1097 = vperm.xlu1 %17542, %v18358_v22   ;;  %v18763_v22 = vpop.trf.xlu1 }
 0x29a   :  { %1101 = vperm.xlu1 %17542, %v18384_v30  }
 0x29e   :  { %1105 = vperm.xlu1 %17542, %v18376_v28  }
 0x2a2   :  { %17543 = vset.pattern.permute.xlu1 %v23054_v24 }
 0x2a3   :  { %1517 = vperm.xlu1 %17543, %v18384_v30   ;;  %v18769_v30 = vpop.trf.xlu1 }
 0x2a7   :  { %1521 = vperm.xlu1 %17543, %v18376_v28   ;;  %v18773_v28 = vpop.trf.xlu1 }
 0x2ab   :  { %17544 = vset.pattern.permute.xlu1 %v23052_v12  ;;  %v18776_v12 = vpop.permute.xlu0 %665 }
 0x2ac   :  { %693 = vperm.xlu1 %17544, %v18405_v36  }
 0x2ae   :  { %772 = vxpose.xlu0.b32.start [1/2] (short) (narrow) %v18597_v2, 8  ;;  %v18781_v2 = vpop.trf.xlu1 }
 0x2af   :  { %v18783_v39 = vpop.permute.xlu0 %677 }
 0x2b0   :  { %697 = vperm.xlu1 %17544, %v18397_v34  }
 0x2b2   :  { %773 = vxpose.xlu0.b32.end [2/2] (short) (narrow) %v18537_v48, 8  ;;  %v18788_v48 = vpop.trf.xlu1 }
 0x2b4   :  { %17545 = vset.pattern.permute.xlu1 %v23051_v45  ;;  %v18790_v45 = vpop.permute.xlu0 %681 }
 0x2b5   :  { %1109 = vperm.xlu1 %17545, %v18405_v36  }
 0x2b6   :  { %1604 = vxpose.xlu0.b32.start [1/2] (short) (narrow) %v18542_v49, 8  ;;  %v18794_v49 = vpop.trf.xlu1 }
 0x2b9   :  { %1113 = vperm.xlu1 %17545, %v18397_v34  }
 0x2ba   :  { %1605 = vxpose.xlu0.b32.end [2/2] (short) (narrow) %v18557_v53, 8  ;;  %v18798_v53 = vpop.permute.xlu0 %685 }
 0x2bb   :  { %23056 = vst [vmem:[#allocation41_spill] sm:$0xff] %v18798_v53 }
 0x2bd   :  { %17546 = vset.pattern.permute.xlu1 %v23054_v24  ;;  %v18802_v24 = vpop.trf.xlu1 }
 0x2be   :  { %1525 = vperm.xlu1 %17546, %v18405_v36   ;;  %804 = vxpose.xlu0.b32.start [1/2] (short) (narrow) %v18601_v3, 8  ;;  %v18804_v3 = vpop.permute.xlu0 %701 }
 0x2bf   :  { %23057 = vst [vmem:[#allocation42_spill] sm:$0xff] %v18804_v3 }
 0x2c2   :  { %1529 = vperm.xlu1 %17546, %v18397_v34   ;;  %805 = vxpose.xlu0.b32.end [2/2] (short) (narrow) %v18618_v11, 8  ;;  %v23058_v34 = vmov 71   ;;  %v18808_v11 = vpop.trf.xlu1 }
 0x2c6   :  { %1533 = vperm.xlu1 %17546, %v18422_v42   ;;  %420 = vxpose.xlu0.b32.start [1/2] (short) (narrow) %v18644_v50, 8  ;;  %v18811_v42 = vpop.permute.xlu0 %705  ;;  %v18814_v50 = vpop.trf.xlu1 }
 0x2c7   :  { %23059 = vst [vmem:[#allocation43_spill] sm:$0xff] %v18811_v42  ;;  %23060 = vst [vmem:[#allocation44_spill] sm:$0xff] %v18814_v50 }
 0x2ca   :  { %1537 = vperm.xlu1 %17546, %v18415_v40   ;;  %421 = vxpose.xlu0.b32.end [2/2] (short) (narrow) %v18624_v14, 8  ;;  %v18816_v36 = vpop.permute.xlu0 %1089  ;;  %v709_v14 = vadd.f32 %v18564_v55, %v18688_v63 }
 0x2ce   :  { %452 = vxpose.xlu0.b32.start [1/2] (short) (narrow) %v18715_v54, 8  ;;  %17547 = vset.pattern.permute.xlu1 %v23058_v34  ;;  %v18821_v54 = vpop.trf.xlu1  ;;  %v18826_v34 = vld [vmem:[%s22858_s1 + $0x8] sm:$0xff] }
 0x2cf   :  { %vm1973_vm4 = vcmp.gt.f32.partialorder %v18826_v34, 0.0 }
 0x2d2   :  { %453 = vxpose.xlu0.b32.end [2/2] (short) (narrow) %v18657_v25, 8  ;;  %v1989_v25 = vmul.f32 %v709_v14, %v18826_v34  ;;  %v18832_v42 = vpop.trf.xlu1 }
 0x2d4   :  { %vm2053_vm3 = vcmp.gt.f32.partialorder %v1989_v25, 0.0 }
 0x2d6   :  { %868 = vxpose.xlu0.b32.start [1/2] (short) (narrow) %v18721_v32, 8  ;;  %v18830_v32 = vpop.permute.xlu0 %1117  ;;  %v18838_v63 = vpop.trf.xlu1 }
 0x2d7   :  { %23061 = vst [vmem:[#allocation45_spill] sm:$0xff] %v18830_v32 }
 0x2da   :  { %869 = vxpose.xlu0.b32.end [2/2] (short) (narrow) %v18661_v9, 8  ;;  %v2117_v9 = vmul.f32 0.2, %v1989_v25  ;;  %v18835_v55 = vpop.permute.xlu0 %1121 }
 0x2db   :  { %23062 = vst [vmem:[#allocation46_spill] sm:$0xff] %v18835_v55 }
 0x2dc   :  { %v2181_v3 = vsel %vm2053_vm3, %v1989_v25, %v2117_v9 }
 0x2dd   :  { %v18846_v14 = vsel %vm1973_vm4, %v2181_v3, -4.2949673e+09 }
 0x2de   :  { %1284 = vxpose.xlu0.b32.start [1/2] (short) (narrow) %v18725_v26, 8  ;;  %23063 = vst [vmem:[#allocation47_spill] sm:$0xff] %v18846_v14  ;;  %v2343_v55 = vsel %vm98_vm0, %v18846_v14, -inf }
 0x2df   :  { %v18841_v26 = vpop.xlane.xlu0 %2341 }
 0x2e2   :  { %1285 = vxpose.xlu0.b32.end [2/2] (short) (narrow) %v18667_v20, 8  ;;  %v18848_v20 = vpop.trf.xlu1 }
 0x2e6   :  { %484 = vxpose.xlu0.b32.start [1/2] (short) (narrow) %v18549_v51, 8  ;;  %v18856_v51 = vpop.trf.xlu1 }
 0x2e7   :  { %v18852_v32 = vpop.permute.xlu0 %1893 }
 0x2ea   :  { %485 = vxpose.xlu0.b32.end [2/2] (short) (narrow) %v18578_v59, 8 }
 0x2eb   :  { %v18858_v25 = vpop.permute.xlu0 %1901 }
 0x2ee   :  { %2344 = vmax.xlane.f32.xlu1 %v2343_v55  ;;  %516 = vxpose.xlu0.b32.start [1/2] (short) (narrow) %v18641_v47, 8 }
 0x2ef   :  { %v1062_v59 = vpop.permute.xlu1 %1061  ;;  %v18861_v3 = vpop.permute.xlu0 %1905 }
 0x2f2   :  { %517 = vxpose.xlu0.b32.end [2/2] (short) (narrow) %v18570_v56, 8 }
 0x2f3   :  { %v1066_v9 = vpop.permute.xlu1 %1065  ;;  %v18866_v55 = vpop.permute.xlu0 %1921 }
 0x2f6   :  { %932 = vxpose.xlu0.b32.start [1/2] (short) (narrow) %v18610_v7, 8 }
 0x2f7   :  { %v18870_v56 = vpop.permute.xlu1 %1069  ;;  %v18872_v47 = vpop.permute.xlu0 %1925 }
 0x2fa   :  { %933 = vxpose.xlu0.b32.end [2/2] (short) (narrow) %v18576_v58, 8 }
 0x2fb   :  { %v18877_v58 = vpop.permute.xlu1 %1073  ;;  %v18880_v7 = vpop.permute.xlu0 %1929 }
 0x2fe   :  { %1348 = vxpose.xlu0.b32.start [1/2] (short) (narrow) %v18616_v10, 8 }
 0x2ff   :  { %1897 = vperm.xlu1 %17547, %v18356_v21   ;;  %v18886_v10 = vpop.permute.xlu0 %1933 }
 0x302   :  { %1349 = vxpose.xlu0.b32.end [2/2] (short) (narrow) %v18582_v60, 8  ;;  %v18884_v60 = vpop.permute.xlu1 %1077 }
 0x303   :  { %1909 = vperm.xlu1 %17547, %v18403_v35  }
 0x306   :  { %548 = vxpose.xlu0.b32.start [1/2] (short) (narrow) %v18651_v38, 8  ;;  %v18890_v38 = vpop.permute.xlu1 %1081 }
 0x307   :  { %1913 = vperm.xlu1 %17547, %v18394_v33  }
 0x30a   :  { %549 = vxpose.xlu0.b32.end [2/2] (short) (narrow) %v18630_v17, 8  ;;  %v18892_v17 = vpop.permute.xlu0 %1937 }
 0x30b   :  { %1917 = vperm.xlu1 %17547, %v18420_v41   ;;  %v18895_v41 = vpop.permute.xlu1 %1085 }
 0x30e   :  { %580 = vxpose.xlu0.b32.start [1/2] (short) (narrow) %v18731_v1, 8  ;;  %v18897_v33 = vpop.permute.xlu0 %1941 }
 0x30f   :  { %1953 = vperm.xlu1 %17547, %v18415_v40   ;;  %v18901_v1 = vpop.permute.xlu1 %1093 }
 0x312   :  { %581 = vxpose.xlu0.b32.end [2/2] (short) (narrow) %v18706_v4, 8  ;;  %v18903_v40 = vpop.permute.xlu0 %1945 }
 0x313   :  { %v18908_v4 = vpop.permute.xlu1 %689 }
 0x314   :  { %23064 = vst [vmem:[#allocation48_spill] sm:$0xff] %v18908_v4 }
 0x316   :  { %996 = vxpose.xlu0.b32.start [1/2] (short) (narrow) %v18682_v61, 8  ;;  %v1447_v61 = vrot.slane %v18757_v27, %v18685_v52 }
 0x317   :  { %v18915_v21 = vpop.permute.xlu1 %1097 }
 0x318   :  { %v1541_v35 = vadd.f32 %v18572_v57, %v1447_v61  ;;  %23065 = vst [vmem:[#allocation49_spill] sm:$0xff] %v18915_v21 }
 0x31a   :  { %997 = vxpose.xlu0.b32.end [2/2] (short) (narrow) %v18659_v19, 8  ;;  %v18910_v19 = vpop.permute.xlu0 %1949 }
 0x31b   :  { %v18919_v27 = vpop.permute.xlu1 %1101 }
 0x31c   :  { %23066 = vst [vmem:[#allocation50_spill] sm:$0xff] %v18919_v27 }
 0x31e   :  { %1412 = vxpose.xlu0.b32.start [1/2] (short) (narrow) %v18735_v43, 8 }
 0x322   :  { %1413 = vxpose.xlu0.b32.end [2/2] (short) (narrow) %v18665_v13, 8  ;;  %v1993_v13 = vmul.f32 %v1541_v35, %v18826_v34 }
 0x324   :  { %v2121_v50 = vmul.f32 0.2, %v1993_v13  ;;  %vm2057_vm5 = vcmp.gt.f32.partialorder %v1993_v13, 0.0 }
 0x326   :  { %1828 = vxpose.xlu0.b32.start [1/2] (short) (narrow) %v18746_v44, 8 }
 0x32a   :  { %1829 = vxpose.xlu0.b32.end [2/2] (short) (narrow) %v18710_v31, 8  ;;  %v2185_v31 = vsel %vm2057_vm5, %v1993_v13, %v2121_v50 }
 0x32e   :  { %v788_v43 = vpop.trf.xlu0 }
 0x32f   :  { %v1031_v14 = vrot.slane %v788_v43, %v18685_v52 }
 0x331   :  { %v1125_v8 = vadd.f32 %v1066_v9, %v1031_v14  ;;  %v18929_v9 = vsel %vm1973_vm4, %v2185_v31, -4.2949673e+09  ;;  %v1124_v50 = vadd.f32 %v1062_v59, %v1031_v14 }
 0x332   :  { %23068 = vst [vmem:[#allocation52_spill] sm:$0xff] %v18929_v9  ;;  %v2355_v43 = vsel %vm98_vm0, %v18929_v9, -inf }
 0x333   :  { %v1991_v44 = vmul.f32 %v1125_v8, %v18826_v34  ;;  %v18931_v8 = vpop.permute.xlu1 %1105 }
 0x334   :  { %23069 = vst [vmem:[#allocation53_spill] sm:$0xff] %v18931_v8  ;;  %v18947_v8 = vrot.slane %v18763_v22, %v18685_v52  ;;  %v82_v22 = vld [vmem:[%s22858_s1 + $0x10] sm:$0xff] }
 0x335   :  { %vm2055_vm6 = vcmp.gt.f32.partialorder %v1991_v44, 0.0  ;;  %v2119_v4 = vmul.f32 0.2, %v1991_v44  ;;  %vm1974_vm11 = vcmp.gt.f32.partialorder %v82_v22, 0.0 }
 0x336   :  { %v1620_v13 = vpop.trf.xlu0 }
 0x337   :  { %v2183_v53 = vsel %vm2055_vm6, %v1991_v44, %v2119_v4  ;;  %v18935_v4 = vpop.permute.xlu1 %1517 }
 0x338   :  { %v18923_v57 = vsel %vm1973_vm4, %v2183_v53, -4.2949673e+09  ;;  %23070 = vst [vmem:[#allocation54_spill] sm:$0xff] %v18935_v4  ;;  %v1540_v53 = vadd.f32 %v18607_v6, %v1447_v61 }
 0x339   :  { %23067 = vst [vmem:[#allocation51_spill] sm:$0xff] %v18923_v57  ;;  %v2349_v35 = vsel %vm98_vm0, %v18923_v57, -inf  ;;  %v18942_v57 = vrot.slane %v1620_v13, %v18685_v52 }
 0x33a   :  { %2350 = vmax.xlane.f32.xlu1 %v2349_v35  ;;  %v1990_v35 = vmul.f32 %v1124_v50, %v18693_v62  ;;  %v1992_v31 = vmul.f32 %v1540_v53, %v18693_v62  ;;  %v710_v50 = vadd.f32 %v18759_v29, %v18947_v8 }
 0x33b   :  { %v18938_v44 = vpop.permute.xlu1 %1521 }
 0x33c   :  { %23071 = vst [vmem:[#allocation55_spill] sm:$0xff] %v18938_v44  ;;  %v2118_v14 = vmul.f32 0.2, %v1990_v35  ;;  %vm2054_vm7 = vcmp.gt.f32.partialorder %v1990_v35, 0.0  ;;  %v2120_v61 = vmul.f32 0.2, %v1992_v31 }
 0x33d   :  { %vm2056_vm8 = vcmp.gt.f32.partialorder %v1992_v31, 0.0 }
 0x33e   :  { %2356 = vmax.xlane.f32.xlu1 %v2355_v43  ;;  %v1956_v43 = vadd.f32 %v18852_v32, %v18942_v57  ;;  %v820_v6 = vpop.trf.xlu0  ;;  %v2182_v9 = vsel %vm2054_vm7, %v1990_v35, %v2118_v14  ;;  %v18964_v32 = vrot.slane %v18769_v30, %v18685_v52  ;;  %v2184_v35 = vsel %vm2056_vm8, %v1992_v31, %v2120_v61 }
 0x33f   :  { %v18951_v59 = vpop.permute.xlu1 %693  ;;  %v18957_v53 = vrot.slane %v820_v6, %v18685_v52  ;;  %v18970_v29 = vsel %vm1972_vm1, %v2182_v9, -4.2949673e+09  ;;  %v1867_v9 = vrot.slane %v18773_v28, %v18685_v52 }
 0x340   :  { %23072 = vst [vmem:[#allocation56_spill] sm:$0xff] %v18951_v59  ;;  %v1994_v13 = vmul.f32 %v1956_v43, %v18693_v62  ;;  %23074 = vst [vmem:[#allocation58_spill] sm:$0xff] %v18970_v29  ;;  %v1996_v43 = vmul.f32 %v710_v50, %v82_v22  ;;  %v2346_v44 = vsel %vm98_vm0, %v18970_v29, -inf  ;;  %v1542_v30 = vadd.f32 %v18646_v0, %v18964_v32 }
 0x341   :  { %v1126_v6 = vadd.f32 %v18870_v56, %v18957_v53 }
 0x342   :  { %v2122_v14 = vmul.f32 0.2, %v1994_v13  ;;  %vm2058_vm9 = vcmp.gt.f32.partialorder %v1994_v13, 0.0  ;;  %v2124_v56 = vmul.f32 0.2, %v1996_v43  ;;  %vm2060_vm10 = vcmp.gt.f32.partialorder %v1996_v43, 0.0 }
 0x343   :  { %v18966_v59 = vpop.permute.xlu1 %697  ;;  %v1998_v50 = vmul.f32 %v1126_v6, %v82_v22  ;;  %v2000_v29 = vmul.f32 %v1542_v30, %v82_v22 }
 0x344   :  { %23073 = vst [vmem:[#allocation57_spill] sm:$0xff] %v18966_v59  ;;  %v18980_v59 = vsel %vm1972_vm1, %v2184_v35, -4.2949673e+09  ;;  %v2186_v4 = vsel %vm2058_vm9, %v1994_v13, %v2122_v14  ;;  %v2188_v35 = vsel %vm2060_vm10, %v1996_v43, %v2124_v56 }
 0x345   :  { %23075 = vst [vmem:[#allocation59_spill] sm:$0xff] %v18980_v59  ;;  %v2352_v61 = vsel %vm98_vm0, %v18980_v59, -inf  ;;  %v18990_v0 = vsel %vm1972_vm1, %v2186_v4, -4.2949673e+09  ;;  %v2126_v28 = vmul.f32 0.2, %v1998_v50  ;;  %vm2062_vm12 = vcmp.gt.f32.partialorder %v1998_v50, 0.0 }
 0x346   :  { %23076 = vst [vmem:[#allocation60_spill] sm:$0xff] %v18990_v0  ;;  %v436_v6 = vpop.trf.xlu0  ;;  %v2358_v13 = vsel %vm98_vm0, %v18990_v0, -inf  ;;  %v18998_v30 = vsel %vm1974_vm11, %v2188_v35, -4.2949673e+09  ;;  %v1959_v4 = vadd.f32 %v18861_v3, %v1867_v9  ;;  %vm2064_vm13 = vcmp.gt.f32.partialorder %v2000_v29, 0.0  ;;  %v19009_v0 = vld [vmem:[%s22858_s1 + $0x18] sm:$0xff] }
 0x347   :  { %v18984_v31 = vpop.permute.xlu1 %1109  ;;  %23077 = vst [vmem:[#allocation61_spill] sm:$0xff] %v18998_v30  ;;  %v2190_v43 = vsel %vm2062_vm12, %v1998_v50, %v2126_v28  ;;  %v2364_v56 = vsel %vm98_vm0, %v18998_v30, -inf  ;;  %vm1975_vm2 = vcmp.gt.f32.partialorder %v19009_v0, 0.0 }
 0x348   :  { %v19012_v35 = vsel %vm1974_vm11, %v2190_v43, -4.2949673e+09 }
 0x349   :  { %23078 = vst [vmem:[#allocation62_spill] sm:$0xff] %v19012_v35 }
 0x34b   :  { %v18995_v14 = vpop.permute.xlu1 %1113 }
 0x34f   :  { %v19017_v28 = vpop.permute.xlu1 %1525 }
 0x357   :  { %2347 = vmax.xlane.f32.xlu0 %v2346_v44  ;;  %v1958_v44 = vadd.f32 %v18858_v25, %v1867_v9  ;;  %v19002_v25 = vrot.slane %v436_v6, %v18685_v52  ;;  %v2370_v6 = vsel %vm98_vm0, %v19012_v35, -inf }
 0x359   :  { %v2002_v62 = vmul.f32 %v1958_v44, %v82_v22  ;;  %v2003_v44 = vmul.f32 %v1959_v4, %v19009_v0  ;;  %v713_v3 = vadd.f32 %v18776_v12, %v19002_v25 }
 0x35b   :  { %2353 = vmax.xlane.f32.xlu0 %v2352_v61  ;;  %v2128_v61 = vmul.f32 0.2, %v2000_v29  ;;  %v2130_v50 = vmul.f32 0.2, %v2002_v62  ;;  %vm2066_vm14 = vcmp.gt.f32.partialorder %v2002_v62, 0.0  ;;  %vm2067_vm15 = vcmp.gt.f32.partialorder %v2003_v44, 0.0 }
 0x35d   :  { %v2192_v9 = vsel %vm2064_vm13, %v2000_v29, %v2128_v61  ;;  %v2194_v12 = vsel %vm2066_vm14, %v2002_v62, %v2130_v50  ;;  %v2131_v29 = vmul.f32 0.2, %v2003_v44 }
 0x35e   :  { %v19027_v43 = vsel %vm1974_vm11, %v2192_v9, -4.2949673e+09  ;;  %v19035_v35 = vsel %vm1974_vm11, %v2194_v12, -4.2949673e+09 }
 0x35f   :  { %2359 = vmax.xlane.f32.xlu0 %v2358_v13  ;;  %v19024_v13 = vld [vmem:[%s22858_s1 + $0x28] sm:$0xff]  ;;  %23079 = vst [vmem:[#allocation63_spill] sm:$0xff] %v19027_v43  ;;  %v2376_v61 = vsel %vm98_vm0, %v19027_v43, -inf  ;;  %23080 = vst [vmem:[#allocation64_spill] sm:$0xff] %v19035_v35  ;;  %v2195_v30 = vsel %vm2067_vm15, %v2003_v44, %v2131_v29  ;;  %v2382_v9 = vsel %vm98_vm0, %v19035_v35, -inf  ;;  %v1883_v43 = vrot.slane %v18832_v42, %v18685_v52 }
 0x360   :  { %v2005_v4 = vmul.f32 %v713_v3, %v19024_v13  ;;  %v19042_v62 = vsel %vm1975_vm2, %v2195_v30, -4.2949673e+09  ;;  %vm1977_vm3 = vcmp.gt.f32.partialorder %v19024_v13, 0.0  ;;  %v19109_v42 = vrot.slane %v18802_v24, %v18685_v52 }
 0x361   :  { %23081 = vst [vmem:[#allocation65_spill] sm:$0xff] %v19042_v62  ;;  %v2385_v22 = vsel %vm98_vm0, %v19042_v62, -inf }
 0x362   :  { %v2133_v59 = vmul.f32 0.2, %v2005_v4  ;;  %vm2069_vm1 = vcmp.gt.f32.partialorder %v2005_v4, 0.0 }
 0x363   :  { %2365 = vmax.xlane.f32.xlu0 %v2364_v56  ;;  %v19032_v56 = vpop.permute.xlu1 %1529 }
 0x364   :  { %v2197_v3 = vsel %vm2069_vm1, %v2005_v4, %v2133_v59  ;;  %v23085_v59 = vld [vmem:[#allocation34_spill] sm:$0xff]  ;;  %v23086_v4 = vld [vmem:[#allocation35_spill] sm:$0xff] }
 0x365   :  { %v19051_v44 = vsel %vm1977_vm3, %v2197_v3, -4.2949673e+09  ;;  %v711_v30 = vadd.f32 %v23085_v59, %v18947_v8  ;;  %v1543_v29 = vadd.f32 %v23086_v4, %v18964_v32 }
 0x366   :  { %23083 = vst [vmem:[#allocation67_spill] sm:$0xff] %v19051_v44 }
 0x367   :  { %2371 = vmax.xlane.f32.xlu0 %v2370_v6  ;;  %v19044_v50 = vpop.permute.xlu1 %1533  ;;  %v2391_v6 = vsel %vm98_vm0, %v19051_v44, -inf  ;;  %v2001_v3 = vmul.f32 %v1543_v29, %v19009_v0  ;;  %v1127_v44 = vadd.f32 %v18877_v58, %v18957_v53  ;;  %v1039_v53 = vrot.slane %v18781_v2, %v18685_v52 }
 0x368   :  { %23082 = vst [vmem:[#allocation66_spill] sm:$0xff] %v19044_v50  ;;  %v1879_v50 = vrot.slane %v18821_v54, %v18685_v52 }
 0x369   :  { %v2129_v59 = vmul.f32 0.2, %v2001_v3  ;;  %vm2065_vm6 = vcmp.gt.f32.partialorder %v2001_v3, 0.0 }
 0x36a   :  { %v1964_v4 = vadd.f32 %v18872_v47, %v1879_v50  ;;  %v1965_v27 = vadd.f32 %v18880_v7, %v1879_v50  ;;  %v1128_v7 = vadd.f32 %v18884_v60, %v1039_v53 }
 0x36b   :  { %2377 = vmax.xlane.f32.xlu0 %v2376_v61  ;;  %v19055_v12 = vpop.permute.xlu1 %1537  ;;  %v468_v61 = vpop.trf.xlu0 }
 0x36c   :  { %23084 = vst [vmem:[#allocation68_spill] sm:$0xff] %v19055_v12  ;;  %v627_v24 = vrot.slane %v468_v61, %v18685_v52 }
 0x36f   :  { %2383 = vmax.xlane.f32.xlu0 %v2382_v9 }
 0x373   :  { %2386 = vmax.xlane.f32.xlu0 %v2385_v22  ;;  %v1997_v22 = vmul.f32 %v711_v30, %v19009_v0  ;;  %v1999_v30 = vmul.f32 %v1127_v44, %v19009_v0 }
 0x375   :  { %vm2061_vm5 = vcmp.gt.f32.partialorder %v1997_v22, 0.0  ;;  %v2125_v32 = vmul.f32 0.2, %v1997_v22  ;;  %v2127_v35 = vmul.f32 0.2, %v1999_v30  ;;  %vm2063_vm8 = vcmp.gt.f32.partialorder %v1999_v30, 0.0 }
 0x377   :  { %2392 = vmax.xlane.f32.xlu0 %v2391_v6  ;;  %v19069_v6 = vpop.trf.xlu0  ;;  %v2189_v47 = vsel %vm2061_vm5, %v1997_v22, %v2125_v32  ;;  %v2191_v32 = vsel %vm2063_vm8, %v1999_v30, %v2127_v35 }
 0x378   :  { %v19148_v35 = vsel %vm1975_vm2, %v2191_v32, -4.2949673e+09  ;;  %v1967_v32 = vadd.f32 %v18892_v17, %v1883_v43 }
 0x379   :  { %23091 = vst [vmem:[#allocation71_spill] sm:$0xff] %v19148_v35 }
 0x37b   :  { %v19061_v9 = vpop.xlane.xlu1 %2344 }
 0x37c   :  { %23087 = vst [vmem:[#allocation34_spill] sm:$0xff] %v19061_v9  ;;  %v19075_v9 = vpop.trf.xlu0 }
 0x37f   :  { %v1898_v12 = vpop.permute.xlu1 %1897 }
 0x380   :  { %v1957_v8 = vadd.f32 %v1898_v12, %v18942_v57  ;;  %v19084_v57 = vld [vmem:[%s22858_s1 + $0x40] sm:$0xff]  ;;  %v2193_v12 = vsel %vm2065_vm6, %v2001_v3, %v2129_v59  ;;  %v19092_v2 = vpop.trf.xlu0 }
 0x381   :  { %v2026_v44 = vmul.f32 %v1964_v4, %v19084_v57  ;;  %v1966_v4 = vadd.f32 %v18886_v10, %v1883_v43  ;;  %v19144_v10 = vld [vmem:[%s22858_s1 + $0x30] sm:$0xff]  ;;  %vm1980_vm10 = vcmp.gt.f32.partialorder %v19084_v57, 0.0 }
 0x382   :  { %v1995_v29 = vmul.f32 %v1957_v8, %v18826_v34  ;;  %v712_v8 = vadd.f32 %v18766_v23, %v19002_v25  ;;  %v19105_v23 = vld [vmem:[%s22858_s1 + $0x20] sm:$0xff]  ;;  %v19114_v34 = vsel %vm1975_vm2, %v2189_v47, -4.2949673e+09  ;;  %v19118_v25 = vsel %vm1975_vm2, %v2193_v12, -4.2949673e+09  ;;  %v19134_v47 = vld [vmem:[%s22858_s1 + $0x50] sm:$0xff] }
 0x383   :  { %v19077_v54 = vpop.permute.xlu1 %1909  ;;  %23089 = vst [vmem:[#allocation69_spill] sm:$0xff] %v19114_v34  ;;  %23090 = vst [vmem:[#allocation70_spill] sm:$0xff] %v19118_v25  ;;  %v2154_v60 = vmul.f32 0.2, %v2026_v44  ;;  %v2367_v61 = vsel %vm98_vm0, %v19114_v34, -inf  ;;  %vm1976_vm9 = vcmp.gt.f32.partialorder %v19105_v23, 0.0  ;;  %v2034_v34 = vmul.f32 %v1966_v4, %v19134_v47 }
 0x384   :  { %vm2059_vm7 = vcmp.gt.f32.partialorder %v1995_v29, 0.0  ;;  %v2123_v58 = vmul.f32 0.2, %v1995_v29  ;;  %v2004_v50 = vmul.f32 %v712_v8, %v19105_v23  ;;  %v2379_v30 = vsel %vm98_vm0, %v19118_v25, -inf  ;;  %v19168_v4 = vld [vmem:[%s22858_s1 + $0x58] sm:$0xff] }
 0x385   :  { %v714_v8 = vadd.f32 %v18677_v16, %v627_v24  ;;  %v2373_v25 = vsel %vm98_vm0, %v19148_v35, -inf  ;;  %vm1978_vm15 = vcmp.gt.f32.partialorder %v19144_v10, 0.0  ;;  %vm2098_vm2 = vcmp.gt.f32.partialorder %v2034_v34, 0.0 }
 0x386   :  { %v2187_v62 = vsel %vm2059_vm7, %v1995_v29, %v2123_v58  ;;  %v19129_v29 = vpop.trf.xlu0  ;;  %vm2068_vm12 = vcmp.gt.f32.partialorder %v2004_v50, 0.0  ;;  %vm1982_vm5 = vcmp.gt.f32.partialorder %v19134_v47, 0.0 }
 0x387   :  { %v19094_v21 = vpop.permute.xlu1 %1913  ;;  %v19098_v22 = vsel %vm1973_vm4, %v2187_v62, -4.2949673e+09  ;;  %v19123_v62 = vld [vmem:[%s22858_s1 + $0x48] sm:$0xff]  ;;  %vm2090_vm4 = vcmp.gt.f32.partialorder %v2026_v44, 0.0  ;;  %v2012_v17 = vmul.f32 %v714_v8, %v19144_v10  ;;  %v2035_v8 = vmul.f32 %v1967_v32, %v19168_v4 }
 0x388   :  { %23088 = vst [vmem:[#allocation35_spill] sm:$0xff] %v19098_v22  ;;  %v2361_v3 = vsel %vm98_vm0, %v19098_v22, -inf  ;;  %v2027_v59 = vmul.f32 %v1965_v27, %v19123_v62  ;;  %v2006_v27 = vmul.f32 %v1128_v7, %v19105_v23  ;;  %v2218_v7 = vsel %vm2090_vm4, %v2026_v44, %v2154_v60 }
 0x389   :  { %2362 = vmax.xlane.f32.xlu1 %v2361_v3  ;;  %vm1981_vm11 = vcmp.gt.f32.partialorder %v19123_v62, 0.0  ;;  %v1455_v44 = vrot.slane %v18788_v48, %v18685_v52  ;;  %v1129_v60 = vadd.f32 %v18890_v38, %v1039_v53  ;;  %v1055_v22 = vrot.slane %v18838_v63, %v18685_v52 }
 0x38a   :  { %vm2091_vm13 = vcmp.gt.f32.partialorder %v2027_v59, 0.0  ;;  %v2155_v0 = vmul.f32 0.2, %v2027_v59  ;;  %vm2070_vm1 = vcmp.gt.f32.partialorder %v2006_v27, 0.0  ;;  %v19182_v53 = vsel %vm1980_vm10, %v2218_v7, -4.2949673e+09 }
 0x38b   :  { %v1918_v58 = vpop.permute.xlu1 %1917  ;;  %23094 = vst [vmem:[#allocation74_spill] sm:$0xff] %v19182_v53  ;;  %v2007_v63 = vmul.f32 %v1129_v60, %v19024_v13  ;;  %v2454_v60 = vsel %vm98_vm0, %v19182_v53, -inf  ;;  %vm2076_vm6 = vcmp.gt.f32.partialorder %v2012_v17, 0.0  ;;  %vm2099_vm7 = vcmp.gt.f32.partialorder %v2035_v8, 0.0 }
 0x38c   :  { %v1962_v12 = vadd.f32 %v1918_v58, %v19109_v42  ;;  %v2132_v58 = vmul.f32 0.2, %v2004_v50  ;;  %vm1983_vm4 = vcmp.gt.f32.partialorder %v19168_v4, 0.0 }
 0x38d   :  { %2368 = vmax.xlane.f32.xlu1 %v2367_v61  ;;  %v19157_v61 = vpop.trf.xlu0  ;;  %vm2071_vm8 = vcmp.gt.f32.partialorder %v2007_v63, 0.0 }
 0x38e   :  { %v2018_v3 = vmul.f32 %v1962_v12, %v19144_v10  ;;  %v2134_v12 = vmul.f32 0.2, %v2006_v27  ;;  %v2196_v35 = vsel %vm2068_vm12, %v2004_v50, %v2132_v58  ;;  %v1136_v58 = vadd.f32 %v18984_v31, %v1055_v22 }
 0x390   :  { %vm2082_vm14 = vcmp.gt.f32.partialorder %v2018_v3, 0.0  ;;  %v2146_v16 = vmul.f32 0.2, %v2018_v3  ;;  %v2198_v7 = vsel %vm2070_vm1, %v2006_v27, %v2134_v12  ;;  %v2135_v12 = vmul.f32 0.2, %v2007_v63 }
 0x391   :  { %2374 = vmax.xlane.f32.xlu1 %v2373_v25  ;;  %v19174_v48 = vpop.trf.xlu0  ;;  %v2219_v25 = vsel %vm2091_vm13, %v2027_v59, %v2155_v0  ;;  %v1544_v59 = vadd.f32 %v18653_v15, %v1455_v44  ;;  %v23095_v0 = vld [vmem:[#allocation36_spill] sm:$0xff]  ;;  %v19209_v15 = vld [vmem:[%s22858_s1 + $0x60] sm:$0xff] }
 0x392   :  { %v2210_v43 = vsel %vm2082_vm14, %v2018_v3, %v2146_v16  ;;  %23092 = vst [vmem:[#allocation72_spill] sm:$0xff] %v19174_v48  ;;  %v2162_v3 = vmul.f32 0.2, %v2034_v34  ;;  %v19192_v16 = vsel %vm1976_vm9, %v2196_v35, -4.2949673e+09  ;;  %v1545_v32 = vadd.f32 %v23095_v0, %v1455_v44  ;;  %v19221_v35 = vld [vmem:[%s22858_s1 + $0x38] sm:$0xff] }
 0x393   :  { %v19178_v38 = vsel %vm1978_vm15, %v2210_v43, -4.2949673e+09  ;;  %v715_v43 = vadd.f32 %v18655_v5, %v627_v24  ;;  %v19203_v31 = vsel %vm1981_vm11, %v2219_v25, -4.2949673e+09  ;;  %v2388_v5 = vsel %vm98_vm0, %v19192_v16, -inf }
 0x394   :  { %23093 = vst [vmem:[#allocation73_spill] sm:$0xff] %v19178_v38  ;;  %v2430_v50 = vsel %vm98_vm0, %v19178_v38, -inf  ;;  %v2140_v38 = vmul.f32 0.2, %v2012_v17  ;;  %23096 = vst [vmem:[#allocation36_spill] sm:$0xff] %v19203_v31  ;;  %v19215_v24 = vsel %vm1976_vm9, %v2198_v7, -4.2949673e+09  ;;  %v2226_v27 = vsel %vm2098_vm2, %v2034_v34, %v2162_v3 }
 0x395   :  { %2380 = vmax.xlane.f32.xlu1 %v2379_v30  ;;  %2431 = vmax.xlane.f32.xlu0 %v2430_v50  ;;  %v19197_v48 = vpop.trf.xlu0  ;;  %v2038_v30 = vmul.f32 %v1136_v58, %v19209_v15  ;;  %v2163_v44 = vmul.f32 0.2, %v2035_v8  ;;  %v1137_v25 = vadd.f32 %v18995_v14, %v1055_v22  ;;  %v2013_v50 = vmul.f32 %v715_v43, %v19221_v35 }
 0x396   :  { %v1043_v34 = vrot.slane %v19069_v6, %v18685_v52  ;;  %v2204_v3 = vsel %vm2076_vm6, %v2012_v17, %v2140_v38  ;;  %v2008_v7 = vmul.f32 %v1544_v59, %v19105_v23  ;;  %v19231_v0 = vmul.f32 %v1545_v32, %v19024_v13  ;;  %v19249_v17 = vld [vmem:[%s22858_s1 + $0x68] sm:$0xff] }
 0x397   :  { %v1471_v58 = vrot.slane %v18848_v20, %v18685_v52  ;;  %v2457_v14 = vsel %vm98_vm0, %v19203_v31, -inf  ;;  %v2394_v22 = vsel %vm98_vm0, %v19215_v24, -inf  ;;  %v19243_v6 = vsel %vm1982_vm5, %v2226_v27, -4.2949673e+09 }
 0x398   :  { %23097 = vst [vmem:[#allocation75_spill] sm:$0xff] %v19243_v6  ;;  %v19254_v38 = vsel %vm1978_vm15, %v2204_v3, -4.2949673e+09  ;;  %v2227_v59 = vsel %vm2099_vm7, %v2035_v8, %v2163_v44  ;;  %v2199_v32 = vsel %vm2071_vm8, %v2007_v63, %v2135_v12  ;;  %v2039_v43 = vmul.f32 %v1137_v25, %v19249_v17 }
 0x399   :  { %2455 = vmax.xlane.f32.xlu0 %v2454_v60  ;;  %2389 = vmax.xlane.f32.xlu1 %v2388_v5  ;;  %v19235_v60 = vpop.trf.xlu0  ;;  %v1552_v20 = vadd.f32 %v19017_v28, %v1471_v58  ;;  %23098 = vst [vmem:[#allocation76_spill] sm:$0xff] %v19254_v38  ;;  %v1130_v5 = vadd.f32 %v18895_v41, %v1043_v34  ;;  %v2166_v27 = vmul.f32 0.2, %v2038_v30  ;;  %v2141_v31 = vmul.f32 0.2, %v2013_v50 }
 0x39a   :  { %vm2102_vm12 = vcmp.gt.f32.partialorder %v2038_v30, 0.0  ;;  %vm1979_vm13 = vcmp.gt.f32.partialorder %v19221_v35, 0.0  ;;  %vm2077_vm14 = vcmp.gt.f32.partialorder %v2013_v50, 0.0  ;;  %v2136_v28 = vmul.f32 0.2, %v2008_v7 }
 0x39b   :  { %v1887_v3 = vrot.slane %v18856_v51, %v18685_v52  ;;  %v2478_v8 = vsel %vm98_vm0, %v19243_v6, -inf  ;;  %v2412_v63 = vsel %vm98_vm0, %v19254_v38, -inf  ;;  %vm2072_vm1 = vcmp.gt.f32.partialorder %v2008_v7, 0.0 }
 0x39c   :  { %v2040_v41 = vmul.f32 %v1552_v20, %v19209_v15  ;;  %v1553_v44 = vadd.f32 %v19032_v56, %v1471_v58  ;;  %v19273_v12 = vsel %vm1983_vm4, %v2227_v59, -4.2949673e+09  ;;  %v19277_v51 = vsel %vm1977_vm3, %v2199_v32, -4.2949673e+09 }
 0x39d   :  { %2458 = vmax.xlane.f32.xlu0 %v2457_v14  ;;  %2395 = vmax.xlane.f32.xlu1 %v2394_v22  ;;  %v19260_v53 = vpop.trf.xlu0  ;;  %v2014_v25 = vmul.f32 %v1130_v5, %v19144_v10  ;;  %v2230_v14 = vsel %vm2102_vm12, %v2038_v30, %v2166_v27  ;;  %v2205_v22 = vsel %vm2077_vm14, %v2013_v50, %v2141_v31  ;;  %v2167_v6 = vmul.f32 0.2, %v2039_v43 }
 0x39e   :  { %vm2103_vm2 = vcmp.gt.f32.partialorder %v2039_v43, 0.0  ;;  %v2200_v20 = vsel %vm2072_vm1, %v2008_v7, %v2136_v28  ;;  %vm2073_vm6 = vcmp.gt.f32.partialorder %v19231_v0, 0.0  ;;  %v2137_v56 = vmul.f32 0.2, %v19231_v0 }
 0x39f   :  { %v1968_v58 = vadd.f32 %v18897_v33, %v1887_v3  ;;  %v2481_v59 = vsel %vm98_vm0, %v19273_v12, -inf  ;;  %v2397_v32 = vsel %vm98_vm0, %v19277_v51, -inf  ;;  %vm1984_vm7 = vcmp.gt.f32.partialorder %v19209_v15, 0.0 }
 0x3a0   :  { %v2041_v31 = vmul.f32 %v1553_v44, %v19249_v17  ;;  %v19293_v30 = vsel %vm1984_vm7, %v2230_v14, -4.2949673e+09  ;;  %v19297_v50 = vsel %vm1979_vm13, %v2205_v22, -4.2949673e+09  ;;  %v2168_v33 = vmul.f32 0.2, %v2040_v41 }
 0x3a1   :  { %2479 = vmax.xlane.f32.xlu0 %v2478_v8  ;;  %2413 = vmax.xlane.f32.xlu1 %v2412_v63  ;;  %v19280_v38 = vpop.trf.xlu0  ;;  %v1131_v7 = vadd.f32 %v18816_v36, %v1043_v34  ;;  %v2231_v5 = vsel %vm2103_vm2, %v2039_v43, %v2167_v6  ;;  %vm2104_vm8 = vcmp.gt.f32.partialorder %v2040_v41, 0.0  ;;  %v2142_v27 = vmul.f32 0.2, %v2014_v25 }
 0x3a2   :  { %v1871_v28 = vrot.slane %v18794_v49, %v18685_v52  ;;  %vm1985_vm12 = vcmp.gt.f32.partialorder %v19249_v17, 0.0  ;;  %v19305_v63 = vsel %vm1976_vm9, %v2200_v20, -4.2949673e+09  ;;  %vm2078_vm14 = vcmp.gt.f32.partialorder %v2014_v25, 0.0 }
 0x3a3   :  { %v2042_v44 = vmul.f32 %v1968_v58, %v19209_v15  ;;  %v1969_v14 = vadd.f32 %v18903_v40, %v1887_v3  ;;  %v2490_v36 = vsel %vm98_vm0, %v19293_v30, -inf  ;;  %v2415_v34 = vsel %vm98_vm0, %v19297_v50, -inf }
 0x3a4   :  { %v1459_v49 = vrot.slane %v19075_v9, %v18685_v52  ;;  %v19317_v6 = vsel %vm1985_vm12, %v2231_v5, -4.2949673e+09  ;;  %v2232_v43 = vsel %vm2104_vm8, %v2040_v41, %v2168_v33  ;;  %v2169_v22 = vmul.f32 0.2, %v2041_v31 }
 0x3a5   :  { %2482 = vmax.xlane.f32.xlu0 %v2481_v59  ;;  %2398 = vmax.xlane.f32.xlu1 %v2397_v32  ;;  %v2015_v20 = vmul.f32 %v1131_v7, %v19221_v35  ;;  %v1960_v40 = vadd.f32 %v19077_v54, %v1871_v28  ;;  %v2206_v58 = vsel %vm2078_vm14, %v2014_v25, %v2142_v27  ;;  %vm2105_vm1 = vcmp.gt.f32.partialorder %v2041_v31, 0.0 }
 0x3a6   :  { %v1844_v8 = vpop.trf.xlu0  ;;  %v2201_v9 = vsel %vm2073_vm6, %v19231_v0, %v2137_v56  ;;  %v2493_v59 = vsel %vm98_vm0, %v19317_v6, -inf  ;;  %v2400_v41 = vsel %vm98_vm0, %v19305_v63, -inf  ;;  %vm2106_vm2 = vcmp.gt.f32.partialorder %v2042_v44, 0.0 }
 0x3a7   :  { %v19322_v3 = vrot.slane %v1844_v8, %v18685_v52  ;;  %v2170_v32 = vmul.f32 0.2, %v2042_v44  ;;  %v2043_v33 = vmul.f32 %v1969_v14, %v19249_v17  ;;  %v1546_v54 = vadd.f32 %v18742_v46, %v1459_v49 }
 0x3a8   :  { %v19335_v25 = vsel %vm1984_vm7, %v2232_v43, -4.2949673e+09  ;;  %v19339_v0 = vsel %vm1978_vm15, %v2206_v58, -4.2949673e+09  ;;  %v2010_v56 = vmul.f32 %v1960_v40, %v19105_v23  ;;  %v2233_v5 = vsel %vm2105_vm1, %v2041_v31, %v2169_v22  ;;  %v19359_v31 = vld [vmem:[%s22858_s1 + $0x70] sm:$0xff] }
 0x3a9   :  { %2491 = vmax.xlane.f32.xlu0 %v2490_v36  ;;  %2416 = vmax.xlane.f32.xlu1 %v2415_v34  ;;  %v1970_v7 = vadd.f32 %v18910_v19, %v19322_v3  ;;  %v2143_v27 = vmul.f32 0.2, %v2015_v20  ;;  %v2532_v46 = vsub.f32 %v18702_v37, %v18841_v26  ;;  %vm2079_vm6 = vcmp.gt.f32.partialorder %v2015_v20, 0.0 }
 0x3aa   :  { %v2496_v8 = vsel %vm98_vm0, %v19335_v25, -inf  ;;  %v2418_v14 = vsel %vm98_vm0, %v19339_v0, -inf  ;;  %v19352_v36 = vsel %vm1977_vm3, %v2201_v9, -4.2949673e+09  ;;  %v2234_v34 = vsel %vm2106_vm2, %v2042_v44, %v2170_v32 }
 0x3ab   :  { %v2016_v19 = vmul.f32 %v1546_v54, %v19144_v10  ;;  %v19363_v37 = vsel %vm1985_vm12, %v2233_v5, -4.2949673e+09  ;;  %vm2107_vm8 = vcmp.gt.f32.partialorder %v2043_v33, 0.0  ;;  %v2171_v26 = vmul.f32 0.2, %v2043_v33 }
 0x3ac   :  { %v1961_v43 = vadd.f32 %v19094_v21, %v1871_v28  ;;  %v2050_v22 = vmul.f32 %v1970_v7, %v19359_v31  ;;  %v2207_v44 = vsel %vm2079_vm6, %v2015_v20, %v2143_v27  ;;  %v2138_v40 = vmul.f32 0.2, %v2010_v56 }
 0x3ad   :  { %2494 = vmax.xlane.f32.xlu0 %v2493_v59  ;;  %2401 = vmax.xlane.f32.xlu1 %v2400_v41  ;;  %v2596_v58 = vmul.f32 1.442695, %v2532_v46  ;;  %vm2074_vm14 = vcmp.gt.f32.partialorder %v2010_v56, 0.0  ;;  %v2499_v9 = vsel %vm98_vm0, %v19363_v37, -inf  ;;  %v2403_v59 = vsel %vm98_vm0, %v19352_v36, -inf }
 0x3ae   :  { %v19373_v41 = vsel %vm1984_vm7, %v2234_v34, -4.2949673e+09  ;;  %v1547_v32 = vadd.f32 %v18663_v18, %v1459_v49  ;;  %v19378_v21 = vsel %vm1979_vm13, %v2207_v44, -4.2949673e+09  ;;  %v2235_v28 = vsel %vm2107_vm8, %v2043_v33, %v2171_v26 }
 0x3af   :  { %v2144_v20 = vmul.f32 0.2, %v2016_v19  ;;  %v631_v54 = vrot.slane %v19092_v2, %v18685_v52  ;;  %v2011_v7 = vmul.f32 %v1961_v43, %v19024_v13  ;;  %v2202_v5 = vsel %vm2074_vm14, %v2010_v56, %v2138_v40 }
 0x3b0   :  { %v2178_v27 = vmul.f32 0.2, %v2050_v22  ;;  %17548 = vpow2.f32 %v2596_v58  ;;  %vm2080_vm1 = vcmp.gt.f32.partialorder %v2016_v19, 0.0  ;;  %vm2114_vm2 = vcmp.gt.f32.partialorder %v2050_v22, 0.0 }
 0x3b1   :  { %2497 = vmax.xlane.f32.xlu0 %v2496_v8  ;;  %2419 = vmax.xlane.f32.xlu1 %v2418_v14  ;;  %v2502_v18 = vsel %vm98_vm0, %v19373_v41, -inf  ;;  %v2421_v49 = vsel %vm98_vm0, %v19378_v21, -inf  ;;  %v2017_v46 = vmul.f32 %v1547_v32, %v19221_v35  ;;  %v19390_v2 = vsel %vm1985_vm12, %v2235_v28, -4.2949673e+09 }
 0x3b2   :  { %v19394_v33 = vsel %vm1976_vm9, %v2202_v5, -4.2949673e+09  ;;  %v716_v56 = vadd.f32 %v18783_v39, %v631_v54  ;;  %v2208_v8 = vsel %vm2080_vm1, %v2016_v19, %v2144_v20  ;;  %v2242_v14 = vsel %vm2114_vm2, %v2050_v22, %v2178_v27 }
 0x3b3   :  { %v2139_v34 = vmul.f32 0.2, %v2011_v7  ;;  %vm2075_vm6 = vcmp.gt.f32.partialorder %v2011_v7, 0.0  ;;  %v2505_v26 = vsel %vm98_vm0, %v19390_v2, -inf  ;;  %v2406_v43 = vsel %vm98_vm0, %v19394_v33, -inf }
 0x3b4   :  { %vm1986_vm8 = vcmp.gt.f32.partialorder %v19359_v31, 0.0  ;;  %v1963_v44 = vadd.f32 %v18866_v55, %v19109_v42  ;;  %v19406_v39 = vsel %vm1978_vm15, %v2208_v8, -4.2949673e+09  ;;  %v2020_v19 = vmul.f32 %v716_v56, %v19084_v57  ;;  %v23099_v8 = vld [vmem:[#allocation41_spill] sm:$0xff] }
 0x3b5   :  { %2500 = vmax.xlane.f32.xlu0 %v2499_v9  ;;  %2404 = vmax.xlane.f32.xlu1 %v2403_v59  ;;  %v19410_v23 = vsel %vm1986_vm8, %v2242_v14, -4.2949673e+09  ;;  %v2203_v22 = vsel %vm2075_vm6, %v2011_v7, %v2139_v34  ;;  %v2145_v40 = vmul.f32 0.2, %v2017_v46  ;;  %vm2081_vm9 = vcmp.gt.f32.partialorder %v2017_v46, 0.0 }
 0x3b6   :  { %v2424_v58 = vsel %vm98_vm0, %v19406_v39, -inf  ;;  %v2526_v55 = vsel %vm98_vm0, %v19410_v23, -inf  ;;  %v2019_v10 = vmul.f32 %v1963_v44, %v19221_v35  ;;  %v19422_v9 = vsel %vm1977_vm3, %v2203_v22, -4.2949673e+09 }
 0x3b7   :  { %v717_v59 = vadd.f32 %v18790_v45, %v631_v54  ;;  %v2209_v32 = vsel %vm2081_vm9, %v2017_v46, %v2145_v40  ;;  %v2148_v28 = vmul.f32 0.2, %v2020_v19  ;;  %vm2084_vm15 = vcmp.gt.f32.partialorder %v2020_v19, 0.0 }
 0x3b8   :  { %v1047_v20 = vrot.slane %v18808_v11, %v18685_v52  ;;  %v2409_v7 = vsel %vm98_vm0, %v19422_v9, -inf  ;;  %v19433_v13 = vsel %vm1979_vm13, %v2209_v32, -4.2949673e+09  ;;  %v2147_v27 = vmul.f32 0.2, %v2019_v10  ;;  %v23102_v32 = vld [vmem:[#allocation48_spill] sm:$0xff] }
 0x3b9   :  { %2503 = vmax.xlane.f32.xlu0 %v2502_v18  ;;  %2422 = vmax.xlane.f32.xlu1 %v2421_v49  ;;  %v2021_v54 = vmul.f32 %v717_v59, %v19123_v62  ;;  %v635_v11 = vrot.slane %v19129_v29, %v18685_v52  ;;  %v2212_v18 = vsel %vm2084_vm15, %v2020_v19, %v2148_v28  ;;  %vm2083_vm3 = vcmp.gt.f32.partialorder %v2019_v10, 0.0 }
 0x3ba   :  { %v19417_v42 = vpop.eup %17548  ;;  %v1132_v45 = vadd.f32 %v18901_v1, %v1047_v20  ;;  %v2427_v49 = vsel %vm98_vm0, %v19433_v13, -inf  ;;  %v19443_v46 = vsel %vm1980_vm10, %v2212_v18, -4.2949673e+09  ;;  %v2211_v1 = vsel %vm2083_vm3, %v2019_v10, %v2147_v27  ;;  %v23103_v27 = vld [vmem:[#allocation39_spill] sm:$0xff] }
 0x3bb   :  { %v2724_v5 = vsel %vm98_vm0, %v19417_v42, 0.0  ;;  %v718_v14 = vadd.f32 %v23099_v8, %v635_v11  ;;  %v2149_v34 = vmul.f32 0.2, %v2021_v54  ;;  %vm2085_vm14 = vcmp.gt.f32.partialorder %v2021_v54, 0.0 }
 0x3bc   :  { %v2022_v56 = vmul.f32 %v1132_v45, %v19084_v57  ;;  %v2436_v29 = vsel %vm98_vm0, %v19443_v46, -inf  ;;  %v719_v28 = vadd.f32 %v23102_v32, %v635_v11 }
 0x3bd   :  { %2506 = vmax.xlane.f32.xlu0 %v2505_v26  ;;  %2407 = vmax.xlane.f32.xlu1 %v2406_v43  ;;  %v19451_v26 = vsel %vm1979_vm13, %v2211_v1, -4.2949673e+09  ;;  %v23100_v43 = vld [vmem:[#allocation49_spill] sm:$0xff]  ;;  %v2028_v19 = vmul.f32 %v718_v14, %v19134_v47  ;;  %v2213_v22 = vsel %vm2085_vm14, %v2021_v54, %v2149_v34  ;;  %v23104_v34 = vld [vmem:[#allocation50_spill] sm:$0xff] }
 0x3be   :  { %v1133_v44 = vadd.f32 %v23100_v43, %v1047_v20  ;;  %v2150_v40 = vmul.f32 0.2, %v2022_v56  ;;  %vm2086_vm1 = vcmp.gt.f32.partialorder %v2022_v56, 0.0  ;;  %v19461_v59 = vsel %vm1981_vm11, %v2213_v22, -4.2949673e+09 }
 0x3bf   :  { %vm2092_vm13 = vcmp.gt.f32.partialorder %v2028_v19, 0.0  ;;  %v2029_v18 = vmul.f32 %v719_v28, %v19168_v4 }
 0x3c0   :  { %v2023_v35 = vmul.f32 %v1133_v44, %v19123_v62  ;;  %v2214_v20 = vsel %vm2086_vm1, %v2022_v56, %v2150_v40 }
 0x3c1   :  { %2425 = vmax.xlane.f32.xlu1 %v2424_v58  ;;  %2527 = vmax.xlane.f32.xlu0 %v2526_v55  ;;  %v2433_v58 = vsel %vm98_vm0, %v19451_v26, -inf  ;;  %v23101_v55 = vld [vmem:[#allocation44_spill] sm:$0xff]  ;;  %v19470_v54 = vsel %vm1980_vm10, %v2214_v20, -4.2949673e+09  ;;  %v2157_v44 = vmul.f32 0.2, %v2029_v18  ;;  %vm2093_vm6 = vcmp.gt.f32.partialorder %v2029_v18, 0.0 }
 0x3c2   :  { %v1463_v10 = vrot.slane %v23101_v55, %v18685_v52  ;;  %v2151_v11 = vmul.f32 0.2, %v2023_v35  ;;  %vm2087_vm2 = vcmp.gt.f32.partialorder %v2023_v35, 0.0  ;;  %v2442_v56 = vsel %vm98_vm0, %v19470_v54, -inf }
 0x3c3   :  { %v2221_v55 = vsel %vm2093_vm6, %v2029_v18, %v2157_v44 }
 0x3c4   :  { %v1548_v45 = vadd.f32 %v23103_v27, %v1463_v10  ;;  %v2215_v43 = vsel %vm2087_vm2, %v2023_v35, %v2151_v11  ;;  %v19496_v20 = vsel %vm1983_vm4, %v2221_v55, -4.2949673e+09 }
 0x3c5   :  { %2410 = vmax.xlane.f32.xlu1 %v2409_v7  ;;  %2725 = vadd.xlane.f32.xlu0 %v2724_v5  ;;  %v2156_v7 = vmul.f32 0.2, %v2028_v19  ;;  %v2439_v5 = vsel %vm98_vm0, %v19461_v59, -inf  ;;  %v19488_v40 = vsel %vm1981_vm11, %v2215_v43, -4.2949673e+09  ;;  %v2463_v11 = vsel %vm98_vm0, %v19496_v20, -inf }
 0x3c6   :  { %v2024_v1 = vmul.f32 %v1548_v45, %v19084_v57  ;;  %v2445_v35 = vsel %vm98_vm0, %v19488_v40, -inf }
 0x3c7   :  { %v2220_v8 = vsel %vm2092_vm13, %v2028_v19, %v2156_v7  ;;  %v23105_v19 = vld [vmem:[#allocation40_spill] sm:$0xff] }
 0x3c8   :  { %v19479_v14 = vsel %vm1982_vm5, %v2220_v8, -4.2949673e+09  ;;  %v1549_v22 = vadd.f32 %v23105_v19, %v1463_v10  ;;  %v2152_v32 = vmul.f32 0.2, %v2024_v1  ;;  %vm2088_vm9 = vcmp.gt.f32.partialorder %v2024_v1, 0.0  ;;  %v23106_v10 = vld [vmem:[#allocation53_spill] sm:$0xff] }
 0x3c9   :  { %2428 = vmax.xlane.f32.xlu1 %v2427_v49  ;;  %v1051_v49 = vrot.slane %v19157_v61, %v18685_v52  ;;  %v2460_v61 = vsel %vm98_vm0, %v19479_v14, -inf }
 0x3ca   :  { %v2025_v28 = vmul.f32 %v1549_v22, %v19123_v62  ;;  %v2216_v45 = vsel %vm2088_vm9, %v2024_v1, %v2152_v32  ;;  %v23110_v32 = vld [vmem:[#allocation55_spill] sm:$0xff] }
 0x3cb   :  { %v1135_v7 = vadd.f32 %v23106_v10, %v1051_v49  ;;  %v23111_v10 = vld [vmem:[#allocation59_spill] sm:$0xff] }
 0x3cc   :  { %v2153_v19 = vmul.f32 0.2, %v2025_v28  ;;  %vm2089_vm3 = vcmp.gt.f32.partialorder %v2025_v28, 0.0 }
 0x3cd   :  { %2437 = vmax.xlane.f32.xlu1 %v2436_v29  ;;  %v1134_v29 = vadd.f32 %v23104_v34, %v1051_v49  ;;  %v2031_v43 = vmul.f32 %v1135_v7, %v19168_v4  ;;  %v23109_v49 = vld [vmem:[#allocation54_spill] sm:$0xff] }
 0x3d1   :  { %2434 = vmax.xlane.f32.xlu1 %v2433_v58  ;;  %v2030_v58 = vmul.f32 %v1134_v29, %v19134_v47  ;;  %v19506_v29 = vsel %vm1980_vm10, %v2216_v45, -4.2949673e+09  ;;  %v2217_v45 = vsel %vm2089_vm3, %v2025_v28, %v2153_v19  ;;  %vm2095_vm10 = vcmp.gt.f32.partialorder %v2031_v43, 0.0 }
 0x3d2   :  { %v2448_v55 = vsel %vm98_vm0, %v19506_v29, -inf }
 0x3d3   :  { %v2158_v8 = vmul.f32 0.2, %v2030_v58  ;;  %vm2094_vm15 = vcmp.gt.f32.partialorder %v2030_v58, 0.0 }
 0x3d5   :  { %2440 = vmax.xlane.f32.xlu1 %v2439_v5  ;;  %v23107_v5 = vld [vmem:[#allocation72_spill] sm:$0xff] }
 0x3d6   :  { %v1467_v27 = vrot.slane %v23107_v5, %v18685_v52 }
 0x3d8   :  { %v1550_v44 = vadd.f32 %v23109_v49, %v1467_v27 }
 0x3d9   :  { %2443 = vmax.xlane.f32.xlu1 %v2442_v56  ;;  %v23108_v56 = vld [vmem:[#allocation58_spill] sm:$0xff] }
 0x3da   :  { %v2032_v7 = vmul.f32 %v1550_v44, %v19134_v47  ;;  %v19527_v44 = vsel %vm1981_vm11, %v2217_v45, -4.2949673e+09  ;;  %v23119_v47 = vld [vmem:[#allocation43_spill] sm:$0xff] }
 0x3dc   :  { %v2160_v19 = vmul.f32 0.2, %v2032_v7  ;;  %vm2096_vm14 = vcmp.gt.f32.partialorder %v2032_v7, 0.0 }
 0x3dd   :  { %2461 = vmax.xlane.f32.xlu1 %v2460_v61  ;;  %v2222_v61 = vsel %vm2094_vm15, %v2030_v58, %v2158_v8  ;;  %v639_v58 = vrot.slane %v19197_v48, %v18685_v52  ;;  %v2159_v8 = vmul.f32 0.2, %v2031_v43 }
 0x3de   :  { %v19516_v57 = vsel %vm1982_vm5, %v2222_v61, -4.2949673e+09  ;;  %v23113_v61 = vld [vmem:[#allocation56_spill] sm:$0xff] }
 0x3df   :  { %v720_v48 = vadd.f32 %v23113_v61, %v639_v58  ;;  %v2223_v28 = vsel %vm2095_vm10, %v2031_v43, %v2159_v8  ;;  %v643_v8 = vrot.slane %v19235_v60, %v18685_v52 }
 0x3e1   :  { %2446 = vmax.xlane.f32.xlu1 %v2445_v35  ;;  %v1551_v35 = vadd.f32 %v23110_v32, %v1467_v27  ;;  %v2466_v27 = vsel %vm98_vm0, %v19516_v57, -inf  ;;  %v23114_v32 = vld [vmem:[#allocation61_spill] sm:$0xff]  ;;  %v2036_v43 = vmul.f32 %v720_v48, %v19209_v15  ;;  %v23117_v48 = vld [vmem:[#allocation42_spill] sm:$0xff] }
 0x3e3   :  { %vm2100_vm1 = vcmp.gt.f32.partialorder %v2036_v43, 0.0 }
 0x3e4   :  { %v2348_v18 = vpop.xlane.xlu0 %2347 }
 0x3e5   :  { %v2534_v34 = vsub.f32 %v23108_v56, %v2348_v18  ;;  %2464 = vmax.xlane.f32.xlu1 %v2463_v11  ;;  %v2033_v56 = vmul.f32 %v1551_v35, %v19168_v4 }
 0x3e7   :  { %v2600_v1 = vmul.f32 1.442695, %v2534_v34  ;;  %v23112_v34 = vld [vmem:[#allocation60_spill] sm:$0xff]  ;;  %v2161_v62 = vmul.f32 0.2, %v2033_v56  ;;  %vm2097_vm11 = vcmp.gt.f32.partialorder %v2033_v56, 0.0 }
 0x3e8   :  { %v2354_v22 = vpop.xlane.xlu0 %2353 }
 0x3e9   :  { %17550 = vpow2.f32 %v2600_v1  ;;  %v2536_v5 = vsub.f32 %v23111_v10, %v2354_v22  ;;  %2449 = vmax.xlane.f32.xlu1 %v2448_v55  ;;  %v2451_v55 = vsel %vm98_vm0, %v19527_v44, -inf  ;;  %v19535_v10 = vsel %vm1983_vm4, %v2223_v28, -4.2949673e+09  ;;  %v23116_v28 = vld [vmem:[#allocation62_spill] sm:$0xff] }
 0x3eb   :  { %v2604_v18 = vmul.f32 1.442695, %v2536_v5  ;;  %v23115_v5 = vld [vmem:[#allocation57_spill] sm:$0xff] }
 0x3ec   :  { %v2360_v11 = vpop.xlane.xlu0 %2359  ;;  %v721_v45 = vadd.f32 %v23115_v5, %v639_v58 }
 0x3ed   :  { %17552 = vpow2.f32 %v2604_v18  ;;  %v2538_v49 = vsub.f32 %v23112_v34, %v2360_v11  ;;  %2467 = vmax.xlane.f32.xlu1 %v2466_v27  ;;  %v2224_v18 = vsel %vm2096_vm14, %v2032_v7, %v2160_v19  ;;  %v722_v19 = vadd.f32 %v23117_v48, %v643_v8 }
 0x3ee   :  { %v19550_v60 = vsel %vm1982_vm5, %v2224_v18, -4.2949673e+09  ;;  %v2037_v7 = vmul.f32 %v721_v45, %v19249_v17  ;;  %v723_v18 = vadd.f32 %v23119_v47, %v643_v8 }
 0x3ef   :  { %v2608_v1 = vmul.f32 1.442695, %v2538_v49  ;;  %v2469_v49 = vsel %vm98_vm0, %v19535_v10, -inf  ;;  %v2472_v5 = vsel %vm98_vm0, %v19550_v60, -inf }
 0x3f0   :  { %v2366_v22 = vpop.xlane.xlu0 %2365  ;;  %vm2101_vm5 = vcmp.gt.f32.partialorder %v2037_v7, 0.0 }
 0x3f1   :  { %17554 = vpow2.f32 %v2608_v1  ;;  %v2540_v35 = vsub.f32 %v23114_v32, %v2366_v22  ;;  %2452 = vmax.xlane.f32.xlu1 %v2451_v55  ;;  %v2225_v1 = vsel %vm2097_vm11, %v2033_v56, %v2161_v62  ;;  %v2164_v22 = vmul.f32 0.2, %v2036_v43  ;;  %v19569_v62 = vld [vmem:[%s22858_s1 + $0x78] sm:$0xff]  ;;  %s18199_s1 = smov 96  }
 0x3f2   :  { %v19564_v56 = vsel %vm1983_vm4, %v2225_v1, -4.2949673e+09 }
 0x3f3   :  { %v19541_v11 = vpop.eup %17550  ;;  %v2612_v27 = vmul.f32 1.442695, %v2540_v35  ;;  %v2228_v8 = vsel %vm2100_vm1, %v2036_v43, %v2164_v22  ;;  %v2475_v4 = vsel %vm98_vm0, %v19564_v56, -inf  ;;  %v23123_v43 = vld [vmem:[#allocation45_spill] sm:$0xff] }
 0x3f4   :  { %v2372_v34 = vpop.xlane.xlu0 %2371  ;;  %v2730_v61 = vsel %vm98_vm0, %v19541_v11, 0.0 }
 0x3f5   :  { %17556 = vpow2.f32 %v2612_v27  ;;  %v2542_v58 = vsub.f32 %v23116_v28, %v2372_v34  ;;  %2470 = vmax.xlane.f32.xlu1 %v2469_v49  ;;  %2731 = vadd.xlane.f32.xlu0 %v2730_v61  ;;  %v23120_v34 = vld [vmem:[#allocation63_spill] sm:$0xff]  ;;  %v2044_v49 = vmul.f32 %v722_v19, %v19359_v31  ;;  %v1059_v61 = vrot.slane %v19260_v53, %v18685_v52  ;;  %v23122_v19 = vld [vmem:[#allocation64_spill] sm:$0xff] }
 0x3f6   :  { %v2165_v28 = vmul.f32 0.2, %v2037_v7  ;;  %v19584_v53 = vsel %vm1984_vm7, %v2228_v8, -4.2949673e+09 }
 0x3f7   :  { %v19554_v55 = vpop.eup %17552  ;;  %v2616_v32 = vmul.f32 1.442695, %v2542_v58  ;;  %v1138_v22 = vadd.f32 %v23123_v43, %v1059_v61  ;;  %v2172_v47 = vmul.f32 0.2, %v2044_v49  ;;  %vm2108_vm4 = vcmp.gt.f32.partialorder %v2044_v49, 0.0 }
 0x3f8   :  { %23118 = vst [vmem:[#allocation41_spill] sm:$0xff] %v19554_v55  ;;  %v2378_v35 = vpop.xlane.xlu0 %2377  ;;  %v2736_v27 = vsel %vm98_vm0, %v19554_v55, 0.0 }
 0x3f9   :  { %17558 = vpow2.f32 %v2616_v32  ;;  %v2544_v45 = vsub.f32 %v23120_v34, %v2378_v35  ;;  %2473 = vmax.xlane.f32.xlu1 %v2472_v5  ;;  %2737 = vadd.xlane.f32.xlu0 %v2736_v27  ;;  %v2045_v35 = vmul.f32 %v723_v18, %v19569_v62  ;;  %v2229_v27 = vsel %vm2101_vm5, %v2037_v7, %v2165_v28  ;;  %v23126_v28 = vld [vmem:[#allocation46_spill] sm:$0xff] }
 0x3fa   :  { %v2484_v18 = vsel %vm98_vm0, %v19584_v53, -inf  ;;  %v19596_v7 = vsel %vm1985_vm12, %v2229_v27, -4.2949673e+09  ;;  %vm1987_vm12 = vcmp.gt.f32.partialorder %v19569_v62, 0.0 }
 0x3fb   :  { %v19574_v58 = vpop.eup %17554  ;;  %v2620_v48 = vmul.f32 1.442695, %v2544_v45  ;;  %v2173_v8 = vmul.f32 0.2, %v2045_v35  ;;  %vm2109_vm7 = vcmp.gt.f32.partialorder %v2045_v35, 0.0 }
 0x3fc   :  { %23121 = vst [vmem:[#allocation49_spill] sm:$0xff] %v19574_v58  ;;  %v2384_v32 = vpop.xlane.xlu0 %2383  ;;  %v2742_v1 = vsel %vm98_vm0, %v19574_v58, 0.0 }
 0x3fd   :  { %17560 = vpow2.f32 %v2620_v48  ;;  %v2546_v5 = vsub.f32 %v23122_v19, %v2384_v32  ;;  %2476 = vmax.xlane.f32.xlu1 %v2475_v4  ;;  %2743 = vadd.xlane.f32.xlu0 %v2742_v1  ;;  %v23125_v32 = vld [vmem:[#allocation65_spill] sm:$0xff]  ;;  %v1139_v4 = vadd.f32 %v23126_v28, %v1059_v61  ;;  %v2046_v1 = vmul.f32 %v1138_v22, %v19359_v31 }
 0x3fe   :  { %v1475_v19 = vrot.slane %v19280_v38, %v18685_v52  ;;  %v2237_v27 = vsel %vm2109_vm7, %v2045_v35, %v2173_v8  ;;  %v23134_v52 = vld [vmem:[#allocation47_spill] sm:$0xff] }
 0x3ff   :  { %v19587_v34 = vpop.eup %17556  ;;  %v2624_v45 = vmul.f32 1.442695, %v2546_v5  ;;  %v2236_v5 = vsel %vm2108_vm4, %v2044_v49, %v2172_v47  ;;  %v2047_v38 = vmul.f32 %v1139_v4, %v19569_v62  ;;  %v23128_v49 = vld [vmem:[#allocation66_spill] sm:$0xff]  ;;  %v2174_v47 = vmul.f32 0.2, %v2046_v1  ;;  %v23130_v4 = vld [vmem:[#allocation68_spill] sm:$0xff] }
 0x400   :  { %23124 = vst [vmem:[#allocation44_spill] sm:$0xff] %v19587_v34  ;;  %v2387_v58 = vpop.xlane.xlu0 %2386  ;;  %v2748_v48 = vsel %vm98_vm0, %v19587_v34, 0.0  ;;  %v19610_v61 = vsel %vm1986_vm8, %v2236_v5, -4.2949673e+09  ;;  %v1554_v22 = vadd.f32 %v23128_v49, %v1475_v19  ;;  %vm2110_vm13 = vcmp.gt.f32.partialorder %v2046_v1, 0.0  ;;  %v23143_v34 = vld [vmem:[#allocation67_spill] sm:$0xff] }
 0x401   :  { %17562 = vpow2.f32 %v2624_v45  ;;  %v2547_v15 = vsub.f32 %v23125_v32, %v2387_v58  ;;  %2485 = vmax.xlane.f32.xlu1 %v2484_v18  ;;  %2749 = vadd.xlane.f32.xlu0 %v2748_v48  ;;  %v2487_v58 = vsel %vm98_vm0, %v19596_v7, -inf  ;;  %v1954_v48 = vpop.permute.xlu1 %1953  ;;  %v2508_v32 = vsel %vm98_vm0, %v19610_v61, -inf }
 0x402   :  { %v19623_v28 = vsel %vm1987_vm12, %v2237_v27, -4.2949673e+09  ;;  %v1555_v5 = vadd.f32 %v23130_v4, %v1475_v19  ;;  %v2048_v35 = vmul.f32 %v1554_v22, %v19359_v31  ;;  %v2238_v8 = vsel %vm2110_vm13, %v2046_v1, %v2174_v47  ;;  %v23133_v4 = vld [vmem:[#allocation34_spill] sm:$0xff] }
 0x403   :  { %v19602_v43 = vpop.eup %17558  ;;  %v2626_v45 = vmul.f32 1.442695, %v2547_v15  ;;  %vm2111_vm2 = vcmp.gt.f32.partialorder %v2047_v38, 0.0  ;;  %v2511_v49 = vsel %vm98_vm0, %v19623_v28, -inf  ;;  %v19635_v27 = vsel %vm1986_vm8, %v2238_v8, -4.2949673e+09 }
 0x404   :  { %23127 = vst [vmem:[#allocation48_spill] sm:$0xff] %v19602_v43  ;;  %v2754_v17 = vsel %vm98_vm0, %v19602_v43, 0.0  ;;  %v2049_v19 = vmul.f32 %v1555_v5, %v19569_v62  ;;  %v1971_v1 = vadd.f32 %v1954_v48, %v19322_v3  ;;  %v2176_v47 = vmul.f32 0.2, %v2048_v35  ;;  %v23136_v43 = vld [vmem:[#allocation52_spill] sm:$0xff] }
 0x405   :  { %17564 = vpow2.f32 %v2626_v45  ;;  %2488 = vmax.xlane.f32.xlu1 %v2487_v58  ;;  %2755 = vadd.xlane.f32.xlu0 %v2754_v17  ;;  %v2175_v45 = vmul.f32 0.2, %v2047_v38  ;;  %v2351_v17 = vpop.xlane.xlu1 %2350  ;;  %vm2112_vm6 = vcmp.gt.f32.partialorder %v2048_v35, 0.0 }
 0x406   :  { %v2051_v3 = vmul.f32 %v1971_v1, %v19569_v62  ;;  %v2240_v48 = vsel %vm2112_vm6, %v2048_v35, %v2176_v47  ;;  %v2177_v8 = vmul.f32 0.2, %v2049_v19  ;;  %vm2113_vm9 = vcmp.gt.f32.partialorder %v2049_v19, 0.0  ;;  %v23139_v62 = vld [vmem:[#allocation71_spill] sm:$0xff] }
 0x407   :  { %v19615_v18 = vpop.eup %17560  ;;  %v2239_v22 = vsel %vm2111_vm2, %v2047_v38, %v2175_v45 }
 0x408   :  { %23129 = vst [vmem:[#allocation39_spill] sm:$0xff] %v19615_v18  ;;  %v2760_v15 = vsel %vm98_vm0, %v19615_v18, 0.0  ;;  %v2533_v18 = vsub.f32 %v23134_v52, %v23133_v4  ;;  %v19649_v5 = vsel %vm1987_vm12, %v2239_v22, -4.2949673e+09  ;;  %v23135_v52 = vld [vmem:[#allocation51_spill] sm:$0xff]  ;;  %v2241_v22 = vsel %vm2113_vm9, %v2049_v19, %v2177_v8 }
 0x409   :  { %2509 = vmax.xlane.f32.xlu1 %v2508_v32  ;;  %2761 = vadd.xlane.f32.xlu0 %v2760_v15  ;;  %v2357_v38 = vpop.xlane.xlu1 %2356  ;;  %v2535_v4 = vsub.f32 %v23135_v52, %v2351_v17  ;;  %vm2115_vm15 = vcmp.gt.f32.partialorder %v2051_v3, 0.0  ;;  %v19664_v17 = vsel %vm1987_vm12, %v2241_v22, -4.2949673e+09 }
 0x40a   :  { %v2598_v45 = vmul.f32 1.442695, %v2533_v18  ;;  %v2537_v35 = vsub.f32 %v23136_v43, %v2357_v38  ;;  %v2523_v8 = vsel %vm98_vm0, %v19664_v17, -inf  ;;  %v2393_v38 = vpop.xlane.xlu0 %2392 }
 0x40b   :  { %v19627_v58 = vpop.eup %17562  ;;  %v2602_v1 = vmul.f32 1.442695, %v2535_v4  ;;  %v23138_v4 = vld [vmem:[#allocation69_spill] sm:$0xff]  ;;  %v2549_v55 = vsub.f32 %v23143_v34, %v2393_v38 }
 0x40c   :  { %23131 = vst [vmem:[#allocation50_spill] sm:$0xff] %v19627_v58  ;;  %v2766_v32 = vsel %vm98_vm0, %v19627_v58, 0.0  ;;  %v2517_v58 = vsel %vm98_vm0, %v19649_v5, -inf  ;;  %17566 = vpow2.f32 %v2598_v45  ;;  %v2606_v47 = vmul.f32 1.442695, %v2537_v35 }
 0x40d   :  { %2512 = vmax.xlane.f32.xlu1 %v2511_v49  ;;  %2767 = vadd.xlane.f32.xlu0 %v2766_v32  ;;  %v2514_v49 = vsel %vm98_vm0, %v19635_v27, -inf  ;;  %17568 = vpow2.f32 %v2602_v1 }
 0x40e   :  { %17570 = vpow2.f32 %v2606_v47 }
 0x40f   :  { %v19639_v15 = vpop.eup %17564 }
 0x410   :  { %23132 = vst [vmem:[#allocation40_spill] sm:$0xff] %v19639_v15  ;;  %v2769_v32 = vsel %vm98_vm0, %v19639_v15, 0.0  ;;  %v2179_v15 = vmul.f32 0.2, %v2051_v3 }
 0x411   :  { %2515 = vmax.xlane.f32.xlu1 %v2514_v49  ;;  %2770 = vadd.xlane.f32.xlu0 %v2769_v32  ;;  %v19657_v49 = vsel %vm1986_vm8, %v2240_v48, -4.2949673e+09  ;;  %v23137_v48 = vld [vmem:[#allocation35_spill] sm:$0xff] }
 0x412   :  { %v2520_v18 = vsel %vm98_vm0, %v19657_v49, -inf  ;;  %v2243_v31 = vsel %vm2115_vm15, %v2051_v3, %v2179_v15 }
 0x413   :  { %v19671_v43 = vsel %vm1987_vm12, %v2243_v31, -4.2949673e+09 }
 0x414   :  { %v2529_v15 = vsel %vm98_vm0, %v19671_v43, -inf }
 0x415   :  { %2518 = vmax.xlane.f32.xlu1 %v2517_v58 }
 0x416   :  { %v2363_v32 = vpop.xlane.xlu1 %2362  ;;  %v19676_v3 = vpop.eup %17566 }
 0x417   :  { %v2539_v19 = vsub.f32 %v23137_v48, %v2363_v32  ;;  %v2727_v31 = vsel %vm98_vm0, %v19676_v3, 0.0  ;;  %v19683_v47 = vpop.eup %17568 }
 0x418   :  { %23140 = vst [vmem:[#allocation53_spill] sm:$0xff] %v19683_v47 }
 0x419   :  { %2521 = vmax.xlane.f32.xlu1 %v2520_v18  ;;  %v2610_v52 = vmul.f32 1.442695, %v2539_v19 }
 0x41a   :  { %v2369_v58 = vpop.xlane.xlu1 %2368 }
 0x41b   :  { %v2541_v22 = vsub.f32 %v23138_v4, %v2369_v58  ;;  %17572 = vpow2.f32 %v2610_v52  ;;  %v23141_v58 = vld [vmem:[#allocation70_spill] sm:$0xff]  ;;  %v19690_v52 = vpop.eup %17570 }
 0x41d   :  { %2524 = vmax.xlane.f32.xlu1 %v2523_v8  ;;  %v2614_v35 = vmul.f32 1.442695, %v2541_v22 }
 0x41e   :  { %v2375_v45 = vpop.xlane.xlu1 %2374 }
 0x41f   :  { %v2543_v18 = vsub.f32 %v23139_v62, %v2375_v45  ;;  %17574 = vpow2.f32 %v2614_v35 }
 0x421   :  { %2530 = vmax.xlane.f32.xlu1 %v2529_v15  ;;  %v2618_v4 = vmul.f32 1.442695, %v2543_v18  ;;  %v2733_v15 = vsel %vm98_vm0, %v19683_v47, 0.0 }
 0x422   :  { %v2381_v32 = vpop.xlane.xlu1 %2380  ;;  %v19678_v1 = vpop.xlane.xlu0 %2431 }
 0x423   :  { %v2545_v48 = vsub.f32 %v23141_v58, %v2381_v32  ;;  %17576 = vpow2.f32 %v2618_v4  ;;  %v2739_v58 = vsel %vm98_vm0, %v19690_v52, 0.0 }
 0x425   :  { %2728 = vadd.xlane.f32.xlu1 %v2727_v31  ;;  %v2622_v45 = vmul.f32 1.442695, %v2545_v48  ;;  %v19698_v35 = vpop.eup %17572 }
 0x426   :  { %v2390_v19 = vpop.xlane.xlu1 %2389  ;;  %v19686_v8 = vpop.xlane.xlu0 %2455  ;;  %23142 = vst [vmem:[#allocation72_spill] sm:$0xff] %v19698_v35 }
 0x427   :  { %v2548_v31 = vsub.f32 %v19192_v16, %v2390_v19  ;;  %17578 = vpow2.f32 %v2622_v45  ;;  %v2745_v16 = vsel %vm98_vm0, %v19698_v35, 0.0 }
 0x429   :  { %2734 = vadd.xlane.f32.xlu1 %v2733_v15  ;;  %v2628_v47 = vmul.f32 1.442695, %v2548_v31  ;;  %v19705_v19 = vpop.eup %17574 }
 0x42a   :  { %v2396_v22 = vpop.xlane.xlu1 %2395  ;;  %v19692_v62 = vpop.xlane.xlu0 %2458  ;;  %v2751_v38 = vsel %vm98_vm0, %v19705_v19, 0.0 }
 0x42b   :  { %v2550_v32 = vsub.f32 %v19215_v24, %v2396_v22  ;;  %v2630_v24 = vmul.f32 1.442695, %v2549_v55 }
 0x42d   :  { %v2632_v18 = vmul.f32 1.442695, %v2550_v32  ;;  %2740 = vadd.xlane.f32.xlu1 %v2739_v58  ;;  %v23144_v32 = vld [vmem:[#allocation76_spill] sm:$0xff]  ;;  %v19713_v45 = vpop.eup %17576 }
 0x42e   :  { %v2414_v15 = vpop.xlane.xlu1 %2413  ;;  %v19701_v48 = vpop.xlane.xlu0 %2479  ;;  %23145 = vst [vmem:[#allocation58_spill] sm:$0xff] %v19713_v45 }
 0x42f   :  { %17580 = vpow2.f32 %v2632_v18  ;;  %v2556_v58 = vsub.f32 %v23144_v32, %v2414_v15 }
 0x430   :  { %17582 = vpow2.f32 %v2628_v47 }
 0x431   :  { %2746 = vadd.xlane.f32.xlu1 %v2745_v16  ;;  %17584 = vpow2.f32 %v2630_v24  ;;  %v2644_v55 = vmul.f32 1.442695, %v2556_v58  ;;  %v19718_v47 = vpop.eup %17578 }
 0x432   :  { %v2399_v4 = vpop.xlane.xlu1 %2398  ;;  %v19707_v22 = vpop.xlane.xlu0 %2482 }
 0x433   :  { %v2551_v34 = vsub.f32 %v19277_v51, %v2399_v4  ;;  %v2757_v51 = vsel %vm98_vm0, %v19713_v45, 0.0 }
 0x435   :  { %v2634_v31 = vmul.f32 1.442695, %v2551_v34  ;;  %2752 = vadd.xlane.f32.xlu1 %v2751_v38 }
 0x436   :  { %v2417_v18 = vpop.xlane.xlu1 %2416  ;;  %v19715_v35 = vpop.xlane.xlu0 %2491 }
 0x437   :  { %17586 = vpow2.f32 %v2634_v31  ;;  %v2557_v16 = vsub.f32 %v19297_v50, %v2417_v18  ;;  %v2763_v50 = vsel %vm98_vm0, %v19718_v47, 0.0 }
 0x438   :  { %17588 = vpow2.f32 %v2644_v55 }
 0x439   :  { %v19722_v15 = vpop.eup %17580  ;;  %2758 = vadd.xlane.f32.xlu1 %v2757_v51  ;;  %v2646_v4 = vmul.f32 1.442695, %v2557_v16 }
 0x43a   :  { %23146 = vst [vmem:[#allocation54_spill] sm:$0xff] %v19722_v15  ;;  %v2402_v32 = vpop.xlane.xlu1 %2401  ;;  %v19724_v34 = vpop.xlane.xlu0 %2494  ;;  %v2778_v24 = vsel %vm98_vm0, %v19722_v15, 0.0 }
 0x43b   :  { %v2552_v58 = vsub.f32 %v19305_v63, %v2402_v32  ;;  %2779 = vadd.xlane.f32.xlu0 %v2778_v24  ;;  %v19731_v38 = vpop.eup %17582  ;;  %17590 = vpow2.f32 %v2646_v4 }
 0x43c   :  { %23147 = vst [vmem:[#allocation55_spill] sm:$0xff] %v19731_v38  ;;  %v19736_v45 = vpop.eup %17584  ;;  %v2772_v63 = vsel %vm98_vm0, %v19731_v38, 0.0 }
 0x43d   :  { %v2636_v31 = vmul.f32 1.442695, %v2552_v58  ;;  %2764 = vadd.xlane.f32.xlu1 %v2763_v50  ;;  %23148 = vst [vmem:[#allocation59_spill] sm:$0xff] %v19736_v45 }
 0x43e   :  { %v2420_v18 = vpop.xlane.xlu1 %2419  ;;  %v19733_v16 = vpop.xlane.xlu0 %2497 }
 0x43f   :  { %17592 = vpow2.f32 %v2636_v31  ;;  %v2558_v51 = vsub.f32 %v19339_v0, %v2420_v18  ;;  %v2775_v0 = vsel %vm98_vm0, %v19736_v45, 0.0 }
 0x441   :  { %v19740_v55 = vpop.eup %17586  ;;  %v2648_v32 = vmul.f32 1.442695, %v2558_v51  ;;  %2773 = vadd.xlane.f32.xlu1 %v2772_v63 }
 0x442   :  { %23149 = vst [vmem:[#allocation60_spill] sm:$0xff] %v19740_v55  ;;  %v2405_v24 = vpop.xlane.xlu1 %2404  ;;  %v19742_v15 = vpop.xlane.xlu0 %2500  ;;  %v2781_v4 = vsel %vm98_vm0, %v19740_v55, 0.0 }
 0x443   :  { %17594 = vpow2.f32 %v2648_v32  ;;  %v2553_v58 = vsub.f32 %v19352_v36, %v2405_v24  ;;  %2782 = vadd.xlane.f32.xlu0 %v2781_v4  ;;  %v19749_v50 = vpop.eup %17588 }
 0x444   :  { %23150 = vst [vmem:[#allocation56_spill] sm:$0xff] %v19749_v50  ;;  %v2796_v32 = vsel %vm98_vm0, %v19749_v50, 0.0 }
 0x445   :  { %v2638_v31 = vmul.f32 1.442695, %v2553_v58  ;;  %2776 = vadd.xlane.f32.xlu1 %v2775_v0  ;;  %v19754_v38 = vpop.eup %17590 }
 0x446   :  { %v2423_v18 = vpop.xlane.xlu1 %2422  ;;  %v19751_v51 = vpop.xlane.xlu0 %2503  ;;  %23151 = vst [vmem:[#allocation61_spill] sm:$0xff] %v19754_v38 }
 0x447   :  { %17596 = vpow2.f32 %v2638_v31  ;;  %v2559_v63 = vsub.f32 %v19378_v21, %v2423_v18  ;;  %v2799_v21 = vsel %vm98_vm0, %v19754_v38, 0.0 }
 0x449   :  { %v19758_v36 = vpop.eup %17592  ;;  %v2650_v24 = vmul.f32 1.442695, %v2559_v63  ;;  %2797 = vadd.xlane.f32.xlu1 %v2796_v32 }
 0x44a   :  { %23152 = vst [vmem:[#allocation57_spill] sm:$0xff] %v19758_v36  ;;  %v2408_v4 = vpop.xlane.xlu1 %2407  ;;  %v19760_v55 = vpop.xlane.xlu0 %2506  ;;  %v2784_v58 = vsel %vm98_vm0, %v19758_v36, 0.0 }
 0x44b   :  { %17598 = vpow2.f32 %v2650_v24  ;;  %v2554_v0 = vsub.f32 %v19394_v33, %v2408_v4  ;;  %2785 = vadd.xlane.f32.xlu0 %v2784_v58  ;;  %v23154_v33 = vld [vmem:[#allocation73_spill] sm:$0xff] }
 0x44c   :  { %v2562_v4 = vsub.f32 %v23154_v33, %v19678_v1 }
 0x44d   :  { %v19767_v31 = vpop.eup %17594  ;;  %v2640_v18 = vmul.f32 1.442695, %v2554_v0  ;;  %2800 = vadd.xlane.f32.xlu1 %v2799_v21 }
 0x44e   :  { %23153 = vst [vmem:[#allocation62_spill] sm:$0xff] %v19767_v31  ;;  %v2426_v50 = vpop.xlane.xlu1 %2425  ;;  %v19769_v63 = vpop.xlane.xlu0 %2527  ;;  %v2802_v36 = vsel %vm98_vm0, %v19767_v31, 0.0 }
 0x44f   :  { %17600 = vpow2.f32 %v2640_v18  ;;  %v2560_v32 = vsub.f32 %v19406_v39, %v2426_v50  ;;  %v2656_v50 = vmul.f32 1.442695, %v2562_v4 }
 0x451   :  { %v19774_v24 = vpop.eup %17596  ;;  %v2652_v58 = vmul.f32 1.442695, %v2560_v32  ;;  %2803 = vadd.xlane.f32.xlu1 %v2802_v36 }
 0x452   :  { %v2411_v38 = vpop.xlane.xlu1 %2410  ;;  %v2726_v45 = vpop.xlane.xlu0 %2725  ;;  %v2787_v0 = vsel %vm98_vm0, %v19774_v24, 0.0 }
 0x453   :  { %17602 = vpow2.f32 %v2652_v58  ;;  %v2555_v21 = vsub.f32 %v19422_v9, %v2411_v38  ;;  %2788 = vadd.xlane.f32.xlu0 %v2787_v0 }
 0x454   :  { %17604 = vrcp.f32 %v2726_v45 }
 0x455   :  { %v19781_v39 = vpop.eup %17598  ;;  %v2642_v18 = vmul.f32 1.442695, %v2555_v21 }
 0x456   :  { %v2429_v31 = vpop.xlane.xlu1 %2428  ;;  %v2805_v1 = vsel %vm98_vm0, %v19781_v39, 0.0 }
 0x457   :  { %17606 = vpow2.f32 %v2642_v18  ;;  %v2561_v36 = vsub.f32 %v19433_v13, %v2429_v31  ;;  %2806 = vadd.xlane.f32.xlu1 %v2805_v1 }
 0x458   :  { %17608 = vpow2.f32 %v2656_v50 }
 0x459   :  { %v19786_v32 = vpop.eup %17600  ;;  %v2654_v33 = vmul.f32 1.442695, %v2561_v36 }
 0x45a   :  { %v2438_v58 = vpop.xlane.xlu1 %2437  ;;  %v2790_v9 = vsel %vm98_vm0, %v19786_v32, 0.0 }
 0x45b   :  { %17610 = vpow2.f32 %v2654_v33  ;;  %v2564_v38 = vsub.f32 %v19443_v46, %v2438_v58  ;;  %2791 = vadd.xlane.f32.xlu0 %v2790_v9 }
 0x45d   :  { %v19791_v45 = vpop.eup %17602  ;;  %v2660_v4 = vmul.f32 1.442695, %v2564_v38 }
 0x45e   :  { %v2435_v0 = vpop.xlane.xlu1 %2434  ;;  %v2808_v13 = vsel %vm98_vm0, %v19791_v45, 0.0  ;;  %v17605_v31 = vpop.eup %17604 }
 0x45f   :  { %17612 = vpow2.f32 %v2660_v4  ;;  %v2563_v21 = vsub.f32 %v19451_v26, %v2435_v0  ;;  %2809 = vadd.xlane.f32.xlu1 %v2808_v13  ;;  %v2980_v50 = vmul.f32 %v17605_v31, %v19417_v42 }
 0x461   :  { %v19797_v18 = vpop.eup %17606  ;;  %v2658_v1 = vmul.f32 1.442695, %v2563_v21  ;;  %16538 = vmatprep.mubr.msk.f32.mxu1 %vm98_vm0, %v2980_v50 }
 0x462   :  { %v2441_v46 = vpop.xlane.xlu1 %2440  ;;  %v2793_v36 = vsel %vm98_vm0, %v19797_v18, 0.0  ;;  %v19802_v33 = vpop.eup %17608 }
 0x463   :  { %17614 = vpow2.f32 %v2658_v1  ;;  %v2565_v58 = vsub.f32 %v19461_v59, %v2441_v46  ;;  %2794 = vadd.xlane.f32.xlu0 %v2793_v36  ;;  %v2814_v4 = vsel %vm98_vm0, %v19802_v33, 0.0 }
 0x465   :  { %v19805_v9 = vpop.eup %17610  ;;  %v2662_v26 = vmul.f32 1.442695, %v2565_v58 }
 0x466   :  { %v2444_v38 = vpop.xlane.xlu1 %2443  ;;  %v2811_v42 = vsel %vm98_vm0, %v19805_v9, 0.0 }
 0x467   :  { %17616 = vpow2.f32 %v2662_v26  ;;  %v2566_v0 = vsub.f32 %v19470_v54, %v2444_v38  ;;  %2812 = vadd.xlane.f32.xlu1 %v2811_v42  ;;  %2815 = vadd.xlane.f32.xlu0 %v2814_v4 }
 0x469   :  { %v19812_v13 = vpop.eup %17612  ;;  %v2664_v31 = vmul.f32 1.442695, %v2566_v0 }
 0x46a   :  { %v2462_v59 = vpop.xlane.xlu1 %2461  ;;  %v2820_v21 = vsel %vm98_vm0, %v19812_v13, 0.0 }
 0x46b   :  { %17618 = vpow2.f32 %v2664_v31  ;;  %v2572_v50 = vsub.f32 %v19479_v14, %v2462_v59  ;;  %2821 = vadd.xlane.f32.xlu1 %v2820_v21 }
 0x46d   :  { %v19817_v1 = vpop.eup %17614  ;;  %v2676_v46 = vmul.f32 1.442695, %v2572_v50 }
 0x46e   :  { %v2447_v36 = vpop.xlane.xlu1 %2446  ;;  %v2817_v54 = vsel %vm98_vm0, %v19817_v1, 0.0 }
 0x46f   :  { %17620 = vpow2.f32 %v2676_v46  ;;  %v2567_v58 = vsub.f32 %v19488_v40, %v2447_v36  ;;  %2818 = vadd.xlane.f32.xlu0 %v2817_v54 }
 0x471   :  { %v19822_v26 = vpop.eup %17616  ;;  %v2666_v38 = vmul.f32 1.442695, %v2567_v58 }
 0x472   :  { %v2465_v42 = vpop.xlane.xlu1 %2464  ;;  %v2823_v4 = vsel %vm98_vm0, %v19822_v26, 0.0 }
 0x473   :  { %17622 = vpow2.f32 %v2666_v38  ;;  %v2573_v14 = vsub.f32 %v19496_v20, %v2465_v42  ;;  %2824 = vadd.xlane.f32.xlu1 %v2823_v4  ;;  %v23155_v38 = vld [vmem:[#allocation74_spill] sm:$0xff] }
 0x474   :  { %v2570_v42 = vsub.f32 %v23155_v38, %v19686_v8  ;;  %v23157_v38 = vld [vmem:[#allocation75_spill] sm:$0xff] }
 0x475   :  { %v19827_v0 = vpop.eup %17618  ;;  %v2678_v31 = vmul.f32 1.442695, %v2573_v14 }
 0x476   :  { %v2450_v59 = vpop.xlane.xlu1 %2449  ;;  %v2826_v21 = vsel %vm98_vm0, %v19827_v0, 0.0 }
 0x477   :  { %17624 = vpow2.f32 %v2678_v31  ;;  %v2568_v40 = vsub.f32 %v19506_v29, %v2450_v59  ;;  %2827 = vadd.xlane.f32.xlu0 %v2826_v21  ;;  %v2672_v21 = vmul.f32 1.442695, %v2570_v42 }
 0x479   :  { %v19832_v50 = vpop.eup %17620  ;;  %v2668_v46 = vmul.f32 1.442695, %v2568_v40 }
 0x47a   :  { %v2468_v36 = vpop.xlane.xlu1 %2467  ;;  %v2844_v54 = vsel %vm98_vm0, %v19832_v50, 0.0 }
 0x47b   :  { %17626 = vpow2.f32 %v2668_v46  ;;  %v2574_v20 = vsub.f32 %v19516_v57, %v2468_v36  ;;  %2845 = vadd.xlane.f32.xlu1 %v2844_v54  ;;  %v23156_v57 = vld [vmem:[#allocation36_spill] sm:$0xff] }
 0x47c   :  { %v2571_v40 = vsub.f32 %v23156_v57, %v19692_v62 }
 0x47d   :  { %v19837_v58 = vpop.eup %17622  ;;  %v2680_v4 = vmul.f32 1.442695, %v2574_v20 }
 0x47e   :  { %v2453_v14 = vpop.xlane.xlu1 %2452  ;;  %v2829_v29 = vsel %vm98_vm0, %v19837_v58, 0.0 }
 0x47f   :  { %17628 = vpow2.f32 %v2680_v4  ;;  %v2569_v31 = vsub.f32 %v19527_v44, %v2453_v14  ;;  %2830 = vadd.xlane.f32.xlu0 %v2829_v29  ;;  %v2674_v44 = vmul.f32 1.442695, %v2571_v40  ;;  %v2578_v4 = vsub.f32 %v23157_v38, %v19701_v48 }
 0x481   :  { %v19844_v59 = vpop.eup %17624  ;;  %v2670_v46 = vmul.f32 1.442695, %v2569_v31 }
 0x482   :  { %v2471_v36 = vpop.xlane.xlu1 %2470  ;;  %v2847_v8 = vsel %vm98_vm0, %v19844_v59, 0.0 }
 0x483   :  { %17630 = vpow2.f32 %v2670_v46  ;;  %v2575_v54 = vsub.f32 %v19535_v10, %v2471_v36  ;;  %2848 = vadd.xlane.f32.xlu1 %v2847_v8  ;;  %v2688_v10 = vmul.f32 1.442695, %v2578_v4  ;;  %v2582_v8 = vsub.f32 %v19293_v30, %v19715_v35 }
 0x484   :  { %17632 = vpow2.f32 %v2672_v21  ;;  %v2579_v21 = vsub.f32 %v19273_v12, %v19707_v22 }
 0x485   :  { %v19851_v20 = vpop.eup %17626  ;;  %v2682_v42 = vmul.f32 1.442695, %v2575_v54  ;;  %v2696_v4 = vmul.f32 1.442695, %v2582_v8 }
 0x486   :  { %v2474_v14 = vpop.xlane.xlu1 %2473  ;;  %v2832_v62 = vsel %vm98_vm0, %v19851_v20, 0.0 }
 0x487   :  { %17634 = vpow2.f32 %v2682_v42  ;;  %v2576_v29 = vsub.f32 %v19550_v60, %v2474_v14  ;;  %2833 = vadd.xlane.f32.xlu0 %v2832_v62  ;;  %v2690_v60 = vmul.f32 1.442695, %v2579_v21  ;;  %v2583_v42 = vsub.f32 %v19317_v6, %v19724_v34 }
 0x488   :  { %17636 = vpow2.f32 %v2674_v44  ;;  %v2584_v6 = vsub.f32 %v19335_v25, %v19733_v16  ;;  %v2585_v25 = vsub.f32 %v19363_v37, %v19742_v15  ;;  %v2586_v37 = vsub.f32 %v19373_v41, %v19751_v51 }
 0x489   :  { %v19858_v31 = vpop.eup %17628  ;;  %v2684_v57 = vmul.f32 1.442695, %v2576_v29  ;;  %v2698_v21 = vmul.f32 1.442695, %v2583_v42  ;;  %v2587_v51 = vsub.f32 %v19390_v2, %v19760_v55  ;;  %v2594_v2 = vsub.f32 %v19410_v23, %v19769_v63 }
 0x48a   :  { %v2477_v40 = vpop.xlane.xlu1 %2476  ;;  %v2850_v48 = vsel %vm98_vm0, %v19858_v31, 0.0  ;;  %v2700_v8 = vmul.f32 1.442695, %v2584_v6  ;;  %v2702_v42 = vmul.f32 1.442695, %v2585_v25 }
 0x48b   :  { %17638 = vpow2.f32 %v2684_v57  ;;  %v2577_v46 = vsub.f32 %v19564_v56, %v2477_v40  ;;  %2851 = vadd.xlane.f32.xlu1 %v2850_v48  ;;  %v2704_v41 = vmul.f32 1.442695, %v2586_v37  ;;  %v2720_v23 = vmul.f32 1.442695, %v2594_v2 }
 0x48c   :  { %17640 = vpow2.f32 %v2688_v10 }
 0x48d   :  { %v19865_v36 = vpop.eup %17630  ;;  %v2686_v54 = vmul.f32 1.442695, %v2577_v46 }
 0x48e   :  { %v2486_v44 = vpop.xlane.xlu1 %2485  ;;  %v2835_v12 = vsel %vm98_vm0, %v19865_v36, 0.0  ;;  %v19871_v22 = vpop.eup %17632 }
 0x48f   :  { %17642 = vpow2.f32 %v2686_v54  ;;  %v2580_v38 = vsub.f32 %v19584_v53, %v2486_v44  ;;  %2836 = vadd.xlane.f32.xlu0 %v2835_v12  ;;  %v2838_v62 = vsel %vm98_vm0, %v19871_v22, 0.0 }
 0x490   :  { %17644 = vpow2.f32 %v2690_v60 }
 0x491   :  { %v19874_v56 = vpop.eup %17634  ;;  %v2692_v14 = vmul.f32 1.442695, %v2580_v38 }
 0x492   :  { %v2489_v30 = vpop.xlane.xlu1 %2488  ;;  %v2853_v35 = vsel %vm98_vm0, %v19874_v56, 0.0  ;;  %v19882_v29 = vpop.eup %17636 }
 0x493   :  { %17646 = vpow2.f32 %v2692_v14  ;;  %v2581_v53 = vsub.f32 %v19596_v7, %v2489_v30  ;;  %2854 = vadd.xlane.f32.xlu1 %v2853_v35  ;;  %2839 = vadd.xlane.f32.xlu0 %v2838_v62  ;;  %v2841_v48 = vsel %vm98_vm0, %v19882_v29, 0.0 }
 0x494   :  { %17648 = vpow2.f32 %v2696_v4 }
 0x495   :  { %v19885_v10 = vpop.eup %17638  ;;  %v2694_v34 = vmul.f32 1.442695, %v2581_v53  ;;  %v2732_v53 = vpop.xlane.xlu0 %2731 }
 0x496   :  { %v2510_v57 = vpop.xlane.xlu1 %2509  ;;  %v2856_v40 = vsel %vm98_vm0, %v19885_v10, 0.0  ;;  %v19893_v46 = vpop.eup %17640 }
 0x497   :  { %17650 = vpow2.f32 %v2694_v34  ;;  %v2588_v7 = vsub.f32 %v19610_v61, %v2510_v57  ;;  %2857 = vadd.xlane.f32.xlu1 %v2856_v40  ;;  %2842 = vadd.xlane.f32.xlu0 %v2841_v48  ;;  %v2862_v12 = vsel %vm98_vm0, %v19893_v46, 0.0 }
 0x498   :  { %17652 = vpow2.f32 %v2698_v21 }
 0x499   :  { %v19896_v60 = vpop.eup %17642  ;;  %v2708_v16 = vmul.f32 1.442695, %v2588_v7  ;;  %v2738_v25 = vpop.xlane.xlu0 %2737 }
 0x49a   :  { %v2513_v54 = vpop.xlane.xlu1 %2512  ;;  %v2859_v44 = vsel %vm98_vm0, %v19896_v60, 0.0  ;;  %v19904_v38 = vpop.eup %17644 }
 0x49b   :  { %17654 = vpow2.f32 %v2708_v16  ;;  %v2589_v61 = vsub.f32 %v19623_v28, %v2513_v54  ;;  %2860 = vadd.xlane.f32.xlu1 %v2859_v44  ;;  %2863 = vadd.xlane.f32.xlu0 %v2862_v12  ;;  %v2865_v35 = vsel %vm98_vm0, %v19904_v38, 0.0 }
 0x49c   :  { %17656 = vpow2.f32 %v2700_v8  ;;  %v2706_v8 = vmul.f32 1.442695, %v2587_v51 }
 0x49d   :  { %v19907_v4 = vpop.eup %17646  ;;  %v2710_v15 = vmul.f32 1.442695, %v2589_v61 }
 0x49e   :  { %v2516_v14 = vpop.xlane.xlu1 %2515  ;;  %v2868_v30 = vsel %vm98_vm0, %v19907_v4, 0.0  ;;  %v19915_v62 = vpop.eup %17648 }
 0x49f   :  { %17658 = vpow2.f32 %v2710_v15  ;;  %v2590_v28 = vsub.f32 %v19635_v27, %v2516_v14  ;;  %2869 = vadd.xlane.f32.xlu1 %v2868_v30  ;;  %2866 = vadd.xlane.f32.xlu0 %v2865_v35  ;;  %v2874_v40 = vsel %vm98_vm0, %v19915_v62, 0.0 }
 0x4a0   :  { %17660 = vpow2.f32 %v2702_v42 }
 0x4a1   :  { %v19918_v21 = vpop.eup %17650  ;;  %v2712_v6 = vmul.f32 1.442695, %v2590_v28 }
 0x4a2   :  { %v2519_v34 = vpop.xlane.xlu1 %2518  ;;  %v2871_v57 = vsel %vm98_vm0, %v19918_v21, 0.0  ;;  %v19926_v48 = vpop.eup %17652 }
 0x4a3   :  { %17662 = vpow2.f32 %v2712_v6  ;;  %v2591_v27 = vsub.f32 %v19649_v5, %v2519_v34  ;;  %2872 = vadd.xlane.f32.xlu1 %v2871_v57  ;;  %2875 = vadd.xlane.f32.xlu0 %v2874_v40  ;;  %v2877_v44 = vsel %vm98_vm0, %v19926_v48, 0.0 }
 0x4a4   :  { %17664 = vpow2.f32 %v2704_v41 }
 0x4a5   :  { %v19929_v7 = vpop.eup %17654  ;;  %v2714_v55 = vmul.f32 1.442695, %v2591_v27 }
 0x4a6   :  { %v2522_v16 = vpop.xlane.xlu1 %2521  ;;  %v2892_v54 = vsel %vm98_vm0, %v19929_v7, 0.0  ;;  %v19937_v12 = vpop.eup %17656 }
 0x4a7   :  { %17666 = vpow2.f32 %v2714_v55  ;;  %v2592_v5 = vsub.f32 %v19657_v49, %v2522_v16  ;;  %2893 = vadd.xlane.f32.xlu1 %v2892_v54  ;;  %2878 = vadd.xlane.f32.xlu0 %v2877_v44  ;;  %v2880_v15 = vsel %vm98_vm0, %v19937_v12, 0.0  ;;  %v2744_v49 = vpop.xlane.xlu0 %2743 }
 0x4a8   :  { %17668 = vpow2.f32 %v2706_v8 }
 0x4a9   :  { %v19940_v61 = vpop.eup %17658  ;;  %v2716_v63 = vmul.f32 1.442695, %v2592_v5 }
 0x4aa   :  { %v2525_v42 = vpop.xlane.xlu1 %2524  ;;  %v2895_v37 = vsel %vm98_vm0, %v19940_v61, 0.0  ;;  %v19946_v14 = vpop.eup %17660 }
 0x4ab   :  { %17670 = vpow2.f32 %v2716_v63  ;;  %v2593_v30 = vsub.f32 %v19664_v17, %v2525_v42  ;;  %2896 = vadd.xlane.f32.xlu1 %v2895_v37  ;;  %2881 = vadd.xlane.f32.xlu0 %v2880_v15  ;;  %v2883_v6 = vsel %vm98_vm0, %v19946_v14, 0.0  ;;  %v2750_v27 = vpop.xlane.xlu0 %2749 }
 0x4ac   :  { %17672 = vpow2.f32 %v2720_v23 }
 0x4ad   :  { %v19949_v35 = vpop.eup %17662  ;;  %v2718_v28 = vmul.f32 1.442695, %v2593_v30 }
 0x4ae   :  { %v2531_v41 = vpop.xlane.xlu1 %2530  ;;  %v2898_v51 = vsel %vm98_vm0, %v19949_v35, 0.0  ;;  %v19955_v34 = vpop.eup %17664 }
 0x4af   :  { %17674 = vpow2.f32 %v2718_v28  ;;  %v2595_v57 = vsub.f32 %v19671_v43, %v2531_v41  ;;  %2899 = vadd.xlane.f32.xlu1 %v2898_v51  ;;  %2884 = vadd.xlane.f32.xlu0 %v2883_v6  ;;  %v2886_v55 = vsel %vm98_vm0, %v19955_v34, 0.0  ;;  %v2756_v23 = vpop.xlane.xlu0 %2755 }
 0x4b0   :  { %17676 = vrcp.f32 %v2732_v53 }
 0x4b1   :  { %v19958_v17 = vpop.eup %17666  ;;  %v2722_v40 = vmul.f32 1.442695, %v2595_v57 }
 0x4b2   :  { %v2729_v8 = vpop.xlane.xlu1 %2728  ;;  %v2901_v2 = vsel %vm98_vm0, %v19958_v17, 0.0  ;;  %v19964_v16 = vpop.eup %17668 }
 0x4b3   :  { %17678 = vpow2.f32 %v2722_v40  ;;  %2902 = vadd.xlane.f32.xlu1 %v2901_v2  ;;  %2887 = vadd.xlane.f32.xlu0 %v2886_v55  ;;  %v2889_v44 = vsel %vm98_vm0, %v19964_v16, 0.0  ;;  %v2762_v41 = vpop.xlane.xlu0 %2761  ;;  %v23158_v2 = vld [vmem:[#allocation21_spill] sm:$0xff] }
 0x4b4   :  { %17680 = vrcp.f32 %v2729_v8  ;;  %v23159_v55 = vld [vmem:[#allocation53_spill] sm:$0xff] }
 0x4b5   :  { %v19966_v43 = vpop.eup %17670  ;;  %17682 = vrcp.f32 %v2738_v25 }
 0x4b6   :  { %v2735_v54 = vpop.xlane.xlu1 %2734  ;;  %v2904_v53 = vsel %vm98_vm0, %v19966_v43, 0.0  ;;  %v19972_v5 = vpop.eup %17672 }
 0x4b7   :  { %17684 = vrcp.f32 %v2735_v54  ;;  %2905 = vadd.xlane.f32.xlu1 %v2904_v53  ;;  %2890 = vadd.xlane.f32.xlu0 %v2889_v44  ;;  %v2910_v37 = vsel %vm98_vm0, %v19972_v5, 0.0  ;;  %v23160_v53 = vld [vmem:[#allocation32_spill] sm:$0xff]  ;;  %v2768_v44 = vpop.xlane.xlu0 %2767 }
 0x4b8   :  { %17686 = vrcp.f32 %v2744_v49 }
 0x4b9   :  { %v19974_v63 = vpop.eup %17674 }
 0x4ba   :  { %v2741_v42 = vpop.xlane.xlu1 %2740  ;;  %v2907_v25 = vsel %vm98_vm0, %v19974_v63, 0.0  ;;  %v17677_v15 = vpop.eup %17676 }
 0x4bb   :  { %17688 = vrcp.f32 %v2741_v42  ;;  %2908 = vadd.xlane.f32.xlu1 %v2907_v25  ;;  %2911 = vadd.xlane.f32.xlu0 %v2910_v37  ;;  %v2982_v40 = vmul.f32 %v17677_v15, %v19541_v11  ;;  %v23161_v42 = vld [vmem:[#allocation41_spill] sm:$0xff] }
 0x4bc   :  { %17690 = vrcp.f32 %v2750_v27 }
 0x4bd   :  { %v19980_v30 = vpop.eup %17678 }
 0x4be   :  { %v17681_v28 = vpop.eup %17680  ;;  %v2747_v51 = vpop.xlane.xlu1 %2746  ;;  %v2913_v49 = vsel %vm98_vm0, %v19980_v30, 0.0 }
 0x4bf   :  { %v2981_v6 = vmul.f32 %v17681_v28, %v19676_v3  ;;  %17692 = vrcp.f32 %v2747_v51  ;;  %2914 = vadd.xlane.f32.xlu1 %v2913_v49  ;;  %v17683_v57 = vpop.eup %17682  ;;  %v23162_v28 = vld [vmem:[#allocation49_spill] sm:$0xff] }
 0x4c0   :  { %17694 = vrcp.f32 %v2756_v23  ;;  %v2984_v25 = vmul.f32 %v17683_v57, %v23161_v42  ;;  %v23165_v42 = vld [vmem:[#allocation12_spill] sm:$0xff] }
 0x4c1   :  { %v17685_v8 = vpop.eup %17684  ;;  %16539 = vmatmul.mubr.msk.f32.vlgmr.msra.gmra.mrb[8].mxu1 %vm98_vm0, %v2981_v6  ;;  %v2771_v6 = vpop.xlane.xlu0 %2770 }
 0x4c2   :  { %17433 = vmatpush3.bf16.msra.mxu1 %v23158_v2  ;;  %16541 = vmatprep.mubr.msk.f32.mxu1 %vm98_vm0, %v2982_v40  ;;  %v2753_v27 = vpop.xlane.xlu1 %2752  ;;  %v2983_v54 = vmul.f32 %v17685_v8, %v23159_v55  ;;  %v17687_v3 = vpop.eup %17686  ;;  %v23163_v40 = vld [vmem:[#allocation72_spill] sm:$0xff] }
 0x4c3   :  { %17439 = vmatprep.subr.bf16.mxu1 %v23160_v53  ;;  %17696 = vrcp.f32 %v2753_v27  ;;  %v2986_v51 = vmul.f32 %v17687_v3, %v23162_v28  ;;  %v23164_v2 = vld [vmem:[#allocation44_spill] sm:$0xff]  ;;  %v23168_v28 = vld [vmem:[#allocation58_spill] sm:$0xff] }
 0x4c4   :  { %17698 = vrcp.f32 %v2762_v41 }
 0x4c5   :  { %v17689_v37 = vpop.eup %17688  ;;  %16542 = vmatmul.mubr.msk.f32.gmra.mrb[10].mxu1 %vm98_vm0, %v2983_v54 }
 0x4c6   :  { %16544 = vmatprep.mubr.msk.f32.mxu1 %vm98_vm0, %v2984_v25  ;;  %v2759_v11 = vpop.xlane.xlu1 %2758  ;;  %v2985_v23 = vmul.f32 %v17689_v37, %v19690_v52  ;;  %v17691_v15 = vpop.eup %17690  ;;  %v23166_v25 = vld [vmem:[#allocation48_spill] sm:$0xff] }
 0x4c7   :  { %17700 = vrcp.f32 %v2759_v11  ;;  %v2988_v27 = vmul.f32 %v17691_v15, %v23164_v2 }
 0x4c8   :  { %17702 = vrcp.f32 %v2768_v44  ;;  %v2780_v54 = vpop.xlane.xlu0 %2779 }
 0x4c9   :  { %v17693_v49 = vpop.eup %17692  ;;  %16545 = vmatmul.mubr.msk.f32.gmra.mrb[12].mxu1 %vm98_vm0, %v2985_v23  ;;  %v23167_v23 = vld [vmem:[#allocation14_spill] sm:$0xff] }
 0x4ca   :  { %16547 = vmatprep.mubr.msk.f32.mxu1 %vm98_vm0, %v2986_v51  ;;  %v2765_v57 = vpop.xlane.xlu1 %2764  ;;  %v2987_v8 = vmul.f32 %v17693_v49, %v23163_v40  ;;  %v17695_v41 = vpop.eup %17694  ;;  %v23169_v49 = vld [vmem:[#allocation22_spill] sm:$0xff]  ;;  %v23171_v40 = vld [vmem:[#allocation39_spill] sm:$0xff] }
 0x4cb   :  { %17704 = vrcp.f32 %v2765_v57  ;;  %v2990_v37 = vmul.f32 %v17695_v41, %v23166_v25  ;;  %v23170_v57 = vld [vmem:[#allocation19_spill] sm:$0xff] }
 0x4cc   :  { %17706 = vrcp.f32 %v2771_v6  ;;  %v23175_v25 = vld [vmem:[#allocation23_spill] sm:$0xff] }
 0x4cd   :  { %v17697_v55 = vpop.eup %17696  ;;  %16548 = vmatmul.mubr.msk.f32.gmra.mrb[14].mxu1 %vm98_vm0, %v2987_v8 }
 0x4ce   :  { %v2989_v52 = vmul.f32 %v17697_v55, %v19705_v19  ;;  %16554 = vmatprep.mubr.msk.f32.mxu1 %vm98_vm0, %v2988_v27  ;;  %v2774_v3 = vpop.xlane.xlu1 %2773  ;;  %v17699_v44 = vpop.eup %17698 }
 0x4cf   :  { %17708 = vrcp.f32 %v2774_v3  ;;  %v2992_v8 = vmul.f32 %v17699_v44, %v23171_v40  ;;  %v23174_v3 = vld [vmem:[#allocation50_spill] sm:$0xff] }
 0x4d0   :  { %4407 = vrot.lane.b32.xlu1 %v23165_v42, %s18199_s1  ;;  %17710 = vrcp.f32 %v2780_v54  ;;  %v2783_v19 = vpop.xlane.xlu0 %2782 }
 0x4d1   :  { %v17701_v11 = vpop.eup %17700  ;;  %16555 = vmatmul.mubr.msk.f32.vlgmr.msra.gmra.mrb[16].mxu1 %vm98_vm0, %v2989_v52  ;;  %4405 = vrot.lane.b32.xlu0 %v23167_v23, %s18199_s1  ;;  %v23173_v52 = vld [vmem:[#allocation25_spill] sm:$0xff]  ;;  %v23177_v23 = vld [vmem:[#allocation40_spill] sm:$0xff] }
 0x4d2   :  { %17441 = vmatpush3.bf16.msra.mxu1 %v23160_v53  ;;  %16557 = vmatprep.mubr.msk.f32.mxu1 %vm98_vm0, %v2990_v37  ;;  %v2777_v15 = vpop.xlane.xlu1 %2776  ;;  %v2991_v51 = vmul.f32 %v17701_v11, %v23168_v28  ;;  %v17703_v6 = vpop.eup %17702  ;;  %v23172_v53 = vld [vmem:[#allocation17_spill] sm:$0xff]  ;;  %v23176_v11 = vld [vmem:[#allocation55_spill] sm:$0xff]  ;;  %v23178_v28 = vld [vmem:[#allocation30_spill] sm:$0xff] }
 0x4d3   :  { %17447 = vmatprep.subr.bf16.mxu1 %v23169_v49  ;;  %17712 = vrcp.f32 %v2777_v15  ;;  %v2994_v44 = vmul.f32 %v17703_v6, %v23174_v3  ;;  %v23179_v6 = vld [vmem:[#allocation28_spill] sm:$0xff]  ;;  %v23184_v3 = vld [vmem:[#allocation13_spill] sm:$0xff] }
 0x4d4   :  { %4409 = vrot.lane.b32.xlu1 %v23170_v57, %s18199_s1  ;;  %17714 = vrcp.f32 %v2783_v19  ;;  %v23180_v57 = vld [vmem:[#allocation59_spill] sm:$0xff] }
 0x4d5   :  { %v17705_v41 = vpop.eup %17704  ;;  %16558 = vmatmul.mubr.msk.f32.gmra.mrb[18].mxu1 %vm98_vm0, %v2991_v51  ;;  %4411 = vrot.lane.b32.xlu0 %v23172_v53, %s18199_s1  ;;  %v23181_v53 = vld [vmem:[#allocation15_spill] sm:$0xff] }
 0x4d6   :  { %16560 = vmatprep.mubr.msk.f32.mxu1 %vm98_vm0, %v2992_v8  ;;  %v2798_v2 = vpop.xlane.xlu1 %2797  ;;  %v2993_v27 = vmul.f32 %v17705_v41, %v19718_v47  ;;  %v17707_v55 = vpop.eup %17706 }
 0x4d7   :  { %17716 = vrcp.f32 %v2798_v2  ;;  %v2995_v19 = vmul.f32 %v17707_v55, %v23177_v23  ;;  %v23188_v23 = vld [vmem:[#allocation20_spill] sm:$0xff] }
 0x4d8   :  { %4413 = vrot.lane.b32.xlu1 %v23173_v52, %s18199_s1  ;;  %v2786_v54 = vpop.xlane.xlu0 %2785 }
 0x4d9   :  { %v17709_v42 = vpop.eup %17708  ;;  %16561 = vmatmul.mubr.msk.f32.gmra.mrb[20].mxu1 %vm98_vm0, %v2993_v27  ;;  %17718 = vrcp.f32 %v2786_v54  ;;  %4415 = vrot.lane.b32.xlu0 %v23175_v25, %s18199_s1  ;;  %v23182_v27 = vld [vmem:[#allocation54_spill] sm:$0xff]  ;;  %v23183_v54 = vld [vmem:[#allocation16_spill] sm:$0xff] }
 0x4da   :  { %16563 = vmatprep.mubr.msk.f32.mxu1 %vm98_vm0, %v2994_v44  ;;  %v2801_v37 = vpop.xlane.xlu1 %2800  ;;  %v2996_v47 = vmul.f32 %v17709_v42, %v23176_v11  ;;  %v17711_v15 = vpop.eup %17710  ;;  %v23185_v44 = vld [vmem:[#allocation27_spill] sm:$0xff]  ;;  %v23186_v42 = vld [vmem:[#allocation60_spill] sm:$0xff] }
 0x4db   :  { %17720 = vrcp.f32 %v2801_v37  ;;  %v2998_v55 = vmul.f32 %v17711_v15, %v23182_v27  ;;  %v23187_v37 = vld [vmem:[#allocation56_spill] sm:$0xff]  ;;  %v23189_v15 = vld [vmem:[#allocation57_spill] sm:$0xff] }
 0x4dc   :  { %16570 = vmatprep.mubr.msk.f32.mxu0 %vm98_vm0, %v2996_v47  ;;  %4417 = vrot.lane.b32.xlu1 %v23178_v28, %s18199_s1  ;;  %v23194_v27 = vld [vmem:[#allocation33_spill] sm:$0xff] }
 0x4dd   :  { %v17713_v51 = vpop.eup %17712  ;;  %16564 = vmatmul.mubr.msk.f32.gmra.mrb[22].mxu1 %vm98_vm0, %v2995_v19  ;;  %4419 = vrot.lane.b32.xlu0 %v23179_v6, %s18199_s1  ;;  %v23190_v6 = vld [vmem:[#allocation18_spill] sm:$0xff] }
 0x4de   :  { %v2997_v40 = vmul.f32 %v17713_v51, %v23180_v57  ;;  %v2804_v8 = vpop.xlane.xlu1 %2803  ;;  %v17715_v41 = vpop.eup %17714  ;;  %v23191_v57 = vld [vmem:[#allocation61_spill] sm:$0xff] }
 0x4df   :  { %17722 = vrcp.f32 %v2804_v8  ;;  %v2999_v25 = vmul.f32 %v17715_v41, %v23186_v42  ;;  %v23192_v8 = vld [vmem:[#allocation26_spill] sm:$0xff] }
 0x4e0   :  { %4421 = vrot.lane.b32.xlu1 %v23181_v53, %s18199_s1  ;;  %16571 = vmatmul.mubr.msk.f32.vlgmr.msra.gmra.mrb[8].mxu0 %vm98_vm0, %v2997_v40  ;;  %v2789_v2 = vpop.xlane.xlu0 %2788 }
 0x4e1   :  { %v17717_v52 = vpop.eup %17716  ;;  %17445 = vmatpush3.bf16.msra.mxu0 %v23183_v54  ;;  %17724 = vrcp.f32 %v2789_v2  ;;  %4423 = vrot.lane.b32.xlu0 %v23184_v3, %s18199_s1  ;;  %v23193_v2 = vld [vmem:[#allocation24_spill] sm:$0xff]  ;;  %v23196_v3 = vld [vmem:[#allocation31_spill] sm:$0xff] }
 0x4e2   :  { %17451 = vmatprep.subr.bf16.mxu0 %v23185_v44  ;;  %16573 = vmatprep.mubr.msk.f32.mxu0 %vm98_vm0, %v2998_v55  ;;  %v3004_v11 = vmul.f32 %v17717_v52, %v23187_v37  ;;  %v23195_v55 = vld [vmem:[#allocation62_spill] sm:$0xff]  ;;  %v23197_v37 = vld [vmem:[#allocation29_spill] sm:$0xff] }
 0x4e3   :  { %v17719_v47 = vpop.eup %17718 }
 0x4e4   :  { %4425 = vrot.lane.b32.xlu1 %v23188_v23, %s18199_s1  ;;  %v2807_v19 = vpop.xlane.xlu1 %2806  ;;  %16574 = vmatmul.mubr.msk.f32.gmra.mrb[10].mxu0 %vm98_vm0, %v2999_v25  ;;  %v3000_v28 = vmul.f32 %v17719_v47, %v23189_v15 }
 0x4e5   :  { %v17721_v51 = vpop.eup %17720  ;;  %17726 = vrcp.f32 %v2807_v19  ;;  %16586 = vmatprep.mubr.msk.f32.mxu1 %vm98_vm0, %v3004_v11  ;;  %4427 = vrot.lane.b32.xlu0 %v23190_v6, %s18199_s1 }
 0x4e6   :  { %v3005_v40 = vmul.f32 %v17721_v51, %v23191_v57  ;;  %16576 = vmatprep.mubr.msk.f32.mxu0 %vm98_vm0, %v3000_v28 }
 0x4e8   :  { %4429 = vrot.lane.b32.xlu1 %v23192_v8, %s18199_s1  ;;  %v2792_v41 = vpop.xlane.xlu0 %2791  ;;  %16587 = vmatmul.mubr.msk.f32.vlgmr.msra.gmra.mrb[24].mxu1 %vm98_vm0, %v3005_v40 }
 0x4e9   :  { %v17723_v53 = vpop.eup %17722  ;;  %17728 = vrcp.f32 %v2792_v41  ;;  %17449 = vmatpush3.bf16.msra.mxu1 %v23169_v49  ;;  %4431 = vrot.lane.b32.xlu0 %v23193_v2, %s18199_s1 }
 0x4ea   :  { %17455 = vmatprep.subr.bf16.mxu1 %v23194_v27  ;;  %v3006_v52 = vmul.f32 %v17723_v53, %v23195_v55 }
 0x4eb   :  { %v17725_v54 = vpop.eup %17724 }
 0x4ec   :  { %4433 = vrot.lane.b32.xlu1 %v23196_v3, %s18199_s1  ;;  %v2810_v42 = vpop.xlane.xlu1 %2809  ;;  %16589 = vmatprep.mubr.msk.f32.mxu1 %vm98_vm0, %v3006_v52  ;;  %v3001_v25 = vmul.f32 %v17725_v54, %v19774_v24 }
 0x4ed   :  { %17730 = vrcp.f32 %v2810_v42  ;;  %4435 = vrot.lane.b32.xlu0 %v23197_v37, %s18199_s1 }
 0x4ee   :  { %16577 = vmatmul.mubr.msk.f32.gmra.mrb[12].mxu0 %vm98_vm0, %v3001_v25 }
 0x4ef   :  { %v17727_v49 = vpop.eup %17726 }
 0x4f0   :  { %v2795_v11 = vpop.xlane.xlu0 %2794  ;;  %v3007_v47 = vmul.f32 %v17727_v49, %v19781_v39 }
 0x4f1   :  { %17732 = vrcp.f32 %v2795_v11 }
 0x4f2   :  { %16590 = vmatmul.mubr.msk.f32.gmra.mrb[26].mxu1 %vm98_vm0, %v3007_v47 }
 0x4f3   :  { %v17729_v23 = vpop.eup %17728 }
 0x4f4   :  { %v2813_v19 = vpop.xlane.xlu1 %2812  ;;  %v2816_v15 = vpop.xlane.xlu0 %2815  ;;  %v3002_v28 = vmul.f32 %v17729_v23, %v19786_v32 }
 0x4f5   :  { %17734 = vrcp.f32 %v2813_v19 }
 0x4f6   :  { %17736 = vrcp.f32 %v2816_v15  ;;  %16579 = vmatprep.mubr.msk.f32.mxu0 %vm98_vm0, %v3002_v28 }
 0x4f7   :  { %v17731_v24 = vpop.eup %17730 }
 0x4f8   :  { %v2822_v51 = vpop.xlane.xlu1 %2821  ;;  %v3008_v6 = vmul.f32 %v17731_v24, %v19791_v45 }
 0x4f9   :  { %17738 = vrcp.f32 %v2822_v51 }
 0x4fa   :  { %16592 = vmatprep.mubr.msk.f32.mxu1 %vm98_vm0, %v3008_v6 }
 0x4fb   :  { %v17733_v39 = vpop.eup %17732 }
 0x4fc   :  { %v2819_v57 = vpop.xlane.xlu0 %2818  ;;  %v3003_v40 = vmul.f32 %v17733_v39, %v19797_v18 }
 0x4fd   :  { %17740 = vrcp.f32 %v2819_v57 }
 0x4fe   :  { %16580 = vmatmul.mubr.msk.f32.gmra.mrb[14].mxu0 %vm98_vm0, %v3003_v40 }
 0x4ff   :  { %v17735_v8 = vpop.eup %17734 }
 0x500   :  { %v17737_v32 = vpop.eup %17736  ;;  %v2825_v41 = vpop.xlane.xlu1 %2824  ;;  %v3009_v53 = vmul.f32 %v17735_v8, %v19805_v9 }
 0x501   :  { %17742 = vrcp.f32 %v2825_v41  ;;  %v3010_v2 = vmul.f32 %v17737_v32, %v19802_v33 }
 0x502   :  { %16593 = vmatmul.mubr.msk.f32.gmra.mrb[28].mxu1 %vm98_vm0, %v3009_v53 }
 0x503   :  { %v17739_v45 = vpop.eup %17738  ;;  %16595 = vmatprep.mubr.msk.f32.mxu1 %vm98_vm0, %v3010_v2 }
 0x504   :  { %v2828_v55 = vpop.xlane.xlu0 %2827  ;;  %v3012_v52 = vmul.f32 %v17739_v45, %v19812_v13 }
 0x505   :  { %17744 = vrcp.f32 %v2828_v55 }
 0x506   :  { %16602 = vmatprep.mubr.msk.f32.mxu0 %vm98_vm0, %v3012_v52 }
 0x507   :  { %v17741_v18 = vpop.eup %17740 }
 0x508   :  { %v2846_v54 = vpop.xlane.xlu1 %2845  ;;  %v3011_v3 = vmul.f32 %v17741_v18, %v19817_v1 }
 0x509   :  { %17746 = vrcp.f32 %v2846_v54 }
 0x50a   :  { %16596 = vmatmul.mubr.msk.f32.gmra.mrb[30].mxu1 %vm98_vm0, %v3011_v3 }
 0x50b   :  { %v17743_v9 = vpop.eup %17742 }
 0x50c   :  { %v3013_v33 = vmul.f32 %v17743_v9, %v19822_v26  ;;  %v2831_v42 = vpop.xlane.xlu0 %2830 }
 0x50d   :  { %17748 = vrcp.f32 %v2831_v42 }
 0x50e   :  { %16603 = vmatmul.mubr.msk.f32.vlgmr.msra.gmra.mrb[16].mxu0 %vm98_vm0, %v3013_v33 }
 0x50f   :  { %v17745_v25 = vpop.eup %17744  ;;  %17453 = vmatpush3.bf16.msra.mxu0 %v23185_v44 }
 0x510   :  { %v2849_v13 = vpop.xlane.xlu1 %2848  ;;  %v3014_v37 = vmul.f32 %v17745_v25, %v19827_v0 }
 0x511   :  { %17750 = vrcp.f32 %v2849_v13 }
 0x512   :  { %16605 = vmatprep.mubr.msk.f32.mxu0 %vm98_vm0, %v3014_v37 }
 0x513   :  { %v17747_v1 = vpop.eup %17746 }
 0x514   :  { %v2834_v49 = vpop.xlane.xlu0 %2833  ;;  %v3020_v11 = vmul.f32 %v17747_v1, %v19832_v50 }
 0x515   :  { %17752 = vrcp.f32 %v2834_v49 }
 0x516   :  { %16618 = vmatprep.mubr.msk.f32.mxu1 %vm98_vm0, %v3020_v11 }
 0x517   :  { %v17749_v26 = vpop.eup %17748 }
 0x518   :  { %v2852_v47 = vpop.xlane.xlu1 %2851  ;;  %v3015_v23 = vmul.f32 %v17749_v26, %v19837_v58 }
 0x519   :  { %17754 = vrcp.f32 %v2852_v47 }
 0x51a   :  { %16606 = vmatmul.mubr.msk.f32.gmra.mrb[18].mxu0 %vm98_vm0, %v3015_v23 }
 0x51b   :  { %v17751_v44 = vpop.eup %17750 }
 0x51c   :  { %v3021_v0 = vmul.f32 %v17751_v44, %v19844_v59  ;;  %v2837_v19 = vpop.xlane.xlu0 %2836 }
 0x51d   :  { %17756 = vrcp.f32 %v2837_v19 }
 0x51e   :  { %16619 = vmatmul.mubr.msk.f32.vlgmr.msra.gmra.mrb[32].mxu1 %vm98_vm0, %v3021_v0 }
 0x51f   :  { %v17753_v15 = vpop.eup %17752  ;;  %17457 = vmatpush3.bf16.msra.mxu1 %v23194_v27 }
 0x520   :  { %v2855_v50 = vpop.xlane.xlu1 %2854  ;;  %v2840_v28 = vpop.xlane.xlu0 %2839  ;;  %v3016_v24 = vmul.f32 %v17753_v15, %v19851_v20 }
 0x521   :  { %17758 = vrcp.f32 %v2855_v50 }
 0x522   :  { %17760 = vrcp.f32 %v2840_v28  ;;  %16608 = vmatprep.mubr.msk.f32.mxu0 %vm98_vm0, %v3016_v24 }
 0x523   :  { %v17755_v58 = vpop.eup %17754 }
 0x524   :  { %v2858_v51 = vpop.xlane.xlu1 %2857  ;;  %v2843_v6 = vpop.xlane.xlu0 %2842  ;;  %v3022_v59 = vmul.f32 %v17755_v58, %v19858_v31 }
 0x525   :  { %17762 = vrcp.f32 %v2858_v51 }
 0x526   :  { %17764 = vrcp.f32 %v2843_v6  ;;  %16621 = vmatprep.mubr.msk.f32.mxu1 %vm98_vm0, %v3022_v59 }
 0x527   :  { %v17757_v39 = vpop.eup %17756 }
 0x528   :  { %v2861_v57 = vpop.xlane.xlu1 %2860  ;;  %v2864_v27 = vpop.xlane.xlu0 %2863  ;;  %v3017_v40 = vmul.f32 %v17757_v39, %v19865_v36 }
 0x529   :  { %17766 = vrcp.f32 %v2861_v57 }
 0x52a   :  { %17768 = vrcp.f32 %v2864_v27  ;;  %16609 = vmatmul.mubr.msk.f32.gmra.mrb[20].mxu0 %vm98_vm0, %v3017_v40 }
 0x52b   :  { %v17759_v20 = vpop.eup %17758 }
 0x52c   :  { %v17761_v8 = vpop.eup %17760  ;;  %v2870_v32 = vpop.xlane.xlu1 %2869  ;;  %v3023_v53 = vmul.f32 %v17759_v20, %v19874_v56 }
 0x52d   :  { %v2867_v41 = vpop.xlane.xlu0 %2866  ;;  %17770 = vrcp.f32 %v2870_v32  ;;  %v3018_v31 = vmul.f32 %v17761_v8, %v19871_v22 }
 0x52e   :  { %17772 = vrcp.f32 %v2867_v41  ;;  %16622 = vmatmul.mubr.msk.f32.gmra.mrb[34].mxu1 %vm98_vm0, %v3023_v53  ;;  %v23199_v53 = vlaneseq }
 0x52f   :  { %v17763_v2 = vpop.eup %17762  ;;  %16611 = vmatprep.mubr.msk.f32.mxu0 %vm98_vm0, %v3018_v31 }
 0x530   :  { %v17765_v36 = vpop.eup %17764  ;;  %v2873_v45 = vpop.xlane.xlu1 %2872  ;;  %v3024_v52 = vmul.f32 %v17763_v2, %v19885_v10  ;;  %v20154_v31 = vand.u32 127, %v23199_v53 }
 0x531   :  { %v2876_v55 = vpop.xlane.xlu0 %2875  ;;  %17774 = vrcp.f32 %v2873_v45  ;;  %v3019_v18 = vmul.f32 %v17765_v36, %v19882_v29  ;;  %v18200_v36 = vmov 1966171168  }
 0x532   :  { %17776 = vrcp.f32 %v2876_v55  ;;  %16624 = vmatprep.mubr.msk.f32.mxu1 %vm98_vm0, %v3024_v52  ;;  %v4089_v45 = vunpack.c.l.s4 %v18200_v36  ;;  %v22938_v55 = vmov 0.0  }
 0x533   :  { %v17767_v56 = vpop.eup %17766  ;;  %16612 = vmatmul.mubr.msk.f32.gmra.mrb[22].mxu0 %vm98_vm0, %v3019_v18 }
 0x534   :  { %v17769_v22 = vpop.eup %17768  ;;  %v2894_v54 = vpop.xlane.xlu1 %2893  ;;  %v3025_v9 = vmul.f32 %v17767_v56, %v19896_v60 }
 0x535   :  { %v2879_v3 = vpop.xlane.xlu0 %2878  ;;  %17778 = vrcp.f32 %v2894_v54  ;;  %v3026_v33 = vmul.f32 %v17769_v22, %v19893_v46  ;;  %v23200_v54 = vld [vmem:[#allocation38_spill] sm:$0xff] }
 0x536   :  { %17780 = vrcp.f32 %v2879_v3  ;;  %16625 = vmatmul.mubr.msk.f32.gmra.mrb[36].mxu1 %vm98_vm0, %v3025_v9 }
 0x537   :  { %v17771_v10 = vpop.eup %17770  ;;  %16627 = vmatprep.mubr.msk.f32.mxu1 %vm98_vm0, %v3026_v33 }
 0x538   :  { %v17773_v29 = vpop.eup %17772  ;;  %v2897_v42 = vpop.xlane.xlu1 %2896  ;;  %v3028_v13 = vmul.f32 %v17771_v10, %v19907_v4 }
 0x539   :  { %v2882_v25 = vpop.xlane.xlu0 %2881  ;;  %17782 = vrcp.f32 %v2897_v42  ;;  %v3027_v37 = vmul.f32 %v17773_v29, %v19904_v38 }
 0x53a   :  { %17784 = vrcp.f32 %v2882_v25  ;;  %16634 = vmatprep.mubr.msk.f32.mxu0 %vm98_vm0, %v3028_v13 }
 0x53b   :  { %v17775_v60 = vpop.eup %17774  ;;  %16628 = vmatmul.mubr.msk.f32.gmra.mrb[38].mxu1 %vm98_vm0, %v3027_v37 }
 0x53c   :  { %v17777_v46 = vpop.eup %17776  ;;  %v3029_v1 = vmul.f32 %v17775_v60, %v19918_v21  ;;  %v2900_v49 = vpop.xlane.xlu1 %2899 }
 0x53d   :  { %v2885_v11 = vpop.xlane.xlu0 %2884  ;;  %17786 = vrcp.f32 %v2900_v49  ;;  %v3030_v26 = vmul.f32 %v17777_v46, %v19915_v62 }
 0x53e   :  { %17788 = vrcp.f32 %v2885_v11  ;;  %16635 = vmatmul.mubr.msk.f32.vlgmr.msra.gmra.mrb[24].mxu0 %vm98_vm0, %v3029_v1 }
 0x53f   :  { %v17779_v4 = vpop.eup %17778  ;;  %16637 = vmatprep.mubr.msk.f32.mxu0 %vm98_vm0, %v3030_v26 }
 0x540   :  { %v17781_v38 = vpop.eup %17780  ;;  %v2903_v47 = vpop.xlane.xlu1 %2902  ;;  %v3036_v44 = vmul.f32 %v17779_v4, %v19929_v7 }
 0x541   :  { %v2888_v23 = vpop.xlane.xlu0 %2887  ;;  %17790 = vrcp.f32 %v2903_v47  ;;  %v3031_v0 = vmul.f32 %v17781_v38, %v19926_v48 }
 0x542   :  { %17792 = vrcp.f32 %v2888_v23  ;;  %16650 = vmatprep.mubr.msk.f32.mxu1 %vm98_vm0, %v3036_v44 }
 0x543   :  { %v17783_v21 = vpop.eup %17782  ;;  %16638 = vmatmul.mubr.msk.f32.gmra.mrb[26].mxu0 %vm98_vm0, %v3031_v0 }
 0x544   :  { %v17785_v62 = vpop.eup %17784  ;;  %v3037_v19 = vmul.f32 %v17783_v21, %v19940_v61  ;;  %v2906_v15 = vpop.xlane.xlu1 %2905 }
 0x545   :  { %v2891_v50 = vpop.xlane.xlu0 %2890  ;;  %17794 = vrcp.f32 %v2906_v15  ;;  %v3032_v28 = vmul.f32 %v17785_v62, %v19937_v12 }
 0x546   :  { %17796 = vrcp.f32 %v2891_v50  ;;  %16651 = vmatmul.mubr.msk.f32.vlgmr.msra.gmra.mrb[40].mxu1 %vm98_vm0, %v3037_v19 }
 0x547   :  { %v17787_v7 = vpop.eup %17786  ;;  %16640 = vmatprep.mubr.msk.f32.mxu0 %vm98_vm0, %v3032_v28 }
 0x548   :  { %v17789_v48 = vpop.eup %17788  ;;  %v2909_v24 = vpop.xlane.xlu1 %2908  ;;  %v3038_v51 = vmul.f32 %v17787_v7, %v19949_v35 }
 0x549   :  { %v2912_v58 = vpop.xlane.xlu0 %2911  ;;  %17798 = vrcp.f32 %v2909_v24  ;;  %v3033_v6 = vmul.f32 %v17789_v48, %v19946_v14 }
 0x54a   :  { %17800 = vrcp.f32 %v2912_v58  ;;  %16653 = vmatprep.mubr.msk.f32.mxu1 %vm98_vm0, %v3038_v51 }
 0x54b   :  { %v17791_v61 = vpop.eup %17790  ;;  %16641 = vmatmul.mubr.msk.f32.gmra.mrb[28].mxu0 %vm98_vm0, %v3033_v6 }
 0x54c   :  { %v17793_v12 = vpop.eup %17792  ;;  %v2915_v59 = vpop.xlane.xlu1 %2914  ;;  %v3039_v39 = vmul.f32 %v17791_v61, %v19958_v17 }
 0x54d   :  { %17802 = vrcp.f32 %v2915_v59  ;;  %v3034_v57 = vmul.f32 %v17793_v12, %v19955_v34 }
 0x54e   :  { %16654 = vmatmul.mubr.msk.f32.gmra.mrb[42].mxu1 %vm98_vm0, %v3039_v39 }
 0x54f   :  { %v17795_v27 = vpop.eup %17794  ;;  %16643 = vmatprep.mubr.msk.f32.mxu0 %vm98_vm0, %v3034_v57 }
 0x550   :  { %v17797_v35 = vpop.eup %17796  ;;  %v3040_v14 = vmul.f32 %v17795_v27, %v19966_v43 }
 0x551   :  { %v3035_v40 = vmul.f32 %v17797_v35, %v19964_v16  ;;  %v23198_v16 = vld [vmem:[#allocation37_spill] sm:$0xff] }
 0x552   :  { %16656 = vmatprep.mubr.msk.f32.mxu1 %vm98_vm0, %v3040_v14  ;;  %v4080_v43 = vmul.u32 8, %v23198_v16 }
 0x553   :  { %v17799_v20 = vpop.eup %17798  ;;  %16644 = vmatmul.mubr.msk.f32.gmra.mrb[30].mxu0 %vm98_vm0, %v3035_v40 }
 0x554   :  { %v17801_v8 = vpop.eup %17800  ;;  %v3041_v17 = vmul.f32 %v17799_v20, %v19974_v63  ;;  %v4082_v2 = vadd.s32 8, %v4080_v43  ;;  %vm4081_vm8 = vcmp.ge.s32.totalorder %v20154_v31, %v4080_v43 }
 0x555   :  { %v3042_v34 = vmul.f32 %v17801_v8, %v19972_v5  ;;  %v4090_v5 = vunpack.c.0.s8 %v4089_v45 }
 0x556   :  { %16657 = vmatmul.mubr.msk.f32.gmra.mrb[44].mxu1 %vm98_vm0, %v3041_v17  ;;  %vm4083_vm3 = vcmp.lt.s32.totalorder %v20154_v31, %v4082_v2 }
 0x557   :  { %v17803_v32 = vpop.eup %17802  ;;  %16659 = vmatprep.mubr.msk.f32.mxu1 %vm98_vm0, %v3042_v34  ;;  %vm4084_vm10 = vmand %vm4081_vm8, %vm4083_vm3  ;;  %v4093_v63 = vsub.s32 %v4090_v5, %v23198_v16 }
 0x558   :  { %v3043_v41 = vmul.f32 %v17803_v32, %v19980_v30  ;;  %v15806_v30 = vsel %vm4084_vm10, 1.0, %v22938_v55 }
 0x559   :  { %v4094_v52 = vrot.slane %v15806_v30, %v4093_v63 }
 0x55a   :  { %16660 = vmatmul.mubr.msk.f32.gmra.mrb[46].mxu1 %vm98_vm0, %v3043_v41  ;;  %vm4196_vm0 = vcmask 261120  }
 0x55b   :  { %v4095_v18 = vcombine.high %v4094_v52, %v4094_v52  ;;  %v4102_v56 = vrot.slane %v4094_v52, %v4093_v63 }
 0x55d   :  { %v4109_v22 = vrot.slane %v4095_v18, %v4093_v63  ;;  %v20161_v3 = vrot.slane %v4102_v56, %v23200_v54  ;;  %v4110_v33 = vcombine.high %v4102_v56, %v4102_v56 }
 0x55f   :  { %23201 = vst [vmem:[#allocation42_spill] sm:$0xff] %v20161_v3  ;;  %v20164_v10 = vrot.slane %v4109_v22, %v23200_v54  ;;  %v4111_v37 = vcombine.high %v4109_v22, %v4109_v22  ;;  %v20169_v60 = vrot.slane %v4110_v33, %v23200_v54 }
 0x561   :  { %23202 = vst [vmem:[#allocation43_spill] sm:$0xff] %v20164_v10  ;;  %23203 = vst [vmem:[#allocation63_spill] sm:$0xff] %v20169_v60  ;;  %v20178_v44 = vrot.slane %v4111_v37, %v23200_v54 }
 0x563   :  { %23204 = vst [vmem:[#allocation64_spill] sm:$0xff] %v20178_v44 }
 0x594   :  { %v16540_v9 = vpop.f32.mrb[8].mxu1 }
 0x595   :  { %v3134_v29 = vpop.f32.mrb[9].mxu1  ;;  %v4133_v42 = vmul.f32 %v16540_v9, %v20161_v3 }
 0x596   :  { %v4132_v25 = vmul.f32 %v20161_v3, %v3134_v29 }
 0x597   :  { %v4204_v11 = vsel %vm4196_vm0, %v4133_v42, 0.0 }
 0x598   :  { %v16543_v13 = vpop.f32.mrb[10].mxu1  ;;  %v4197_v4 = vsel %vm4196_vm0, %v4132_v25, 0.0 }
 0x599   :  { %v4135_v46 = vmul.f32 %v16543_v13, %v20164_v10  ;;  %v3144_v1 = vpop.f32.mrb[11].mxu1 }
 0x59a   :  { %v4134_v49 = vmul.f32 %v20164_v10, %v3144_v1 }
 0x59b   :  { %v4205_v26 = vsel %vm4196_vm0, %v4135_v46, 0.0 }
 0x59c   :  { %v4206_v38 = vadd.f32 %v4205_v26, %v4204_v11  ;;  %v4198_v47 = vsel %vm4196_vm0, %v4134_v49, 0.0  ;;  %v16546_v23 = vpop.f32.mrb[12].mxu1 }
 0x59d   :  { %v4199_v0 = vadd.f32 %v4198_v47, %v4197_v4  ;;  %v4137_v21 = vmul.f32 %v16546_v23, %v20169_v60  ;;  %v3154_v62 = vpop.f32.mrb[13].mxu1 }
 0x59e   :  { %v4136_v19 = vmul.f32 %v20169_v60, %v3154_v62  ;;  %v4408_v62 = vpop.permute.xlu1 %4407 }
 0x59f   :  { %v4207_v15 = vsel %vm4196_vm0, %v4137_v21, 0.0 }
 0x5a0   :  { %v4208_v50 = vadd.f32 %v4207_v15, %v4206_v38  ;;  %v4200_v28 = vsel %vm4196_vm0, %v4136_v19, 0.0  ;;  %v16549_v7 = vpop.f32.mrb[14].mxu1 }
 0x5a1   :  { %v4201_v48 = vadd.f32 %v4200_v28, %v4199_v0  ;;  %v4139_v24 = vmul.f32 %v16549_v7, %v20178_v44  ;;  %v3164_v58 = vpop.f32.mrb[15].mxu1  ;;  %v4406_v28 = vpop.permute.xlu0 %4405 }
 0x5a2   :  { %v4138_v51 = vmul.f32 %v20178_v44, %v3164_v58 }
 0x5a3   :  { %v4209_v6 = vsel %vm4196_vm0, %v4139_v24, 0.0 }
 0x5a4   :  { %v4210_v61 = vadd.f32 %v4209_v6, %v4208_v50  ;;  %v4202_v12 = vsel %vm4196_vm0, %v4138_v51, 0.0  ;;  %v16556_v59 = vpop.f32.mrb[16].mxu1 }
 0x5a5   :  { %v4203_v39 = vadd.f32 %v4202_v12, %v4201_v48  ;;  %v3263_v57 = vpop.f32.mrb[17].mxu1  ;;  %v4141_v14 = vmul.f32 %v16556_v59, %v20161_v3 }
 0x5a6   :  { %v4326_v27 = vmin.f32 %v4210_v61, 0.0  ;;  %v4140_v20 = vmul.f32 %v20161_v3, %v3263_v57  ;;  %vm4310_vm14 = vcmp.gt.f32.partialorder %v4210_v61, 0.0 }
 0x5a7   :  { %v4325_v35 = vmin.f32 %v4203_v39, 0.0  ;;  %v4218_v43 = vsel %vm4196_vm0, %v4141_v14, 0.0  ;;  %vm4309_vm11 = vcmp.gt.f32.partialorder %v4203_v39, 0.0 }
 0x5a8   :  { %v4343_v40 = vmul.f32 1.442695, %v4326_v27  ;;  %v16559_v8 = vpop.f32.mrb[18].mxu1  ;;  %v4211_v2 = vsel %vm4196_vm0, %v4140_v20, 0.0 }
 0x5a9   :  { %v4341_v17 = vmul.f32 1.442695, %v4325_v35  ;;  %v4143_v34 = vmul.f32 %v16559_v8, %v20164_v10  ;;  %v3273_v32 = vpop.f32.mrb[19].mxu1 }
 0x5aa   :  { %17804 = vpow2.f32 %v4343_v40  ;;  %v4142_v41 = vmul.f32 %v20164_v10, %v3273_v32 }
 0x5ab   :  { %17806 = vpow2.f32 %v4341_v17  ;;  %v4219_v53 = vsel %vm4196_vm0, %v4143_v34, 0.0 }
 0x5ac   :  { %v4220_v36 = vadd.f32 %v4219_v53, %v4218_v43  ;;  %v4212_v45 = vsel %vm4196_vm0, %v4142_v41, 0.0  ;;  %v16562_v5 = vpop.f32.mrb[20].mxu1 }
 0x5ad   :  { %v4213_v63 = vadd.f32 %v4212_v45, %v4211_v2  ;;  %v4145_v30 = vmul.f32 %v16562_v5, %v20169_v60  ;;  %v3283_v52 = vpop.f32.mrb[21].mxu1 }
 0x5ae   :  { %v4144_v18 = vmul.f32 %v20169_v60, %v3283_v52 }
 0x5af   :  { %v4221_v56 = vsel %vm4196_vm0, %v4145_v30, 0.0 }
 0x5b0   :  { %v4222_v22 = vadd.f32 %v4221_v56, %v4220_v36  ;;  %v4214_v54 = vsel %vm4196_vm0, %v4144_v18, 0.0  ;;  %v16565_v9 = vpop.f32.mrb[22].mxu1 }
 0x5b1   :  { %v4215_v33 = vadd.f32 %v4214_v54, %v4213_v63  ;;  %v4147_v29 = vmul.f32 %v16565_v9, %v20178_v44  ;;  %v3293_v42 = vpop.f32.mrb[23].mxu1  ;;  %v4412_v9 = vpop.permute.xlu0 %4411 }
 0x5b2   :  { %v4146_v25 = vmul.f32 %v20178_v44, %v3293_v42  ;;  %v4410_v42 = vpop.permute.xlu1 %4409 }
 0x5b3   :  { %v4223_v13 = vsel %vm4196_vm0, %v4147_v29, 0.0  ;;  %v16572_v37 = vpop.f32.mrb[8].mxu0 }
 0x5b4   :  { %v17805_v46 = vpop.eup %17804  ;;  %v4224_v1 = vadd.f32 %v4223_v13, %v4222_v22  ;;  %v4216_v49 = vsel %vm4196_vm0, %v4146_v25, 0.0  ;;  %v3392_v11 = vpop.f32.mrb[9].mxu0  ;;  %v4149_v23 = vmul.f32 %v16572_v37, %v20161_v3 }
 0x5b5   :  { %v17807_v26 = vpop.eup %17806  ;;  %v4217_v4 = vadd.f32 %v4216_v49, %v4215_v33  ;;  %v15808_v38 = vadd.f32 -1.0, %v17805_v46  ;;  %v4148_v0 = vmul.f32 %v20161_v3, %v3392_v11 }
 0x5b6   :  { %v4328_v47 = vmin.f32 %v4224_v1, 0.0  ;;  %v15807_v21 = vadd.f32 -1.0, %v17807_v26  ;;  %v4232_v57 = vsel %vm4196_vm0, %v4149_v23, 0.0  ;;  %vm4312_vm1 = vcmp.gt.f32.partialorder %v4224_v1, 0.0 }
 0x5b7   :  { %v4327_v19 = vmin.f32 %v4217_v4, 0.0  ;;  %v16575_v15 = vpop.f32.mrb[10].mxu0  ;;  %v4390_v50 = vsel %vm4310_vm14, %v4210_v61, %v15808_v38  ;;  %v4225_v27 = vsel %vm4196_vm0, %v4148_v0, 0.0  ;;  %vm4311_vm5 = vcmp.gt.f32.partialorder %v4217_v4, 0.0 }
 0x5b8   :  { %v4347_v7 = vmul.f32 1.442695, %v4328_v47  ;;  %v4151_v48 = vmul.f32 %v16575_v15, %v20164_v10  ;;  %v3402_v24 = vpop.f32.mrb[11].mxu0  ;;  %v4389_v58 = vsel %vm4309_vm11, %v4203_v39, %v15807_v21  ;;  %v4454_v51 = vadd.f32 %v4408_v62, %v4390_v50 }
 0x5b9   :  { %v4345_v6 = vmul.f32 1.442695, %v4327_v19  ;;  %v4150_v12 = vmul.f32 %v20164_v10, %v3402_v24  ;;  %v4453_v59 = vadd.f32 %v4406_v28, %v4389_v58  ;;  %v20225_v0 = vmul.u32 16, %v23198_v16 }
 0x5ba   :  { %17808 = vpow2.f32 %v4347_v7  ;;  %v4233_v35 = vsel %vm4196_vm0, %v4151_v48, 0.0 }
 0x5bb   :  { %17810 = vpow2.f32 %v4345_v6  ;;  %v4234_v61 = vadd.f32 %v4233_v35, %v4232_v57  ;;  %v4226_v14 = vsel %vm4196_vm0, %v4150_v12, 0.0  ;;  %v16588_v40 = vpop.f32.mrb[24].mxu1  ;;  %v17458_v20 = vpack.c.bf16 %v4454_v51, %v4453_v59 }
 0x5bc   :  { %v4227_v8 = vadd.f32 %v4226_v14, %v4225_v27  ;;  %v3521_v39 = vpop.f32.mrb[25].mxu1  ;;  %v4157_v53 = vmul.f32 %v16588_v40, %v20161_v3  ;;  %vm4485_vm4 = vcmp.eq.s32.totalorder %v20154_v31, %v20225_v0 }
 0x5bd   :  { %17459 = vmatprep.subr.bf16.mxu0 %v17458_v20  ;;  %v4156_v45 = vmul.f32 %v20161_v3, %v3521_v39 }
 0x5be   :  { %17461 = vmatpush3.bf16.msra.mxu0 %v17458_v20  ;;  %v4246_v25 = vsel %vm4196_vm0, %v4157_v53, 0.0 }
 0x5bf   :  { %v4239_v49 = vsel %vm4196_vm0, %v4156_v45, 0.0 }
 0x5c1   :  { %v16578_v17 = vpop.f32.mrb[12].mxu0 }
 0x5c2   :  { %v4153_v34 = vmul.f32 %v16578_v17, %v20169_v60  ;;  %v3412_v32 = vpop.f32.mrb[13].mxu0 }
 0x5c3   :  { %v4152_v41 = vmul.f32 %v20169_v60, %v3412_v32 }
 0x5c4   :  { %v17809_v43 = vpop.eup %17808  ;;  %v4235_v2 = vsel %vm4196_vm0, %v4153_v34, 0.0 }
 0x5c5   :  { %v17811_v36 = vpop.eup %17810  ;;  %v4236_v5 = vadd.f32 %v4235_v2, %v4234_v61  ;;  %v4228_v63 = vsel %vm4196_vm0, %v4152_v41, 0.0  ;;  %v16591_v30 = vpop.f32.mrb[26].mxu1  ;;  %v15810_v52 = vadd.f32 -1.0, %v17809_v43 }
 0x5c6   :  { %v4229_v18 = vadd.f32 %v4228_v63, %v4227_v8  ;;  %v4159_v56 = vmul.f32 %v16591_v30, %v20164_v10  ;;  %v3531_v22 = vpop.f32.mrb[27].mxu1  ;;  %v15809_v54 = vadd.f32 -1.0, %v17811_v36 }
 0x5c7   :  { %v4158_v33 = vmul.f32 %v20164_v10, %v3531_v22  ;;  %v4392_v29 = vsel %vm4312_vm1, %v4224_v1, %v15810_v52  ;;  %v18202_v1 = vmov 1.0  }
 0x5c8   :  { %v4247_v13 = vsel %vm4196_vm0, %v4159_v56, 0.0  ;;  %v4391_v37 = vsel %vm4311_vm5, %v4217_v4, %v15809_v54  ;;  %v4456_v46 = vadd.f32 %v4412_v9, %v4392_v29  ;;  %16694 = vmatprep.mubr.msk.f32.mxu0 %vm4485_vm4, %v18202_v1  ;;  %v4416_v56 = vpop.permute.xlu0 %4415  ;;  %v4414_v54 = vpop.permute.xlu1 %4413 }
 0x5c9   :  { %v4248_v11 = vadd.f32 %v4247_v13, %v4246_v25  ;;  %v4240_v26 = vsel %vm4196_vm0, %v4158_v33, 0.0  ;;  %v4455_v38 = vadd.f32 %v4410_v42, %v4391_v37  ;;  %v4695_v42 = vld [vmem:[%s22861_s4] sm:$0xff]  ;;  %v4696_v25 = vld [vmem:[%s22861_s4 + $0x8] sm:$0xff] }
 0x5ca   :  { %v4241_v47 = vadd.f32 %v4240_v26, %v4239_v49  ;;  %v17490_v13 = vpack.c.bf16 %v4696_v25, %v4695_v42 }
 0x5cb   :  { %v17462_v23 = vpack.c.bf16 %v4456_v46, %v4455_v38 }
 0x5cc   :  { %17491 = vmatprep.subr.bf16.mxu1 %v17490_v13 }
 0x5cd   :  { %17463 = vmatprep.subr.bf16.mxu0 %v17462_v23  ;;  %17493 = vmatpush3.bf16.msra.mxu1 %v17490_v13 }
 0x5ce   :  { %17465 = vmatpush3.bf16.msra.mxu0 %v17462_v23 }
 0x5d1   :  { %v16581_v4 = vpop.f32.mrb[14].mxu0 }
 0x5d2   :  { %v4155_v21 = vmul.f32 %v16581_v4, %v20178_v44  ;;  %v3422_v62 = vpop.f32.mrb[15].mxu0 }
 0x5d3   :  { %v4154_v19 = vmul.f32 %v20178_v44, %v3422_v62 }
 0x5d4   :  { %v4237_v15 = vsel %vm4196_vm0, %v4155_v21, 0.0 }
 0x5d5   :  { %v4238_v50 = vadd.f32 %v4237_v15, %v4236_v5  ;;  %v4230_v28 = vsel %vm4196_vm0, %v4154_v19, 0.0  ;;  %v16594_v7 = vpop.f32.mrb[28].mxu1 }
 0x5d6   :  { %v4231_v48 = vadd.f32 %v4230_v28, %v4229_v18  ;;  %v4161_v24 = vmul.f32 %v16594_v7, %v20169_v60  ;;  %v3541_v58 = vpop.f32.mrb[29].mxu1 }
 0x5d7   :  { %v4330_v51 = vmin.f32 %v4238_v50, 0.0  ;;  %v4160_v6 = vmul.f32 %v20169_v60, %v3541_v58  ;;  %vm4314_vm7 = vcmp.gt.f32.partialorder %v4238_v50, 0.0 }
 0x5d8   :  { %v4329_v12 = vmin.f32 %v4231_v48, 0.0  ;;  %v4249_v59 = vsel %vm4196_vm0, %v4161_v24, 0.0  ;;  %vm4313_vm12 = vcmp.gt.f32.partialorder %v4231_v48, 0.0 }
 0x5d9   :  { %v4351_v57 = vmul.f32 1.442695, %v4330_v51  ;;  %v4250_v27 = vadd.f32 %v4249_v59, %v4248_v11  ;;  %v4242_v35 = vsel %vm4196_vm0, %v4160_v6, 0.0  ;;  %v4420_v51 = vpop.permute.xlu0 %4419 }
 0x5da   :  { %v4349_v61 = vmul.f32 1.442695, %v4329_v12  ;;  %v4243_v14 = vadd.f32 %v4242_v35, %v4241_v47  ;;  %v4418_v12 = vpop.permute.xlu1 %4417 }
 0x5db   :  { %17812 = vpow2.f32 %v4351_v57 }
 0x5dc   :  { %17814 = vpow2.f32 %v4349_v61 }
 0x5dd   :  { %v16597_v40 = vpop.f32.mrb[30].mxu1 }
 0x5de   :  { %v4163_v20 = vmul.f32 %v16597_v40, %v20178_v44  ;;  %v3551_v8 = vpop.f32.mrb[31].mxu1 }
 0x5df   :  { %v4162_v39 = vmul.f32 %v20178_v44, %v3551_v8 }
 0x5e0   :  { %v4251_v17 = vsel %vm4196_vm0, %v4163_v20, 0.0 }
 0x5e1   :  { %v4252_v34 = vadd.f32 %v4251_v17, %v4250_v27  ;;  %v4244_v32 = vsel %vm4196_vm0, %v4162_v39, 0.0  ;;  %v16604_v41 = vpop.f32.mrb[16].mxu0 }
 0x5e2   :  { %v4245_v43 = vadd.f32 %v4244_v32, %v4243_v14  ;;  %v3650_v53 = vpop.f32.mrb[17].mxu0  ;;  %v4165_v37 = vmul.f32 %v16604_v41, %v20161_v3 }
 0x5e3   :  { %v4332_v2 = vmin.f32 %v4252_v34, 0.0  ;;  %v4164_v49 = vmul.f32 %v20161_v3, %v3650_v53  ;;  %vm4316_vm13 = vcmp.gt.f32.partialorder %v4252_v34, 0.0 }
 0x5e4   :  { %v4331_v36 = vmin.f32 %v4245_v43, 0.0  ;;  %v4260_v23 = vsel %vm4196_vm0, %v4165_v37, 0.0  ;;  %vm4315_vm2 = vcmp.gt.f32.partialorder %v4245_v43, 0.0 }
 0x5e5   :  { %v17813_v45 = vpop.eup %17812  ;;  %v4355_v5 = vmul.f32 1.442695, %v4332_v2  ;;  %v4253_v62 = vsel %vm4196_vm0, %v4164_v49, 0.0 }
 0x5e6   :  { %v17815_v63 = vpop.eup %17814  ;;  %v4353_v30 = vmul.f32 1.442695, %v4331_v36  ;;  %v15812_v52 = vadd.f32 -1.0, %v17813_v45 }
 0x5e7   :  { %17816 = vpow2.f32 %v4355_v5  ;;  %v15811_v18 = vadd.f32 -1.0, %v17815_v63 }
 0x5e8   :  { %17818 = vpow2.f32 %v4353_v30  ;;  %v4394_v22 = vsel %vm4314_vm7, %v4238_v50, %v15812_v52 }
 0x5e9   :  { %v4393_v9 = vsel %vm4313_vm12, %v4231_v48, %v15811_v18  ;;  %v4458_v33 = vadd.f32 %v4416_v56, %v4394_v22 }
 0x5ea   :  { %v4457_v29 = vadd.f32 %v4414_v54, %v4393_v9 }
 0x5ec   :  { %v17466_v46 = vpack.c.bf16 %v4458_v33, %v4457_v29 }
 0x5ed   :  { %v16607_v11 = vpop.f32.mrb[18].mxu0 }
 0x5ee   :  { %v4167_v26 = vmul.f32 %v16607_v11, %v20164_v10  ;;  %v3660_v38 = vpop.f32.mrb[19].mxu0  ;;  %17467 = vmatprep.subr.bf16.mxu0 %v17466_v46 }
 0x5ef   :  { %v4166_v47 = vmul.f32 %v20164_v10, %v3660_v38  ;;  %17469 = vmatpush3.bf16.msra.mxu0 %v17466_v46 }
 0x5f0   :  { %v4261_v4 = vsel %vm4196_vm0, %v4167_v26, 0.0 }
 0x5f1   :  { %v17817_v21 = vpop.eup %17816  ;;  %v4262_v19 = vadd.f32 %v4261_v4, %v4260_v23  ;;  %v4254_v15 = vsel %vm4196_vm0, %v4166_v47, 0.0  ;;  %v16620_v50 = vpop.f32.mrb[32].mxu1 }
 0x5f2   :  { %v17819_v28 = vpop.eup %17818  ;;  %v4255_v7 = vadd.f32 %v4254_v15, %v4253_v62  ;;  %v3779_v48 = vpop.f32.mrb[33].mxu1  ;;  %v15814_v24 = vadd.f32 -1.0, %v17817_v21  ;;  %v4173_v8 = vmul.f32 %v16620_v50, %v20161_v3 }
 0x5f3   :  { %v15813_v58 = vadd.f32 -1.0, %v17819_v28  ;;  %v4172_v17 = vmul.f32 %v20161_v3, %v3779_v48 }
 0x5f4   :  { %v4396_v6 = vsel %vm4316_vm13, %v4252_v34, %v15814_v24  ;;  %v4274_v45 = vsel %vm4196_vm0, %v4173_v8, 0.0 }
 0x5f5   :  { %v4395_v59 = vsel %vm4315_vm2, %v4245_v43, %v15813_v58  ;;  %v4460_v57 = vadd.f32 %v4420_v51, %v4396_v6  ;;  %v4267_v63 = vsel %vm4196_vm0, %v4172_v17, 0.0 }
 0x5f6   :  { %v4459_v27 = vadd.f32 %v4418_v12, %v4395_v59 }
 0x5f8   :  { %v17470_v35 = vpack.c.bf16 %v4460_v57, %v4459_v27 }
 0x5fa   :  { %17471 = vmatprep.subr.bf16.mxu0 %v17470_v35 }
 0x5fb   :  { %17473 = vmatpush3.bf16.msra.mxu0 %v17470_v35 }
 0x5fd   :  { %v16610_v61 = vpop.f32.mrb[20].mxu0 }
 0x5fe   :  { %v4169_v14 = vmul.f32 %v16610_v61, %v20169_v60  ;;  %v3670_v40 = vpop.f32.mrb[21].mxu0 }
 0x5ff   :  { %v4168_v20 = vmul.f32 %v20169_v60, %v3670_v40 }
 0x600   :  { %v4263_v39 = vsel %vm4196_vm0, %v4169_v14, 0.0 }
 0x601   :  { %v4264_v34 = vadd.f32 %v4263_v39, %v4262_v19  ;;  %v4256_v32 = vsel %vm4196_vm0, %v4168_v20, 0.0  ;;  %v16623_v41 = vpop.f32.mrb[34].mxu1 }
 0x602   :  { %v4257_v43 = vadd.f32 %v4256_v32, %v4255_v7  ;;  %v4175_v53 = vmul.f32 %v16623_v41, %v20164_v10  ;;  %v3789_v2 = vpop.f32.mrb[35].mxu1 }
 0x603   :  { %v4174_v36 = vmul.f32 %v20164_v10, %v3789_v2 }
 0x604   :  { %v4275_v5 = vsel %vm4196_vm0, %v4175_v53, 0.0 }
 0x605   :  { %v4276_v30 = vadd.f32 %v4275_v5, %v4274_v45  ;;  %v4268_v52 = vsel %vm4196_vm0, %v4174_v36, 0.0 }
 0x606   :  { %v4269_v18 = vadd.f32 %v4268_v52, %v4267_v63  ;;  %v16613_v56 = vpop.f32.mrb[22].mxu0 }
 0x607   :  { %v4171_v22 = vmul.f32 %v16613_v56, %v20178_v44  ;;  %v3680_v54 = vpop.f32.mrb[23].mxu0 }
 0x608   :  { %v4170_v9 = vmul.f32 %v20178_v44, %v3680_v54 }
 0x609   :  { %v4265_v33 = vsel %vm4196_vm0, %v4171_v22, 0.0  ;;  %v16626_v29 = vpop.f32.mrb[36].mxu1 }
 0x60a   :  { %v4266_v42 = vadd.f32 %v4265_v33, %v4264_v34  ;;  %v4258_v25 = vsel %vm4196_vm0, %v4170_v9, 0.0  ;;  %v4177_v13 = vmul.f32 %v16626_v29, %v20169_v60  ;;  %v3799_v37 = vpop.f32.mrb[37].mxu1 }
 0x60b   :  { %v4259_v46 = vadd.f32 %v4258_v25, %v4257_v43  ;;  %v4176_v49 = vmul.f32 %v20169_v60, %v3799_v37 }
 0x60c   :  { %v4334_v11 = vmin.f32 %v4266_v42, 0.0  ;;  %v4277_v26 = vsel %vm4196_vm0, %v4177_v13, 0.0  ;;  %vm4318_vm6 = vcmp.gt.f32.partialorder %v4266_v42, 0.0 }
 0x60d   :  { %v4333_v38 = vmin.f32 %v4259_v46, 0.0  ;;  %v4278_v47 = vadd.f32 %v4277_v26, %v4276_v30  ;;  %v4270_v23 = vsel %vm4196_vm0, %v4176_v49, 0.0  ;;  %v4424_v30 = vpop.permute.xlu0 %4423  ;;  %vm4317_vm9 = vcmp.gt.f32.partialorder %v4259_v46, 0.0 }
 0x60e   :  { %v4359_v4 = vmul.f32 1.442695, %v4334_v11  ;;  %v4271_v21 = vadd.f32 %v4270_v23, %v4269_v18  ;;  %v16629_v62 = vpop.f32.mrb[38].mxu1  ;;  %v4422_v18 = vpop.permute.xlu1 %4421 }
 0x60f   :  { %v4357_v19 = vmul.f32 1.442695, %v4333_v38  ;;  %v4179_v15 = vmul.f32 %v16629_v62, %v20178_v44  ;;  %v3809_v50 = vpop.f32.mrb[39].mxu1 }
 0x610   :  { %17820 = vpow2.f32 %v4359_v4  ;;  %v4178_v28 = vmul.f32 %v20178_v44, %v3809_v50 }
 0x611   :  { %17822 = vpow2.f32 %v4357_v19  ;;  %v4279_v7 = vsel %vm4196_vm0, %v4179_v15, 0.0  ;;  %v16636_v48 = vpop.f32.mrb[24].mxu0 }
 0x612   :  { %v20279_v24 = vadd.f32 %v4279_v7, %v4278_v47  ;;  %v4272_v58 = vsel %vm4196_vm0, %v4178_v28, 0.0  ;;  %v3908_v51 = vpop.f32.mrb[25].mxu0  ;;  %v4181_v57 = vmul.f32 %v16636_v48, %v20161_v3  ;;  %v4428_v7 = vpop.permute.xlu0 %4427 }
 0x613   :  { %v20282_v6 = vadd.f32 %v4272_v58, %v4271_v21  ;;  %v4180_v35 = vmul.f32 %v20161_v3, %v3908_v51 }
 0x614   :  { %v4336_v12 = vmin.f32 %v20279_v24, 0.0  ;;  %v4288_v39 = vsel %vm4196_vm0, %v4181_v57, 0.0  ;;  %vm4320_vm15 = vcmp.gt.f32.partialorder %v20279_v24, 0.0 }
 0x615   :  { %v4335_v59 = vmin.f32 %v20282_v6, 0.0  ;;  %v4281_v41 = vsel %vm4196_vm0, %v4180_v35, 0.0  ;;  %vm4319_vm8 = vcmp.gt.f32.partialorder %v20282_v6, 0.0 }
 0x616   :  { %v4363_v27 = vmul.f32 1.442695, %v4336_v12  ;;  %v16639_v61 = vpop.f32.mrb[26].mxu0 }
 0x617   :  { %v4361_v14 = vmul.f32 1.442695, %v4335_v59  ;;  %v4183_v40 = vmul.f32 %v16639_v61, %v20164_v10  ;;  %v3918_v20 = vpop.f32.mrb[27].mxu0  ;;  %v4426_v59 = vpop.permute.xlu1 %4425 }
 0x618   :  { %17824 = vpow2.f32 %v4363_v27  ;;  %v4182_v8 = vmul.f32 %v20164_v10, %v3918_v20 }
 0x619   :  { %17826 = vpow2.f32 %v4361_v14  ;;  %v4289_v17 = vsel %vm4196_vm0, %v4183_v40, 0.0  ;;  %v16652_v34 = vpop.f32.mrb[40].mxu1 }
 0x61a   :  { %v17821_v32 = vpop.eup %17820  ;;  %v4290_v43 = vadd.f32 %v4289_v17, %v4288_v39  ;;  %v4282_v53 = vsel %vm4196_vm0, %v4182_v8, 0.0  ;;  %v4037_v2 = vpop.f32.mrb[41].mxu1  ;;  %v4189_v25 = vmul.f32 %v16652_v34, %v20161_v3 }
 0x61b   :  { %v17823_v36 = vpop.eup %17822  ;;  %v4283_v45 = vadd.f32 %v4282_v53, %v4281_v41  ;;  %v15816_v5 = vadd.f32 -1.0, %v17821_v32  ;;  %v4188_v37 = vmul.f32 %v20161_v3, %v4037_v2 }
 0x61c   :  { %v15815_v63 = vadd.f32 -1.0, %v17823_v36  ;;  %v4302_v15 = vsel %vm4196_vm0, %v4189_v25, 0.0 }
 0x61d   :  { %v4398_v52 = vsel %vm4318_vm6, %v4266_v42, %v15816_v5  ;;  %v4295_v48 = vsel %vm4196_vm0, %v4188_v37, 0.0 }
 0x61e   :  { %v16642_v56 = vpop.f32.mrb[28].mxu0  ;;  %v4397_v22 = vsel %vm4317_vm9, %v4259_v46, %v15815_v63  ;;  %v4462_v54 = vadd.f32 %v4424_v30, %v4398_v52 }
 0x61f   :  { %v4185_v9 = vmul.f32 %v16642_v56, %v20169_v60  ;;  %v3928_v33 = vpop.f32.mrb[29].mxu0  ;;  %v4461_v29 = vadd.f32 %v4422_v18, %v4397_v22 }
 0x620   :  { %v4184_v13 = vmul.f32 %v20169_v60, %v3928_v33 }
 0x621   :  { %v4291_v49 = vsel %vm4196_vm0, %v4185_v9, 0.0  ;;  %v16655_v11 = vpop.f32.mrb[42].mxu1  ;;  %v17474_v26 = vpack.c.bf16 %v4462_v54, %v4461_v29 }
 0x622   :  { %v17825_v38 = vpop.eup %17824  ;;  %v4292_v42 = vadd.f32 %v4291_v49, %v4290_v43  ;;  %v4284_v47 = vsel %vm4196_vm0, %v4184_v13, 0.0  ;;  %v4191_v46 = vmul.f32 %v16655_v11, %v20164_v10  ;;  %v4047_v23 = vpop.f32.mrb[43].mxu1 }
 0x623   :  { %v17827_v4 = vpop.eup %17826  ;;  %v4285_v21 = vadd.f32 %v4284_v47, %v4283_v45  ;;  %v4190_v62 = vmul.f32 %v20164_v10, %v4047_v23  ;;  %17475 = vmatprep.subr.bf16.mxu0 %v17474_v26  ;;  %v15818_v19 = vadd.f32 -1.0, %v17825_v38  ;;  %v4432_v23 = vpop.permute.xlu0 %4431 }
 0x624   :  { %v4303_v50 = vsel %vm4196_vm0, %v4191_v46, 0.0  ;;  %17477 = vmatpush3.bf16.msra.mxu0 %v17474_v26  ;;  %v15817_v28 = vadd.f32 -1.0, %v17827_v4 }
 0x625   :  { %v4304_v58 = vadd.f32 %v4303_v50, %v4302_v15  ;;  %v4296_v51 = vsel %vm4196_vm0, %v4190_v62, 0.0  ;;  %v4400_v12 = vsel %vm4320_vm15, %v20279_v24, %v15818_v19 }
 0x626   :  { %v4297_v57 = vadd.f32 %v4296_v51, %v4295_v48  ;;  %v16645_v27 = vpop.f32.mrb[30].mxu0  ;;  %v4399_v35 = vsel %vm4319_vm8, %v20282_v6, %v15817_v28  ;;  %v4464_v61 = vadd.f32 %v4428_v7, %v4400_v12 }
 0x627   :  { %v4187_v14 = vmul.f32 %v16645_v27, %v20178_v44  ;;  %v3938_v40 = vpop.f32.mrb[31].mxu0  ;;  %v4463_v20 = vadd.f32 %v4426_v59, %v4399_v35  ;;  %v4436_v51 = vpop.permute.xlu0 %4435 }
 0x628   :  { %v4186_v8 = vmul.f32 %v20178_v44, %v3938_v40  ;;  %v4471_v40 = vadd.s32 2, %v20225_v0 }
 0x629   :  { %v4293_v39 = vsel %vm4196_vm0, %v4187_v14, 0.0  ;;  %v16658_v17 = vpop.f32.mrb[44].mxu1  ;;  %v17478_v34 = vpack.c.bf16 %v4464_v61, %v4463_v20  ;;  %v4470_v61 = vadd.s32 1, %v20225_v0  ;;  %v4472_v20 = vadd.s32 3, %v20225_v0 }
 0x62a   :  { %v4294_v32 = vadd.f32 %v4293_v39, %v4292_v42  ;;  %v4286_v41 = vsel %vm4196_vm0, %v4186_v8, 0.0  ;;  %v4193_v24 = vmul.f32 %v16658_v17, %v20169_v60  ;;  %v4057_v43 = vpop.f32.mrb[45].mxu1  ;;  %vm4487_vm5 = vcmp.eq.s32.totalorder %v20154_v31, %v4471_v40 }
 0x62b   :  { %v4287_v53 = vadd.f32 %v4286_v41, %v4285_v21  ;;  %v4192_v6 = vmul.f32 %v20169_v60, %v4057_v43  ;;  %17479 = vmatprep.subr.bf16.mxu0 %v17478_v34  ;;  %v4430_v21 = vpop.permute.xlu1 %4429  ;;  %vm4486_vm1 = vcmp.eq.s32.totalorder %v20154_v31, %v4470_v61  ;;  %v4473_v8 = vadd.s32 4, %v20225_v0 }
 0x62c   :  { %v4338_v2 = vmin.f32 %v4294_v32, 0.0  ;;  %v4305_v36 = vsel %vm4196_vm0, %v4193_v24, 0.0  ;;  %17481 = vmatpush3.bf16.msra.mxu0 %v17478_v34  ;;  %vm4322_vm3 = vcmp.gt.f32.partialorder %v4294_v32, 0.0  ;;  %vm4488_vm4 = vcmp.eq.s32.totalorder %v20154_v31, %v4472_v20 }
 0x62d   :  { %v4337_v45 = vmin.f32 %v4287_v53, 0.0  ;;  %v4306_v5 = vadd.f32 %v4305_v36, %v4304_v58  ;;  %v4298_v63 = vsel %vm4196_vm0, %v4192_v6, 0.0  ;;  %v16661_v30 = vpop.f32.mrb[46].mxu1  ;;  %vm4321_vm10 = vcmp.gt.f32.partialorder %v4287_v53, 0.0 }
 0x62e   :  { %v4367_v52 = vmul.f32 1.442695, %v4338_v2  ;;  %v4299_v18 = vadd.f32 %v4298_v63, %v4297_v57  ;;  %v4195_v56 = vmul.f32 %v16661_v30, %v20178_v44  ;;  %v4067_v22 = vpop.f32.mrb[47].mxu1  ;;  %v4474_v39 = vadd.s32 5, %v20225_v0 }
 0x62f   :  { %v4365_v54 = vmul.f32 1.442695, %v4337_v45  ;;  %v4194_v9 = vmul.f32 %v20178_v44, %v4067_v22  ;;  %v4434_v59 = vpop.permute.xlu1 %4433  ;;  %vm4489_vm7 = vcmp.eq.s32.totalorder %v20154_v31, %v4473_v8  ;;  %v4475_v17 = vadd.s32 6, %v20225_v0  ;;  %v4697_v45 = vld [vmem:[%s22861_s4 + $0x10] sm:$0xff] }
 0x630   :  { %17828 = vpow2.f32 %v4367_v52  ;;  %v4307_v33 = vsel %vm4196_vm0, %v4195_v56, 0.0  ;;  %vm4490_vm12 = vcmp.eq.s32.totalorder %v20154_v31, %v4474_v39  ;;  %v4476_v34 = vadd.s32 7, %v20225_v0 }
 0x631   :  { %17830 = vpow2.f32 %v4365_v54  ;;  %v4308_v29 = vadd.f32 %v4307_v33, %v4306_v5  ;;  %v4300_v25 = vsel %vm4196_vm0, %v4194_v9, 0.0  ;;  %vm4491_vm13 = vcmp.eq.s32.totalorder %v20154_v31, %v4475_v17  ;;  %v4698_v5 = vld [vmem:[%s22861_s4 + $0x18] sm:$0xff]  ;;  %s18204_s4 = smov [#allocation8]  }
 0x632   :  { %v4301_v13 = vadd.f32 %v4300_v25, %v4299_v18  ;;  %vm4492_vm2 = vcmp.eq.s32.totalorder %v20154_v31, %v4476_v34  ;;  %v4478_v41 = vadd.s32 9, %v20225_v0  ;;  %v4479_v24 = vadd.s32 10, %v20225_v0 }
 0x633   :  { %v4340_v37 = vmin.f32 %v4308_v29, 0.0  ;;  %vm4324_vm14 = vcmp.gt.f32.partialorder %v4308_v29, 0.0  ;;  %v4480_v43 = vadd.s32 11, %v20225_v0  ;;  %v4482_v6 = vadd.s32 13, %v20225_v0 }
 0x634   :  { %v4339_v49 = vmin.f32 %v4301_v13, 0.0  ;;  %vm4323_vm11 = vcmp.gt.f32.partialorder %v4301_v13, 0.0  ;;  %vm4494_vm9 = vcmp.eq.s32.totalorder %v20154_v31, %v4478_v41  ;;  %vm4495_vm15 = vcmp.eq.s32.totalorder %v20154_v31, %v4479_v24 }
 0x635   :  { %v4371_v11 = vmul.f32 1.442695, %v4340_v37  ;;  %vm4496_vm8 = vcmp.eq.s32.totalorder %v20154_v31, %v4480_v43  ;;  %v4483_v2 = vadd.s32 14, %v20225_v0  ;;  %v4484_v36 = vadd.s32 15, %v20225_v0 }
 0x636   :  { %v4369_v26 = vmul.f32 1.442695, %v4339_v49  ;;  %v17494_v63 = vpack.c.bf16 %v4698_v5, %v4697_v45 }
 0x637   :  { %17832 = vpow2.f32 %v4371_v11 }
 0x638   :  { %17834 = vpow2.f32 %v4369_v26  ;;  %17495 = vmatprep.subr.bf16.mxu1 %v17494_v63 }
 0x639   :  { %17497 = vmatpush3.bf16.msra.mxu1 %v17494_v63 }
 0x63a   :  { %v17829_v38 = vpop.eup %17828  ;;  %16750 = vmatprep.subr.mxu1 %v22938_v55 }
 0x63b   :  { %v17831_v42 = vpop.eup %17830  ;;  %v15820_v47 = vadd.f32 -1.0, %v17829_v38 }
 0x63c   :  { %v15819_v46 = vadd.f32 -1.0, %v17831_v42 }
 0x63d   :  { %v4402_v4 = vsel %vm4322_vm3, %v4294_v32, %v15820_v47  ;;  %v4477_v32 = vadd.s32 8, %v20225_v0 }
 0x63e   :  { %v4401_v62 = vsel %vm4321_vm10, %v4287_v53, %v15819_v46  ;;  %v4466_v19 = vadd.f32 %v4432_v23, %v4402_v4  ;;  %v4481_v53 = vadd.s32 12, %v20225_v0  ;;  %vm4498_vm10 = vcmp.eq.s32.totalorder %v20154_v31, %v4482_v6  ;;  %v4678_v0 = vld [vmem:[#allocation2] sm:$0xff] }
 0x63f   :  { %v4465_v15 = vadd.f32 %v4430_v21, %v4401_v62  ;;  %vm4493_vm6 = vcmp.eq.s32.totalorder %v20154_v31, %v4477_v32 }
 0x640   :  { %vm4497_vm3 = vcmp.eq.s32.totalorder %v20154_v31, %v4481_v53 }
 0x641   :  { %v17833_v50 = vpop.eup %17832  ;;  %v17482_v28 = vpack.c.bf16 %v4466_v19, %v4465_v15 }
 0x642   :  { %v17835_v7 = vpop.eup %17834  ;;  %v15822_v48 = vadd.f32 -1.0, %v17833_v50 }
 0x643   :  { %17483 = vmatprep.subr.bf16.mxu0 %v17482_v28  ;;  %v15821_v58 = vadd.f32 -1.0, %v17835_v7 }
 0x644   :  { %17485 = vmatpush3.bf16.msra.mxu0 %v17482_v28  ;;  %v4404_v12 = vsel %vm4324_vm14, %v4308_v29, %v15822_v48  ;;  %vm4499_vm14 = vcmp.eq.s32.totalorder %v20154_v31, %v4483_v2 }
 0x645   :  { %v4403_v57 = vsel %vm4323_vm11, %v4301_v13, %v15821_v58  ;;  %v4468_v27 = vadd.f32 %v4436_v51, %v4404_v12  ;;  %vm4500_vm11 = vcmp.eq.s32.totalorder %v20154_v31, %v4484_v36 }
 0x646   :  { %v4467_v35 = vadd.f32 %v4434_v59, %v4403_v57 }
 0x648   :  { %v17486_v14 = vpack.c.bf16 %v4468_v27, %v4467_v35 }
 0x64a   :  { %17487 = vmatprep.subr.bf16.mxu0 %v17486_v14 }
 0x64b   :  { %17489 = vmatpush3.bf16.msra.mxu0 %v17486_v14 }
 0x64c   :  { %16770 = vmatprep.subr.mxu0 %v22938_v55 }
 0x64e   :  { %16695 = vmatmul.mubr.msk.f32.vlgmr.msra.gmra.mrb[32].mxu0 %vm4486_vm1, %v18202_v1  ;;  %vm18203_vm1 = vmmov 0  }
 0x64f   :  { %16697 = vmatprep.mubr.msk.f32.mxu0 %vm4487_vm5, %v18202_v1  ;;  %vm21053_vm5 = vcmp.ge.s32.totalorder %v23198_v16, %v20154_v31 }
 0x652   :  { %16698 = vmatmul.mubr.msk.f32.gmra.mrb[34].mxu0 %vm4488_vm4, %v18202_v1  ;;  %vm9839_vm4 = vcmask 64512  }
 0x653   :  { %16700 = vmatprep.mubr.msk.f32.mxu0 %vm4489_vm7, %v18202_v1 }
 0x656   :  { %16701 = vmatmul.mubr.msk.f32.gmra.mrb[36].mxu0 %vm4490_vm12, %v18202_v1 }
 0x657   :  { %16703 = vmatprep.mubr.msk.f32.mxu0 %vm4491_vm13, %v18202_v1 }
 0x65a   :  { %16704 = vmatmul.mubr.msk.f32.gmra.mrb[38].mxu0 %vm4492_vm2, %v18202_v1 }
 0x65b   :  { %16706 = vmatprep.mubr.msk.f32.mxu0 %vm4493_vm6, %v18202_v1 }
 0x65e   :  { %16707 = vmatmul.mubr.msk.f32.gmra.mrb[40].mxu0 %vm4494_vm9, %v18202_v1 }
 0x65f   :  { %16709 = vmatprep.mubr.msk.f32.mxu0 %vm4495_vm15, %v18202_v1 }
 0x662   :  { %16710 = vmatmul.mubr.msk.f32.gmra.mrb[42].mxu0 %vm4496_vm8, %v18202_v1 }
 0x663   :  { %16712 = vmatprep.mubr.msk.f32.mxu0 %vm4497_vm3, %v18202_v1 }
 0x666   :  { %16713 = vmatmul.mubr.msk.f32.gmra.mrb[44].mxu0 %vm4498_vm10, %v18202_v1 }
 0x667   :  { %16715 = vmatprep.mubr.msk.f32.mxu0 %vm4499_vm14, %v18202_v1 }
 0x66a   :  { %16716 = vmatmul.mubr.msk.f32.gmra.mrb[46].mxu0 %vm4500_vm11, %v18202_v1 }
 0x66b   :  { %16772 = vmatprep.mubr.msk.f32.mxu0 %vm18203_vm1, %v22938_v55 }
 0x721   :  { %v16696_v30 = vpop.f32.mrb[32].mxu0 }
 0x722   :  { %v4599_v52 = vpop.f32.mrb[33].mxu0  ;;  %v20377_v56 = vadd.f32 %v16696_v30, %v4678_v0 }
 0x723   :  { %v20375_v18 = vadd.f32 %v4678_v0, %v4599_v52 }
 0x724   :  { %23206 = vst [vmem:[#allocation65_spill] sm:$0xff] %v20377_v56 }
 0x725   :  { %23205 = vst [vmem:[#allocation45_spill] sm:$0xff] %v20375_v18  ;;  %v16699_v1 = vpop.f32.mrb[34].mxu0  ;;  %16726 = vmatprep.mubr.msk.f32.mxu1 %vm4196_vm0, %v20375_v18 }
 0x726   :  { %v20381_v22 = vadd.f32 %v16699_v1, %v4678_v0  ;;  %v4609_v54 = vpop.f32.mrb[35].mxu0  ;;  %16727 = vmatmul.mubr.msk.f32.vlgmr.msra.gmra.mrb[48].mxu1 %vm4196_vm0, %v20377_v56 }
 0x727   :  { %v20385_v9 = vadd.f32 %v4678_v0, %v4609_v54 }
 0x728   :  { %23207 = vst [vmem:[#allocation46_spill] sm:$0xff] %v20381_v22 }
 0x729   :  { %23208 = vst [vmem:[#allocation66_spill] sm:$0xff] %v20385_v9  ;;  %v16702_v33 = vpop.f32.mrb[36].mxu0  ;;  %16729 = vmatprep.mubr.msk.f32.mxu1 %vm4196_vm0, %v20385_v9 }
 0x72a   :  { %v20389_v29 = vadd.f32 %v16702_v33, %v4678_v0  ;;  %v4619_v25 = vpop.f32.mrb[37].mxu0  ;;  %16730 = vmatmul.mubr.msk.f32.gmra.mrb[50].mxu1 %vm4196_vm0, %v20381_v22 }
 0x72b   :  { %v20393_v13 = vadd.f32 %v4678_v0, %v4619_v25 }
 0x72c   :  { %23209 = vst [vmem:[#allocation68_spill] sm:$0xff] %v20389_v29 }
 0x72d   :  { %23210 = vst [vmem:[#allocation34_spill] sm:$0xff] %v20393_v13  ;;  %v16705_v37 = vpop.f32.mrb[38].mxu0  ;;  %16732 = vmatprep.mubr.msk.f32.mxu1 %vm4196_vm0, %v20393_v13 }
 0x72e   :  { %v20397_v49 = vadd.f32 %v16705_v37, %v4678_v0  ;;  %v4629_v11 = vpop.f32.mrb[39].mxu0  ;;  %16733 = vmatmul.mubr.msk.f32.gmra.mrb[52].mxu1 %vm4196_vm0, %v20389_v29 }
 0x72f   :  { %v20401_v26 = vadd.f32 %v4678_v0, %v4629_v11 }
 0x730   :  { %23211 = vst [vmem:[#allocation47_spill] sm:$0xff] %v20397_v49 }
 0x731   :  { %23212 = vst [vmem:[#allocation51_spill] sm:$0xff] %v20401_v26  ;;  %v16708_v38 = vpop.f32.mrb[40].mxu0  ;;  %16735 = vmatprep.mubr.msk.f32.mxu1 %vm4196_vm0, %v20401_v26 }
 0x732   :  { %v20405_v42 = vadd.f32 %v16708_v38, %v4678_v0  ;;  %v4639_v47 = vpop.f32.mrb[41].mxu0  ;;  %16736 = vmatmul.mubr.msk.f32.gmra.mrb[54].mxu1 %vm4196_vm0, %v20397_v49 }
 0x733   :  { %v20409_v46 = vadd.f32 %v4678_v0, %v4639_v47 }
 0x734   :  { %23213 = vst [vmem:[#allocation52_spill] sm:$0xff] %v20405_v42 }
 0x735   :  { %23214 = vst [vmem:[#allocation35_spill] sm:$0xff] %v20409_v46  ;;  %v16711_v23 = vpop.f32.mrb[42].mxu0  ;;  %16738 = vmatprep.mubr.msk.f32.mxu1 %vm4196_vm0, %v20409_v46 }
 0x736   :  { %v20413_v4 = vadd.f32 %v16711_v23, %v4678_v0  ;;  %v4649_v21 = vpop.f32.mrb[43].mxu0  ;;  %16739 = vmatmul.mubr.msk.f32.gmra.mrb[56].mxu1 %vm4196_vm0, %v20405_v42 }
 0x737   :  { %v20417_v62 = vadd.f32 %v4678_v0, %v4649_v21 }
 0x738   :  { %23215 = vst [vmem:[#allocation69_spill] sm:$0xff] %v20413_v4 }
 0x739   :  { %23216 = vst [vmem:[#allocation71_spill] sm:$0xff] %v20417_v62  ;;  %v16714_v19 = vpop.f32.mrb[44].mxu0  ;;  %16741 = vmatprep.mubr.msk.f32.mxu1 %vm4196_vm0, %v20417_v62 }
 0x73a   :  { %v20421_v15 = vadd.f32 %v16714_v19, %v4678_v0  ;;  %v4659_v50 = vpop.f32.mrb[45].mxu0  ;;  %16742 = vmatmul.mubr.msk.f32.gmra.mrb[58].mxu1 %vm4196_vm0, %v20413_v4 }
 0x73b   :  { %v20425_v28 = vadd.f32 %v4678_v0, %v4659_v50 }
 0x73c   :  { %23217 = vst [vmem:[#allocation70_spill] sm:$0xff] %v20421_v15 }
 0x73d   :  { %23218 = vst [vmem:[#allocation67_spill] sm:$0xff] %v20425_v28  ;;  %v16717_v7 = vpop.f32.mrb[46].mxu0  ;;  %16744 = vmatprep.mubr.msk.f32.mxu1 %vm4196_vm0, %v20425_v28 }
 0x73e   :  { %v20429_v48 = vadd.f32 %v16717_v7, %v4678_v0  ;;  %v4669_v58 = vpop.f32.mrb[47].mxu0  ;;  %16745 = vmatmul.mubr.msk.f32.gmra.mrb[60].mxu1 %vm4196_vm0, %v20421_v15 }
 0x73f   :  { %v20433_v51 = vadd.f32 %v4678_v0, %v4669_v58 }
 0x740   :  { %23219 = vst [vmem:[#allocation76_spill] sm:$0xff] %v20429_v48 }
 0x741   :  { %23220 = vst [vmem:[#allocation73_spill] sm:$0xff] %v20433_v51  ;;  %16747 = vmatprep.mubr.msk.f32.mxu1 %vm4196_vm0, %v20433_v51 }
 0x742   :  { %16748 = vmatmul.mubr.msk.f32.gmra.mrb[62].mxu1 %vm4196_vm0, %v20429_v48 }
 0x743   :  { %16752 = vmatprep.mubr.msk.f32.mxu1 %vm18203_vm1, %v22938_v55 }
 0x7f9   :  { %v20443_v12 = vpop.f32.mrb[48].mxu1 }
 0x7fa   :  { %5036 = vrot.lane.b32.xlu0 %v20443_v12, %s18199_s1  ;;  %v20447_v59 = vpop.f32.mrb[49].mxu1  ;;  %v4893_v45 = vmul.f32 %v20443_v12, %v20161_v3 }
 0x7fb   :  { %4958 = vrot.lane.b32.xlu1 %v20447_v59, %s18199_s1  ;;  %v4892_v6 = vmul.f32 %v20447_v59, %v20161_v3 }
 0x7fd   :  { %v20451_v57 = vpop.f32.mrb[50].mxu1 }
 0x7fe   :  { %v20453_v27 = vpop.f32.mrb[51].mxu1  ;;  %5192 = vrot.lane.b32.xlu0 %v20451_v57, %s18199_s1  ;;  %v4895_v54 = vmul.f32 %v20451_v57, %v20161_v3 }
 0x7ff   :  { %5114 = vrot.lane.b32.xlu1 %v20453_v27, %s18199_s1  ;;  %v4894_v0 = vmul.f32 %v20453_v27, %v20161_v3 }
 0x801   :  { %v20459_v35 = vpop.f32.mrb[52].mxu1 }
 0x802   :  { %v20461_v61 = vpop.f32.mrb[53].mxu1  ;;  %5348 = vrot.lane.b32.xlu0 %v20459_v35, %s18199_s1  ;;  %v4897_v11 = vmul.f32 %v20459_v35, %v20161_v3 }
 0x803   :  { %5270 = vrot.lane.b32.xlu1 %v20461_v61, %s18199_s1  ;;  %v4896_v30 = vmul.f32 %v20461_v61, %v20161_v3 }
 0x805   :  { %v20467_v14 = vpop.f32.mrb[54].mxu1 }
 0x806   :  { %v20469_v40 = vpop.f32.mrb[55].mxu1  ;;  %5504 = vrot.lane.b32.xlu0 %v20467_v14, %s18199_s1  ;;  %v4899_v23 = vmul.f32 %v20467_v14, %v20161_v3 }
 0x807   :  { %5426 = vrot.lane.b32.xlu1 %v20469_v40, %s18199_s1  ;;  %v4898_v33 = vmul.f32 %v20469_v40, %v20161_v3 }
 0x809   :  { %v20475_v20 = vpop.f32.mrb[56].mxu1 }
 0x80a   :  { %v20477_v8 = vpop.f32.mrb[57].mxu1  ;;  %5660 = vrot.lane.b32.xlu0 %v20475_v20, %s18199_s1  ;;  %v4901_v7 = vmul.f32 %v20475_v20, %v20161_v3 }
 0x80b   :  { %5582 = vrot.lane.b32.xlu1 %v20477_v8, %s18199_s1  ;;  %v4900_v38 = vmul.f32 %v20477_v8, %v20161_v3 }
 0x80d   :  { %v20483_v39 = vpop.f32.mrb[58].mxu1 }
 0x80e   :  { %v20485_v17 = vpop.f32.mrb[59].mxu1  ;;  %5816 = vrot.lane.b32.xlu0 %v20483_v39, %s18199_s1 }
 0x80f   :  { %5738 = vrot.lane.b32.xlu1 %v20485_v17, %s18199_s1  ;;  %v4902_v21 = vmul.f32 %v20485_v17, %v20161_v3 }
 0x811   :  { %v20491_v34 = vpop.f32.mrb[60].mxu1 }
 0x812   :  { %23221 = vst [vmem:[#allocation74_spill] sm:$0xff] %v20491_v34  ;;  %v20493_v32 = vpop.f32.mrb[61].mxu1  ;;  %5972 = vrot.lane.b32.xlu0 %v20491_v34, %s18199_s1 }
 0x813   :  { %5894 = vrot.lane.b32.xlu1 %v20493_v32, %s18199_s1  ;;  %v4904_v58 = vmul.f32 %v20493_v32, %v20161_v3 }
 0x815   :  { %v20499_v41 = vpop.f32.mrb[62].mxu1 }
 0x816   :  { %23222 = vst [vmem:[#allocation36_spill] sm:$0xff] %v20499_v41  ;;  %v20501_v24 = vpop.f32.mrb[63].mxu1  ;;  %6128 = vrot.lane.b32.xlu0 %v20499_v41, %s18199_s1 }
 0x817   :  { %6050 = vrot.lane.b32.xlu1 %v20501_v24, %s18199_s1 }
 0x86c   :  { %v20507_v43 = vpop.permute.xlu0 %5036 }
 0x86d   :  { %v20509_v53 = vpop.permute.xlu1 %4958 }
 0x86e   :  { %16751 = vmatpush3.xpose.msk.msra.mxu1 %vm4196_vm0, %v20509_v53 }
 0x86f   :  { %16755 = vmatprep.subr.mxu1 %v22938_v55 }
 0x870   :  { %v20516_v2 = vpop.permute.xlu0 %5192 }
 0x871   :  { %v20518_v36 = vpop.permute.xlu1 %5114  ;;  %16753 = vmatmul.mubr.msk.f32.vlgmr.msra.gmra.mrb[64].mxu1 %vm4196_vm0, %v4892_v6 }
 0x872   :  { %16756 = vmatpush3.xpose.msk.msra.mxu1 %vm4196_vm0, %v20507_v43  ;;  %16757 = vmatprep.mubr.msk.f32.mxu1 %vm18203_vm1, %v22938_v55 }
 0x873   :  { %16760 = vmatprep.subr.mxu1 %v22938_v55 }
 0x874   :  { %v20528_v5 = vpop.permute.xlu0 %5348 }
 0x875   :  { %v20530_v63 = vpop.permute.xlu1 %5270  ;;  %16758 = vmatmul.mubr.msk.f32.vlgmr.msra.gmra.mrb[66].mxu1 %vm4196_vm0, %v4893_v45 }
 0x876   :  { %16761 = vmatpush3.xpose.msk.msra.mxu1 %vm4196_vm0, %v20518_v36  ;;  %16771 = vmatpush3.xpose.msk.msra.mxu0 %vm4196_vm0, %v20530_v63 }
 0x877   :  { %16762 = vmatprep.mubr.msk.f32.mxu1 %vm18203_vm1, %v22938_v55  ;;  %16780 = vmatprep.subr.mxu0 %v22938_v55 }
 0x878   :  { %16765 = vmatprep.subr.mxu1 %v22938_v55  ;;  %v20545_v52 = vpop.permute.xlu0 %5504 }
 0x879   :  { %16773 = vmatmul.mubr.msk.f32.vlgmr.msra.gmra.mrb[48].mxu0 %vm4196_vm0, %v4896_v30  ;;  %v20548_v1 = vpop.permute.xlu1 %5426  ;;  %16763 = vmatmul.mubr.msk.f32.vlgmr.msra.gmra.mrb[68].mxu1 %vm4196_vm0, %v4894_v0  ;;  %v4903_v0 = vmul.f32 %v20483_v39, %v20161_v3  ;;  %v4906_v30 = vmul.f32 %v20501_v24, %v20161_v3 }
 0x87a   :  { %16766 = vmatpush3.xpose.msk.msra.mxu1 %vm4196_vm0, %v20516_v2  ;;  %16781 = vmatpush3.xpose.msk.msra.mxu0 %vm4196_vm0, %v20548_v1 }
 0x87b   :  { %16767 = vmatprep.mubr.msk.f32.mxu1 %vm18203_vm1, %v22938_v55  ;;  %16782 = vmatprep.mubr.msk.f32.mxu0 %vm18203_vm1, %v22938_v55 }
 0x87c   :  { %16790 = vmatprep.subr.mxu0 %v22938_v55  ;;  %16775 = vmatprep.subr.mxu1 %v22938_v55  ;;  %v20569_v37 = vpop.permute.xlu0 %5660 }
 0x87d   :  { %16783 = vmatmul.mubr.msk.f32.vlgmr.msra.gmra.mrb[50].mxu0 %vm4196_vm0, %v4898_v33  ;;  %v20566_v25 = vpop.permute.xlu1 %5582  ;;  %16768 = vmatmul.mubr.msk.f32.vlgmr.msra.gmra.mrb[70].mxu1 %vm4196_vm0, %v4895_v54  ;;  %v4908_v54 = vmul.f32 %v20447_v59, %v20164_v10  ;;  %v4905_v33 = vmul.f32 %v20491_v34, %v20161_v3 }
 0x87e   :  { %16776 = vmatpush3.xpose.msk.msra.mxu1 %vm4196_vm0, %v20528_v5  ;;  %16791 = vmatpush3.xpose.msk.msra.mxu0 %vm4196_vm0, %v20566_v25 }
 0x87f   :  { %16777 = vmatprep.mubr.msk.f32.mxu1 %vm18203_vm1, %v22938_v55  ;;  %16792 = vmatprep.mubr.msk.f32.mxu0 %vm18203_vm1, %v22938_v55 }
 0x880   :  { %16800 = vmatprep.subr.mxu0 %v22938_v55  ;;  %16785 = vmatprep.subr.mxu1 %v22938_v55  ;;  %v20601_v19 = vpop.permute.xlu0 %5816 }
 0x881   :  { %16793 = vmatmul.mubr.msk.f32.vlgmr.msra.gmra.mrb[52].mxu0 %vm4196_vm0, %v4900_v38  ;;  %v20586_v47 = vpop.permute.xlu1 %5738  ;;  %16778 = vmatmul.mubr.msk.f32.vlgmr.msra.gmra.mrb[72].mxu1 %vm4196_vm0, %v4897_v11  ;;  %v4910_v38 = vmul.f32 %v20453_v27, %v20164_v10 }
 0x882   :  { %16786 = vmatpush3.xpose.msk.msra.mxu1 %vm4196_vm0, %v20545_v52  ;;  %16801 = vmatpush3.xpose.msk.msra.mxu0 %vm4196_vm0, %v20586_v47 }
 0x883   :  { %16787 = vmatprep.mubr.msk.f32.mxu1 %vm18203_vm1, %v22938_v55  ;;  %16802 = vmatprep.mubr.msk.f32.mxu0 %vm18203_vm1, %v22938_v55 }
 0x884   :  { %16810 = vmatprep.subr.mxu0 %v22938_v55  ;;  %16795 = vmatprep.subr.mxu1 %v22938_v55  ;;  %v20627_v45 = vpop.permute.xlu0 %5972 }
 0x885   :  { %16803 = vmatmul.mubr.msk.f32.vlgmr.msra.gmra.mrb[54].mxu0 %vm4196_vm0, %v4902_v21  ;;  %v20606_v50 = vpop.permute.xlu1 %5894  ;;  %16788 = vmatmul.mubr.msk.f32.vlgmr.msra.gmra.mrb[74].mxu1 %vm4196_vm0, %v4899_v23  ;;  %v4907_v23 = vmul.f32 %v20499_v41, %v20161_v3  ;;  %v4909_v21 = vmul.f32 %v20443_v12, %v20164_v10 }
 0x886   :  { %16796 = vmatpush3.xpose.msk.msra.mxu1 %vm4196_vm0, %v20569_v37  ;;  %16811 = vmatpush3.xpose.msk.msra.mxu0 %vm4196_vm0, %v20606_v50 }
 0x887   :  { %16797 = vmatprep.mubr.msk.f32.mxu1 %vm18203_vm1, %v22938_v55  ;;  %16812 = vmatprep.mubr.msk.f32.mxu0 %vm18203_vm1, %v22938_v55 }
 0x888   :  { %16805 = vmatprep.subr.mxu1 %v22938_v55  ;;  %16820 = vmatprep.subr.mxu0 %v22938_v55  ;;  %v20657_v11 = vpop.permute.xlu0 %6128 }
 0x889   :  { %16798 = vmatmul.mubr.msk.f32.vlgmr.msra.gmra.mrb[76].mxu1 %vm4196_vm0, %v4901_v7  ;;  %16813 = vmatmul.mubr.msk.f32.vlgmr.msra.gmra.mrb[56].mxu0 %vm4196_vm0, %v4904_v58  ;;  %v20625_v6 = vpop.permute.xlu1 %6050  ;;  %v4912_v7 = vmul.f32 %v20461_v61, %v20164_v10  ;;  %v4911_v58 = vmul.f32 %v20451_v57, %v20164_v10 }
 0x88a   :  { %16806 = vmatpush3.xpose.msk.msra.mxu1 %vm4196_vm0, %v20601_v19  ;;  %16821 = vmatpush3.xpose.msk.msra.mxu0 %vm4196_vm0, %v20625_v6 }
 0x88b   :  { %16807 = vmatprep.mubr.msk.f32.mxu1 %vm18203_vm1, %v22938_v55  ;;  %16822 = vmatprep.mubr.msk.f32.mxu0 %vm18203_vm1, %v22938_v55 }
 0x88c   :  { %16815 = vmatprep.subr.mxu1 %v22938_v55  ;;  %16830 = vmatprep.subr.mxu0 %v22938_v55 }
 0x88d   :  { %16808 = vmatmul.mubr.msk.f32.vlgmr.msra.gmra.mrb[78].mxu1 %vm4196_vm0, %v4903_v0  ;;  %16823 = vmatmul.mubr.msk.f32.vlgmr.msra.gmra.mrb[58].mxu0 %vm4196_vm0, %v4906_v30  ;;  %v4914_v0 = vmul.f32 %v20469_v40, %v20164_v10  ;;  %v4913_v30 = vmul.f32 %v20459_v35, %v20164_v10 }
 0x88e   :  { %16816 = vmatpush3.xpose.msk.msra.mxu1 %vm4196_vm0, %v20627_v45  ;;  %16831 = vmatpush3.xpose.msk.msra.mxu0 %vm4196_vm0, %v20509_v53 }
 0x88f   :  { %16817 = vmatprep.mubr.msk.f32.mxu1 %vm18203_vm1, %v22938_v55  ;;  %16832 = vmatprep.mubr.msk.f32.mxu0 %vm18203_vm1, %v22938_v55 }
 0x890   :  { %16825 = vmatprep.subr.mxu1 %v22938_v55  ;;  %16840 = vmatprep.subr.mxu0 %v22938_v55 }
 0x891   :  { %16818 = vmatmul.mubr.msk.f32.vlgmr.msra.gmra.mrb[80].mxu1 %vm4196_vm0, %v4905_v33  ;;  %16833 = vmatmul.mubr.msk.f32.vlgmr.msra.gmra.mrb[60].mxu0 %vm4196_vm0, %v4908_v54  ;;  %v4916_v54 = vmul.f32 %v20477_v8, %v20164_v10  ;;  %v4915_v33 = vmul.f32 %v20467_v14, %v20164_v10 }
 0x892   :  { %16826 = vmatpush3.xpose.msk.msra.mxu1 %vm4196_vm0, %v20657_v11  ;;  %16841 = vmatpush3.xpose.msk.msra.mxu0 %vm4196_vm0, %v20518_v36 }
 0x893   :  { %16827 = vmatprep.mubr.msk.f32.mxu1 %vm18203_vm1, %v22938_v55  ;;  %16842 = vmatprep.mubr.msk.f32.mxu0 %vm18203_vm1, %v22938_v55 }
 0x894   :  { %16835 = vmatprep.subr.mxu1 %v22938_v55  ;;  %16850 = vmatprep.subr.mxu0 %v22938_v55 }
 0x895   :  { %16828 = vmatmul.mubr.msk.f32.vlgmr.msra.gmra.mrb[82].mxu1 %vm4196_vm0, %v4907_v23  ;;  %16843 = vmatmul.mubr.msk.f32.vlgmr.msra.gmra.mrb[62].mxu0 %vm4196_vm0, %v4910_v38  ;;  %v4918_v38 = vmul.f32 %v20485_v17, %v20164_v10  ;;  %v4917_v23 = vmul.f32 %v20475_v20, %v20164_v10 }
 0x896   :  { %16836 = vmatpush3.xpose.msk.msra.mxu1 %vm4196_vm0, %v20507_v43  ;;  %16851 = vmatpush3.xpose.msk.msra.mxu0 %vm4196_vm0, %v20530_v63 }
 0x897   :  { %16837 = vmatprep.mubr.msk.f32.mxu1 %vm18203_vm1, %v22938_v55  ;;  %16852 = vmatprep.mubr.msk.f32.mxu0 %vm18203_vm1, %v22938_v55 }
 0x898   :  { %16845 = vmatprep.subr.mxu1 %v22938_v55  ;;  %16860 = vmatprep.subr.mxu0 %v22938_v55 }
 0x899   :  { %16838 = vmatmul.mubr.msk.f32.vlgmr.msra.gmra.mrb[84].mxu1 %vm4196_vm0, %v4909_v21  ;;  %16853 = vmatmul.mubr.msk.f32.vlgmr.msra.gmra.mrb[64].mxu0 %vm4196_vm0, %v4912_v7  ;;  %v4920_v21 = vmul.f32 %v20493_v32, %v20164_v10  ;;  %v4919_v7 = vmul.f32 %v20483_v39, %v20164_v10 }
 0x89a   :  { %16846 = vmatpush3.xpose.msk.msra.mxu1 %vm4196_vm0, %v20516_v2  ;;  %16861 = vmatpush3.xpose.msk.msra.mxu0 %vm4196_vm0, %v20548_v1 }
 0x89b   :  { %16847 = vmatprep.mubr.msk.f32.mxu1 %vm18203_vm1, %v22938_v55  ;;  %16862 = vmatprep.mubr.msk.f32.mxu0 %vm18203_vm1, %v22938_v55 }
 0x89c   :  { %16855 = vmatprep.subr.mxu1 %v22938_v55  ;;  %16870 = vmatprep.subr.mxu0 %v22938_v55 }
 0x89d   :  { %16848 = vmatmul.mubr.msk.f32.vlgmr.msra.gmra.mrb[86].mxu1 %vm4196_vm0, %v4911_v58  ;;  %16863 = vmatmul.mubr.msk.f32.vlgmr.msra.gmra.mrb[66].mxu0 %vm4196_vm0, %v4914_v0  ;;  %v4922_v58 = vmul.f32 %v20501_v24, %v20164_v10  ;;  %v4924_v0 = vmul.f32 %v20447_v59, %v20169_v60 }
 0x89e   :  { %16856 = vmatpush3.xpose.msk.msra.mxu1 %vm4196_vm0, %v20528_v5  ;;  %16871 = vmatpush3.xpose.msk.msra.mxu0 %vm4196_vm0, %v20566_v25 }
 0x89f   :  { %16857 = vmatprep.mubr.msk.f32.mxu1 %vm18203_vm1, %v22938_v55  ;;  %16872 = vmatprep.mubr.msk.f32.mxu0 %vm18203_vm1, %v22938_v55 }
 0x8a0   :  { %16865 = vmatprep.subr.mxu1 %v22938_v55  ;;  %16880 = vmatprep.subr.mxu0 %v22938_v55 }
 0x8a1   :  { %16858 = vmatmul.mubr.msk.f32.vlgmr.msra.gmra.mrb[88].mxu1 %vm4196_vm0, %v4913_v30  ;;  %16873 = vmatmul.mubr.msk.f32.vlgmr.msra.gmra.mrb[68].mxu0 %vm4196_vm0, %v4916_v54  ;;  %v4921_v30 = vmul.f32 %v20491_v34, %v20164_v10  ;;  %v4926_v54 = vmul.f32 %v20453_v27, %v20169_v60 }
 0x8a2   :  { %16866 = vmatpush3.xpose.msk.msra.mxu1 %vm4196_vm0, %v20545_v52  ;;  %16881 = vmatpush3.xpose.msk.msra.mxu0 %vm4196_vm0, %v20586_v47 }
 0x8a3   :  { %16867 = vmatprep.mubr.msk.f32.mxu1 %vm18203_vm1, %v22938_v55  ;;  %16882 = vmatprep.mubr.msk.f32.mxu0 %vm18203_vm1, %v22938_v55 }
 0x8a4   :  { %16875 = vmatprep.subr.mxu1 %v22938_v55  ;;  %16890 = vmatprep.subr.mxu0 %v22938_v55 }
 0x8a5   :  { %16868 = vmatmul.mubr.msk.f32.vlgmr.msra.gmra.mrb[90].mxu1 %vm4196_vm0, %v4915_v33  ;;  %16883 = vmatmul.mubr.msk.f32.vlgmr.msra.gmra.mrb[70].mxu0 %vm4196_vm0, %v4918_v38  ;;  %v4923_v33 = vmul.f32 %v20499_v41, %v20164_v10  ;;  %v4925_v38 = vmul.f32 %v20443_v12, %v20169_v60 }
 0x8a6   :  { %16876 = vmatpush3.xpose.msk.msra.mxu1 %vm4196_vm0, %v20569_v37  ;;  %16891 = vmatpush3.xpose.msk.msra.mxu0 %vm4196_vm0, %v20606_v50 }
 0x8a7   :  { %16877 = vmatprep.mubr.msk.f32.mxu1 %vm18203_vm1, %v22938_v55  ;;  %16892 = vmatprep.mubr.msk.f32.mxu0 %vm18203_vm1, %v22938_v55 }
 0x8a8   :  { %16885 = vmatprep.subr.mxu1 %v22938_v55  ;;  %16900 = vmatprep.subr.mxu0 %v22938_v55 }
 0x8a9   :  { %16878 = vmatmul.mubr.msk.f32.vlgmr.msra.gmra.mrb[92].mxu1 %vm4196_vm0, %v4917_v23  ;;  %16893 = vmatmul.mubr.msk.f32.vlgmr.msra.gmra.mrb[72].mxu0 %vm4196_vm0, %v4920_v21  ;;  %v4928_v23 = vmul.f32 %v20461_v61, %v20169_v60  ;;  %v4927_v21 = vmul.f32 %v20451_v57, %v20169_v60 }
 0x8aa   :  { %16886 = vmatpush3.xpose.msk.msra.mxu1 %vm4196_vm0, %v20601_v19  ;;  %16901 = vmatpush3.xpose.msk.msra.mxu0 %vm4196_vm0, %v20625_v6 }
 0x8ab   :  { %16887 = vmatprep.mubr.msk.f32.mxu1 %vm18203_vm1, %v22938_v55  ;;  %16902 = vmatprep.mubr.msk.f32.mxu0 %vm18203_vm1, %v22938_v55 }
 0x8ac   :  { %16895 = vmatprep.subr.mxu1 %v22938_v55  ;;  %16910 = vmatprep.subr.mxu0 %v22938_v55 }
 0x8ad   :  { %16888 = vmatmul.mubr.msk.f32.vlgmr.msra.gmra.mrb[94].mxu1 %vm4196_vm0, %v4919_v7  ;;  %16903 = vmatmul.mubr.msk.f32.vlgmr.msra.gmra.mrb[74].mxu0 %vm4196_vm0, %v4922_v58  ;;  %v4930_v7 = vmul.f32 %v20469_v40, %v20169_v60  ;;  %v4929_v58 = vmul.f32 %v20459_v35, %v20169_v60 }
 0x8ae   :  { %16896 = vmatpush3.xpose.msk.msra.mxu1 %vm4196_vm0, %v20627_v45  ;;  %16911 = vmatpush3.xpose.msk.msra.mxu0 %vm4196_vm0, %v20509_v53 }
 0x8af   :  { %16897 = vmatprep.mubr.msk.f32.mxu1 %vm18203_vm1, %v22938_v55  ;;  %16912 = vmatprep.mubr.msk.f32.mxu0 %vm18203_vm1, %v22938_v55 }
 0x8b0   :  { %16905 = vmatprep.subr.mxu1 %v22938_v55  ;;  %16920 = vmatprep.subr.mxu0 %v22938_v55 }
 0x8b1   :  { %16898 = vmatmul.mubr.msk.f32.vlgmr.msra.gmra.mrb[96].mxu1 %vm4196_vm0, %v4921_v30  ;;  %16913 = vmatmul.mubr.msk.f32.vlgmr.msra.gmra.mrb[76].mxu0 %vm4196_vm0, %v4924_v0  ;;  %v4932_v0 = vmul.f32 %v20477_v8, %v20169_v60  ;;  %v4931_v30 = vmul.f32 %v20467_v14, %v20169_v60 }
 0x8b2   :  { %16906 = vmatpush3.xpose.msk.msra.mxu1 %vm4196_vm0, %v20657_v11  ;;  %16921 = vmatpush3.xpose.msk.msra.mxu0 %vm4196_vm0, %v20518_v36 }
 0x8b3   :  { %16907 = vmatprep.mubr.msk.f32.mxu1 %vm18203_vm1, %v22938_v55  ;;  %16922 = vmatprep.mubr.msk.f32.mxu0 %vm18203_vm1, %v22938_v55 }
 0x8b4   :  { %16915 = vmatprep.subr.mxu1 %v22938_v55  ;;  %16930 = vmatprep.subr.mxu0 %v22938_v55 }
 0x8b5   :  { %16908 = vmatmul.mubr.msk.f32.vlgmr.msra.gmra.mrb[98].mxu1 %vm4196_vm0, %v4923_v33  ;;  %16923 = vmatmul.mubr.msk.f32.vlgmr.msra.gmra.mrb[78].mxu0 %vm4196_vm0, %v4926_v54  ;;  %v4934_v54 = vmul.f32 %v20485_v17, %v20169_v60  ;;  %v4933_v33 = vmul.f32 %v20475_v20, %v20169_v60 }
 0x8b6   :  { %16916 = vmatpush3.xpose.msk.msra.mxu1 %vm4196_vm0, %v20507_v43  ;;  %16931 = vmatpush3.xpose.msk.msra.mxu0 %vm4196_vm0, %v20530_v63 }
 0x8b7   :  { %16917 = vmatprep.mubr.msk.f32.mxu1 %vm18203_vm1, %v22938_v55  ;;  %16932 = vmatprep.mubr.msk.f32.mxu0 %vm18203_vm1, %v22938_v55 }
 0x8b8   :  { %16925 = vmatprep.subr.mxu1 %v22938_v55  ;;  %16940 = vmatprep.subr.mxu0 %v22938_v55 }
 0x8b9   :  { %16918 = vmatmul.mubr.msk.f32.vlgmr.msra.gmra.mrb[100].mxu1 %vm4196_vm0, %v4925_v38  ;;  %16933 = vmatmul.mubr.msk.f32.vlgmr.msra.gmra.mrb[80].mxu0 %vm4196_vm0, %v4928_v23  ;;  %v4936_v38 = vmul.f32 %v20493_v32, %v20169_v60  ;;  %v4935_v23 = vmul.f32 %v20483_v39, %v20169_v60 }
 0x8ba   :  { %16926 = vmatpush3.xpose.msk.msra.mxu1 %vm4196_vm0, %v20516_v2  ;;  %16941 = vmatpush3.xpose.msk.msra.mxu0 %vm4196_vm0, %v20548_v1 }
 0x8bb   :  { %16927 = vmatprep.mubr.msk.f32.mxu1 %vm18203_vm1, %v22938_v55  ;;  %16942 = vmatprep.mubr.msk.f32.mxu0 %vm18203_vm1, %v22938_v55 }
 0x8bc   :  { %16935 = vmatprep.subr.mxu1 %v22938_v55  ;;  %16950 = vmatprep.subr.mxu0 %v22938_v55 }
 0x8bd   :  { %16928 = vmatmul.mubr.msk.f32.vlgmr.msra.gmra.mrb[102].mxu1 %vm4196_vm0, %v4927_v21  ;;  %16943 = vmatmul.mubr.msk.f32.vlgmr.msra.gmra.mrb[82].mxu0 %vm4196_vm0, %v4930_v7  ;;  %v4938_v21 = vmul.f32 %v20501_v24, %v20169_v60  ;;  %v4940_v7 = vmul.f32 %v20447_v59, %v20178_v44 }
 0x8be   :  { %16936 = vmatpush3.xpose.msk.msra.mxu1 %vm4196_vm0, %v20528_v5  ;;  %16951 = vmatpush3.xpose.msk.msra.mxu0 %vm4196_vm0, %v20566_v25 }
 0x8bf   :  { %16937 = vmatprep.mubr.msk.f32.mxu1 %vm18203_vm1, %v22938_v55  ;;  %16952 = vmatprep.mubr.msk.f32.mxu0 %vm18203_vm1, %v22938_v55 }
 0x8c0   :  { %16945 = vmatprep.subr.mxu1 %v22938_v55  ;;  %16960 = vmatprep.subr.mxu0 %v22938_v55 }
 0x8c1   :  { %16938 = vmatmul.mubr.msk.f32.vlgmr.msra.gmra.mrb[104].mxu1 %vm4196_vm0, %v4929_v58  ;;  %16953 = vmatmul.mubr.msk.f32.vlgmr.msra.gmra.mrb[84].mxu0 %vm4196_vm0, %v4932_v0  ;;  %v4937_v58 = vmul.f32 %v20491_v34, %v20169_v60  ;;  %v4939_v0 = vmul.f32 %v20499_v41, %v20169_v60 }
 0x8c2   :  { %16946 = vmatpush3.xpose.msk.msra.mxu1 %vm4196_vm0, %v20545_v52  ;;  %16961 = vmatpush3.xpose.msk.msra.mxu0 %vm4196_vm0, %v20586_v47 }
 0x8c3   :  { %16947 = vmatprep.mubr.msk.f32.mxu1 %vm18203_vm1, %v22938_v55  ;;  %16962 = vmatprep.mubr.msk.f32.mxu0 %vm18203_vm1, %v22938_v55 }
 0x8c4   :  { %16955 = vmatprep.subr.mxu1 %v22938_v55  ;;  %16970 = vmatprep.subr.mxu0 %v22938_v55 }
 0x8c5   :  { %16948 = vmatmul.mubr.msk.f32.vlgmr.msra.gmra.mrb[106].mxu1 %vm4196_vm0, %v4931_v30  ;;  %16963 = vmatmul.mubr.msk.f32.vlgmr.msra.gmra.mrb[86].mxu0 %vm4196_vm0, %v4934_v54  ;;  %v4944_v30 = vmul.f32 %v20461_v61, %v20178_v44 }
 0x8c6   :  { %16956 = vmatpush3.xpose.msk.msra.mxu1 %vm4196_vm0, %v20569_v37  ;;  %16971 = vmatpush3.xpose.msk.msra.mxu0 %vm4196_vm0, %v20606_v50 }
 0x8c7   :  { %16957 = vmatprep.mubr.msk.f32.mxu1 %vm18203_vm1, %v22938_v55  ;;  %16972 = vmatprep.mubr.msk.f32.mxu0 %vm18203_vm1, %v22938_v55 }
 0x8c8   :  { %16965 = vmatprep.subr.mxu1 %v22938_v55  ;;  %16980 = vmatprep.subr.mxu0 %v22938_v55 }
 0x8c9   :  { %16958 = vmatmul.mubr.msk.f32.vlgmr.msra.gmra.mrb[108].mxu1 %vm4196_vm0, %v4933_v33  ;;  %16973 = vmatmul.mubr.msk.f32.vlgmr.msra.gmra.mrb[88].mxu0 %vm4196_vm0, %v4936_v38 }
 0x8ca   :  { %16966 = vmatpush3.xpose.msk.msra.mxu1 %vm4196_vm0, %v20601_v19  ;;  %16981 = vmatpush3.xpose.msk.msra.mxu0 %vm4196_vm0, %v20625_v6 }
 0x8cb   :  { %16967 = vmatprep.mubr.msk.f32.mxu1 %vm18203_vm1, %v22938_v55  ;;  %16982 = vmatprep.mubr.msk.f32.mxu0 %vm18203_vm1, %v22938_v55 }
 0x8cc   :  { %16975 = vmatprep.subr.mxu1 %v22938_v55  ;;  %16990 = vmatprep.subr.mxu0 %v22938_v55 }
 0x8cd   :  { %16968 = vmatmul.mubr.msk.f32.vlgmr.msra.gmra.mrb[110].mxu1 %vm4196_vm0, %v4935_v23  ;;  %16983 = vmatmul.mubr.msk.f32.vlgmr.msra.gmra.mrb[90].mxu0 %vm4196_vm0, %v4938_v21 }
 0x8ce   :  { %16976 = vmatpush3.xpose.msk.msra.mxu1 %vm4196_vm0, %v20627_v45  ;;  %16991 = vmatpush3.xpose.msk.msra.mxu0 %vm4196_vm0, %v20509_v53  ;;  %v4942_v53 = vmul.f32 %v20453_v27, %v20178_v44 }
 0x8cf   :  { %16977 = vmatprep.mubr.msk.f32.mxu1 %vm18203_vm1, %v22938_v55  ;;  %16992 = vmatprep.mubr.msk.f32.mxu0 %vm18203_vm1, %v22938_v55 }
 0x8d0   :  { %16985 = vmatprep.subr.mxu1 %v22938_v55  ;;  %17000 = vmatprep.subr.mxu0 %v22938_v55 }
 0x8d1   :  { %16978 = vmatmul.mubr.msk.f32.vlgmr.msra.gmra.mrb[112].mxu1 %vm4196_vm0, %v4937_v58  ;;  %16993 = vmatmul.mubr.msk.f32.vlgmr.msra.gmra.mrb[92].mxu0 %vm4196_vm0, %v4940_v7 }
 0x8d2   :  { %16986 = vmatpush3.xpose.msk.msra.mxu1 %vm4196_vm0, %v20657_v11  ;;  %17001 = vmatpush3.xpose.msk.msra.mxu0 %vm4196_vm0, %v20518_v36  ;;  %v4941_v36 = vmul.f32 %v20443_v12, %v20178_v44 }
 0x8d3   :  { %16987 = vmatprep.mubr.msk.f32.mxu1 %vm18203_vm1, %v22938_v55  ;;  %17002 = vmatprep.mubr.msk.f32.mxu0 %vm18203_vm1, %v22938_v55 }
 0x8d4   :  { %16995 = vmatprep.subr.mxu1 %v22938_v55  ;;  %17010 = vmatprep.subr.mxu0 %v22938_v55 }
 0x8d5   :  { %16988 = vmatmul.mubr.msk.f32.vlgmr.msra.gmra.mrb[114].mxu1 %vm4196_vm0, %v4939_v0  ;;  %17003 = vmatmul.mubr.msk.f32.vlgmr.msra.gmra.mrb[94].mxu0 %vm4196_vm0, %v4942_v53 }
 0x8d6   :  { %16996 = vmatpush3.xpose.msk.msra.mxu1 %vm4196_vm0, %v20507_v43  ;;  %17011 = vmatpush3.xpose.msk.msra.mxu0 %vm4196_vm0, %v20530_v63  ;;  %v4943_v43 = vmul.f32 %v20451_v57, %v20178_v44  ;;  %v4946_v63 = vmul.f32 %v20469_v40, %v20178_v44 }
 0x8d7   :  { %16997 = vmatprep.mubr.msk.f32.mxu1 %vm18203_vm1, %v22938_v55  ;;  %17012 = vmatprep.mubr.msk.f32.mxu0 %vm18203_vm1, %v22938_v55 }
 0x8d8   :  { %17005 = vmatprep.subr.mxu1 %v22938_v55  ;;  %17020 = vmatprep.subr.mxu0 %v22938_v55 }
 0x8d9   :  { %16998 = vmatmul.mubr.msk.f32.vlgmr.msra.gmra.mrb[116].mxu1 %vm4196_vm0, %v4941_v36  ;;  %17013 = vmatmul.mubr.msk.f32.vlgmr.msra.gmra.mrb[96].mxu0 %vm4196_vm0, %v4944_v30 }
 0x8da   :  { %17006 = vmatpush3.xpose.msk.msra.mxu1 %vm4196_vm0, %v20516_v2  ;;  %17021 = vmatpush3.xpose.msk.msra.mxu0 %vm4196_vm0, %v20548_v1  ;;  %v4945_v2 = vmul.f32 %v20459_v35, %v20178_v44  ;;  %v4948_v1 = vmul.f32 %v20477_v8, %v20178_v44 }
 0x8db   :  { %17007 = vmatprep.mubr.msk.f32.mxu1 %vm18203_vm1, %v22938_v55  ;;  %17022 = vmatprep.mubr.msk.f32.mxu0 %vm18203_vm1, %v22938_v55 }
 0x8dc   :  { %17015 = vmatprep.subr.mxu1 %v22938_v55  ;;  %17030 = vmatprep.subr.mxu0 %v22938_v55 }
 0x8dd   :  { %17008 = vmatmul.mubr.msk.f32.vlgmr.msra.gmra.mrb[118].mxu1 %vm4196_vm0, %v4943_v43  ;;  %17023 = vmatmul.mubr.msk.f32.vlgmr.msra.gmra.mrb[98].mxu0 %vm4196_vm0, %v4946_v63 }
 0x8de   :  { %17016 = vmatpush3.xpose.msk.msra.mxu1 %vm4196_vm0, %v20528_v5  ;;  %17031 = vmatpush3.xpose.msk.msra.mxu0 %vm4196_vm0, %v20566_v25  ;;  %v4947_v5 = vmul.f32 %v20467_v14, %v20178_v44  ;;  %v4950_v25 = vmul.f32 %v20485_v17, %v20178_v44 }
 0x8df   :  { %17017 = vmatprep.mubr.msk.f32.mxu1 %vm18203_vm1, %v22938_v55  ;;  %17032 = vmatprep.mubr.msk.f32.mxu0 %vm18203_vm1, %v22938_v55 }
 0x8e0   :  { %17025 = vmatprep.subr.mxu1 %v22938_v55  ;;  %17040 = vmatprep.subr.mxu0 %v22938_v55 }
 0x8e1   :  { %17018 = vmatmul.mubr.msk.f32.vlgmr.msra.gmra.mrb[120].mxu1 %vm4196_vm0, %v4945_v2  ;;  %17033 = vmatmul.mubr.msk.f32.vlgmr.msra.gmra.mrb[100].mxu0 %vm4196_vm0, %v4948_v1 }
 0x8e2   :  { %17026 = vmatpush3.xpose.msk.msra.mxu1 %vm4196_vm0, %v20545_v52  ;;  %17041 = vmatpush3.xpose.msk.msra.mxu0 %vm4196_vm0, %v20586_v47  ;;  %v4949_v52 = vmul.f32 %v20475_v20, %v20178_v44  ;;  %v4952_v47 = vmul.f32 %v20493_v32, %v20178_v44 }
 0x8e3   :  { %17027 = vmatprep.mubr.msk.f32.mxu1 %vm18203_vm1, %v22938_v55  ;;  %17042 = vmatprep.mubr.msk.f32.mxu0 %vm18203_vm1, %v22938_v55 }
 0x8e4   :  { %17035 = vmatprep.subr.mxu1 %v22938_v55  ;;  %17050 = vmatprep.subr.mxu0 %v22938_v55 }
 0x8e5   :  { %17028 = vmatmul.mubr.msk.f32.vlgmr.msra.gmra.mrb[122].mxu1 %vm4196_vm0, %v4947_v5  ;;  %17043 = vmatmul.mubr.msk.f32.vlgmr.msra.gmra.mrb[102].mxu0 %vm4196_vm0, %v4950_v25 }
 0x8e6   :  { %17036 = vmatpush3.xpose.msk.msra.mxu1 %vm4196_vm0, %v20569_v37  ;;  %17051 = vmatpush3.xpose.msk.msra.mxu0 %vm4196_vm0, %v20606_v50  ;;  %v4951_v37 = vmul.f32 %v20483_v39, %v20178_v44  ;;  %v4954_v50 = vmul.f32 %v20501_v24, %v20178_v44 }
 0x8e7   :  { %17037 = vmatprep.mubr.msk.f32.mxu1 %vm18203_vm1, %v22938_v55  ;;  %17052 = vmatprep.mubr.msk.f32.mxu0 %vm18203_vm1, %v22938_v55 }
 0x8e8   :  { %17045 = vmatprep.subr.mxu1 %v22938_v55  ;;  %17060 = vmatprep.subr.mxu0 %v22938_v55 }
 0x8e9   :  { %17038 = vmatmul.mubr.msk.f32.vlgmr.msra.gmra.mrb[124].mxu1 %vm4196_vm0, %v4949_v52  ;;  %17053 = vmatmul.mubr.msk.f32.vlgmr.msra.gmra.mrb[104].mxu0 %vm4196_vm0, %v4952_v47 }
 0x8ea   :  { %17046 = vmatpush3.xpose.msk.msra.mxu1 %vm4196_vm0, %v20601_v19  ;;  %17061 = vmatpush3.xpose.msk.msra.mxu0 %vm4196_vm0, %v20625_v6  ;;  %v4953_v19 = vmul.f32 %v20491_v34, %v20178_v44  ;;  %v4955_v6 = vmul.f32 %v20499_v41, %v20178_v44 }
 0x8eb   :  { %17047 = vmatprep.mubr.msk.f32.mxu1 %vm18203_vm1, %v22938_v55  ;;  %17062 = vmatprep.mubr.msk.f32.mxu0 %vm18203_vm1, %v22938_v55 }
 0x8ec   :  { %17055 = vmatprep.subr.mxu1 %v22938_v55  ;;  %17070 = vmatprep.subr.mxu0 %v22938_v55 }
 0x8ed   :  { %17048 = vmatmul.mubr.msk.f32.vlgmr.msra.gmra.mrb[126].mxu1 %vm4196_vm0, %v4951_v37  ;;  %17063 = vmatmul.mubr.msk.f32.vlgmr.msra.gmra.mrb[106].mxu0 %vm4196_vm0, %v4954_v50 }
 0x8ee   :  { %17056 = vmatpush3.xpose.msk.msra.mxu1 %vm4196_vm0, %v20627_v45  ;;  %17057 = vmatprep.mubr.msk.f32.mxu1 %vm18203_vm1, %v22938_v55 }
 0x8ef   :  { %17065 = vmatprep.subr.mxu1 %v22938_v55  ;;  %17072 = vmatprep.mubr.msk.f32.mxu0 %vm18203_vm1, %v22938_v55 }
 0x8f1   :  { %17058 = vmatmul.mubr.msk.f32.vlgmr.msra.gmra.mrb[128].mxu1 %vm4196_vm0, %v4953_v19 }
 0x8f2   :  { %17066 = vmatpush3.xpose.msk.msra.mxu1 %vm4196_vm0, %v20657_v11  ;;  %17067 = vmatprep.mubr.msk.f32.mxu1 %vm18203_vm1, %v22938_v55 }
 0x8f3   :  { %17075 = vmatprep.subr.mxu1 %v22938_v55 }
 0x8f5   :  { %17068 = vmatmul.mubr.msk.f32.vlgmr.msra.gmra.mrb[130].mxu1 %vm4196_vm0, %v4955_v6 }
 0x8f6   :  { %17077 = vmatprep.mubr.msk.f32.mxu1 %vm18203_vm1, %v22938_v55 }
 0x944   :  { %v5031_v11 = vpop.f32.mrb[64].mxu1 }
 0x945   :  { %v9709_v54 = vmul.f32 0.35355338, %v5031_v11  ;;  %v16754_v33 = vpop.f32.mrb[65].mxu1 }
 0x947   :  { %v21059_v38 = vsel %vm21053_vm5, %v9709_v54, -4.2949673e+09 }
 0x948   :  { %v5109_v23 = vpop.f32.mrb[66].mxu1  ;;  %v9840_v21 = vsel %vm9839_vm4, %v21059_v38, -inf }
 0x949   :  { %v9710_v7 = vmul.f32 0.35355338, %v5109_v23  ;;  %9841 = vmax.xlane.f32.xlu1 %v9840_v21  ;;  %v16759_v58 = vpop.f32.mrb[67].mxu1 }
 0x94b   :  { %v21065_v16 = vsel %vm21053_vm5, %v9710_v7, -4.2949673e+09 }
 0x94c   :  { %v5187_v31 = vpop.f32.mrb[68].mxu1  ;;  %v5343_v53 = vpop.f32.mrb[48].mxu0  ;;  %v9843_v0 = vsel %vm9839_vm4, %v21065_v16, -inf }
 0x94d   :  { %v9711_v36 = vmul.f32 0.35355338, %v5187_v31  ;;  %v9713_v30 = vmul.f32 0.35355338, %v5343_v53  ;;  %v16774_v43 = vpop.f32.mrb[49].mxu0  ;;  %9844 = vmax.xlane.f32.xlu0 %v9843_v0  ;;  %v16764_v63 = vpop.f32.mrb[69].mxu1 }
 0x94f   :  { %v21071_v2 = vsel %vm21053_vm5, %v9711_v36, -4.2949673e+09  ;;  %v21075_v1 = vsel %vm21053_vm5, %v9713_v30, -4.2949673e+09 }
 0x950   :  { %v5265_v5 = vpop.f32.mrb[70].mxu1  ;;  %v5499_v25 = vpop.f32.mrb[50].mxu0  ;;  %v9846_v52 = vsel %vm9839_vm4, %v21071_v2, -inf  ;;  %v9852_v23 = vsel %vm9839_vm4, %v21075_v1, -inf }
 0x951   :  { %v9712_v47 = vmul.f32 0.35355338, %v5265_v5  ;;  %v9715_v37 = vmul.f32 0.35355338, %v5499_v25  ;;  %v16784_v50 = vpop.f32.mrb[51].mxu0  ;;  %9847 = vmax.xlane.f32.xlu0 %v9846_v52  ;;  %v16769_v19 = vpop.f32.mrb[71].mxu1 }
 0x953   :  { %v21081_v6 = vsel %vm21053_vm5, %v9712_v47, -4.2949673e+09  ;;  %v21085_v11 = vsel %vm21053_vm5, %v9715_v37, -4.2949673e+09 }
 0x954   :  { %v5421_v54 = vpop.f32.mrb[72].mxu1  ;;  %v5655_v33 = vpop.f32.mrb[52].mxu0  ;;  %v9849_v21 = vsel %vm9839_vm4, %v21081_v6, -inf  ;;  %v9858_v63 = vsel %vm9839_vm4, %v21085_v11, -inf }
 0x955   :  { %v9714_v7 = vmul.f32 0.35355338, %v5421_v54  ;;  %v9717_v58 = vmul.f32 0.35355338, %v5655_v33  ;;  %v16794_v31 = vpop.f32.mrb[53].mxu0  ;;  %9853 = vmax.xlane.f32.xlu0 %v9852_v23  ;;  %9850 = vmax.xlane.f32.xlu1 %v9849_v21  ;;  %v16779_v53 = vpop.f32.mrb[73].mxu1 }
 0x957   :  { %v21093_v0 = vsel %vm21053_vm5, %v9714_v7, -4.2949673e+09  ;;  %v21097_v36 = vsel %vm21053_vm5, %v9717_v58, -4.2949673e+09 }
 0x958   :  { %v5577_v30 = vpop.f32.mrb[74].mxu1  ;;  %v5811_v43 = vpop.f32.mrb[54].mxu0  ;;  %v9855_v5 = vsel %vm9839_vm4, %v21093_v0, -inf  ;;  %v9864_v23 = vsel %vm9839_vm4, %v21097_v36, -inf }
 0x959   :  { %v9716_v25 = vmul.f32 0.35355338, %v5577_v30  ;;  %v9719_v52 = vmul.f32 0.35355338, %v5811_v43  ;;  %v16804_v47 = vpop.f32.mrb[55].mxu0  ;;  %9859 = vmax.xlane.f32.xlu0 %v9858_v63  ;;  %9856 = vmax.xlane.f32.xlu1 %v9855_v5  ;;  %v16789_v37 = vpop.f32.mrb[75].mxu1 }
 0x95b   :  { %v21105_v50 = vsel %vm21053_vm5, %v9716_v25, -4.2949673e+09  ;;  %v21109_v19 = vsel %vm21053_vm5, %v9719_v52, -4.2949673e+09 }
 0x95c   :  { %v5733_v54 = vpop.f32.mrb[76].mxu1  ;;  %v5967_v33 = vpop.f32.mrb[56].mxu0  ;;  %v9861_v21 = vsel %vm9839_vm4, %v21105_v50, -inf  ;;  %v9870_v25 = vsel %vm9839_vm4, %v21109_v19, -inf }
 0x95d   :  { %v9718_v7 = vmul.f32 0.35355338, %v5733_v54  ;;  %v9721_v58 = vmul.f32 0.35355338, %v5967_v33  ;;  %v16814_v31 = vpop.f32.mrb[57].mxu0  ;;  %9865 = vmax.xlane.f32.xlu0 %v9864_v23  ;;  %9862 = vmax.xlane.f32.xlu1 %v9861_v21  ;;  %v16799_v53 = vpop.f32.mrb[77].mxu1 }
 0x95f   :  { %v21117_v30 = vsel %vm21053_vm5, %v9718_v7, -4.2949673e+09  ;;  %v21121_v43 = vsel %vm21053_vm5, %v9721_v58, -4.2949673e+09 }
 0x960   :  { %v5889_v63 = vpop.f32.mrb[78].mxu1  ;;  %v6123_v5 = vpop.f32.mrb[58].mxu0  ;;  %v9867_v52 = vsel %vm9839_vm4, %v21117_v30, -inf  ;;  %v9876_v31 = vsel %vm9839_vm4, %v21121_v43, -inf }
 0x961   :  { %v9720_v47 = vmul.f32 0.35355338, %v5889_v63  ;;  %v9723_v37 = vmul.f32 0.35355338, %v6123_v5  ;;  %9871 = vmax.xlane.f32.xlu0 %v9870_v25  ;;  %9868 = vmax.xlane.f32.xlu1 %v9867_v52  ;;  %v16809_v54 = vpop.f32.mrb[79].mxu1  ;;  %v16824_v33 = vpop.f32.mrb[59].mxu0 }
 0x963   :  { %v21129_v23 = vsel %vm21053_vm5, %v9720_v47, -4.2949673e+09  ;;  %v21133_v21 = vsel %vm21053_vm5, %v9723_v37, -4.2949673e+09 }
 0x964   :  { %v6045_v7 = vpop.f32.mrb[80].mxu1  ;;  %v6274_v58 = vpop.f32.mrb[60].mxu0  ;;  %v9873_v53 = vsel %vm9839_vm4, %v21129_v23, -inf }
 0x965   :  { %v9722_v63 = vmul.f32 0.35355338, %v6045_v7  ;;  %v9725_v5 = vmul.f32 0.35355338, %v6274_v58  ;;  %9877 = vmax.xlane.f32.xlu0 %v9876_v31  ;;  %9874 = vmax.xlane.f32.xlu1 %v9873_v53  ;;  %v16819_v25 = vpop.f32.mrb[81].mxu1  ;;  %v16834_v52 = vpop.f32.mrb[61].mxu0 }
 0x966   :  { %v9882_v7 = vsel %vm9839_vm4, %v21133_v21, -inf }
 0x967   :  { %v21141_v47 = vsel %vm21053_vm5, %v9722_v63, -4.2949673e+09  ;;  %v21145_v37 = vsel %vm21053_vm5, %v9725_v5, -4.2949673e+09 }
 0x968   :  { %v6201_v54 = vpop.f32.mrb[82].mxu1  ;;  %v6420_v33 = vpop.f32.mrb[62].mxu0  ;;  %v9879_v55 = vsel %vm9839_vm4, %v21141_v47, -inf }
 0x969   :  { %v9724_v58 = vmul.f32 0.35355338, %v6201_v54  ;;  %v9727_v31 = vmul.f32 0.35355338, %v6420_v33  ;;  %9880 = vmax.xlane.f32.xlu1 %v9879_v55  ;;  %v16829_v53 = vpop.f32.mrb[83].mxu1  ;;  %9883 = vmax.xlane.f32.xlu0 %v9882_v7  ;;  %v16844_v25 = vpop.f32.mrb[63].mxu0 }
 0x96a   :  { %v9888_v54 = vsel %vm9839_vm4, %v21145_v37, -inf }
 0x96b   :  { %v21153_v63 = vsel %vm21053_vm5, %v9724_v58, -4.2949673e+09  ;;  %v21157_v5 = vsel %vm21053_vm5, %v9727_v31, -4.2949673e+09 }
 0x96c   :  { %v6347_v52 = vpop.f32.mrb[84].mxu1  ;;  %v6566_v51 = vpop.f32.mrb[64].mxu0  ;;  %v9885_v48 = vsel %vm9839_vm4, %v21153_v63, -inf }
 0x96d   :  { %v9726_v55 = vmul.f32 0.35355338, %v6347_v52  ;;  %v9729_v33 = vmul.f32 0.35355338, %v6566_v51  ;;  %9886 = vmax.xlane.f32.xlu1 %v9885_v48  ;;  %v16839_v7 = vpop.f32.mrb[85].mxu1  ;;  %9889 = vmax.xlane.f32.xlu0 %v9888_v54  ;;  %v16854_v53 = vpop.f32.mrb[65].mxu0 }
 0x96e   :  { %v9894_v51 = vsel %vm9839_vm4, %v21157_v5, -inf }
 0x96f   :  { %v21165_v58 = vsel %vm21053_vm5, %v9726_v55, -4.2949673e+09  ;;  %v21169_v31 = vsel %vm21053_vm5, %v9729_v33, -4.2949673e+09 }
 0x970   :  { %v6493_v25 = vpop.f32.mrb[86].mxu1  ;;  %v6712_v28 = vpop.f32.mrb[66].mxu0  ;;  %v9891_v15 = vsel %vm9839_vm4, %v21165_v58, -inf }
 0x971   :  { %v9728_v48 = vmul.f32 0.35355338, %v6493_v25  ;;  %v9731_v52 = vmul.f32 0.35355338, %v6712_v28  ;;  %9892 = vmax.xlane.f32.xlu1 %v9891_v15  ;;  %v16849_v54 = vpop.f32.mrb[87].mxu1  ;;  %9895 = vmax.xlane.f32.xlu0 %v9894_v51  ;;  %v16864_v7 = vpop.f32.mrb[67].mxu0 }
 0x972   :  { %v9900_v28 = vsel %vm9839_vm4, %v21169_v31, -inf }
 0x973   :  { %v21177_v55 = vsel %vm21053_vm5, %v9728_v48, -4.2949673e+09  ;;  %v21181_v33 = vsel %vm21053_vm5, %v9731_v52, -4.2949673e+09 }
 0x974   :  { %v6639_v53 = vpop.f32.mrb[88].mxu1  ;;  %v6858_v62 = vpop.f32.mrb[68].mxu0  ;;  %v9897_v4 = vsel %vm9839_vm4, %v21177_v55, -inf }
 0x975   :  { %v9730_v15 = vmul.f32 0.35355338, %v6639_v53  ;;  %v9733_v25 = vmul.f32 0.35355338, %v6858_v62  ;;  %9898 = vmax.xlane.f32.xlu1 %v9897_v4  ;;  %v16859_v51 = vpop.f32.mrb[89].mxu1  ;;  %9901 = vmax.xlane.f32.xlu0 %v9900_v28  ;;  %v16874_v54 = vpop.f32.mrb[69].mxu0 }
 0x976   :  { %v9906_v62 = vsel %vm9839_vm4, %v21181_v33, -inf }
 0x977   :  { %v21189_v48 = vsel %vm21053_vm5, %v9730_v15, -4.2949673e+09  ;;  %v21193_v52 = vsel %vm21053_vm5, %v9733_v25, -4.2949673e+09 }
 0x978   :  { %v6785_v7 = vpop.f32.mrb[90].mxu1  ;;  %v7004_v46 = vpop.f32.mrb[70].mxu0  ;;  %v9903_v42 = vsel %vm9839_vm4, %v21189_v48, -inf }
 0x979   :  { %v9732_v4 = vmul.f32 0.35355338, %v6785_v7  ;;  %v9735_v53 = vmul.f32 0.35355338, %v7004_v46  ;;  %9904 = vmax.xlane.f32.xlu1 %v9903_v42  ;;  %v16869_v28 = vpop.f32.mrb[91].mxu1  ;;  %9907 = vmax.xlane.f32.xlu0 %v9906_v62  ;;  %v16884_v51 = vpop.f32.mrb[71].mxu0 }
 0x97a   :  { %v9912_v46 = vsel %vm9839_vm4, %v21193_v52, -inf }
 0x97b   :  { %v21201_v15 = vsel %vm21053_vm5, %v9732_v4, -4.2949673e+09  ;;  %v21205_v25 = vsel %vm21053_vm5, %v9735_v53, -4.2949673e+09 }
 0x97c   :  { %23225 = vst [vmem:[#allocation75_spill] sm:$0xff] %v21205_v25  ;;  %v6931_v54 = vpop.f32.mrb[92].mxu1  ;;  %v7150_v26 = vpop.f32.mrb[72].mxu0  ;;  %v9909_v49 = vsel %vm9839_vm4, %v21201_v15, -inf }
 0x97d   :  { %v9734_v42 = vmul.f32 0.35355338, %v6931_v54  ;;  %v9737_v7 = vmul.f32 0.35355338, %v7150_v26  ;;  %9910 = vmax.xlane.f32.xlu1 %v9909_v49  ;;  %v16879_v62 = vpop.f32.mrb[93].mxu1  ;;  %9913 = vmax.xlane.f32.xlu0 %v9912_v46  ;;  %v16894_v28 = vpop.f32.mrb[73].mxu0 }
 0x97e   :  { %v9918_v26 = vsel %vm9839_vm4, %v21205_v25, -inf }
 0x97f   :  { %v21213_v4 = vsel %vm21053_vm5, %v9734_v42, -4.2949673e+09  ;;  %v21217_v53 = vsel %vm21053_vm5, %v9737_v7, -4.2949673e+09 }
 0x980   :  { %23226 = vst [vmem:[#allocation21_spill] sm:$0xff] %v21217_v53  ;;  %v7077_v51 = vpop.f32.mrb[94].mxu1  ;;  %v7296_v13 = vpop.f32.mrb[74].mxu0  ;;  %v9915_v29 = vsel %vm9839_vm4, %v21213_v4, -inf }
 0x981   :  { %v9736_v49 = vmul.f32 0.35355338, %v7077_v51  ;;  %v9739_v54 = vmul.f32 0.35355338, %v7296_v13  ;;  %9916 = vmax.xlane.f32.xlu1 %v9915_v29  ;;  %v16889_v46 = vpop.f32.mrb[95].mxu1  ;;  %9919 = vmax.xlane.f32.xlu0 %v9918_v26  ;;  %v16904_v62 = vpop.f32.mrb[75].mxu0 }
 0x982   :  { %v9924_v13 = vsel %vm9839_vm4, %v21217_v53, -inf }
 0x983   :  { %v21225_v42 = vsel %vm21053_vm5, %v9736_v49, -4.2949673e+09  ;;  %v21229_v7 = vsel %vm21053_vm5, %v9739_v54, -4.2949673e+09 }
 0x984   :  { %23227 = vst [vmem:[#allocation53_spill] sm:$0xff] %v21229_v7  ;;  %v7223_v28 = vpop.f32.mrb[96].mxu1  ;;  %v7442_v9 = vpop.f32.mrb[76].mxu0  ;;  %v9921_v22 = vsel %vm9839_vm4, %v21225_v42, -inf }
 0x985   :  { %v9738_v29 = vmul.f32 0.35355338, %v7223_v28  ;;  %v9741_v51 = vmul.f32 0.35355338, %v7442_v9  ;;  %9922 = vmax.xlane.f32.xlu1 %v9921_v22  ;;  %v16899_v26 = vpop.f32.mrb[97].mxu1  ;;  %9925 = vmax.xlane.f32.xlu0 %v9924_v13  ;;  %v16914_v46 = vpop.f32.mrb[77].mxu0 }
 0x986   :  { %v9930_v9 = vsel %vm9839_vm4, %v21229_v7, -inf }
 0x987   :  { %v21237_v49 = vsel %vm21053_vm5, %v9738_v29, -4.2949673e+09  ;;  %v21241_v54 = vsel %vm21053_vm5, %v9741_v51, -4.2949673e+09 }
 0x988   :  { %23228 = vst [vmem:[#allocation32_spill] sm:$0xff] %v21241_v54  ;;  %v7369_v62 = vpop.f32.mrb[98].mxu1  ;;  %v7588_v18 = vpop.f32.mrb[78].mxu0  ;;  %v9927_v56 = vsel %vm9839_vm4, %v21237_v49, -inf }
 0x989   :  { %v9740_v22 = vmul.f32 0.35355338, %v7369_v62  ;;  %v9743_v28 = vmul.f32 0.35355338, %v7588_v18  ;;  %9928 = vmax.xlane.f32.xlu1 %v9927_v56  ;;  %v16909_v13 = vpop.f32.mrb[99].mxu1  ;;  %9931 = vmax.xlane.f32.xlu0 %v9930_v9  ;;  %v16924_v26 = vpop.f32.mrb[79].mxu0 }
 0x98a   :  { %v9936_v18 = vsel %vm9839_vm4, %v21241_v54, -inf }
 0x98b   :  { %v21249_v29 = vsel %vm21053_vm5, %v9740_v22, -4.2949673e+09  ;;  %v21253_v51 = vsel %vm21053_vm5, %v9743_v28, -4.2949673e+09 }
 0x98c   :  { %23229 = vst [vmem:[#allocation41_spill] sm:$0xff] %v21249_v29  ;;  %23230 = vst [vmem:[#allocation49_spill] sm:$0xff] %v21253_v51  ;;  %v7515_v46 = vpop.f32.mrb[100].mxu1  ;;  %v7734_v44 = vpop.f32.mrb[80].mxu0  ;;  %v9933_v60 = vsel %vm9839_vm4, %v21249_v29, -inf }
 0x98d   :  { %v9742_v56 = vmul.f32 0.35355338, %v7515_v46  ;;  %v9745_v62 = vmul.f32 0.35355338, %v7734_v44  ;;  %9934 = vmax.xlane.f32.xlu1 %v9933_v60  ;;  %v16919_v9 = vpop.f32.mrb[101].mxu1  ;;  %9937 = vmax.xlane.f32.xlu0 %v9936_v18  ;;  %v16934_v13 = vpop.f32.mrb[81].mxu0 }
 0x98e   :  { %v9942_v44 = vsel %vm9839_vm4, %v21253_v51, -inf }
 0x98f   :  { %v21261_v22 = vsel %vm21053_vm5, %v9742_v56, -4.2949673e+09  ;;  %v21265_v28 = vsel %vm21053_vm5, %v9745_v62, -4.2949673e+09 }
 0x990   :  { %23231 = vst [vmem:[#allocation72_spill] sm:$0xff] %v21261_v22  ;;  %23232 = vst [vmem:[#allocation44_spill] sm:$0xff] %v21265_v28  ;;  %v7661_v26 = vpop.f32.mrb[102].mxu1  ;;  %v7880_v10 = vpop.f32.mrb[82].mxu0  ;;  %v9939_v3 = vsel %vm9839_vm4, %v21261_v22, -inf }
 0x991   :  { %v9744_v60 = vmul.f32 0.35355338, %v7661_v26  ;;  %v9747_v46 = vmul.f32 0.35355338, %v7880_v10  ;;  %9940 = vmax.xlane.f32.xlu1 %v9939_v3  ;;  %v16929_v18 = vpop.f32.mrb[103].mxu1  ;;  %9943 = vmax.xlane.f32.xlu0 %v9942_v44  ;;  %v16944_v9 = vpop.f32.mrb[83].mxu0 }
 0x992   :  { %v9948_v10 = vsel %vm9839_vm4, %v21265_v28, -inf }
 0x993   :  { %v21273_v56 = vsel %vm21053_vm5, %v9744_v60, -4.2949673e+09  ;;  %v21277_v62 = vsel %vm21053_vm5, %v9747_v46, -4.2949673e+09 }
 0x994   :  { %23233 = vst [vmem:[#allocation12_spill] sm:$0xff] %v21273_v56  ;;  %23234 = vst [vmem:[#allocation48_spill] sm:$0xff] %v21277_v62  ;;  %v7807_v13 = vpop.f32.mrb[104].mxu1  ;;  %v8026_v29 = vpop.f32.mrb[84].mxu0  ;;  %v9945_v22 = vsel %vm9839_vm4, %v21273_v56, -inf }
 0x995   :  { %v9746_v3 = vmul.f32 0.35355338, %v7807_v13  ;;  %v9749_v26 = vmul.f32 0.35355338, %v8026_v29  ;;  %9946 = vmax.xlane.f32.xlu1 %v9945_v22  ;;  %v16939_v44 = vpop.f32.mrb[105].mxu1  ;;  %9949 = vmax.xlane.f32.xlu0 %v9948_v10  ;;  %v16954_v18 = vpop.f32.mrb[85].mxu0 }
 0x996   :  { %v9954_v29 = vsel %vm9839_vm4, %v21277_v62, -inf }
 0x997   :  { %v21285_v60 = vsel %vm21053_vm5, %v9746_v3, -4.2949673e+09  ;;  %v21289_v46 = vsel %vm21053_vm5, %v9749_v26, -4.2949673e+09 }
 0x998   :  { %23235 = vst [vmem:[#allocation14_spill] sm:$0xff] %v21285_v60  ;;  %23236 = vst [vmem:[#allocation58_spill] sm:$0xff] %v21289_v46  ;;  %v7953_v9 = vpop.f32.mrb[106].mxu1  ;;  %v8172_v53 = vpop.f32.mrb[86].mxu0  ;;  %v9951_v56 = vsel %vm9839_vm4, %v21285_v60, -inf }
 0x999   :  { %v9748_v22 = vmul.f32 0.35355338, %v7953_v9  ;;  %v9751_v13 = vmul.f32 0.35355338, %v8172_v53  ;;  %9952 = vmax.xlane.f32.xlu1 %v9951_v56  ;;  %v16949_v10 = vpop.f32.mrb[107].mxu1  ;;  %9955 = vmax.xlane.f32.xlu0 %v9954_v29  ;;  %v16964_v44 = vpop.f32.mrb[87].mxu0 }
 0x99a   :  { %v9960_v53 = vsel %vm9839_vm4, %v21289_v46, -inf }
 0x99b   :  { %v21297_v3 = vsel %vm21053_vm5, %v9748_v22, -4.2949673e+09  ;;  %v21301_v26 = vsel %vm21053_vm5, %v9751_v13, -4.2949673e+09 }
 0x99c   :  { %23237 = vst [vmem:[#allocation22_spill] sm:$0xff] %v21297_v3  ;;  %23238 = vst [vmem:[#allocation19_spill] sm:$0xff] %v21301_v26  ;;  %v8099_v18 = vpop.f32.mrb[108].mxu1  ;;  %v8318_v41 = vpop.f32.mrb[88].mxu0  ;;  %v9957_v60 = vsel %vm9839_vm4, %v21297_v3, -inf  ;;  %v9966_v3 = vsel %vm9839_vm4, %v21301_v26, -inf }
 0x99d   :  { %v9750_v56 = vmul.f32 0.35355338, %v8099_v18  ;;  %v9753_v9 = vmul.f32 0.35355338, %v8318_v41  ;;  %9958 = vmax.xlane.f32.xlu1 %v9957_v60  ;;  %v16959_v29 = vpop.f32.mrb[109].mxu1  ;;  %9961 = vmax.xlane.f32.xlu0 %v9960_v53  ;;  %v16974_v10 = vpop.f32.mrb[89].mxu0 }
 0x99f   :  { %v21309_v22 = vsel %vm21053_vm5, %v9750_v56, -4.2949673e+09  ;;  %v21317_v18 = vsel %vm21053_vm5, %v9753_v9, -4.2949673e+09 }
 0x9a0   :  { %23239 = vst [vmem:[#allocation39_spill] sm:$0xff] %v21309_v22  ;;  %v8245_v13 = vpop.f32.mrb[110].mxu1  ;;  %v8464_v44 = vpop.f32.mrb[90].mxu0  ;;  %v9963_v62 = vsel %vm9839_vm4, %v21309_v22, -inf  ;;  %23240 = vst [vmem:[#allocation17_spill] sm:$0xff] %v21317_v18  ;;  %v9972_v26 = vsel %vm9839_vm4, %v21317_v18, -inf }
 0x9a1   :  { %v9752_v41 = vmul.f32 0.35355338, %v8245_v13  ;;  %9964 = vmax.xlane.f32.xlu1 %v9963_v62  ;;  %v16969_v60 = vpop.f32.mrb[111].mxu1  ;;  %9967 = vmax.xlane.f32.xlu0 %v9966_v3  ;;  %v16984_v53 = vpop.f32.mrb[91].mxu0  ;;  %v9755_v46 = vmul.f32 0.35355338, %v8464_v44 }
 0x9a3   :  { %v21321_v56 = vsel %vm21053_vm5, %v9752_v41, -4.2949673e+09 }
 0x9a4   :  { %23241 = vst [vmem:[#allocation25_spill] sm:$0xff] %v21321_v56  ;;  %v8391_v29 = vpop.f32.mrb[112].mxu1  ;;  %v8610_v10 = vpop.f32.mrb[92].mxu0  ;;  %v9969_v22 = vsel %vm9839_vm4, %v21321_v56, -inf  ;;  %v21335_v56 = vsel %vm21053_vm5, %v9755_v46, -4.2949673e+09 }
 0x9a5   :  { %v9754_v9 = vmul.f32 0.35355338, %v8391_v29  ;;  %9970 = vmax.xlane.f32.xlu1 %v9969_v22  ;;  %v16979_v13 = vpop.f32.mrb[113].mxu1  ;;  %9973 = vmax.xlane.f32.xlu0 %v9972_v26  ;;  %v16994_v62 = vpop.f32.mrb[93].mxu0  ;;  %23243 = vst [vmem:[#allocation23_spill] sm:$0xff] %v21335_v56 }
 0x9a6   :  { %v9978_v13 = vsel %vm9839_vm4, %v21335_v56, -inf }
 0x9a7   :  { %v21329_v3 = vsel %vm21053_vm5, %v9754_v9, -4.2949673e+09  ;;  %v9757_v9 = vmul.f32 0.35355338, %v8610_v10 }
 0x9a8   :  { %23242 = vst [vmem:[#allocation50_spill] sm:$0xff] %v21329_v3  ;;  %v8537_v41 = vpop.f32.mrb[114].mxu1  ;;  %v8756_v60 = vpop.f32.mrb[94].mxu0  ;;  %v9975_v53 = vsel %vm9839_vm4, %v21329_v3, -inf }
 0x9a9   :  { %v9756_v18 = vmul.f32 0.35355338, %v8537_v41  ;;  %v16989_v44 = vpop.f32.mrb[115].mxu1  ;;  %9976 = vmax.xlane.f32.xlu0 %v9975_v53  ;;  %v17004_v22 = vpop.f32.mrb[95].mxu0  ;;  %v21347_v53 = vsel %vm21053_vm5, %v9757_v9, -4.2949673e+09 }
 0x9aa   :  { %23245 = vst [vmem:[#allocation40_spill] sm:$0xff] %v21347_v53 }
 0x9ab   :  { %v21341_v62 = vsel %vm21053_vm5, %v9756_v18, -4.2949673e+09  ;;  %v9759_v18 = vmul.f32 0.35355338, %v8756_v60 }
 0x9ac   :  { %v8683_v29 = vpop.f32.mrb[116].mxu1  ;;  %v8902_v26 = vpop.f32.mrb[96].mxu0  ;;  %23244 = vst [vmem:[#allocation55_spill] sm:$0xff] %v21341_v62  ;;  %v9981_v41 = vsel %vm9839_vm4, %v21341_v62, -inf }
 0x9ad   :  { %v16999_v28 = vpop.f32.mrb[117].mxu1  ;;  %9979 = vmax.xlane.f32.xlu0 %v9978_v13  ;;  %v17014_v3 = vpop.f32.mrb[97].mxu0  ;;  %v9758_v44 = vmul.f32 0.35355338, %v8683_v29 }
 0x9ae   :  { %v9984_v28 = vsel %vm9839_vm4, %v21347_v53, -inf }
 0x9af   :  { %v21353_v3 = vsel %vm21053_vm5, %v9758_v44, -4.2949673e+09 }
 0x9b0   :  { %v8829_v25 = vpop.f32.mrb[118].mxu1  ;;  %v9048_v46 = vpop.f32.mrb[98].mxu0  ;;  %23246 = vst [vmem:[#allocation30_spill] sm:$0xff] %v21353_v3  ;;  %v9987_v29 = vsel %vm9839_vm4, %v21353_v3, -inf }
 0x9b1   :  { %v17009_v22 = vpop.f32.mrb[119].mxu1  ;;  %9982 = vmax.xlane.f32.xlu0 %v9981_v41  ;;  %v17024_v10 = vpop.f32.mrb[99].mxu0  ;;  %v21361_v41 = vsel %vm21053_vm5, %v9759_v18, -4.2949673e+09 }
 0x9b2   :  { %23247 = vst [vmem:[#allocation28_spill] sm:$0xff] %v21361_v41  ;;  %v9760_v22 = vmul.f32 0.35355338, %v8829_v25 }
 0x9b4   :  { %v8975_v56 = vpop.f32.mrb[120].mxu1  ;;  %v9194_v51 = vpop.f32.mrb[100].mxu0 }
 0x9b5   :  { %v17019_v13 = vpop.f32.mrb[121].mxu1  ;;  %9985 = vmax.xlane.f32.xlu0 %v9984_v28  ;;  %v17034_v62 = vpop.f32.mrb[101].mxu0  ;;  %v9761_v28 = vmul.f32 0.35355338, %v8902_v26 }
 0x9b6   :  { %v9990_v62 = vsel %vm9839_vm4, %v21361_v41, -inf  ;;  %v21369_v13 = vsel %vm21053_vm5, %v9760_v22, -4.2949673e+09 }
 0x9b7   :  { %23248 = vst [vmem:[#allocation59_spill] sm:$0xff] %v21369_v13 }
 0x9b8   :  { %v9121_v54 = vpop.f32.mrb[122].mxu1  ;;  %v21355_v9 = vpop.f32.mrb[102].mxu0 }
 0x9b9   :  { %v17029_v10 = vpop.f32.mrb[123].mxu1  ;;  %9988 = vmax.xlane.f32.xlu0 %v9987_v29  ;;  %v17044_v60 = vpop.f32.mrb[103].mxu0  ;;  %v9993_v29 = vsel %vm9839_vm4, %v21369_v13, -inf }
 0x9ba   :  { %v21379_v10 = vsel %vm21053_vm5, %v9761_v28, -4.2949673e+09  ;;  %v9762_v60 = vmul.f32 0.35355338, %v8975_v56  ;;  %v9764_v28 = vmul.f32 0.35355338, %v9121_v54 }
 0x9bb   :  { %23249 = vst [vmem:[#allocation15_spill] sm:$0xff] %v21379_v10 }
 0x9bc   :  { %v9267_v53 = vpop.f32.mrb[124].mxu1  ;;  %v21363_v44 = vpop.f32.mrb[104].mxu0 }
 0x9bd   :  { %v17039_v3 = vpop.f32.mrb[125].mxu1  ;;  %9991 = vmax.xlane.f32.xlu0 %v9990_v62  ;;  %v17054_v7 = vpop.f32.mrb[105].mxu0  ;;  %v21387_v62 = vsel %vm21053_vm5, %v9762_v60, -4.2949673e+09 }
 0x9be   :  { %v9996_v7 = vsel %vm9839_vm4, %v21379_v10, -inf  ;;  %v9763_v3 = vmul.f32 0.35355338, %v9048_v46  ;;  %23250 = vst [vmem:[#allocation54_spill] sm:$0xff] %v21387_v62  ;;  %v9999_v56 = vsel %vm9839_vm4, %v21387_v62, -inf }
 0x9c0   :  { %v21371_v18 = vpop.f32.mrb[126].mxu1  ;;  %v21373_v25 = vpop.f32.mrb[106].mxu0 }
 0x9c1   :  { %v17049_v26 = vpop.f32.mrb[127].mxu1  ;;  %9994 = vmax.xlane.f32.xlu0 %v9993_v29  ;;  %v17064_v41 = vpop.f32.mrb[107].mxu0 }
 0x9c2   :  { %v21395_v41 = vsel %vm21053_vm5, %v9763_v3, -4.2949673e+09  ;;  %v9765_v26 = vmul.f32 0.35355338, %v9194_v51  ;;  %v9766_v3 = vmul.f32 0.35355338, %v9267_v53 }
 0x9c3   :  { %23251 = vst [vmem:[#allocation16_spill] sm:$0xff] %v21395_v41  ;;  %v10002_v46 = vsel %vm9839_vm4, %v21395_v41, -inf }
 0x9c4   :  { %v21381_v22 = vpop.f32.mrb[128].mxu1  ;;  %v21413_v51 = vsel %vm21053_vm5, %v9766_v3, -4.2949673e+09 }
 0x9c5   :  { %v17059_v34 = vpop.f32.mrb[129].mxu1  ;;  %9997 = vmax.xlane.f32.xlu0 %v9996_v7  ;;  %v21407_v7 = vsel %vm21053_vm5, %v9765_v26, -4.2949673e+09  ;;  %23254 = vst [vmem:[#allocation60_spill] sm:$0xff] %v21413_v51 }
 0x9c6   :  { %v21401_v34 = vsel %vm21053_vm5, %v9764_v28, -4.2949673e+09  ;;  %23253 = vst [vmem:[#allocation27_spill] sm:$0xff] %v21407_v7  ;;  %v10008_v54 = vsel %vm9839_vm4, %v21407_v7, -inf }
 0x9c7   :  { %23252 = vst [vmem:[#allocation13_spill] sm:$0xff] %v21401_v34  ;;  %v10005_v60 = vsel %vm9839_vm4, %v21401_v34, -inf }
 0x9c8   :  { %v21389_v13 = vpop.f32.mrb[130].mxu1 }
 0x9c9   :  { %v17069_v29 = vpop.f32.mrb[131].mxu1  ;;  %10000 = vmax.xlane.f32.xlu0 %v9999_v56 }
 0x9ca   :  { %v10011_v29 = vsel %vm9839_vm4, %v21413_v51, -inf }
 0x9cd   :  { %10003 = vmax.xlane.f32.xlu0 %v10002_v46 }
 0x9d1   :  { %10006 = vmax.xlane.f32.xlu0 %v10005_v60 }
 0x9d5   :  { %10009 = vmax.xlane.f32.xlu0 %v10008_v54 }
 0x9d6   :  { %v9842_v56 = vpop.xlane.xlu1 %9841 }
 0x9d7   :  { %v10032_v28 = vsub.f32 %v21059_v38, %v9842_v56 }
 0x9d9   :  { %v10096_v46 = vmul.f32 1.442695, %v10032_v28  ;;  %10012 = vmax.xlane.f32.xlu0 %v10011_v29 }
 0x9da   :  { %v9845_v26 = vpop.xlane.xlu0 %9844 }
 0x9db   :  { %17836 = vpow2.f32 %v10096_v46  ;;  %v10033_v53 = vsub.f32 %v21065_v16, %v9845_v26 }
 0x9dd   :  { %v10098_v60 = vmul.f32 1.442695, %v10033_v53 }
 0x9de   :  { %v9848_v34 = vpop.xlane.xlu0 %9847 }
 0x9df   :  { %17838 = vpow2.f32 %v10098_v60  ;;  %v10034_v62 = vsub.f32 %v21071_v2, %v9848_v34 }
 0x9e1   :  { %v10100_v3 = vmul.f32 1.442695, %v10034_v62 }
 0x9e2   :  { %v9854_v7 = vpop.xlane.xlu0 %9853  ;;  %v9851_v54 = vpop.xlane.xlu1 %9850 }
 0x9e3   :  { %17840 = vpow2.f32 %v10100_v3  ;;  %v10036_v38 = vsub.f32 %v21075_v1, %v9854_v7  ;;  %v10035_v56 = vsub.f32 %v21081_v6, %v9851_v54 }
 0x9e5   :  { %v21422_v51 = vpop.eup %17836  ;;  %v10102_v28 = vmul.f32 1.442695, %v10035_v56  ;;  %v10104_v29 = vmul.f32 1.442695, %v10036_v38 }
 0x9e6   :  { %v9860_v46 = vpop.xlane.xlu0 %9859  ;;  %v9857_v41 = vpop.xlane.xlu1 %9856  ;;  %v10224_v16 = vsel %vm9839_vm4, %v21422_v51, 0.0 }
 0x9e7   :  { %v10037_v26 = vsub.f32 %v21093_v0, %v9857_v41  ;;  %10225 = vadd.xlane.f32.xlu1 %v10224_v16  ;;  %17842 = vpow2.f32 %v10102_v28  ;;  %v10038_v1 = vsub.f32 %v21085_v11, %v9860_v46 }
 0x9e8   :  { %17844 = vpow2.f32 %v10104_v29 }
 0x9e9   :  { %v21427_v2 = vpop.eup %17838  ;;  %v10106_v62 = vmul.f32 1.442695, %v10037_v26  ;;  %v10108_v60 = vmul.f32 1.442695, %v10038_v1 }
 0x9ea   :  { %v9866_v6 = vpop.xlane.xlu0 %9865  ;;  %v10227_v34 = vsel %vm9839_vm4, %v21427_v2, 0.0  ;;  %v9863_v7 = vpop.xlane.xlu1 %9862 }
 0x9eb   :  { %10228 = vadd.xlane.f32.xlu1 %v10227_v34  ;;  %17846 = vpow2.f32 %v10106_v62  ;;  %v10039_v0 = vsub.f32 %v21105_v50, %v9863_v7  ;;  %v10040_v54 = vsub.f32 %v21097_v36, %v9866_v6 }
 0x9ec   :  { %17848 = vpow2.f32 %v10108_v60 }
 0x9ed   :  { %v21432_v53 = vpop.eup %17840  ;;  %v10110_v38 = vmul.f32 1.442695, %v10039_v0  ;;  %v10112_v46 = vmul.f32 1.442695, %v10040_v54 }
 0x9ee   :  { %v9872_v41 = vpop.xlane.xlu0 %9871  ;;  %v10230_v3 = vsel %vm9839_vm4, %v21432_v53, 0.0  ;;  %v9869_v28 = vpop.xlane.xlu1 %9868 }
 0x9ef   :  { %10231 = vadd.xlane.f32.xlu1 %v10230_v3  ;;  %10544 = vrot.lane.b32.xlu0 %v20447_v59, %s18194_s25  ;;  %17850 = vpow2.f32 %v10110_v38  ;;  %v10041_v16 = vsub.f32 %v21117_v30, %v9869_v28  ;;  %v10042_v62 = vsub.f32 %v21109_v19, %v9872_v41 }
 0x9f0   :  { %17852 = vpow2.f32 %v10112_v46 }
 0x9f1   :  { %v21439_v11 = vpop.eup %17842  ;;  %v10114_v6 = vmul.f32 1.442695, %v10041_v16  ;;  %v10116_v3 = vmul.f32 1.442695, %v10042_v62 }
 0x9f2   :  { %v9878_v56 = vpop.xlane.xlu0 %9877  ;;  %v10233_v29 = vsel %vm9839_vm4, %v21439_v11, 0.0  ;;  %v21444_v50 = vpop.eup %17844 }
 0x9f3   :  { %10234 = vadd.xlane.f32.xlu1 %v10233_v29  ;;  %v10236_v59 = vsel %vm9839_vm4, %v21444_v50, 0.0  ;;  %v9875_v7 = vpop.xlane.xlu1 %9874  ;;  %17854 = vpow2.f32 %v10114_v6  ;;  %v10044_v38 = vsub.f32 %v21121_v43, %v9878_v56  ;;  %v9768_v6 = vmul.f32 0.35355338, %v21371_v18 }
 0x9f4   :  { %v10043_v54 = vsub.f32 %v21129_v23, %v9875_v7 }
 0x9f5   :  { %v21449_v1 = vpop.eup %17846 }
 0x9f6   :  { %v9884_v26 = vpop.xlane.xlu0 %9883  ;;  %v10239_v60 = vsel %vm9839_vm4, %v21449_v1, 0.0  ;;  %v21457_v30 = vpop.eup %17848  ;;  %v10118_v28 = vmul.f32 1.442695, %v10043_v54  ;;  %v21493_v54 = vsel %vm21053_vm5, %v9768_v6, -4.2949673e+09 }
 0x9f7   :  { %v10046_v36 = vsub.f32 %v21133_v21, %v9884_v26  ;;  %10237 = vadd.xlane.f32.xlu1 %v10236_v59  ;;  %v10242_v19 = vsel %vm9839_vm4, %v21457_v30, 0.0  ;;  %v9881_v46 = vpop.xlane.xlu1 %9880  ;;  %v10120_v26 = vmul.f32 1.442695, %v10044_v38  ;;  %23257 = vst [vmem:[#allocation57_spill] sm:$0xff] %v21493_v54 }
 0x9f8   :  { %v10045_v59 = vsub.f32 %v21141_v47, %v9881_v46 }
 0x9f9   :  { %v10124_v0 = vmul.f32 1.442695, %v10046_v36  ;;  %v21464_v41 = vpop.eup %17850 }
 0x9fa   :  { %v21453_v34 = vpop.xlane.xlu0 %9889  ;;  %v10245_v16 = vsel %vm9839_vm4, %v21464_v41, 0.0  ;;  %v21471_v23 = vpop.eup %17852  ;;  %v10122_v7 = vmul.f32 1.442695, %v10045_v59 }
 0x9fb   :  { %10240 = vadd.xlane.f32.xlu1 %v10239_v60  ;;  %17856 = vpow2.f32 %v10124_v0  ;;  %v10248_v62 = vsel %vm9839_vm4, %v21471_v23, 0.0 }
 0x9fc   :  { %17858 = vpow2.f32 %v10116_v3 }
 0x9fd   :  { %17860 = vpow2.f32 %v10118_v28  ;;  %v21478_v43 = vpop.eup %17854  ;;  %v10017_v28 = vsel %vm9839_vm4, %v21493_v54, -inf }
 0x9fe   :  { %v21460_v21 = vpop.xlane.xlu0 %9895  ;;  %23255 = vst [vmem:[#allocation56_spill] sm:$0xff] %v21478_v43  ;;  %17862 = vpow2.f32 %v10120_v26  ;;  %v10251_v0 = vsel %vm9839_vm4, %v21478_v43, 0.0 }
 0x9ff   :  { %10243 = vadd.xlane.f32.xlu1 %v10242_v19  ;;  %17864 = vpow2.f32 %v10122_v7 }
 0xa02   :  { %v21467_v29 = vpop.xlane.xlu0 %9901 }
 0xa03   :  { %10246 = vadd.xlane.f32.xlu1 %v10245_v16 }
 0xa05   :  { %v21480_v56 = vpop.eup %17856 }
 0xa06   :  { %v21474_v36 = vpop.xlane.xlu0 %9907  ;;  %23256 = vst [vmem:[#allocation20_spill] sm:$0xff] %v21480_v56  ;;  %v21487_v47 = vpop.eup %17858  ;;  %v10266_v3 = vsel %vm9839_vm4, %v21480_v56, 0.0 }
 0xa07   :  { %10249 = vadd.xlane.f32.xlu1 %v10248_v62  ;;  %v10254_v18 = vsel %vm9839_vm4, %v21487_v47, 0.0  ;;  %v21499_v38 = vpop.eup %17860 }
 0xa08   :  { %23258 = vst [vmem:[#allocation18_spill] sm:$0xff] %v21499_v38  ;;  %v10257_v16 = vsel %vm9839_vm4, %v21499_v38, 0.0  ;;  %v21507_v26 = vpop.eup %17862  ;;  %v10048_v38 = vsub.f32 %v21145_v37, %v21453_v34  ;;  %v9770_v34 = vmul.f32 0.35355338, %v21381_v22 }
 0xa09   :  { %23260 = vst [vmem:[#allocation26_spill] sm:$0xff] %v21507_v26  ;;  %v10260_v62 = vsel %vm9839_vm4, %v21507_v26, 0.0  ;;  %v21513_v6 = vpop.eup %17864 }
 0xa0a   :  { %v21483_v60 = vpop.xlane.xlu0 %9913  ;;  %23261 = vst [vmem:[#allocation24_spill] sm:$0xff] %v21513_v6  ;;  %v10128_v10 = vmul.f32 1.442695, %v10048_v38 }
 0xa0b   :  { %10252 = vadd.xlane.f32.xlu1 %v10251_v0  ;;  %v10263_v0 = vsel %vm9839_vm4, %v21513_v6, 0.0 }
 0xa0c   :  { %17866 = vpow2.f32 %v10128_v10 }
 0xa0e   :  { %v21495_v19 = vpop.xlane.xlu0 %9919  ;;  %10267 = vadd.xlane.f32.xlu0 %v10266_v3  ;;  %v9887_v3 = vpop.xlane.xlu1 %9886 }
 0xa0f   :  { %10255 = vadd.xlane.f32.xlu1 %v10254_v18 }
 0xa12   :  { %v21503_v46 = vpop.xlane.xlu0 %9925  ;;  %10018 = vmax.xlane.f32.xlu0 %v10017_v28  ;;  %v21521_v28 = vpop.xlane.xlu1 %9892 }
 0xa13   :  { %23259 = vst [vmem:[#allocation61_spill] sm:$0xff] %v21503_v46  ;;  %10258 = vadd.xlane.f32.xlu1 %v10257_v16 }
 0xa16   :  { %v21509_v59 = vpop.xlane.xlu0 %9931  ;;  %v21527_v56 = vpop.xlane.xlu1 %9898 }
 0xa17   :  { %10261 = vadd.xlane.f32.xlu1 %v10260_v62  ;;  %v21558_v37 = vpop.eup %17866 }
 0xa18   :  { %23269 = vst [vmem:[#allocation78_spill] sm:$0xff] %v21558_v37 }
 0xa1a   :  { %v21515_v7 = vpop.xlane.xlu0 %9937  ;;  %v21535_v6 = vpop.xlane.xlu1 %9904 }
 0xa1b   :  { %10264 = vadd.xlane.f32.xlu1 %v10263_v0 }
 0xa1e   :  { %v21519_v18 = vpop.xlane.xlu0 %9943  ;;  %v21543_v26 = vpop.xlane.xlu1 %9910 }
 0xa1f   :  { %v10055_v45 = vsub.f32 %v21201_v15, %v21543_v26 }
 0xa22   :  { %v21523_v16 = vpop.xlane.xlu0 %9949 }
 0xa23   :  { %23262 = vst [vmem:[#allocation33_spill] sm:$0xff] %v21523_v16 }
 0xa26   :  { %v21525_v54 = vpop.xlane.xlu0 %9955 }
 0xa27   :  { %23263 = vst [vmem:[#allocation62_spill] sm:$0xff] %v21525_v54  ;;  %v10047_v54 = vsub.f32 %v21153_v63, %v9887_v3  ;;  %v9767_v63 = vmul.f32 0.35355338, %v21355_v9 }
 0xa28   :  { %10696 = vrot.lane.b32.xlu0 %v20453_v27, %s18194_s25  ;;  %v21547_v27 = vpop.xlane.xlu1 %9916 }
 0xa29   :  { %v10126_v38 = vmul.f32 1.442695, %v10047_v54 }
 0xa2a   :  { %v21531_v62 = vpop.xlane.xlu0 %9961 }
 0xa2b   :  { %23264 = vst [vmem:[#allocation31_spill] sm:$0xff] %v21531_v62  ;;  %17868 = vpow2.f32 %v10126_v38 }
 0xa2c   :  { %10620 = vrot.lane.b32.xlu1 %v20443_v12, %s18194_s25 }
 0xa2e   :  { %v21537_v0 = vpop.xlane.xlu0 %9967 }
 0xa2f   :  { %23265 = vst [vmem:[#allocation29_spill] sm:$0xff] %v21537_v0  ;;  %v21554_v0 = vpop.xlane.xlu1 %9922 }
 0xa32   :  { %v21541_v46 = vpop.xlane.xlu0 %9973 }
 0xa33   :  { %23266 = vst [vmem:[#allocation37_spill] sm:$0xff] %v21541_v46  ;;  %v21561_v46 = vpop.xlane.xlu1 %9928 }
 0xa36   :  { %v21545_v43 = vpop.xlane.xlu0 %9976 }
 0xa37   :  { %23267 = vst [vmem:[#allocation38_spill] sm:$0xff] %v21545_v43  ;;  %v10272_v43 = vsel %vm9839_vm4, %v21558_v37, 0.0  ;;  %v21576_v54 = vpop.xlane.xlu1 %9934 }
 0xa38   :  { %23272 = vst [vmem:[#allocation81_spill] sm:$0xff] %v21576_v54 }
 0xa3a   :  { %v21549_v62 = vpop.xlane.xlu0 %9979 }
 0xa3b   :  { %v21588_v9 = vpop.xlane.xlu1 %9940 }
 0xa3c   :  { %23276 = vst [vmem:[#allocation85_spill] sm:$0xff] %v21588_v9 }
 0xa3e   :  { %v21551_v12 = vpop.xlane.xlu0 %9982 }
 0xa3f   :  { %23268 = vst [vmem:[#allocation77_spill] sm:$0xff] %v21551_v12  ;;  %v21569_v12 = vsel %vm21053_vm5, %v9770_v34, -4.2949673e+09 }
 0xa40   :  { %23271 = vst [vmem:[#allocation80_spill] sm:$0xff] %v21569_v12  ;;  %v10023_v22 = vsel %vm9839_vm4, %v21569_v12, -inf }
 0xa42   :  { %v21556_v16 = vpop.xlane.xlu0 %9985 }
 0xa46   :  { %v21563_v10 = vpop.xlane.xlu0 %9988 }
 0xa47   :  { %23270 = vst [vmem:[#allocation79_spill] sm:$0xff] %v21563_v10  ;;  %10273 = vadd.xlane.f32.xlu0 %v10272_v43  ;;  %v21580_v10 = vsel %vm21053_vm5, %v9767_v63, -4.2949673e+09  ;;  %v21586_v43 = vpop.eup %17868  ;;  %v21596_v63 = vpop.xlane.xlu1 %9946 }
 0xa48   :  { %23273 = vst [vmem:[#allocation82_spill] sm:$0xff] %v21580_v10  ;;  %v10014_v34 = vsel %vm9839_vm4, %v21580_v10, -inf  ;;  %23275 = vst [vmem:[#allocation84_spill] sm:$0xff] %v21586_v43 }
 0xa49   :  { %23278 = vst [vmem:[#allocation87_spill] sm:$0xff] %v21596_v63 }
 0xa4a   :  { %v21572_v3 = vpop.xlane.xlu0 %9991 }
 0xa4b   :  { %10024 = vmax.xlane.f32.xlu0 %v10023_v22  ;;  %v10269_v22 = vsel %vm9839_vm4, %v21586_v43, 0.0  ;;  %v10050_v43 = vsub.f32 %v21157_v5, %v21460_v21  ;;  %v9772_v5 = vmul.f32 0.35355338, %v21389_v13 }
 0xa4e   :  { %v21582_v37 = vpop.xlane.xlu0 %9994 }
 0xa4f   :  { %23274 = vst [vmem:[#allocation83_spill] sm:$0xff] %v21582_v37  ;;  %v21600_v37 = vpop.xlane.xlu1 %9952 }
 0xa50   :  { %10015 = vmax.xlane.f32.xlu1 %v10014_v34  ;;  %23280 = vst [vmem:[#allocation89_spill] sm:$0xff] %v21600_v37 }
 0xa52   :  { %v21590_v38 = vpop.xlane.xlu0 %9997 }
 0xa53   :  { %v21608_v9 = vpop.xlane.xlu1 %9958 }
 0xa54   :  { %10270 = vadd.xlane.f32.xlu1 %v10269_v22  ;;  %23283 = vst [vmem:[#allocation92_spill] sm:$0xff] %v21608_v9 }
 0xa56   :  { %v21594_v12 = vpop.xlane.xlu0 %10000 }
 0xa57   :  { %23277 = vst [vmem:[#allocation86_spill] sm:$0xff] %v21594_v12  ;;  %v21616_v12 = vpop.xlane.xlu1 %9964 }
 0xa58   :  { %23285 = vst [vmem:[#allocation94_spill] sm:$0xff] %v21616_v12 }
 0xa5a   :  { %v21598_v54 = vpop.xlane.xlu0 %10003 }
 0xa5b   :  { %23279 = vst [vmem:[#allocation88_spill] sm:$0xff] %v21598_v54  ;;  %v21622_v63 = vpop.xlane.xlu1 %9970 }
 0xa5c   :  { %23288 = vst [vmem:[#allocation96_spill] sm:$0xff] %v21622_v63 }
 0xa5e   :  { %v21602_v10 = vpop.xlane.xlu0 %10006 }
 0xa5f   :  { %23281 = vst [vmem:[#allocation90_spill] sm:$0xff] %v21602_v10  ;;  %v23287_v10 = vmov 0.0  }
 0xa61   :  { %10848 = vrot.lane.b32.xlu0 %v20461_v61, %s18194_s25  ;;  %v10132_v61 = vmul.f32 1.442695, %v10050_v43  ;;  %v21633_v43 = vsel %vm21053_vm5, %v9772_v5, -4.2949673e+09 }
 0xa62   :  { %v21606_v34 = vpop.xlane.xlu0 %10009  ;;  %23290 = vst [vmem:[#allocation98_spill] sm:$0xff] %v21633_v43  ;;  %v10029_v13 = vsel %vm9839_vm4, %v21633_v43, -inf }
 0xa63   :  { %23282 = vst [vmem:[#allocation91_spill] sm:$0xff] %v21606_v34  ;;  %17870 = vpow2.f32 %v10132_v61 }
 0xa65   :  { %10772 = vrot.lane.b32.xlu1 %v20451_v57, %s18194_s25  ;;  %v10049_v57 = vsub.f32 %v21165_v58, %v21521_v28  ;;  %v9769_v28 = vmul.f32 0.35355338, %v21363_v44 }
 0xa66   :  { %v21612_v22 = vpop.xlane.xlu0 %10012 }
 0xa67   :  { %23284 = vst [vmem:[#allocation93_spill] sm:$0xff] %v21612_v22  ;;  %v10130_v21 = vmul.f32 1.442695, %v10049_v57  ;;  %v21646_v57 = vsel %vm21053_vm5, %v9769_v28, -4.2949673e+09 }
 0xa6a   :  { %v21618_v37 = vpop.permute.xlu0 %10544 }
 0xa6b   :  { %23286 = vst [vmem:[#allocation95_spill] sm:$0xff] %v21618_v37  ;;  %17071 = vmatpush3.msra.mxu0 %v21618_v37 }
 0xa6c   :  { %17080 = vmatprep.subr.mxu0 %v23287_v10 }
 0xa6d   :  { %v21626_v34 = vpop.eup %17870 }
 0xa6e   :  { %23289 = vst [vmem:[#allocation97_spill] sm:$0xff] %v21626_v34  ;;  %v10278_v37 = vsel %vm9839_vm4, %v21626_v34, 0.0 }
 0xa74   :  { %v10226_v9 = vpop.xlane.xlu1 %10225 }
 0xa75   :  { %17872 = vrcp.f32 %v10226_v9 }
 0xa76   :  { %17874 = vpow2.f32 %v10130_v21 }
 0xa78   :  { %v10229_v22 = vpop.xlane.xlu1 %10228 }
 0xa7c   :  { %v10232_v12 = vpop.xlane.xlu1 %10231 }
 0xa7d   :  { %17876 = vrcp.f32 %v10232_v12  ;;  %v10053_v12 = vsub.f32 %v21189_v48, %v21535_v6  ;;  %v10051_v6 = vsub.f32 %v21177_v55, %v21527_v56 }
 0xa7e   :  { %17878 = vrcp.f32 %v10229_v22 }
 0xa7f   :  { %v17873_v54 = vpop.eup %17872 }
 0xa80   :  { %10279 = vadd.xlane.f32.xlu0 %v10278_v37  ;;  %v10480_v9 = vmul.f32 %v17873_v54, %v21422_v51  ;;  %v21636_v58 = vpop.xlane.xlu1 %10234  ;;  %v10020_v51 = vsel %vm9839_vm4, %v21646_v57, -inf  ;;  %v21652_v44 = vpop.eup %17874 }
 0xa81   :  { %23291 = vst [vmem:[#allocation99_spill] sm:$0xff] %v21652_v44  ;;  %v10275_v5 = vsel %vm9839_vm4, %v21652_v44, 0.0 }
 0xa82   :  { %17073 = vmatmul.mubr.msk.f32.vlgmr.msra.gmra.mrb[108].mxu0 %vm9839_vm4, %v10480_v9 }
 0xa83   :  { %17082 = vmatprep.mubr.msk.f32.mxu0 %vm18203_vm1, %v23287_v10 }
 0xa84   :  { %10030 = vmax.xlane.f32.xlu0 %v10029_v13  ;;  %v10238_v61 = vpop.xlane.xlu1 %10237 }
 0xa88   :  { %v21648_v37 = vpop.xlane.xlu1 %10240 }
 0xa89   :  { %10021 = vmax.xlane.f32.xlu1 %v10020_v51 }
 0xa8c   :  { %v21654_v54 = vpop.xlane.xlu1 %10243 }
 0xa8d   :  { %10276 = vadd.xlane.f32.xlu1 %v10275_v5  ;;  %v17877_v5 = vpop.eup %17876 }
 0xa8e   :  { %v10482_v34 = vmul.f32 %v17877_v5, %v21432_v53  ;;  %v10134_v5 = vmul.f32 1.442695, %v10051_v6 }
 0xa90   :  { %v21658_v21 = vpop.xlane.xlu1 %10246 }
 0xa94   :  { %v21660_v9 = vpop.xlane.xlu1 %10249 }
 0xa98   :  { %v21662_v28 = vpop.xlane.xlu1 %10252 }
 0xa9a   :  { %11000 = vrot.lane.b32.xlu0 %v20469_v40, %s18194_s25 }
 0xa9b   :  { %v21666_v13 = vpop.xlane.xlu0 %10267 }
 0xa9c   :  { %v21668_v43 = vpop.xlane.xlu1 %10255 }
 0xa9e   :  { %10924 = vrot.lane.b32.xlu1 %v20459_v35, %s18194_s25  ;;  %v10138_v35 = vmul.f32 1.442695, %v10053_v12 }
 0xa9f   :  { %v21672_v51 = vpop.xlane.xlu0 %10018 }
 0xaa0   :  { %23292 = vst [vmem:[#allocation100_spill] sm:$0xff] %v21672_v51  ;;  %v21674_v44 = vpop.xlane.xlu1 %10258  ;;  %v17879_v51 = vpop.eup %17878  ;;  %17880 = vpow2.f32 %v10138_v35 }
 0xaa1   :  { %v10481_v48 = vmul.f32 %v17879_v51, %v21427_v2  ;;  %17882 = vpow2.f32 %v10134_v5  ;;  %v9771_v51 = vmul.f32 0.35355338, %v21373_v25  ;;  %v10142_v5 = vmul.f32 1.442695, %v10055_v45 }
 0xaa2   :  { %17884 = vrcp.f32 %v10238_v61 }
 0xaa3   :  { %v21679_v63 = vpop.permute.xlu0 %10696  ;;  %v21707_v12 = vsel %vm21053_vm5, %v9771_v51, -4.2949673e+09  ;;  %17886 = vrcp.f32 %v21636_v58 }
 0xaa4   :  { %17081 = vmatpush3.msra.mxu0 %v21679_v63  ;;  %v21682_v40 = vpop.xlane.xlu1 %10261  ;;  %v10026_v35 = vsel %vm9839_vm4, %v21707_v12, -inf  ;;  %17888 = vpow2.f32 %v10142_v5 }
 0xaa5   :  { %17083 = vmatmul.mubr.msk.f32.vlgmr.msra.gmra.mrb[110].mxu0 %vm9839_vm4, %v10482_v34  ;;  %17090 = vmatprep.subr.mxu0 %v23287_v10 }
 0xaa6   :  { %17092 = vmatprep.mubr.msk.f32.mxu0 %vm18203_vm1, %v23287_v10 }
 0xaa8   :  { %v21688_v22 = vpop.xlane.xlu1 %10264 }
 0xaaa   :  { %v21700_v34 = vpop.eup %17880 }
 0xaab   :  { %v10287_v2 = vsel %vm9839_vm4, %v21700_v34, 0.0 }
 0xaac   :  { %v21691_v53 = vpop.permute.xlu1 %10620 }
 0xaad   :  { %17076 = vmatpush3.msra.mxu1 %v21691_v53 }
 0xaae   :  { %17078 = vmatmul.mubr.msk.f32.vlgmr.msra.gmra.mrb[132].mxu1 %vm9839_vm4, %v10481_v48  ;;  %17085 = vmatprep.subr.mxu1 %v23287_v10  ;;  %v21711_v48 = vpop.eup %17882 }
 0xaaf   :  { %17087 = vmatprep.mubr.msk.f32.mxu1 %vm18203_vm1, %v23287_v10  ;;  %v10281_v55 = vsel %vm9839_vm4, %v21711_v48, 0.0  ;;  %v17885_v6 = vpop.eup %17884 }
 0xab0   :  { %v17887_v15 = vpop.eup %17886 }
 0xab1   :  { %v10483_v26 = vmul.f32 %v17887_v15, %v21439_v11  ;;  %v21748_v51 = vpop.eup %17888 }
 0xab9   :  { %10288 = vadd.xlane.f32.xlu0 %v10287_v2  ;;  %v10484_v2 = vmul.f32 %v17885_v6, %v21444_v50  ;;  %v10052_v50 = vsub.f32 %v21169_v31, %v21467_v29  ;;  %v10057_v29 = vsub.f32 %v21213_v4, %v21547_v27 }
 0xabb   :  { %v10146_v6 = vmul.f32 1.442695, %v10057_v29 }
 0xac2   :  { %10027 = vmax.xlane.f32.xlu1 %v10026_v35  ;;  %v10136_v35 = vmul.f32 1.442695, %v10052_v50 }
 0xac4   :  { %17890 = vpow2.f32 %v10136_v35 }
 0xac5   :  { %17892 = vrcp.f32 %v21654_v54 }
 0xac6   :  { %10282 = vadd.xlane.f32.xlu1 %v10281_v55  ;;  %v10293_v55 = vsel %vm9839_vm4, %v21748_v51, 0.0  ;;  %17894 = vrcp.f32 %v21648_v37 }
 0xac7   :  { %17896 = vpow2.f32 %v10146_v6 }
 0xace   :  { %v21752_v31 = vpop.eup %17890 }
 0xacf   :  { %11152 = vrot.lane.b32.xlu0 %v20477_v8, %s18194_s25  ;;  %v10284_v11 = vsel %vm9839_vm4, %v21752_v31, 0.0 }
 0xad4   :  { %v21717_v56 = vpop.xlane.xlu0 %10273 }
 0xad7   :  { %11076 = vrot.lane.b32.xlu1 %v20467_v14, %s18194_s25 }
 0xad8   :  { %v21723_v25 = vpop.xlane.xlu0 %10024 }
 0xadc   :  { %v21727_v61 = vpop.permute.xlu0 %10848 }
 0xadd   :  { %17091 = vmatpush3.msra.mxu0 %v21727_v61  ;;  %v21730_v8 = vpop.xlane.xlu1 %10015 }
 0xade   :  { %17093 = vmatmul.mubr.msk.f32.vlgmr.msra.gmra.mrb[112].mxu0 %vm9839_vm4, %v10484_v2  ;;  %17100 = vmatprep.subr.mxu0 %v23287_v10  ;;  %v17893_v2 = vpop.eup %17892 }
 0xadf   :  { %17102 = vmatprep.mubr.msk.f32.mxu0 %vm18203_vm1, %v23287_v10  ;;  %v10486_v15 = vmul.f32 %v17893_v2, %v21457_v30  ;;  %v17895_v27 = vpop.eup %17894 }
 0xae0   :  { %v21782_v30 = vpop.eup %17896  ;;  %v10485_v50 = vmul.f32 %v17895_v27, %v21449_v1 }
 0xae1   :  { %v21736_v14 = vpop.xlane.xlu1 %10270  ;;  %v10299_v35 = vsel %vm9839_vm4, %v21782_v30, 0.0 }
 0xae5   :  { %v21741_v58 = vpop.permute.xlu1 %10772 }
 0xae6   :  { %17086 = vmatpush3.msra.mxu1 %v21741_v58 }
 0xae7   :  { %17088 = vmatmul.mubr.msk.f32.vlgmr.msra.gmra.mrb[134].mxu1 %vm9839_vm4, %v10483_v26  ;;  %17095 = vmatprep.subr.mxu1 %v23287_v10 }
 0xae8   :  { %17097 = vmatprep.mubr.msk.f32.mxu1 %vm18203_vm1, %v23287_v10 }
 0xaee   :  { %10294 = vadd.xlane.f32.xlu0 %v10293_v55 }
 0xafb   :  { %10285 = vadd.xlane.f32.xlu1 %v10284_v11 }
 0xb04   :  { %11304 = vrot.lane.b32.xlu0 %v20485_v17, %s18194_s25 }
 0xb0c   :  { %11228 = vrot.lane.b32.xlu1 %v20475_v20, %s18194_s25  ;;  %v10054_v20 = vsub.f32 %v21181_v33, %v21474_v36  ;;  %v10059_v36 = vsub.f32 %v21225_v42, %v21554_v0 }
 0xb0d   :  { %v21763_v45 = vpop.xlane.xlu0 %10279 }
 0xb0e   :  { %v10140_v37 = vmul.f32 1.442695, %v10054_v20  ;;  %v10150_v55 = vmul.f32 1.442695, %v10059_v36 }
 0xb10   :  { %17898 = vpow2.f32 %v10140_v37 }
 0xb11   :  { %v21765_v5 = vpop.xlane.xlu0 %10030  ;;  %17900 = vrcp.f32 %v21660_v9 }
 0xb12   :  { %17902 = vpow2.f32 %v10150_v55  ;;  %v23296_v55 = vld [vmem:[#allocation53_spill] sm:$0xff] }
 0xb13   :  { %17904 = vrcp.f32 %v21658_v21 }
 0xb15   :  { %v21769_v17 = vpop.permute.xlu0 %11000 }
 0xb16   :  { %17101 = vmatpush3.msra.mxu0 %v21769_v17  ;;  %v21772_v54 = vpop.xlane.xlu1 %10021 }
 0xb17   :  { %17103 = vmatmul.mubr.msk.f32.vlgmr.msra.gmra.mrb[114].mxu0 %vm9839_vm4, %v10486_v15  ;;  %17110 = vmatprep.subr.mxu0 %v23287_v10 }
 0xb18   :  { %17112 = vmatprep.mubr.msk.f32.mxu0 %vm18203_vm1, %v23287_v10 }
 0xb1a   :  { %v21780_v4 = vpop.xlane.xlu1 %10276  ;;  %v21794_v33 = vpop.eup %17898 }
 0xb1b   :  { %v10290_v1 = vsel %vm9839_vm4, %v21794_v33, 0.0  ;;  %v17901_v29 = vpop.eup %17900 }
 0xb1c   :  { %v10488_v6 = vmul.f32 %v17901_v29, %v21471_v23  ;;  %v21820_v42 = vpop.eup %17902  ;;  %v10062_v29 = vsub.f32 %v23296_v55, %v21509_v59 }
 0xb1d   :  { %v17905_v21 = vpop.eup %17904  ;;  %v10305_v20 = vsel %vm9839_vm4, %v21820_v42, 0.0 }
 0xb1e   :  { %v21785_v26 = vpop.permute.xlu1 %10924  ;;  %v10487_v27 = vmul.f32 %v17905_v21, %v21464_v41  ;;  %v10061_v41 = vsub.f32 %v21237_v49, %v21561_v46 }
 0xb1f   :  { %17096 = vmatpush3.msra.mxu1 %v21785_v26 }
 0xb20   :  { %17098 = vmatmul.mubr.msk.f32.vlgmr.msra.gmra.mrb[136].mxu1 %vm9839_vm4, %v10485_v50  ;;  %17105 = vmatprep.subr.mxu1 %v23287_v10  ;;  %v23294_v50 = vld [vmem:[#allocation74_spill] sm:$0xff]  ;;  %v10154_v36 = vmul.f32 1.442695, %v10061_v41  ;;  %v23302_v41 = vld [vmem:[#allocation44_spill] sm:$0xff] }
 0xb21   :  { %17107 = vmatprep.mubr.msk.f32.mxu1 %vm18203_vm1, %v23287_v10 }
 0xb23   :  { %10300 = vadd.xlane.f32.xlu0 %v10299_v35 }
 0xb30   :  { %10291 = vadd.xlane.f32.xlu1 %v10290_v1 }
 0xb39   :  { %11456 = vrot.lane.b32.xlu0 %v20493_v32, %s18194_s25 }
 0xb41   :  { %11380 = vrot.lane.b32.xlu1 %v20483_v39, %s18194_s25  ;;  %v10056_v39 = vsub.f32 %v21193_v52, %v21483_v60 }
 0xb43   :  { %v10144_v23 = vmul.f32 1.442695, %v10056_v39 }
 0xb45   :  { %17906 = vpow2.f32 %v10144_v23 }
 0xb46   :  { %v21805_v11 = vpop.xlane.xlu0 %10288  ;;  %17908 = vrcp.f32 %v21668_v43  ;;  %v23297_v43 = vld [vmem:[#allocation32_spill] sm:$0xff] }
 0xb47   :  { %17910 = vpow2.f32 %v10154_v36  ;;  %v10064_v23 = vsub.f32 %v23297_v43, %v21515_v7  ;;  %v23299_v7 = vld [vmem:[#allocation49_spill] sm:$0xff]  ;;  %v23304_v43 = vld [vmem:[#allocation48_spill] sm:$0xff] }
 0xb48   :  { %17912 = vrcp.f32 %v21662_v28 }
 0xb49   :  { %v10160_v21 = vmul.f32 1.442695, %v10064_v23 }
 0xb4a   :  { %v21808_v2 = vpop.permute.xlu0 %11152 }
 0xb4b   :  { %17111 = vmatpush3.msra.mxu0 %v21808_v2 }
 0xb4c   :  { %17113 = vmatmul.mubr.msk.f32.vlgmr.msra.gmra.mrb[116].mxu0 %vm9839_vm4, %v10488_v6  ;;  %17120 = vmatprep.subr.mxu0 %v23287_v10 }
 0xb4d   :  { %17122 = vmatprep.mubr.msk.f32.mxu0 %vm18203_vm1, %v23287_v10 }
 0xb4f   :  { %v21818_v32 = vpop.xlane.xlu1 %10027  ;;  %v21836_v52 = vpop.eup %17906 }
 0xb50   :  { %v10296_v60 = vsel %vm9839_vm4, %v21836_v52, 0.0  ;;  %v17909_v39 = vpop.eup %17908 }
 0xb51   :  { %v10490_v49 = vmul.f32 %v17909_v39, %v21487_v47  ;;  %v10066_v47 = vsub.f32 %v23299_v7, %v21519_v18 }
 0xb53   :  { %v21822_v0 = vpop.xlane.xlu1 %10282 }
 0xb55   :  { %v21824_v9 = vpop.f32.mrb[108].mxu0 }
 0xb56   :  { %23293 = vst [vmem:[#allocation101_spill] sm:$0xff] %v21824_v9  ;;  %v17074_v15 = vpop.f32.mrb[109].mxu0 }
 0xb57   :  { %v21829_v37 = vpop.permute.xlu1 %11076 }
 0xb58   :  { %10306 = vadd.xlane.f32.xlu0 %v10305_v20  ;;  %17106 = vmatpush3.msra.mxu1 %v21829_v37  ;;  %v23300_v20 = vld [vmem:[#allocation75_spill] sm:$0xff] }
 0xb59   :  { %17108 = vmatmul.mubr.msk.f32.vlgmr.msra.gmra.mrb[138].mxu1 %vm9839_vm4, %v10487_v27  ;;  %17115 = vmatprep.subr.mxu1 %v23287_v10  ;;  %v10058_v28 = vsub.f32 %v23300_v20, %v21495_v19  ;;  %v10164_v27 = vmul.f32 1.442695, %v10066_v47  ;;  %v23307_v20 = vld [vmem:[#allocation58_spill] sm:$0xff] }
 0xb5a   :  { %17117 = vmatprep.mubr.msk.f32.mxu1 %vm18203_vm1, %v23287_v10 }
 0xb5b   :  { %v10148_v36 = vmul.f32 1.442695, %v10058_v28 }
 0xb65   :  { %10297 = vadd.xlane.f32.xlu1 %v10296_v60  ;;  %v23301_v60 = vld [vmem:[#allocation33_spill] sm:$0xff] }
 0xb6e   :  { %11608 = vrot.lane.b32.xlu0 %v20501_v24, %s18194_s25  ;;  %v10156_v24 = vmul.f32 1.442695, %v10062_v29 }
 0xb70   :  { %17914 = vpow2.f32 %v10156_v24  ;;  %v23303_v24 = vld [vmem:[#allocation62_spill] sm:$0xff] }
 0xb71   :  { %17916 = vpow2.f32 %v10160_v21  ;;  %v10070_v18 = vsub.f32 %v23304_v43, %v23303_v24 }
 0xb72   :  { %17918 = vpow2.f32 %v10164_v27 }
 0xb73   :  { %17920 = vpow2.f32 %v10148_v36  ;;  %v10172_v47 = vmul.f32 1.442695, %v10070_v18  ;;  %v23309_v36 = vld [vmem:[#allocation19_spill] sm:$0xff] }
 0xb76   :  { %11532 = vrot.lane.b32.xlu1 %v23294_v50, %s18194_s25  ;;  %v10068_v50 = vsub.f32 %v23302_v41, %v23301_v60 }
 0xb78   :  { %v21847_v35 = vpop.f32.mrb[110].mxu0  ;;  %v10168_v39 = vmul.f32 1.442695, %v10068_v50  ;;  %v23308_v50 = vld [vmem:[#allocation29_spill] sm:$0xff] }
 0xb79   :  { %23295 = vst [vmem:[#allocation74_spill] sm:$0xff] %v21847_v35  ;;  %v17084_v1 = vpop.f32.mrb[111].mxu0 }
 0xb7a   :  { %v21872_v1 = vpop.eup %17910  ;;  %17922 = vpow2.f32 %v10168_v39 }
 0xb7b   :  { %v21851_v6 = vpop.xlane.xlu0 %10294  ;;  %v17913_v29 = vpop.eup %17912  ;;  %v10311_v23 = vsel %vm9839_vm4, %v21872_v1, 0.0  ;;  %17924 = vpow2.f32 %v10172_v47 }
 0xb7c   :  { %v21880_v19 = vpop.eup %17914 }
 0xb7d   :  { %v10314_v27 = vsel %vm9839_vm4, %v21880_v19, 0.0  ;;  %v21894_v60 = vpop.eup %17916 }
 0xb7e   :  { %v10320_v39 = vsel %vm9839_vm4, %v21894_v60, 0.0  ;;  %v21900_v24 = vpop.eup %17918 }
 0xb7f   :  { %v21856_v46 = vpop.permute.xlu0 %11304  ;;  %v21902_v43 = vpop.eup %17920  ;;  %v10326_v47 = vsel %vm9839_vm4, %v21900_v24, 0.0 }
 0xb80   :  { %17121 = vmatpush3.msra.mxu0 %v21856_v46 }
 0xb81   :  { %17123 = vmatmul.mubr.msk.f32.vlgmr.msra.gmra.mrb[118].mxu0 %vm9839_vm4, %v10490_v49  ;;  %17130 = vmatprep.subr.mxu0 %v23287_v10  ;;  %v21862_v59 = vpop.f32.mrb[132].mxu1  ;;  %v23305_v49 = vld [vmem:[#allocation56_spill] sm:$0xff] }
 0xb82   :  { %23298 = vst [vmem:[#allocation53_spill] sm:$0xff] %v21862_v59  ;;  %17132 = vmatprep.mubr.msk.f32.mxu0 %vm18203_vm1, %v23287_v10  ;;  %v17079_v15 = vpop.f32.mrb[133].mxu1  ;;  %v10489_v21 = vmul.f32 %v17913_v29, %v23305_v49  ;;  %v10074_v29 = vsub.f32 %v23309_v36, %v23308_v50  ;;  %v23311_v49 = vld [vmem:[#allocation17_spill] sm:$0xff] }
 0xb83   :  { %v23306_v15 = vld [vmem:[#allocation31_spill] sm:$0xff] }
 0xb84   :  { %v10072_v28 = vsub.f32 %v23307_v20, %v23306_v15  ;;  %v10180_v18 = vmul.f32 1.442695, %v10074_v29  ;;  %v21908_v15 = vpop.eup %17922  ;;  %v10302_v20 = vsel %vm9839_vm4, %v21902_v43, 0.0  ;;  %v23313_v29 = vld [vmem:[#allocation40_spill] sm:$0xff] }
 0xb85   :  { %v21916_v36 = vpop.eup %17924 }
 0xb86   :  { %v10176_v41 = vmul.f32 1.442695, %v10072_v28 }
 0xb88   :  { %v21874_v55 = vpop.xlane.xlu1 %10285  ;;  %17926 = vpow2.f32 %v10176_v41  ;;  %v10332_v41 = vsel %vm9839_vm4, %v21908_v15, 0.0 }
 0xb89   :  { %17928 = vpow2.f32 %v10180_v18 }
 0xb8c   :  { %v21883_v7 = vpop.permute.xlu1 %11228 }
 0xb8d   :  { %10312 = vadd.xlane.f32.xlu0 %v10311_v23  ;;  %17116 = vmatpush3.msra.mxu1 %v21883_v7  ;;  %v23310_v23 = vld [vmem:[#allocation37_spill] sm:$0xff] }
 0xb8e   :  { %17118 = vmatmul.mubr.msk.f32.vlgmr.msra.gmra.mrb[140].mxu1 %vm9839_vm4, %v10489_v21  ;;  %17125 = vmatprep.subr.mxu1 %v23287_v10  ;;  %v10076_v21 = vsub.f32 %v23311_v49, %v23310_v23  ;;  %v10338_v49 = vsel %vm9839_vm4, %v21916_v36, 0.0 }
 0xb8f   :  { %17127 = vmatprep.mubr.msk.f32.mxu1 %vm18203_vm1, %v23287_v10 }
 0xb90   :  { %v10184_v28 = vmul.f32 1.442695, %v10076_v21 }
 0xb91   :  { %10315 = vadd.xlane.f32.xlu0 %v10314_v27  ;;  %v23312_v27 = vld [vmem:[#allocation23_spill] sm:$0xff] }
 0xb92   :  { %v10078_v50 = vsub.f32 %v23312_v27, %v21549_v62  ;;  %17930 = vpow2.f32 %v10184_v28  ;;  %v21922_v18 = vpop.eup %17926  ;;  %v23314_v62 = vld [vmem:[#allocation28_spill] sm:$0xff]  ;;  %v23315_v28 = vld [vmem:[#allocation15_spill] sm:$0xff] }
 0xb93   :  { %v21928_v27 = vpop.eup %17928 }
 0xb94   :  { %v10188_v23 = vmul.f32 1.442695, %v10078_v50  ;;  %v10084_v50 = vsub.f32 %v23315_v28, %v21590_v38 }
 0xb95   :  { %10321 = vadd.xlane.f32.xlu0 %v10320_v39  ;;  %v10080_v39 = vsub.f32 %v23313_v29, %v21556_v16 }
 0xb96   :  { %17932 = vpow2.f32 %v10188_v23  ;;  %v23318_v23 = vld [vmem:[#allocation16_spill] sm:$0xff] }
 0xb97   :  { %v10192_v21 = vmul.f32 1.442695, %v10080_v39  ;;  %v23317_v39 = vld [vmem:[#allocation88_spill] sm:$0xff] }
 0xb99   :  { %10327 = vadd.xlane.f32.xlu0 %v10326_v47  ;;  %v10082_v47 = vsub.f32 %v23314_v62, %v21572_v3  ;;  %17934 = vpow2.f32 %v10192_v21  ;;  %v10200_v3 = vmul.f32 1.442695, %v10084_v50  ;;  %v23319_v62 = vld [vmem:[#allocation36_spill] sm:$0xff] }
 0xb9a   :  { %10303 = vadd.xlane.f32.xlu1 %v10302_v20  ;;  %v10344_v20 = vsel %vm9839_vm4, %v21922_v18, 0.0  ;;  %17936 = vrcp.f32 %v21682_v40 }
 0xb9b   :  { %v10196_v16 = vmul.f32 1.442695, %v10082_v47  ;;  %v23321_v47 = vld [vmem:[#allocation91_spill] sm:$0xff] }
 0xb9c   :  { %v21935_v29 = vpop.eup %17930 }
 0xb9d   :  { %10333 = vadd.xlane.f32.xlu0 %v10332_v41  ;;  %v10350_v41 = vsel %vm9839_vm4, %v21928_v27, 0.0  ;;  %23316 = vst [vmem:[#allocation32_spill] sm:$0xff] %v21935_v29  ;;  %17938 = vpow2.f32 %v10196_v16  ;;  %v10356_v21 = vsel %vm9839_vm4, %v21935_v29, 0.0 }
 0xb9e   :  { %17940 = vpow2.f32 %v10200_v3  ;;  %v23325_v3 = vld [vmem:[#allocation82_spill] sm:$0xff] }
 0xba0   :  { %v21943_v38 = vpop.eup %17932 }
 0xba1   :  { %10339 = vadd.xlane.f32.xlu0 %v10338_v49  ;;  %v10086_v49 = vsub.f32 %v23318_v23, %v23317_v39  ;;  %23320 = vst [vmem:[#allocation49_spill] sm:$0xff] %v21943_v38  ;;  %v10362_v50 = vsel %vm9839_vm4, %v21943_v38, 0.0  ;;  %v23362_v38 = vld [vmem:[#allocation86_spill] sm:$0xff] }
 0xba3   :  { %v10204_v40 = vmul.f32 1.442695, %v10086_v49  ;;  %v10090_v49 = vsub.f32 %v23325_v3, %v21730_v8 }
 0xba5   :  { %10345 = vadd.xlane.f32.xlu0 %v10344_v20  ;;  %v23322_v20 = vld [vmem:[#allocation27_spill] sm:$0xff]  ;;  %17942 = vpow2.f32 %v10204_v40  ;;  %v10212_v8 = vmul.f32 1.442695, %v10090_v49  ;;  %v10092_v40 = vsub.f32 %v21646_v57, %v21772_v54 }
 0xba6   :  { %v10088_v28 = vsub.f32 %v23322_v20, %v23321_v47  ;;  %17944 = vrcp.f32 %v21674_v44  ;;  %v23329_v44 = vld [vmem:[#allocation61_spill] sm:$0xff] }
 0xba8   :  { %v10208_v59 = vmul.f32 1.442695, %v10088_v28 }
 0xba9   :  { %10351 = vadd.xlane.f32.xlu0 %v10350_v41  ;;  %v21947_v41 = vpop.eup %17934 }
 0xbaa   :  { %23323 = vst [vmem:[#allocation75_spill] sm:$0xff] %v21947_v41  ;;  %v17937_v39 = vpop.eup %17936  ;;  %v10368_v20 = vsel %vm9839_vm4, %v21947_v41, 0.0  ;;  %17946 = vpow2.f32 %v10208_v59  ;;  %v10094_v59 = vsub.f32 %v21707_v12, %v21818_v32 }
 0xbab   :  { %11684 = vrot.lane.b32.xlu1 %v23319_v62, %s18194_s25  ;;  %v21962_v9 = vpop.eup %17938  ;;  %17948 = vpow2.f32 %v10212_v8  ;;  %s15713_s25 = sshll.u32 %s18204_s4, 4  ;;  %s15714_s25 = int_to_ptr.vmem [resolvable:$true] %s15713_s25 }
 0xbac   :  { %23327 = vst [vmem:[#allocation44_spill] sm:$0xff] %v21962_v9  ;;  %v10374_v28 = vsel %vm9839_vm4, %v21962_v9, 0.0  ;;  %s18158_s22 = scalar_lea.vmem %s15714_s25, 2048  ;;  %p18163_p11 = scmp.lt.s32.totalorder %s15714_s25, %s15714_s25 }
 0xbad   :  { %10357 = vadd.xlane.f32.xlu0 %v10356_v21  ;;  %v23326_v21 = vld [vmem:[#allocation26_spill] sm:$0xff]  ;;  %p18159_p10 = scmp.ne.s32.totalorder %s15714_s25, %s18158_s22  ;;  %p18164_p12 = scmp.lt.s32.totalorder %s18158_s22, %s18158_s22 }
 0xbae   :  { %v10492_v35 = vmul.f32 %v17937_v39, %v23326_v21  ;;  %v23330_v39 = vld [vmem:[#allocation21_spill] sm:$0xff] }
 0xbaf   :  { %p18165_p13 = por %p18164_p12, %p18163_p11 }
 0xbb0   :  { %v21949_v16 = vpop.xlane.xlu0 %10300 }
 0xbb1   :  { %10363 = vadd.xlane.f32.xlu0 %v10362_v50  ;;  %v21953_v23 = vpop.f32.mrb[112].mxu0  ;;  %v21974_v50 = vpop.eup %17940  ;;  %p18166_p0 = pnand %p18165_p13, %p18159_p10 }
 0xbb2   :  { %23324 = vst [vmem:[#allocation33_spill] sm:$0xff] %v21953_v23  ;;  %v17094_v62 = vpop.f32.mrb[113].mxu0  ;;  %23328 = vst [vmem:[#allocation62_spill] sm:$0xff] %v21974_v50  ;;  %v10380_v54 = vsel %vm9839_vm4, %v21974_v50, 0.0  ;;  %v21984_v49 = vpop.eup %17942 }
 0xbb3   :  { %v10060_v62 = vsub.f32 %v23330_v39, %v23329_v44  ;;  %23332 = vst [vmem:[#allocation56_spill] sm:$0xff] %v21984_v49  ;;  %v17945_v8 = vpop.eup %17944  ;;  %v10386_v12 = vsel %vm9839_vm4, %v21984_v49, 0.0  ;;  %v23336_v39 = vld [vmem:[#allocation85_spill] sm:$0xff] }
 0xbb4   :  { %v21958_v47 = vpop.permute.xlu0 %11456  ;;  %v21992_v32 = vpop.eup %17946 }
 0xbb5   :  { %10369 = vadd.xlane.f32.xlu0 %v10368_v20  ;;  %17131 = vmatpush3.msra.mxu0 %v21958_v47  ;;  %v10152_v21 = vmul.f32 1.442695, %v10060_v62  ;;  %v23333_v20 = vld [vmem:[#allocation81_spill] sm:$0xff]  ;;  %23335 = vst [vmem:[#allocation31_spill] sm:$0xff] %v21992_v32  ;;  %v23338_v62 = vld [vmem:[#allocation18_spill] sm:$0xff] }
 0xbb6   :  { %17133 = vmatmul.mubr.msk.f32.vlgmr.msra.gmra.mrb[120].mxu0 %vm9839_vm4, %v10492_v35  ;;  %17140 = vmatprep.subr.mxu0 %v23287_v10  ;;  %v10216_v35 = vmul.f32 1.442695, %v10092_v40  ;;  %v10220_v40 = vmul.f32 1.442695, %v10094_v59  ;;  %v22004_v59 = vpop.eup %17948 }
 0xbb7   :  { %17142 = vmatprep.mubr.msk.f32.mxu0 %vm18203_vm1, %v23287_v10  ;;  %23339 = vst [vmem:[#allocation58_spill] sm:$0xff] %v22004_v59 }
 0xbb8   :  { %17950 = vpow2.f32 %v10216_v35  ;;  %v10392_v35 = vsel %vm9839_vm4, %v21992_v32, 0.0  ;;  %v23351_v32 = vld [vmem:[#allocation25_spill] sm:$0xff] }
 0xbb9   :  { %10375 = vadd.xlane.f32.xlu0 %v10374_v28  ;;  %v23334_v28 = vld [vmem:[#allocation41_spill] sm:$0xff]  ;;  %17952 = vpow2.f32 %v10152_v21  ;;  %v23340_v21 = vld [vmem:[#allocation87_spill] sm:$0xff] }
 0xbba   :  { %v21980_v3 = vpop.f32.mrb[134].mxu1  ;;  %v10063_v23 = vsub.f32 %v23334_v28, %v23333_v20  ;;  %17954 = vpow2.f32 %v10220_v40  ;;  %v23341_v20 = vld [vmem:[#allocation12_spill] sm:$0xff] }
 0xbbb   :  { %23331 = vst [vmem:[#allocation48_spill] sm:$0xff] %v21980_v3  ;;  %v17089_v57 = vpop.f32.mrb[135].mxu1  ;;  %v10491_v3 = vmul.f32 %v17945_v8, %v23338_v62  ;;  %v10067_v28 = vsub.f32 %v23341_v20, %v23340_v21  ;;  %v10398_v8 = vsel %vm9839_vm4, %v22004_v59, 0.0  ;;  %v23346_v21 = vld [vmem:[#allocation92_spill] sm:$0xff]  ;;  %v23347_v20 = vld [vmem:[#allocation22_spill] sm:$0xff] }
 0xbbc   :  { %v10158_v44 = vmul.f32 1.442695, %v10063_v23  ;;  %v23337_v57 = vld [vmem:[#allocation72_spill] sm:$0xff]  ;;  %v10071_v59 = vsub.f32 %v23347_v20, %v23346_v21 }
 0xbbd   :  { %10381 = vadd.xlane.f32.xlu0 %v10380_v54  ;;  %v21988_v9 = vpop.xlane.xlu1 %10291  ;;  %v10065_v54 = vsub.f32 %v23337_v57, %v23336_v39  ;;  %v10166_v40 = vmul.f32 1.442695, %v10067_v28  ;;  %v23344_v39 = vld [vmem:[#allocation14_spill] sm:$0xff]  ;;  %v23350_v20 = vld [vmem:[#allocation96_spill] sm:$0xff] }
 0xbbe   :  { %17956 = vpow2.f32 %v10158_v44 }
 0xbbf   :  { %v10162_v23 = vmul.f32 1.442695, %v10065_v54 }
 0xbc1   :  { %10387 = vadd.xlane.f32.xlu0 %v10386_v12  ;;  %v21997_v50 = vpop.permute.xlu1 %11380  ;;  %17958 = vpow2.f32 %v10162_v23  ;;  %v23343_v12 = vld [vmem:[#allocation89_spill] sm:$0xff] }
 0xbc2   :  { %17126 = vmatpush3.msra.mxu1 %v21997_v50  ;;  %v10069_v57 = vsub.f32 %v23344_v39, %v23343_v12  ;;  %17960 = vpow2.f32 %v10166_v40  ;;  %v10174_v12 = vmul.f32 1.442695, %v10071_v59  ;;  %v23348_v39 = vld [vmem:[#allocation94_spill] sm:$0xff] }
 0xbc3   :  { %17128 = vmatmul.mubr.msk.f32.vlgmr.msra.gmra.mrb[142].mxu1 %vm9839_vm4, %v10491_v3  ;;  %17135 = vmatprep.subr.mxu1 %v23287_v10  ;;  %v22012_v3 = vpop.eup %17950 }
 0xbc4   :  { %17137 = vmatprep.mubr.msk.f32.mxu1 %vm18203_vm1, %v23287_v10  ;;  %23342 = vst [vmem:[#allocation29_spill] sm:$0xff] %v22012_v3  ;;  %v22016_v62 = vpop.eup %17952  ;;  %v10404_v44 = vsel %vm9839_vm4, %v22012_v3, 0.0  ;;  %v23349_v3 = vld [vmem:[#allocation39_spill] sm:$0xff] }
 0xbc5   :  { %10393 = vadd.xlane.f32.xlu0 %v10392_v35  ;;  %v22020_v54 = vpop.eup %17954  ;;  %v10170_v35 = vmul.f32 1.442695, %v10069_v57  ;;  %v10308_v23 = vsel %vm9839_vm4, %v22016_v62, 0.0 }
 0xbc6   :  { %23345 = vst [vmem:[#allocation19_spill] sm:$0xff] %v22020_v54 }
 0xbc7   :  { %17962 = vpow2.f32 %v10170_v35  ;;  %v23353_v35 = vld [vmem:[#allocation50_spill] sm:$0xff] }
 0xbc8   :  { %v22026_v28 = vpop.eup %17956  ;;  %17964 = vpow2.f32 %v10174_v12  ;;  %v23354_v12 = vld [vmem:[#allocation77_spill] sm:$0xff] }
 0xbc9   :  { %10399 = vadd.xlane.f32.xlu0 %v10398_v8  ;;  %v10410_v8 = vsel %vm9839_vm4, %v22020_v54, 0.0  ;;  %v10317_v40 = vsel %vm9839_vm4, %v22026_v28, 0.0 }
 0xbcb   :  { %v22034_v57 = vpop.eup %17958 }
 0xbcc   :  { %v10323_v54 = vsel %vm9839_vm4, %v22034_v57, 0.0 }
 0xbcd   :  { %10405 = vadd.xlane.f32.xlu0 %v10404_v44  ;;  %v10073_v44 = vsub.f32 %v23349_v3, %v23348_v39  ;;  %v23352_v3 = vld [vmem:[#allocation38_spill] sm:$0xff] }
 0xbce   :  { %v10077_v39 = vsub.f32 %v23353_v35, %v23352_v3  ;;  %v23357_v3 = vld [vmem:[#allocation30_spill] sm:$0xff] }
 0xbcf   :  { %10309 = vadd.xlane.f32.xlu1 %v10308_v23  ;;  %v10178_v21 = vmul.f32 1.442695, %v10073_v44  ;;  %v10075_v23 = vsub.f32 %v23351_v32, %v23350_v20  ;;  %v23355_v44 = vld [vmem:[#allocation55_spill] sm:$0xff] }
 0xbd0   :  { %v10186_v32 = vmul.f32 1.442695, %v10077_v39  ;;  %v10079_v20 = vsub.f32 %v23355_v44, %v23354_v12  ;;  %v23359_v44 = vld [vmem:[#allocation59_spill] sm:$0xff] }
 0xbd1   :  { %10411 = vadd.xlane.f32.xlu0 %v10410_v8  ;;  %v22040_v8 = vpop.eup %17960  ;;  %17966 = vpow2.f32 %v10178_v21  ;;  %v10182_v59 = vmul.f32 1.442695, %v10075_v23  ;;  %v23356_v23 = vld [vmem:[#allocation79_spill] sm:$0xff] }
 0xbd2   :  { %v10329_v49 = vsel %vm9839_vm4, %v22040_v8, 0.0  ;;  %17968 = vrcp.f32 %v21666_v13  ;;  %v10081_v35 = vsub.f32 %v23357_v3, %v23356_v23  ;;  %v10190_v41 = vmul.f32 1.442695, %v10079_v20  ;;  %v23361_v23 = vld [vmem:[#allocation20_spill] sm:$0xff] }
 0xbd3   :  { %10318 = vadd.xlane.f32.xlu1 %v10317_v40  ;;  %v22046_v40 = vpop.eup %17962  ;;  %17970 = vpow2.f32 %v10182_v59 }
 0xbd4   :  { %v22053_v21 = vpop.eup %17964  ;;  %17972 = vrcp.f32 %v21717_v56  ;;  %v10194_v59 = vmul.f32 1.442695, %v10081_v35  ;;  %v23358_v56 = vld [vmem:[#allocation83_spill] sm:$0xff] }
 0xbd5   :  { %17974 = vpow2.f32 %v10186_v32  ;;  %v10341_v13 = vsel %vm9839_vm4, %v22053_v21, 0.0 }
 0xbd6   :  { %17976 = vrcp.f32 %v21763_v45 }
 0xbd7   :  { %10324 = vadd.xlane.f32.xlu1 %v10323_v54  ;;  %v10335_v54 = vsel %vm9839_vm4, %v22046_v40, 0.0  ;;  %17978 = vpow2.f32 %v10190_v41  ;;  %v23363_v41 = vld [vmem:[#allocation54_spill] sm:$0xff] }
 0xbd8   :  { %17980 = vrcp.f32 %v21874_v55  ;;  %v10085_v29 = vsub.f32 %v23363_v41, %v23362_v38  ;;  %v23366_v38 = vld [vmem:[#allocation95_spill] sm:$0xff] }
 0xbd9   :  { %17982 = vpow2.f32 %v10194_v59 }
 0xbda   :  { %17984 = vrcp.f32 %v21688_v22  ;;  %v23367_v22 = vld [vmem:[#allocation78_spill] sm:$0xff] }
 0xbdb   :  { %10330 = vadd.xlane.f32.xlu1 %v10329_v49  ;;  %v22060_v49 = vpop.eup %17966  ;;  %17986 = vrcp.f32 %v21988_v9 }
 0xbdc   :  { %v17969_v12 = vpop.eup %17968  ;;  %v10347_v32 = vsel %vm9839_vm4, %v22060_v49, 0.0 }
 0xbdd   :  { %v22069_v20 = vpop.eup %17970  ;;  %v10494_v45 = vmul.f32 %v17969_v12, %v23361_v23  ;;  %v23368_v23 = vld [vmem:[#allocation90_spill] sm:$0xff] }
 0xbde   :  { %23360 = vst [vmem:[#allocation37_spill] sm:$0xff] %v22069_v20  ;;  %v17973_v35 = vpop.eup %17972  ;;  %v10353_v55 = vsel %vm9839_vm4, %v22069_v20, 0.0 }
 0xbdf   :  { %10336 = vadd.xlane.f32.xlu1 %v10335_v54  ;;  %v10083_v54 = vsub.f32 %v23359_v44, %v23358_v56  ;;  %v22085_v12 = vpop.eup %17974  ;;  %v10496_v44 = vmul.f32 %v17973_v35, %v23367_v22  ;;  %v23371_v35 = vld [vmem:[#allocation97_spill] sm:$0xff] }
 0xbe0   :  { %23365 = vst [vmem:[#allocation23_spill] sm:$0xff] %v22085_v12  ;;  %v10359_v9 = vsel %vm9839_vm4, %v22085_v12, 0.0  ;;  %v23372_v22 = vld [vmem:[#allocation93_spill] sm:$0xff] }
 0xbe3   :  { %10342 = vadd.xlane.f32.xlu1 %v10341_v13  ;;  %v10198_v13 = vmul.f32 1.442695, %v10083_v54  ;;  %v17977_v54 = vpop.eup %17976 }
 0xbe5   :  { %v22063_v39 = vpop.xlane.xlu0 %10306  ;;  %17988 = vpow2.f32 %v10198_v13 }
 0xbe7   :  { %10348 = vadd.xlane.f32.xlu1 %v10347_v32  ;;  %v10202_v32 = vmul.f32 1.442695, %v10085_v29 }
 0xbe9   :  { %v22073_v3 = vpop.permute.xlu0 %11608  ;;  %17990 = vpow2.f32 %v10202_v32 }
 0xbea   :  { %v22078_v56 = vpop.f32.mrb[114].mxu0  ;;  %17141 = vmatpush3.msra.mxu0 %v22073_v3 }
 0xbeb   :  { %23364 = vst [vmem:[#allocation17_spill] sm:$0xff] %v22078_v56  ;;  %17143 = vmatmul.mubr.msk.f32.vlgmr.msra.gmra.mrb[122].mxu0 %vm9839_vm4, %v10494_v45  ;;  %17150 = vmatprep.subr.mxu0 %v23287_v10  ;;  %v17104_v59 = vpop.f32.mrb[115].mxu0  ;;  %v23369_v45 = vld [vmem:[#allocation13_spill] sm:$0xff] }
 0xbec   :  { %10354 = vadd.xlane.f32.xlu1 %v10353_v55  ;;  %17151 = vmatpush3.msra.mxu0 %v23366_v38  ;;  %v10087_v41 = vsub.f32 %v23369_v45, %v23368_v23  ;;  %v22098_v55 = vpop.eup %17978  ;;  %v10498_v59 = vmul.f32 %v17977_v54, %v23371_v35 }
 0xbed   :  { %17152 = vmatprep.mubr.msk.f32.mxu0 %vm18203_vm1, %v23287_v10  ;;  %17160 = vmatprep.subr.mxu0 %v23287_v10  ;;  %23370 = vst [vmem:[#allocation40_spill] sm:$0xff] %v22098_v55  ;;  %v17981_v29 = vpop.eup %17980 }
 0xbee   :  { %v10206_v13 = vmul.f32 1.442695, %v10087_v41  ;;  %v22107_v45 = vpop.eup %17982  ;;  %v10500_v32 = vmul.f32 %v17981_v29, %v21752_v31 }
 0xbef   :  { %17153 = vmatmul.mubr.msk.f32.vlgmr.msra.gmra.mrb[124].mxu0 %vm9839_vm4, %v10496_v44  ;;  %v23373_v44 = vld [vmem:[#allocation60_spill] sm:$0xff]  ;;  %v17985_v54 = vpop.eup %17984 }
 0xbf0   :  { %17161 = vmatpush3.msra.mxu0 %v21679_v63  ;;  %10360 = vadd.xlane.f32.xlu1 %v10359_v9  ;;  %v10089_v23 = vsub.f32 %v23373_v44, %v23372_v22  ;;  %v10365_v9 = vsel %vm9839_vm4, %v22098_v55, 0.0  ;;  %v17987_v22 = vpop.eup %17986  ;;  %v23375_v44 = vld [vmem:[#allocation100_spill] sm:$0xff]  ;;  %v23376_v55 = vld [vmem:[#allocation57_spill] sm:$0xff] }
 0xbf1   :  { %17162 = vmatprep.mubr.msk.f32.mxu0 %vm18203_vm1, %v23287_v10  ;;  %17170 = vmatprep.subr.mxu0 %v23287_v10  ;;  %v10091_v12 = vsub.f32 %v23376_v55, %v23375_v44  ;;  %v22127_v31 = vpop.eup %17988  ;;  %v10502_v29 = vmul.f32 %v17987_v22, %v21794_v33 }
 0xbf2   :  { %v10298_v56 = vpop.xlane.xlu1 %10297 }
 0xbf3   :  { %17163 = vmatmul.mubr.msk.f32.vlgmr.msra.gmra.mrb[126].mxu0 %vm9839_vm4, %v10498_v59  ;;  %17992 = vrcp.f32 %v10298_v56  ;;  %v22112_v35 = vpop.f32.mrb[136].mxu1  ;;  %v10210_v59 = vmul.f32 1.442695, %v10089_v23  ;;  %v23377_v56 = vld [vmem:[#allocation24_spill] sm:$0xff]  ;;  %v10214_v55 = vmul.f32 1.442695, %v10091_v12  ;;  %v22142_v33 = vpop.eup %17990 }
 0xbf4   :  { %23374 = vst [vmem:[#allocation28_spill] sm:$0xff] %v22112_v35  ;;  %17171 = vmatpush3.msra.mxu0 %v21727_v61  ;;  %10366 = vadd.xlane.f32.xlu1 %v10365_v9  ;;  %v17099_v41 = vpop.f32.mrb[137].mxu1  ;;  %17994 = vpow2.f32 %v10206_v13  ;;  %v10493_v20 = vmul.f32 %v17985_v54, %v23377_v56  ;;  %v10371_v9 = vsel %vm9839_vm4, %v22107_v45, 0.0  ;;  %v23378_v13 = vld [vmem:[#allocation80_spill] sm:$0xff]  ;;  %v10377_v54 = vsel %vm9839_vm4, %v22127_v31, 0.0  ;;  %v23379_v12 = vld [vmem:[#allocation98_spill] sm:$0xff] }
 0xbf5   :  { %17172 = vmatprep.mubr.msk.f32.mxu0 %vm18203_vm1, %v23287_v10  ;;  %17180 = vmatprep.subr.mxu0 %v23287_v10  ;;  %17996 = vpow2.f32 %v10210_v59  ;;  %v10093_v23 = vsub.f32 %v23378_v13, %v21723_v25  ;;  %v10383_v22 = vsel %vm9839_vm4, %v22142_v33, 0.0 }
 0xbf6   :  { %v22122_v35 = vpop.permute.xlu1 %11532  ;;  %17998 = vpow2.f32 %v10214_v55 }
 0xbf7   :  { %17173 = vmatmul.mubr.msk.f32.vlgmr.msra.gmra.mrb[128].mxu0 %vm9839_vm4, %v10500_v32  ;;  %17136 = vmatpush3.msra.mxu1 %v22122_v35  ;;  %v10095_v32 = vsub.f32 %v23379_v12, %v21765_v5 }
 0xbf8   :  { %10372 = vadd.xlane.f32.xlu1 %v10371_v9  ;;  %17181 = vmatpush3.msra.mxu0 %v21769_v17 }
 0xbf9   :  { %17138 = vmatmul.mubr.msk.f32.vlgmr.msra.gmra.mrb[144].mxu1 %vm9839_vm4, %v10493_v20  ;;  %17182 = vmatprep.mubr.msk.f32.mxu0 %vm18203_vm1, %v23287_v10  ;;  %v10218_v20 = vmul.f32 1.442695, %v10093_v23  ;;  %v10222_v44 = vmul.f32 1.442695, %v10095_v32 }
 0xbfa   :  { %17190 = vmatprep.subr.mxu0 %v23287_v10  ;;  %17145 = vmatprep.subr.mxu1 %v23287_v10 }
 0xbfb   :  { %17183 = vmatmul.mubr.msk.f32.vlgmr.msra.gmra.mrb[130].mxu0 %vm9839_vm4, %v10502_v29  ;;  %17147 = vmatprep.mubr.msk.f32.mxu1 %vm18203_vm1, %v23287_v10  ;;  %18000 = vpow2.f32 %v10218_v20 }
 0xbfc   :  { %10378 = vadd.xlane.f32.xlu1 %v10377_v54  ;;  %17191 = vmatpush3.msra.mxu0 %v21808_v2  ;;  %18002 = vpow2.f32 %v10222_v44 }
 0xbfd   :  { %17192 = vmatprep.mubr.msk.f32.mxu0 %vm18203_vm1, %v23287_v10  ;;  %17200 = vmatprep.subr.mxu0 %v23287_v10  ;;  %v17993_v25 = vpop.eup %17992  ;;  %18004 = vrcp.f32 %v21736_v14 }
 0xbfe   :  { %v10504_v41 = vmul.f32 %v17993_v25, %v21836_v52  ;;  %v22155_v59 = vpop.eup %17994  ;;  %18006 = vrcp.f32 %v21780_v4  ;;  %v23381_v4 = vld [vmem:[#allocation99_spill] sm:$0xff] }
 0xbff   :  { %v10389_v5 = vsel %vm9839_vm4, %v22155_v59, 0.0  ;;  %v22164_v52 = vpop.eup %17996  ;;  %18008 = vrcp.f32 %v21822_v0 }
 0xc00   :  { %10384 = vadd.xlane.f32.xlu1 %v10383_v22  ;;  %17193 = vmatmul.mubr.msk.f32.vlgmr.msra.gmra.mrb[132].mxu0 %vm9839_vm4, %v10504_v41  ;;  %v10395_v56 = vsel %vm9839_vm4, %v22164_v52, 0.0  ;;  %v22168_v9 = vpop.eup %17998  ;;  %v23380_v41 = vld [vmem:[#allocation84_spill] sm:$0xff] }
 0xc01   :  { %17201 = vmatpush3.msra.mxu0 %v21856_v46  ;;  %17202 = vmatprep.mubr.msk.f32.mxu0 %vm18203_vm1, %v23287_v10  ;;  %v10401_v29 = vsel %vm9839_vm4, %v22168_v9, 0.0 }
 0xc02   :  { %17210 = vmatprep.subr.mxu0 %v23287_v10 }
 0xc04   :  { %10390 = vadd.xlane.f32.xlu1 %v10389_v5 }
 0xc05   :  { %v22172_v55 = vpop.eup %18000 }
 0xc06   :  { %v10407_v13 = vsel %vm9839_vm4, %v22172_v55, 0.0  ;;  %v22176_v23 = vpop.eup %18002 }
 0xc07   :  { %v10413_v54 = vsel %vm9839_vm4, %v22176_v23, 0.0  ;;  %v18005_v32 = vpop.eup %18004 }
 0xc08   :  { %10396 = vadd.xlane.f32.xlu1 %v10395_v56  ;;  %v10495_v22 = vmul.f32 %v18005_v32, %v23380_v41  ;;  %v18007_v5 = vpop.eup %18006 }
 0xc09   :  { %v18009_v0 = vpop.eup %18008 }
 0xc0c   :  { %10402 = vadd.xlane.f32.xlu1 %v10401_v29 }
 0xc10   :  { %10408 = vadd.xlane.f32.xlu1 %v10407_v13 }
 0xc14   :  { %10414 = vadd.xlane.f32.xlu1 %v10413_v54 }
 0xc1f   :  { %v22181_v25 = vpop.f32.mrb[116].mxu0 }
 0xc20   :  { %v17114_v20 = vpop.f32.mrb[117].mxu0 }
 0xc21   :  { %v10313_v20 = vpop.xlane.xlu0 %10312 }
 0xc27   :  { %v10304_v12 = vpop.xlane.xlu1 %10303 }
 0xc28   :  { %18010 = vrcp.f32 %v10304_v12 }
 0xc29   :  { %18012 = vrcp.f32 %v21805_v11  ;;  %v10497_v11 = vmul.f32 %v18007_v5, %v23381_v4 }
 0xc2a   :  { %18014 = vrcp.f32 %v21851_v6  ;;  %v10499_v6 = vmul.f32 %v18009_v0, %v21711_v48 }
 0xc2b   :  { %v22187_v44 = vpop.permute.xlu1 %11684  ;;  %18016 = vrcp.f32 %v21949_v16 }
 0xc2c   :  { %v22189_v56 = vpop.f32.mrb[138].mxu1  ;;  %17146 = vmatpush3.msra.mxu1 %v22187_v44  ;;  %18018 = vrcp.f32 %v22063_v39  ;;  %v10316_v39 = vpop.xlane.xlu0 %10315 }
 0xc2d   :  { %v17109_v14 = vpop.f32.mrb[139].mxu1  ;;  %17148 = vmatmul.mubr.msk.f32.vlgmr.msra.gmra.mrb[146].mxu1 %vm9839_vm4, %v10495_v22  ;;  %17155 = vmatprep.subr.mxu1 %v23287_v10  ;;  %18020 = vrcp.f32 %v10313_v20 }
 0xc2e   :  { %17156 = vmatpush3.msra.mxu1 %v21691_v53  ;;  %17157 = vmatprep.mubr.msk.f32.mxu1 %vm18203_vm1, %v23287_v10 }
 0xc2f   :  { %17165 = vmatprep.subr.mxu1 %v23287_v10 }
 0xc30   :  { %v10322_v41 = vpop.xlane.xlu0 %10321 }
 0xc31   :  { %17158 = vmatmul.mubr.msk.f32.vlgmr.msra.gmra.mrb[148].mxu1 %vm9839_vm4, %v10497_v11 }
 0xc32   :  { %v18011_v29 = vpop.eup %18010  ;;  %17166 = vmatpush3.msra.mxu1 %v21741_v58  ;;  %17167 = vmatprep.mubr.msk.f32.mxu1 %vm18203_vm1, %v23287_v10 }
 0xc33   :  { %v10506_v13 = vmul.f32 %v18011_v29, %v21902_v43  ;;  %17175 = vmatprep.subr.mxu1 %v23287_v10  ;;  %v18013_v54 = vpop.eup %18012 }
 0xc34   :  { %v10501_v16 = vmul.f32 %v18013_v54, %v21700_v34  ;;  %v18015_v48 = vpop.eup %18014  ;;  %v10328_v5 = vpop.xlane.xlu0 %10327 }
 0xc35   :  { %17168 = vmatmul.mubr.msk.f32.vlgmr.msra.gmra.mrb[150].mxu1 %vm9839_vm4, %v10499_v6  ;;  %17203 = vmatmul.mubr.msk.f32.vlgmr.msra.gmra.mrb[134].mxu0 %vm9839_vm4, %v10506_v13  ;;  %v10503_v34 = vmul.f32 %v18015_v48, %v21748_v51  ;;  %v18017_v43 = vpop.eup %18016 }
 0xc36   :  { %17176 = vmatpush3.msra.mxu1 %v21785_v26  ;;  %17211 = vmatpush3.msra.mxu0 %v21958_v47  ;;  %v10505_v12 = vmul.f32 %v18017_v43, %v21782_v30  ;;  %v18019_v32 = vpop.eup %18018 }
 0xc37   :  { %17177 = vmatprep.mubr.msk.f32.mxu1 %vm18203_vm1, %v23287_v10  ;;  %17185 = vmatprep.subr.mxu1 %v23287_v10  ;;  %v10507_v51 = vmul.f32 %v18019_v32, %v21820_v42  ;;  %v18021_v22 = vpop.eup %18020 }
 0xc38   :  { %17212 = vmatprep.mubr.msk.f32.mxu0 %vm18203_vm1, %v23287_v10  ;;  %17220 = vmatprep.subr.mxu0 %v23287_v10  ;;  %v10509_v30 = vmul.f32 %v18021_v22, %v21872_v1  ;;  %v10334_v42 = vpop.xlane.xlu0 %10333 }
 0xc39   :  { %17178 = vmatmul.mubr.msk.f32.vlgmr.msra.gmra.mrb[152].mxu1 %vm9839_vm4, %v10501_v16 }
 0xc3a   :  { %17186 = vmatpush3.msra.mxu1 %v21829_v37  ;;  %17187 = vmatprep.mubr.msk.f32.mxu1 %vm18203_vm1, %v23287_v10 }
 0xc3b   :  { %17195 = vmatprep.subr.mxu1 %v23287_v10 }
 0xc3c   :  { %v10340_v4 = vpop.xlane.xlu0 %10339 }
 0xc3d   :  { %17188 = vmatmul.mubr.msk.f32.vlgmr.msra.gmra.mrb[154].mxu1 %vm9839_vm4, %v10503_v34 }
 0xc3e   :  { %17196 = vmatpush3.msra.mxu1 %v21883_v7  ;;  %17197 = vmatprep.mubr.msk.f32.mxu1 %vm18203_vm1, %v23287_v10 }
 0xc3f   :  { %17205 = vmatprep.subr.mxu1 %v23287_v10 }
 0xc40   :  { %v10346_v0 = vpop.xlane.xlu0 %10345 }
 0xc41   :  { %17198 = vmatmul.mubr.msk.f32.vlgmr.msra.gmra.mrb[156].mxu1 %vm9839_vm4, %v10505_v12 }
 0xc42   :  { %17206 = vmatpush3.msra.mxu1 %v21997_v50  ;;  %17207 = vmatprep.mubr.msk.f32.mxu1 %vm18203_vm1, %v23287_v10 }
 0xc43   :  { %17215 = vmatprep.subr.mxu1 %v23287_v10 }
 0xc44   :  { %v10352_v1 = vpop.xlane.xlu0 %10351 }
 0xc45   :  { %17208 = vmatmul.mubr.msk.f32.vlgmr.msra.gmra.mrb[158].mxu1 %vm9839_vm4, %v10507_v51 }
 0xc46   :  { %17216 = vmatpush3.msra.mxu1 %v22122_v35  ;;  %17217 = vmatprep.mubr.msk.f32.mxu1 %vm18203_vm1, %v23287_v10 }
 0xc47   :  { %17225 = vmatprep.subr.mxu1 %v23287_v10 }
 0xc48   :  { %v22253_v16 = vpop.xlane.xlu0 %10357 }
 0xc49   :  { %17218 = vmatmul.mubr.msk.f32.vlgmr.msra.gmra.mrb[160].mxu1 %vm9839_vm4, %v10509_v30 }
 0xc4a   :  { %17226 = vmatpush3.msra.mxu1 %v22187_v44  ;;  %17227 = vmatprep.mubr.msk.f32.mxu1 %vm18203_vm1, %v23287_v10 }
 0xc4b   :  { %17235 = vmatprep.subr.mxu1 %v23287_v10 }
 0xc54   :  { %v22249_v14 = vpop.f32.mrb[118].mxu0 }
 0xc55   :  { %v17124_v11 = vpop.f32.mrb[119].mxu0 }
 0xc5c   :  { %v10310_v29 = vpop.xlane.xlu1 %10309 }
 0xc5d   :  { %18022 = vrcp.f32 %v10310_v29 }
 0xc5e   :  { %18024 = vrcp.f32 %v10316_v39 }
 0xc60   :  { %v10319_v6 = vpop.xlane.xlu1 %10318 }
 0xc61   :  { %18026 = vrcp.f32 %v10319_v6  ;;  %v22251_v13 = vpop.f32.mrb[140].mxu1 }
 0xc62   :  { %v17119_v54 = vpop.f32.mrb[141].mxu1  ;;  %18028 = vrcp.f32 %v10322_v41  ;;  %v22261_v41 = vpop.xlane.xlu0 %10363 }
 0xc64   :  { %v10325_v20 = vpop.xlane.xlu1 %10324 }
 0xc65   :  { %18030 = vrcp.f32 %v10325_v20 }
 0xc66   :  { %18032 = vrcp.f32 %v10328_v5 }
 0xc67   :  { %v18023_v48 = vpop.eup %18022 }
 0xc68   :  { %v10508_v34 = vmul.f32 %v18023_v48, %v22016_v62  ;;  %v10331_v43 = vpop.xlane.xlu1 %10330  ;;  %v18025_v12 = vpop.eup %18024 }
 0xc69   :  { %18034 = vrcp.f32 %v10331_v43  ;;  %v10510_v32 = vmul.f32 %v18025_v12, %v21880_v19 }
 0xc6a   :  { %17213 = vmatmul.mubr.msk.f32.vlgmr.msra.gmra.mrb[136].mxu0 %vm9839_vm4, %v10508_v34  ;;  %18036 = vrcp.f32 %v10334_v42 }
 0xc6b   :  { %v18027_v39 = vpop.eup %18026  ;;  %17221 = vmatpush3.msra.mxu0 %v22073_v3  ;;  %17222 = vmatprep.mubr.msk.f32.mxu0 %vm18203_vm1, %v23287_v10 }
 0xc6c   :  { %v10511_v51 = vmul.f32 %v18027_v39, %v22026_v28  ;;  %v10337_v22 = vpop.xlane.xlu1 %10336  ;;  %17230 = vmatprep.subr.mxu0 %v23287_v10  ;;  %v18029_v62 = vpop.eup %18028 }
 0xc6d   :  { %18038 = vrcp.f32 %v10337_v22  ;;  %v10512_v19 = vmul.f32 %v18029_v62, %v21894_v60 }
 0xc6e   :  { %17223 = vmatmul.mubr.msk.f32.vlgmr.msra.gmra.mrb[138].mxu0 %vm9839_vm4, %v10510_v32  ;;  %17228 = vmatmul.mubr.msk.f32.vlgmr.msra.gmra.mrb[162].mxu1 %vm9839_vm4, %v10511_v51  ;;  %18040 = vrcp.f32 %v10340_v4  ;;  %v22277_v4 = vpop.xlane.xlu0 %10369  ;;  %v23382_v51 = vld [vmem:[#allocation37_spill] sm:$0xff] }
 0xc6f   :  { %v18031_v30 = vpop.eup %18030  ;;  %17231 = vmatpush3.msra.mxu0 %v23366_v38  ;;  %17236 = vmatpush3.msra.mxu1 %v21691_v53 }
 0xc70   :  { %v10513_v5 = vmul.f32 %v18031_v30, %v22034_v57  ;;  %v10343_v28 = vpop.xlane.xlu1 %10342  ;;  %17232 = vmatprep.mubr.msk.f32.mxu0 %vm18203_vm1, %v23287_v10  ;;  %17237 = vmatprep.mubr.msk.f32.mxu1 %vm18203_vm1, %v23287_v10  ;;  %v18033_v42 = vpop.eup %18032 }
 0xc71   :  { %18042 = vrcp.f32 %v10343_v28  ;;  %17240 = vmatprep.subr.mxu0 %v23287_v10  ;;  %17245 = vmatprep.subr.mxu1 %v23287_v10  ;;  %v10514_v57 = vmul.f32 %v18033_v42, %v21900_v24  ;;  %v23384_v28 = vld [vmem:[#allocation23_spill] sm:$0xff] }
 0xc72   :  { %17233 = vmatmul.mubr.msk.f32.vlgmr.msra.gmra.mrb[140].mxu0 %vm9839_vm4, %v10512_v19  ;;  %17238 = vmatmul.mubr.msk.f32.vlgmr.msra.gmra.mrb[164].mxu1 %vm9839_vm4, %v10513_v5  ;;  %18044 = vrcp.f32 %v10346_v0  ;;  %v10376_v0 = vpop.xlane.xlu0 %10375  ;;  %v23383_v19 = vld [vmem:[#allocation32_spill] sm:$0xff] }
 0xc73   :  { %v18035_v60 = vpop.eup %18034  ;;  %17241 = vmatpush3.msra.mxu0 %v21679_v63  ;;  %17246 = vmatpush3.msra.mxu1 %v21741_v58 }
 0xc74   :  { %v10515_v11 = vmul.f32 %v18035_v60, %v22040_v8  ;;  %v10349_v29 = vpop.xlane.xlu1 %10348  ;;  %17242 = vmatprep.mubr.msk.f32.mxu0 %vm18203_vm1, %v23287_v10  ;;  %17247 = vmatprep.mubr.msk.f32.mxu1 %vm18203_vm1, %v23287_v10  ;;  %v18037_v6 = vpop.eup %18036 }
 0xc75   :  { %18046 = vrcp.f32 %v10349_v29  ;;  %17250 = vmatprep.subr.mxu0 %v23287_v10  ;;  %17255 = vmatprep.subr.mxu1 %v23287_v10  ;;  %v10516_v8 = vmul.f32 %v18037_v6, %v21908_v15 }
 0xc76   :  { %17243 = vmatmul.mubr.msk.f32.vlgmr.msra.gmra.mrb[142].mxu0 %vm9839_vm4, %v10514_v57  ;;  %17248 = vmatmul.mubr.msk.f32.vlgmr.msra.gmra.mrb[166].mxu1 %vm9839_vm4, %v10515_v11  ;;  %18048 = vrcp.f32 %v10352_v1 }
 0xc77   :  { %v18039_v24 = vpop.eup %18038  ;;  %17251 = vmatpush3.msra.mxu0 %v21727_v61  ;;  %17256 = vmatpush3.msra.mxu1 %v21785_v26 }
 0xc78   :  { %v10517_v54 = vmul.f32 %v18039_v24, %v22046_v40  ;;  %17252 = vmatprep.mubr.msk.f32.mxu0 %vm18203_vm1, %v23287_v10  ;;  %17257 = vmatprep.mubr.msk.f32.mxu1 %vm18203_vm1, %v23287_v10  ;;  %v18041_v48 = vpop.eup %18040  ;;  %v23385_v24 = vld [vmem:[#allocation49_spill] sm:$0xff] }
 0xc79   :  { %v10355_v20 = vpop.xlane.xlu1 %10354  ;;  %17260 = vmatprep.subr.mxu0 %v23287_v10  ;;  %17265 = vmatprep.subr.mxu1 %v23287_v10  ;;  %v10518_v40 = vmul.f32 %v18041_v48, %v21916_v36 }
 0xc7a   :  { %18050 = vrcp.f32 %v10355_v20  ;;  %17253 = vmatmul.mubr.msk.f32.vlgmr.msra.gmra.mrb[144].mxu0 %vm9839_vm4, %v10516_v8  ;;  %17258 = vmatmul.mubr.msk.f32.vlgmr.msra.gmra.mrb[168].mxu1 %vm9839_vm4, %v10517_v54 }
 0xc7b   :  { %v18043_v15 = vpop.eup %18042  ;;  %18052 = vrcp.f32 %v22253_v16  ;;  %17261 = vmatpush3.msra.mxu0 %v21769_v17  ;;  %17266 = vmatpush3.msra.mxu1 %v21829_v37  ;;  %v10382_v16 = vpop.xlane.xlu0 %10381 }
 0xc7c   :  { %v10519_v1 = vmul.f32 %v18043_v15, %v22053_v21  ;;  %17262 = vmatprep.mubr.msk.f32.mxu0 %vm18203_vm1, %v23287_v10  ;;  %17267 = vmatprep.mubr.msk.f32.mxu1 %vm18203_vm1, %v23287_v10  ;;  %v18045_v43 = vpop.eup %18044 }
 0xc7d   :  { %v10361_v34 = vpop.xlane.xlu1 %10360  ;;  %17270 = vmatprep.subr.mxu0 %v23287_v10  ;;  %17275 = vmatprep.subr.mxu1 %v23287_v10  ;;  %v10520_v21 = vmul.f32 %v18045_v43, %v21922_v18 }
 0xc7e   :  { %18054 = vrcp.f32 %v10361_v34  ;;  %17263 = vmatmul.mubr.msk.f32.vlgmr.msra.gmra.mrb[146].mxu0 %vm9839_vm4, %v10518_v40  ;;  %17268 = vmatmul.mubr.msk.f32.vlgmr.msra.gmra.mrb[170].mxu1 %vm9839_vm4, %v10519_v1  ;;  %v23387_v40 = vld [vmem:[#allocation75_spill] sm:$0xff] }
 0xc7f   :  { %v18047_v36 = vpop.eup %18046  ;;  %18056 = vrcp.f32 %v22261_v41  ;;  %17271 = vmatpush3.msra.mxu0 %v21808_v2  ;;  %17276 = vmatpush3.msra.mxu1 %v21883_v7  ;;  %v10388_v41 = vpop.xlane.xlu0 %10387 }
 0xc80   :  { %v10521_v12 = vmul.f32 %v18047_v36, %v22060_v49  ;;  %17272 = vmatprep.mubr.msk.f32.mxu0 %vm18203_vm1, %v23287_v10  ;;  %17277 = vmatprep.mubr.msk.f32.mxu1 %vm18203_vm1, %v23287_v10  ;;  %v18049_v32 = vpop.eup %18048 }
 0xc81   :  { %v10367_v39 = vpop.xlane.xlu1 %10366  ;;  %17280 = vmatprep.subr.mxu0 %v23287_v10  ;;  %17285 = vmatprep.subr.mxu1 %v23287_v10  ;;  %v10522_v49 = vmul.f32 %v18049_v32, %v21928_v27 }
 0xc82   :  { %18058 = vrcp.f32 %v10367_v39  ;;  %17273 = vmatmul.mubr.msk.f32.vlgmr.msra.gmra.mrb[148].mxu0 %vm9839_vm4, %v10520_v21  ;;  %17278 = vmatmul.mubr.msk.f32.vlgmr.msra.gmra.mrb[172].mxu1 %vm9839_vm4, %v10521_v12 }
 0xc83   :  { %18060 = vrcp.f32 %v22277_v4  ;;  %17281 = vmatpush3.msra.mxu0 %v21856_v46  ;;  %17286 = vmatpush3.msra.mxu1 %v21997_v50  ;;  %v10394_v29 = vpop.xlane.xlu0 %10393 }
 0xc84   :  { %v18051_v18 = vpop.eup %18050  ;;  %17282 = vmatprep.mubr.msk.f32.mxu0 %vm18203_vm1, %v23287_v10  ;;  %17287 = vmatprep.mubr.msk.f32.mxu1 %vm18203_vm1, %v23287_v10 }
 0xc85   :  { %v10523_v22 = vmul.f32 %v18051_v18, %v23382_v51  ;;  %v10373_v62 = vpop.xlane.xlu1 %10372  ;;  %v18053_v30 = vpop.eup %18052  ;;  %17290 = vmatprep.subr.mxu0 %v23287_v10  ;;  %17295 = vmatprep.subr.mxu1 %v23287_v10  ;;  %v23389_v18 = vld [vmem:[#allocation62_spill] sm:$0xff] }
 0xc86   :  { %18062 = vrcp.f32 %v10373_v62  ;;  %17283 = vmatmul.mubr.msk.f32.vlgmr.msra.gmra.mrb[150].mxu0 %vm9839_vm4, %v10522_v49  ;;  %v10524_v5 = vmul.f32 %v18053_v30, %v23383_v19 }
 0xc87   :  { %17288 = vmatmul.mubr.msk.f32.vlgmr.msra.gmra.mrb[174].mxu1 %vm9839_vm4, %v10523_v22  ;;  %18064 = vrcp.f32 %v10376_v0  ;;  %17291 = vmatpush3.msra.mxu0 %v21958_v47  ;;  %v23386_v0 = vld [vmem:[#allocation40_spill] sm:$0xff]  ;;  %v10400_v34 = vpop.xlane.xlu0 %10399 }
 0xc88   :  { %v18055_v27 = vpop.eup %18054  ;;  %17296 = vmatpush3.msra.mxu1 %v22122_v35  ;;  %17292 = vmatprep.mubr.msk.f32.mxu0 %vm18203_vm1, %v23287_v10 }
 0xc89   :  { %v10525_v42 = vmul.f32 %v18055_v27, %v23384_v28  ;;  %v10379_v4 = vpop.xlane.xlu1 %10378  ;;  %v22348_v60 = vpop.f32.mrb[120].mxu0  ;;  %17297 = vmatprep.mubr.msk.f32.mxu1 %vm18203_vm1, %v23287_v10  ;;  %17300 = vmatprep.subr.mxu0 %v23287_v10 }
 0xc8a   :  { %v18057_v57 = vpop.eup %18056  ;;  %18066 = vrcp.f32 %v10379_v4  ;;  %17305 = vmatprep.subr.mxu1 %v23287_v10  ;;  %v17134_v11 = vpop.f32.mrb[121].mxu0  ;;  %17293 = vmatmul.mubr.msk.f32.vlgmr.msra.gmra.mrb[152].mxu0 %vm9839_vm4, %v10524_v5 }
 0xc8b   :  { %17298 = vmatmul.mubr.msk.f32.vlgmr.msra.gmra.mrb[176].mxu1 %vm9839_vm4, %v10525_v42  ;;  %18068 = vrcp.f32 %v10382_v16  ;;  %17301 = vmatpush3.msra.mxu0 %v22073_v3  ;;  %v10526_v8 = vmul.f32 %v18057_v57, %v23385_v24 }
 0xc8c   :  { %v18059_v6 = vpop.eup %18058  ;;  %17306 = vmatpush3.msra.mxu1 %v22187_v44  ;;  %17302 = vmatprep.mubr.msk.f32.mxu0 %vm18203_vm1, %v23287_v10 }
 0xc8d   :  { %v10527_v54 = vmul.f32 %v18059_v6, %v23386_v0  ;;  %v10385_v20 = vpop.xlane.xlu1 %10384  ;;  %17307 = vmatprep.mubr.msk.f32.mxu1 %vm18203_vm1, %v23287_v10  ;;  %v18061_v48 = vpop.eup %18060  ;;  %17310 = vmatprep.subr.mxu0 %v23287_v10  ;;  %v23396_v0 = vld [vmem:[#allocation101_spill] sm:$0xff] }
 0xc8e   :  { %18070 = vrcp.f32 %v10385_v20  ;;  %17315 = vmatprep.subr.mxu1 %v23287_v10  ;;  %17303 = vmatmul.mubr.msk.f32.vlgmr.msra.gmra.mrb[154].mxu0 %vm9839_vm4, %v10526_v8  ;;  %v10528_v1 = vmul.f32 %v18061_v48, %v23387_v40  ;;  %v23397_v20 = vld [vmem:[#allocation43_spill] sm:$0xff]  ;;  %v23398_v40 = vld [vmem:[#allocation74_spill] sm:$0xff] }
 0xc8f   :  { %17308 = vmatmul.mubr.msk.f32.vlgmr.msra.gmra.mrb[178].mxu1 %vm9839_vm4, %v10527_v54  ;;  %18072 = vrcp.f32 %v10388_v41  ;;  %17311 = vmatpush3.msra.mxu0 %v23366_v38  ;;  %v23388_v38 = vld [vmem:[#allocation44_spill] sm:$0xff] }
 0xc90   :  { %v18063_v15 = vpop.eup %18062  ;;  %17316 = vmatpush3.msra.mxu1 %v21691_v53  ;;  %17312 = vmatprep.mubr.msk.f32.mxu0 %vm18203_vm1, %v23287_v10 }
 0xc91   :  { %v10529_v43 = vmul.f32 %v18063_v15, %v22107_v45  ;;  %v10391_v16 = vpop.xlane.xlu1 %10390  ;;  %17317 = vmatprep.mubr.msk.f32.mxu1 %vm18203_vm1, %v23287_v10  ;;  %v18065_v36 = vpop.eup %18064  ;;  %17320 = vmatprep.subr.mxu0 %v23287_v10 }
 0xc92   :  { %18074 = vrcp.f32 %v10391_v16  ;;  %17325 = vmatprep.subr.mxu1 %v23287_v10  ;;  %17313 = vmatmul.mubr.msk.f32.vlgmr.msra.gmra.mrb[156].mxu0 %vm9839_vm4, %v10528_v1  ;;  %v10530_v45 = vmul.f32 %v18065_v36, %v23388_v38  ;;  %v23399_v38 = vld [vmem:[#allocation33_spill] sm:$0xff] }
 0xc93   :  { %17318 = vmatmul.mubr.msk.f32.vlgmr.msra.gmra.mrb[180].mxu1 %vm9839_vm4, %v10529_v43  ;;  %18076 = vrcp.f32 %v10394_v29  ;;  %17321 = vmatpush3.msra.mxu0 %v21679_v63  ;;  %v10406_v63 = vpop.xlane.xlu0 %10405 }
 0xc94   :  { %v18067_v53 = vpop.eup %18066  ;;  %17326 = vmatpush3.msra.mxu1 %v21741_v58  ;;  %17322 = vmatprep.mubr.msk.f32.mxu0 %vm18203_vm1, %v23287_v10 }
 0xc95   :  { %v10531_v21 = vmul.f32 %v18067_v53, %v22127_v31  ;;  %v10397_v12 = vpop.xlane.xlu1 %10396  ;;  %17327 = vmatprep.mubr.msk.f32.mxu1 %vm18203_vm1, %v23287_v10  ;;  %v18069_v39 = vpop.eup %18068  ;;  %17330 = vmatprep.subr.mxu0 %v23287_v10 }
 0xc96   :  { %18078 = vrcp.f32 %v10397_v12  ;;  %17335 = vmatprep.subr.mxu1 %v23287_v10  ;;  %v22392_v32 = vpop.f32.mrb[142].mxu1  ;;  %17323 = vmatmul.mubr.msk.f32.vlgmr.msra.gmra.mrb[158].mxu0 %vm9839_vm4, %v10530_v45  ;;  %v10532_v49 = vmul.f32 %v18069_v39, %v23389_v18 }
 0xc97   :  { %17328 = vmatmul.mubr.msk.f32.vlgmr.msra.gmra.mrb[182].mxu1 %vm9839_vm4, %v10531_v21  ;;  %18080 = vrcp.f32 %v10400_v34  ;;  %17331 = vmatpush3.msra.mxu0 %v21727_v61  ;;  %v17129_v31 = vpop.f32.mrb[143].mxu1  ;;  %v10412_v62 = vpop.xlane.xlu0 %10411 }
 0xc98   :  { %v18071_v58 = vpop.eup %18070  ;;  %17336 = vmatpush3.msra.mxu1 %v21785_v26  ;;  %17332 = vmatprep.mubr.msk.f32.mxu0 %vm18203_vm1, %v23287_v10  ;;  %v23390_v26 = vld [vmem:[#allocation56_spill] sm:$0xff] }
 0xc99   :  { %v10533_v41 = vmul.f32 %v18071_v58, %v22142_v33  ;;  %v10403_v51 = vpop.xlane.xlu1 %10402  ;;  %17337 = vmatprep.mubr.msk.f32.mxu1 %vm18203_vm1, %v23287_v10  ;;  %v18073_v22 = vpop.eup %18072  ;;  %17340 = vmatprep.subr.mxu0 %v23287_v10 }
 0xc9a   :  { %18082 = vrcp.f32 %v10403_v51  ;;  %17345 = vmatprep.subr.mxu1 %v23287_v10  ;;  %17333 = vmatmul.mubr.msk.f32.vlgmr.msra.gmra.mrb[160].mxu0 %vm9839_vm4, %v10532_v49  ;;  %v10534_v33 = vmul.f32 %v18073_v22, %v23390_v26  ;;  %v23400_v49 = vld [vmem:[#allocation17_spill] sm:$0xff] }
 0xc9b   :  { %17338 = vmatmul.mubr.msk.f32.vlgmr.msra.gmra.mrb[184].mxu1 %vm9839_vm4, %v10533_v41  ;;  %18084 = vrcp.f32 %v10406_v63  ;;  %17341 = vmatpush3.msra.mxu0 %v21769_v17 }
 0xc9c   :  { %v18075_v61 = vpop.eup %18074  ;;  %17346 = vmatpush3.msra.mxu1 %v21829_v37  ;;  %17342 = vmatprep.mubr.msk.f32.mxu0 %vm18203_vm1, %v23287_v10  ;;  %v23391_v37 = vld [vmem:[#allocation31_spill] sm:$0xff] }
 0xc9d   :  { %v10535_v30 = vmul.f32 %v18075_v61, %v22155_v59  ;;  %v10409_v27 = vpop.xlane.xlu1 %10408  ;;  %17347 = vmatprep.mubr.msk.f32.mxu1 %vm18203_vm1, %v23287_v10  ;;  %v18077_v19 = vpop.eup %18076  ;;  %17350 = vmatprep.subr.mxu0 %v23287_v10 }
 0xc9e   :  { %18086 = vrcp.f32 %v10409_v27  ;;  %17355 = vmatprep.subr.mxu1 %v23287_v10  ;;  %17343 = vmatmul.mubr.msk.f32.vlgmr.msra.gmra.mrb[162].mxu0 %vm9839_vm4, %v10534_v33  ;;  %v10536_v59 = vmul.f32 %v18077_v19, %v23391_v37 }
 0xc9f   :  { %17348 = vmatmul.mubr.msk.f32.vlgmr.msra.gmra.mrb[186].mxu1 %vm9839_vm4, %v10535_v30  ;;  %18088 = vrcp.f32 %v10412_v62  ;;  %17351 = vmatpush3.msra.mxu0 %v21808_v2 }
 0xca0   :  { %v18079_v17 = vpop.eup %18078  ;;  %17356 = vmatpush3.msra.mxu1 %v21883_v7  ;;  %17352 = vmatprep.mubr.msk.f32.mxu0 %vm18203_vm1, %v23287_v10  ;;  %v23392_v7 = vld [vmem:[#allocation58_spill] sm:$0xff] }
 0xca1   :  { %v10537_v5 = vmul.f32 %v18079_v17, %v22164_v52  ;;  %v10415_v28 = vpop.xlane.xlu1 %10414  ;;  %17357 = vmatprep.mubr.msk.f32.mxu1 %vm18203_vm1, %v23287_v10  ;;  %v18081_v42 = vpop.eup %18080  ;;  %17360 = vmatprep.subr.mxu0 %v23287_v10 }
 0xca2   :  { %18090 = vrcp.f32 %v10415_v28  ;;  %17365 = vmatprep.subr.mxu1 %v23287_v10  ;;  %17353 = vmatmul.mubr.msk.f32.vlgmr.msra.gmra.mrb[164].mxu0 %vm9839_vm4, %v10536_v59  ;;  %v10538_v52 = vmul.f32 %v18081_v42, %v23392_v7  ;;  %v15440_v7 = vld [vmem:[#allocation5] sm:$0xff] }
 0xca3   :  { %17358 = vmatmul.mubr.msk.f32.vlgmr.msra.gmra.mrb[188].mxu1 %vm9839_vm4, %v10537_v5  ;;  %17361 = vmatpush3.msra.mxu0 %v21856_v46 }
 0xca4   :  { %v18083_v2 = vpop.eup %18082  ;;  %17366 = vmatpush3.msra.mxu1 %v21997_v50  ;;  %17362 = vmatprep.mubr.msk.f32.mxu0 %vm18203_vm1, %v23287_v10  ;;  %v23393_v50 = vld [vmem:[#allocation29_spill] sm:$0xff] }
 0xca5   :  { %v10539_v4 = vmul.f32 %v18083_v2, %v22168_v9  ;;  %17367 = vmatprep.mubr.msk.f32.mxu1 %vm18203_vm1, %v23287_v10  ;;  %v18085_v57 = vpop.eup %18084  ;;  %17370 = vmatprep.subr.mxu0 %v23287_v10 }
 0xca6   :  { %17375 = vmatprep.subr.mxu1 %v23287_v10  ;;  %17363 = vmatmul.mubr.msk.f32.vlgmr.msra.gmra.mrb[166].mxu0 %vm9839_vm4, %v10538_v52  ;;  %v10540_v9 = vmul.f32 %v18085_v57, %v23393_v50  ;;  %v15441_v52 = vld [vmem:[#allocation5 + $0x8] sm:$0xff]  ;;  %v15442_v57 = vld [vmem:[#allocation5 + $0x10] sm:$0xff] }
 0xca7   :  { %17368 = vmatmul.mubr.msk.f32.vlgmr.msra.gmra.mrb[190].mxu1 %vm9839_vm4, %v10539_v4  ;;  %17371 = vmatpush3.msra.mxu0 %v21958_v47  ;;  %v17498_v4 = vpack.c.bf16 %v15441_v52, %v15440_v7 }
 0xca8   :  { %v18087_v46 = vpop.eup %18086  ;;  %17376 = vmatpush3.msra.mxu1 %v22122_v35  ;;  %17372 = vmatprep.mubr.msk.f32.mxu0 %vm18203_vm1, %v23287_v10  ;;  %v23394_v35 = vld [vmem:[#allocation19_spill] sm:$0xff] }
 0xca9   :  { %v10541_v11 = vmul.f32 %v18087_v46, %v22172_v55  ;;  %17377 = vmatprep.mubr.msk.f32.mxu1 %vm18203_vm1, %v23287_v10  ;;  %v18089_v29 = vpop.eup %18088  ;;  %17380 = vmatprep.subr.mxu0 %v23287_v10  ;;  %v15443_v46 = vld [vmem:[#allocation5 + $0x18] sm:$0xff] }
 0xcaa   :  { %17385 = vmatprep.subr.mxu1 %v23287_v10  ;;  %17373 = vmatmul.mubr.msk.f32.vlgmr.msra.gmra.mrb[168].mxu0 %vm9839_vm4, %v10540_v9  ;;  %v10542_v55 = vmul.f32 %v18089_v29, %v23394_v35  ;;  %v17502_v50 = vpack.c.bf16 %v15443_v46, %v15442_v57 }
 0xcab   :  { %17378 = vmatmul.mubr.msk.f32.vlgmr.msra.gmra.mrb[192].mxu1 %vm9839_vm4, %v10541_v11  ;;  %17381 = vmatpush3.msra.mxu0 %v22073_v3  ;;  %v23395_v3 = vld [vmem:[#allocation42_spill] sm:$0xff]  ;;  %v23401_v11 = vld [vmem:[#allocation53_spill] sm:$0xff] }
 0xcac   :  { %v18091_v47 = vpop.eup %18090  ;;  %17386 = vmatpush3.msra.mxu1 %v22187_v44  ;;  %17382 = vmatprep.mubr.msk.f32.mxu0 %vm18203_vm1, %v23287_v10  ;;  %v15264_v44 = vmul.f32 %v23396_v0, %v23395_v3  ;;  %v15266_v1 = vmul.f32 %v23398_v40, %v23395_v3  ;;  %v15268_v45 = vmul.f32 %v23399_v38, %v23395_v3 }
 0xcad   :  { %v10543_v6 = vmul.f32 %v18091_v47, %v22176_v23  ;;  %17387 = vmatprep.mubr.msk.f32.mxu1 %vm18203_vm1, %v23287_v10  ;;  %v15270_v41 = vmul.f32 %v23400_v49, %v23395_v3  ;;  %v15272_v17 = vmul.f32 %v22181_v25, %v23395_v3  ;;  %17499 = vmatprep.subr.bf16.mxu0 %v17498_v4 }
 0xcae   :  { %17383 = vmatmul.mubr.msk.f32.vlgmr.msra.gmra.mrb[170].mxu0 %vm9839_vm4, %v10542_v55  ;;  %v15328_v15 = vsel %vm4196_vm0, %v15264_v44, 0.0  ;;  %v15342_v53 = vsel %vm4196_vm0, %v15266_v1, 0.0  ;;  %v15356_v18 = vsel %vm4196_vm0, %v15268_v45, 0.0  ;;  %v15265_v29 = vmul.f32 %v23401_v11, %v23395_v3 }
 0xcaf   :  { %17388 = vmatmul.mubr.msk.f32.vlgmr.msra.gmra.mrb[194].mxu1 %vm9839_vm4, %v10543_v6  ;;  %v15370_v30 = vsel %vm4196_vm0, %v15270_v41, 0.0  ;;  %v15384_v28 = vsel %vm4196_vm0, %v15272_v17, 0.0  ;;  %17501 = vmatpush3.bf16.msra.mxu0 %v17498_v4  ;;  %v23402_v6 = vld [vmem:[#allocation48_spill] sm:$0xff]  ;;  %v15274_v44 = vmul.f32 %v22249_v14, %v23395_v3  ;;  %v15271_v41 = vmul.f32 %v22189_v56, %v23395_v3 }
 0xcb0   :  { %17503 = vmatprep.subr.bf16.mxu0 %v17502_v50  ;;  %v15335_v0 = vsel %vm4196_vm0, %v15265_v29, 0.0 }
 0xcb1   :  { %v15398_v38 = vsel %vm4196_vm0, %v15274_v44, 0.0 }
 0xcb3   :  { %17505 = vmatpush3.bf16.msra.mxu0 %v17502_v50 }
 0xcbe   :  { %v22466_v24 = vpop.f32.mrb[122].mxu0 }
 0xcbf   :  { %v17144_v8 = vpop.f32.mrb[123].mxu0 }
 0xcc0   :  { %v15267_v8 = vmul.f32 %v23402_v6, %v23395_v3 }
 0xcc2   :  { %v11829_v54 = vpop.f32.mrb[124].mxu0 }
 0xcc3   :  { %v15280_v48 = vmul.f32 %v11829_v54, %v23397_v20  ;;  %v17154_v23 = vpop.f32.mrb[125].mxu0 }
 0xcc5   :  { %v15329_v10 = vsel %vm4196_vm0, %v15280_v48, 0.0 }
 0xcc6   :  { %v22475_v34 = vadd.f32 %v15329_v10, %v15328_v15  ;;  %v11975_v43 = vpop.f32.mrb[126].mxu0 }
 0xcc7   :  { %v15282_v16 = vmul.f32 %v11975_v43, %v23397_v20  ;;  %v17164_v36 = vpop.f32.mrb[127].mxu0 }
 0xcc8   :  { %v23403_v36 = vld [vmem:[#allocation28_spill] sm:$0xff] }
 0xcc9   :  { %v15343_v21 = vsel %vm4196_vm0, %v15282_v16, 0.0  ;;  %v15349_v16 = vsel %vm4196_vm0, %v15267_v8, 0.0  ;;  %v15276_v8 = vmul.f32 %v22348_v60, %v23395_v3 }
 0xcca   :  { %v22482_v12 = vadd.f32 %v15343_v21, %v15342_v53  ;;  %v12121_v39 = vpop.f32.mrb[128].mxu0  ;;  %v15269_v53 = vmul.f32 %v23403_v36, %v23395_v3 }
 0xccb   :  { %v15284_v63 = vmul.f32 %v12121_v39, %v23397_v20  ;;  %v17174_v58 = vpop.f32.mrb[129].mxu0 }
 0xccc   :  { %v22485_v31 = vpop.f32.mrb[144].mxu1  ;;  %v15363_v49 = vsel %vm4196_vm0, %v15269_v53, 0.0 }
 0xccd   :  { %v15357_v51 = vsel %vm4196_vm0, %v15284_v63, 0.0  ;;  %v17139_v22 = vpop.f32.mrb[145].mxu1  ;;  %v15277_v50 = vmul.f32 %v22485_v31, %v23395_v3 }
 0xcce   :  { %v22491_v61 = vadd.f32 %v15357_v51, %v15356_v18  ;;  %v12267_v26 = vpop.f32.mrb[130].mxu0 }
 0xccf   :  { %v15286_v33 = vmul.f32 %v12267_v26, %v23397_v20  ;;  %v17184_v62 = vpop.f32.mrb[131].mxu0 }
 0xcd1   :  { %v15371_v27 = vsel %vm4196_vm0, %v15286_v33, 0.0 }
 0xcd2   :  { %v22496_v19 = vadd.f32 %v15371_v27, %v15370_v30  ;;  %v15377_v30 = vsel %vm4196_vm0, %v15271_v41, 0.0  ;;  %v15273_v27 = vmul.f32 %v22251_v13, %v23395_v3 }
 0xcd3   :  { %v12413_v37 = vpop.f32.mrb[132].mxu0 }
 0xcd4   :  { %v15288_v59 = vmul.f32 %v12413_v37, %v23397_v20  ;;  %v17194_v5 = vpop.f32.mrb[133].mxu0 }
 0xcd6   :  { %v15385_v42 = vsel %vm4196_vm0, %v15288_v59, 0.0 }
 0xcd7   :  { %v22503_v2 = vadd.f32 %v15385_v42, %v15384_v28  ;;  %v15391_v28 = vsel %vm4196_vm0, %v15273_v27, 0.0  ;;  %v15275_v42 = vmul.f32 %v22392_v32, %v23395_v3 }
 0xcd9   :  { %v15405_v46 = vsel %vm4196_vm0, %v15275_v42, 0.0 }
 0xd00   :  { %v22505_v25 = vpop.f32.mrb[146].mxu1 }
 0xd01   :  { %v17149_v9 = vpop.f32.mrb[147].mxu1 }
 0xd04   :  { %v11902_v47 = vpop.f32.mrb[148].mxu1 }
 0xd05   :  { %v15281_v35 = vmul.f32 %v11902_v47, %v23397_v20  ;;  %v17159_v55 = vpop.f32.mrb[149].mxu1 }
 0xd07   :  { %v15336_v54 = vsel %vm4196_vm0, %v15281_v35, 0.0  ;;  %v15419_v35 = vsel %vm4196_vm0, %v15277_v50, 0.0 }
 0xd08   :  { %v22516_v48 = vadd.f32 %v15336_v54, %v15335_v0  ;;  %v12048_v23 = vpop.f32.mrb[150].mxu1  ;;  %v12559_v15 = vpop.f32.mrb[134].mxu0  ;;  %v15412_v54 = vsel %vm4196_vm0, %v15276_v8, 0.0 }
 0xd09   :  { %v15283_v40 = vmul.f32 %v12048_v23, %v23397_v20  ;;  %v15290_v1 = vmul.f32 %v12559_v15, %v23397_v20  ;;  %v17169_v10 = vpop.f32.mrb[151].mxu1  ;;  %v17204_v43 = vpop.f32.mrb[135].mxu0  ;;  %v15278_v23 = vmul.f32 %v22466_v24, %v23395_v3  ;;  %v15279_v15 = vmul.f32 %v22505_v25, %v23395_v3 }
 0xd0b   :  { %v15350_v14 = vsel %vm4196_vm0, %v15283_v40, 0.0  ;;  %v15399_v45 = vsel %vm4196_vm0, %v15290_v1, 0.0 }
 0xd0c   :  { %v22526_v21 = vadd.f32 %v15350_v14, %v15349_v16  ;;  %v22528_v39 = vadd.f32 %v15399_v45, %v15398_v38  ;;  %v12194_v63 = vpop.f32.mrb[152].mxu1  ;;  %v15426_v38 = vsel %vm4196_vm0, %v15278_v23, 0.0  ;;  %v15433_v14 = vsel %vm4196_vm0, %v15279_v15, 0.0 }
 0xd0d   :  { %v15285_v58 = vmul.f32 %v12194_v63, %v23397_v20  ;;  %v17179_v18 = vpop.f32.mrb[153].mxu1 }
 0xd0e   :  { %v23404_v18 = vld [vmem:[#allocation63_spill] sm:$0xff] }
 0xd0f   :  { %v15364_v51 = vsel %vm4196_vm0, %v15285_v58, 0.0 }
 0xd10   :  { %v22535_v22 = vadd.f32 %v15364_v51, %v15363_v49  ;;  %v12340_v26 = vpop.f32.mrb[154].mxu1 }
 0xd11   :  { %v15287_v33 = vmul.f32 %v12340_v26, %v23397_v20  ;;  %v17189_v62 = vpop.f32.mrb[155].mxu1 }
 0xd13   :  { %v15378_v17 = vsel %vm4196_vm0, %v15287_v33, 0.0 }
 0xd14   :  { %v22542_v37 = vadd.f32 %v15378_v17, %v15377_v30  ;;  %v12486_v59 = vpop.f32.mrb[156].mxu1 }
 0xd15   :  { %v15289_v56 = vmul.f32 %v12486_v59, %v23397_v20  ;;  %v17199_v5 = vpop.f32.mrb[157].mxu1 }
 0xd17   :  { %v15392_v7 = vsel %vm4196_vm0, %v15289_v56, 0.0 }
 0xd18   :  { %v22549_v52 = vadd.f32 %v15392_v7, %v15391_v28  ;;  %v12632_v4 = vpop.f32.mrb[158].mxu1 }
 0xd19   :  { %v15291_v13 = vmul.f32 %v12632_v4, %v23397_v20  ;;  %v17209_v57 = vpop.f32.mrb[159].mxu1 }
 0xd1b   :  { %v15406_v9 = vsel %vm4196_vm0, %v15291_v13, 0.0 }
 0xd1c   :  { %v22556_v11 = vadd.f32 %v15406_v9, %v15405_v46  ;;  %v12778_v29 = vpop.f32.mrb[160].mxu1 }
 0xd1d   :  { %v15293_v32 = vmul.f32 %v12778_v29, %v23397_v20  ;;  %v17219_v47 = vpop.f32.mrb[161].mxu1 }
 0xd1f   :  { %v15420_v55 = vsel %vm4196_vm0, %v15293_v32, 0.0 }
 0xd20   :  { %v22561_v6 = vadd.f32 %v15420_v55, %v15419_v35 }
 0xd3d   :  { %v12705_v0 = vpop.f32.mrb[136].mxu0 }
 0xd3e   :  { %v15292_v31 = vmul.f32 %v12705_v0, %v23397_v20  ;;  %v17214_v44 = vpop.f32.mrb[137].mxu0 }
 0xd40   :  { %v15413_v40 = vsel %vm4196_vm0, %v15292_v31, 0.0 }
 0xd41   :  { %v22572_v1 = vadd.f32 %v15413_v40, %v15412_v54  ;;  %v12851_v10 = vpop.f32.mrb[138].mxu0  ;;  %v12924_v43 = vpop.f32.mrb[162].mxu1 }
 0xd42   :  { %v15294_v60 = vmul.f32 %v12851_v10, %v23397_v20  ;;  %v15295_v16 = vmul.f32 %v12924_v43, %v23397_v20  ;;  %v17224_v36 = vpop.f32.mrb[139].mxu0  ;;  %v17229_v53 = vpop.f32.mrb[163].mxu1 }
 0xd44   :  { %v15427_v24 = vsel %vm4196_vm0, %v15294_v60, 0.0  ;;  %v15434_v3 = vsel %vm4196_vm0, %v15295_v16, 0.0 }
 0xd45   :  { %v22580_v25 = vadd.f32 %v15427_v24, %v15426_v38  ;;  %v22582_v45 = vadd.f32 %v15434_v3, %v15433_v14  ;;  %v12997_v63 = vpop.f32.mrb[140].mxu0  ;;  %v13070_v58 = vpop.f32.mrb[164].mxu1 }
 0xd46   :  { %v15296_v49 = vmul.f32 %v12997_v63, %v23404_v18  ;;  %v15297_v20 = vmul.f32 %v13070_v58, %v23404_v18  ;;  %v17234_v41 = vpop.f32.mrb[141].mxu0  ;;  %v17239_v51 = vpop.f32.mrb[165].mxu1 }
 0xd48   :  { %v15331_v26 = vsel %vm4196_vm0, %v15296_v49, 0.0  ;;  %v15338_v33 = vsel %vm4196_vm0, %v15297_v20, 0.0 }
 0xd49   :  { %v22589_v62 = vadd.f32 %v15331_v26, %v22475_v34  ;;  %v22592_v30 = vadd.f32 %v15338_v33, %v22516_v48  ;;  %v13143_v27 = vpop.f32.mrb[142].mxu0  ;;  %v13216_v17 = vpop.f32.mrb[166].mxu1 }
 0xd4a   :  { %v15298_v59 = vmul.f32 %v13143_v27, %v23404_v18  ;;  %v15299_v56 = vmul.f32 %v13216_v17, %v23404_v18  ;;  %v17244_v5 = vpop.f32.mrb[143].mxu0  ;;  %v17249_v28 = vpop.f32.mrb[167].mxu1 }
 0xd4c   :  { %v15345_v42 = vsel %vm4196_vm0, %v15298_v59, 0.0  ;;  %v15352_v7 = vsel %vm4196_vm0, %v15299_v56, 0.0 }
 0xd4d   :  { %v22599_v4 = vadd.f32 %v15345_v42, %v22482_v12  ;;  %v22602_v34 = vadd.f32 %v15352_v7, %v22526_v21  ;;  %v13289_v48 = vpop.f32.mrb[144].mxu0  ;;  %v13362_v13 = vpop.f32.mrb[168].mxu1 }
 0xd4e   :  { %v15300_v57 = vmul.f32 %v13289_v48, %v23404_v18  ;;  %v15301_v46 = vmul.f32 %v13362_v13, %v23404_v18  ;;  %v17254_v50 = vpop.f32.mrb[145].mxu0  ;;  %v17259_v9 = vpop.f32.mrb[169].mxu1 }
 0xd4f   :  { %v23405_v9 = vld [vmem:[#allocation64_spill] sm:$0xff] }
 0xd50   :  { %v15359_v29 = vsel %vm4196_vm0, %v15300_v57, 0.0  ;;  %v15366_v32 = vsel %vm4196_vm0, %v15301_v46, 0.0 }
 0xd51   :  { %v22609_v47 = vadd.f32 %v15359_v29, %v22491_v61  ;;  %v22612_v12 = vadd.f32 %v15366_v32, %v22535_v22  ;;  %v13435_v21 = vpop.f32.mrb[146].mxu0  ;;  %v13508_v35 = vpop.f32.mrb[170].mxu1 }
 0xd52   :  { %v15302_v55 = vmul.f32 %v13435_v21, %v23404_v18  ;;  %v15303_v8 = vmul.f32 %v13508_v35, %v23404_v18  ;;  %v17264_v0 = vpop.f32.mrb[147].mxu0  ;;  %v17269_v31 = vpop.f32.mrb[171].mxu1 }
 0xd54   :  { %v15373_v44 = vsel %vm4196_vm0, %v15302_v55, 0.0  ;;  %v15380_v54 = vsel %vm4196_vm0, %v15303_v8, 0.0 }
 0xd55   :  { %v22619_v23 = vadd.f32 %v15373_v44, %v22496_v19  ;;  %v22622_v61 = vadd.f32 %v15380_v54, %v22542_v37  ;;  %v13581_v22 = vpop.f32.mrb[148].mxu0  ;;  %v13654_v15 = vpop.f32.mrb[172].mxu1 }
 0xd56   :  { %v15304_v40 = vmul.f32 %v13581_v22, %v23404_v18  ;;  %v15305_v10 = vmul.f32 %v13654_v15, %v23404_v18  ;;  %v17274_v43 = vpop.f32.mrb[149].mxu0  ;;  %v17279_v60 = vpop.f32.mrb[173].mxu1 }
 0xd58   :  { %v15387_v16 = vsel %vm4196_vm0, %v15304_v40, 0.0  ;;  %v15394_v36 = vsel %vm4196_vm0, %v15305_v10, 0.0 }
 0xd59   :  { %v22629_v53 = vadd.f32 %v15387_v16, %v22503_v2  ;;  %v22632_v19 = vadd.f32 %v15394_v36, %v22549_v52  ;;  %v13727_v37 = vpop.f32.mrb[150].mxu0 }
 0xd5a   :  { %v13800_v38 = vpop.f32.mrb[174].mxu1  ;;  %v15306_v14 = vmul.f32 %v13727_v37, %v23404_v18  ;;  %v17284_v3 = vpop.f32.mrb[151].mxu0 }
 0xd5b   :  { %v15307_v24 = vmul.f32 %v13800_v38, %v23404_v18  ;;  %v17289_v63 = vpop.f32.mrb[175].mxu1 }
 0xd5c   :  { %v15401_v58 = vsel %vm4196_vm0, %v15306_v14, 0.0 }
 0xd5d   :  { %v15408_v49 = vsel %vm4196_vm0, %v15307_v24, 0.0  ;;  %v22639_v20 = vadd.f32 %v15401_v58, %v22528_v39  ;;  %v13873_v52 = vpop.f32.mrb[152].mxu0 }
 0xd5e   :  { %v22642_v2 = vadd.f32 %v15408_v49, %v22556_v11  ;;  %v13946_v41 = vpop.f32.mrb[176].mxu1  ;;  %v15308_v51 = vmul.f32 %v13873_v52, %v23404_v18  ;;  %v17294_v33 = vpop.f32.mrb[153].mxu0 }
 0xd5f   :  { %v15309_v26 = vmul.f32 %v13946_v41, %v23404_v18  ;;  %v17299_v27 = vpop.f32.mrb[177].mxu1 }
 0xd60   :  { %v15415_v17 = vsel %vm4196_vm0, %v15308_v51, 0.0 }
 0xd61   :  { %v15422_v59 = vsel %vm4196_vm0, %v15309_v26, 0.0  ;;  %v22649_v56 = vadd.f32 %v15415_v17, %v22572_v1  ;;  %v14019_v11 = vpop.f32.mrb[154].mxu0 }
 0xd62   :  { %v22652_v39 = vadd.f32 %v15422_v59, %v22561_v6  ;;  %v14092_v5 = vpop.f32.mrb[178].mxu1  ;;  %v15310_v28 = vmul.f32 %v14019_v11, %v23404_v18  ;;  %v17304_v7 = vpop.f32.mrb[155].mxu0 }
 0xd63   :  { %v15311_v42 = vmul.f32 %v14092_v5, %v23404_v18  ;;  %v17309_v48 = vpop.f32.mrb[179].mxu1 }
 0xd64   :  { %v15429_v13 = vsel %vm4196_vm0, %v15310_v28, 0.0 }
 0xd65   :  { %v15436_v57 = vsel %vm4196_vm0, %v15311_v42, 0.0  ;;  %v22659_v46 = vadd.f32 %v15429_v13, %v22580_v25  ;;  %v14165_v6 = vpop.f32.mrb[156].mxu0 }
 0xd66   :  { %v22662_v1 = vadd.f32 %v15436_v57, %v22582_v45  ;;  %v14238_v50 = vpop.f32.mrb[180].mxu1  ;;  %v15312_v29 = vmul.f32 %v14165_v6, %v23405_v9  ;;  %v17314_v21 = vpop.f32.mrb[157].mxu0 }
 0xd67   :  { %v15313_v32 = vmul.f32 %v14238_v50, %v23405_v9  ;;  %v17319_v18 = vpop.f32.mrb[181].mxu1 }
 0xd68   :  { %v15333_v35 = vsel %vm4196_vm0, %v15312_v29, 0.0 }
 0xd69   :  { %v15340_v55 = vsel %vm4196_vm0, %v15313_v32, 0.0  ;;  %v22669_v8 = vadd.f32 %v15333_v35, %v22589_v62  ;;  %v14311_v45 = vpop.f32.mrb[158].mxu0 }
 0xd6a   :  { %v22672_v25 = vadd.f32 %v15340_v55, %v22592_v30  ;;  %v14384_v0 = vpop.f32.mrb[182].mxu1  ;;  %v15314_v31 = vmul.f32 %v14311_v45, %v23405_v9  ;;  %v17324_v54 = vpop.f32.mrb[159].mxu0 }
 0xd6b   :  { %v15315_v44 = vmul.f32 %v14384_v0, %v23405_v9  ;;  %v17329_v22 = vpop.f32.mrb[183].mxu1  ;;  %17398 = vmatprep.mubr.msk.f32.mxu0 %vm4196_vm0, %v22669_v8 }
 0xd6c   :  { %v15347_v15 = vsel %vm4196_vm0, %v15314_v31, 0.0  ;;  %17399 = vmatmul.mubr.msk.f32.vlgmr.msra.gmra.mrb[172].mxu0 %vm4196_vm0, %v22672_v25 }
 0xd6d   :  { %v15354_v40 = vsel %vm4196_vm0, %v15315_v44, 0.0  ;;  %v22683_v62 = vadd.f32 %v15347_v15, %v22599_v4  ;;  %v14457_v10 = vpop.f32.mrb[160].mxu0 }
 0xd6e   :  { %v22686_v30 = vadd.f32 %v15354_v40, %v22602_v34  ;;  %v14530_v43 = vpop.f32.mrb[184].mxu1  ;;  %v15316_v60 = vmul.f32 %v14457_v10, %v23405_v9  ;;  %v17334_v36 = vpop.f32.mrb[161].mxu0 }
 0xd6f   :  { %v15317_v16 = vmul.f32 %v14530_v43, %v23405_v9  ;;  %v17339_v37 = vpop.f32.mrb[185].mxu1  ;;  %17401 = vmatprep.mubr.msk.f32.mxu0 %vm4196_vm0, %v22683_v62 }
 0xd70   :  { %v15361_v38 = vsel %vm4196_vm0, %v15316_v60, 0.0  ;;  %17402 = vmatmul.mubr.msk.f32.gmra.mrb[174].mxu0 %vm4196_vm0, %v22686_v30 }
 0xd71   :  { %v15368_v14 = vsel %vm4196_vm0, %v15317_v16, 0.0  ;;  %v22697_v4 = vadd.f32 %v15361_v38, %v22609_v47  ;;  %v14603_v24 = vpop.f32.mrb[162].mxu0 }
 0xd72   :  { %v22700_v34 = vadd.f32 %v15368_v14, %v22612_v12  ;;  %v14676_v3 = vpop.f32.mrb[186].mxu1  ;;  %v15318_v63 = vmul.f32 %v14603_v24, %v23405_v9  ;;  %v17344_v49 = vpop.f32.mrb[163].mxu0 }
 0xd73   :  { %v15319_v58 = vmul.f32 %v14676_v3, %v23405_v9  ;;  %v17349_v52 = vpop.f32.mrb[187].mxu1  ;;  %17404 = vmatprep.mubr.msk.f32.mxu0 %vm4196_vm0, %v22697_v4 }
 0xd74   :  { %v15375_v41 = vsel %vm4196_vm0, %v15318_v63, 0.0  ;;  %17405 = vmatmul.mubr.msk.f32.gmra.mrb[176].mxu0 %vm4196_vm0, %v22700_v34  ;;  %v23406_v52 = vld [vmem:[#allocation65_spill] sm:$0xff] }
 0xd75   :  { %v15382_v51 = vsel %vm4196_vm0, %v15319_v58, 0.0  ;;  %v22711_v47 = vadd.f32 %v15375_v41, %v22619_v23  ;;  %v14749_v26 = vpop.f32.mrb[164].mxu0 }
 0xd76   :  { %v22714_v12 = vadd.f32 %v15382_v51, %v22622_v61  ;;  %v14822_v33 = vpop.f32.mrb[188].mxu1  ;;  %v15320_v27 = vmul.f32 %v14749_v26, %v23405_v9  ;;  %v17354_v59 = vpop.f32.mrb[165].mxu0  ;;  %v23407_v26 = vld [vmem:[#allocation45_spill] sm:$0xff] }
 0xd77   :  { %v15321_v17 = vmul.f32 %v14822_v33, %v23405_v9  ;;  %v17359_v11 = vpop.f32.mrb[189].mxu1  ;;  %17407 = vmatprep.mubr.msk.f32.mxu0 %vm4196_vm0, %v22711_v47 }
 0xd78   :  { %v15389_v5 = vsel %vm4196_vm0, %v15320_v27, 0.0  ;;  %17408 = vmatmul.mubr.msk.f32.gmra.mrb[178].mxu0 %vm4196_vm0, %v22714_v12 }
 0xd79   :  { %v15396_v28 = vsel %vm4196_vm0, %v15321_v17, 0.0  ;;  %v22725_v23 = vadd.f32 %v15389_v5, %v22629_v53  ;;  %v14895_v42 = vpop.f32.mrb[166].mxu0 }
 0xd7a   :  { %v22728_v61 = vadd.f32 %v15396_v28, %v22632_v19  ;;  %v14968_v7 = vpop.f32.mrb[190].mxu1  ;;  %v15322_v48 = vmul.f32 %v14895_v42, %v23405_v9  ;;  %v17364_v57 = vpop.f32.mrb[167].mxu0  ;;  %v23408_v28 = vld [vmem:[#allocation46_spill] sm:$0xff] }
 0xd7b   :  { %v15323_v13 = vmul.f32 %v14968_v7, %v23405_v9  ;;  %v17369_v6 = vpop.f32.mrb[191].mxu1  ;;  %17410 = vmatprep.mubr.msk.f32.mxu0 %vm4196_vm0, %v22725_v23 }
 0xd7c   :  { %v15403_v50 = vsel %vm4196_vm0, %v15322_v48, 0.0  ;;  %17411 = vmatmul.mubr.msk.f32.gmra.mrb[180].mxu0 %vm4196_vm0, %v22728_v61  ;;  %v23409_v48 = vld [vmem:[#allocation66_spill] sm:$0xff] }
 0xd7d   :  { %v15410_v29 = vsel %vm4196_vm0, %v15323_v13, 0.0  ;;  %v22739_v53 = vadd.f32 %v15403_v50, %v22639_v20  ;;  %v15041_v32 = vpop.f32.mrb[168].mxu0 }
 0xd7e   :  { %v22742_v19 = vadd.f32 %v15410_v29, %v22642_v2  ;;  %v15114_v21 = vpop.f32.mrb[192].mxu1  ;;  %v15324_v18 = vmul.f32 %v15041_v32, %v23405_v9  ;;  %v17374_v55 = vpop.f32.mrb[169].mxu0 }
 0xd7f   :  { %v15325_v35 = vmul.f32 %v15114_v21, %v23405_v9  ;;  %v17379_v45 = vpop.f32.mrb[193].mxu1  ;;  %17413 = vmatprep.mubr.msk.f32.mxu0 %vm4196_vm0, %v22739_v53  ;;  %v23410_v21 = vld [vmem:[#allocation68_spill] sm:$0xff]  ;;  %v23411_v55 = vld [vmem:[#allocation34_spill] sm:$0xff] }
 0xd80   :  { %v15417_v0 = vsel %vm4196_vm0, %v15324_v18, 0.0  ;;  %17414 = vmatmul.mubr.msk.f32.gmra.mrb[182].mxu0 %vm4196_vm0, %v22742_v19 }
 0xd81   :  { %v15424_v31 = vsel %vm4196_vm0, %v15325_v35, 0.0  ;;  %v22753_v20 = vadd.f32 %v15417_v0, %v22649_v56  ;;  %v15187_v44 = vpop.f32.mrb[170].mxu0 }
 0xd82   :  { %v22756_v2 = vadd.f32 %v15424_v31, %v22652_v39  ;;  %v15260_v54 = vpop.f32.mrb[194].mxu1  ;;  %v15326_v22 = vmul.f32 %v15187_v44, %v23405_v9  ;;  %v17384_v40 = vpop.f32.mrb[171].mxu0 }
 0xd83   :  { %v15327_v15 = vmul.f32 %v15260_v54, %v23405_v9  ;;  %v17389_v10 = vpop.f32.mrb[195].mxu1  ;;  %17416 = vmatprep.mubr.msk.f32.mxu0 %vm4196_vm0, %v22753_v20  ;;  %v22776_v9 = vld [vmem:[#allocation7] ss:$0 sm:$0xff] }
 0xd84   :  { %v15431_v43 = vsel %vm4196_vm0, %v15326_v22, 0.0  ;;  %17417 = vmatmul.mubr.msk.f32.gmra.mrb[184].mxu0 %vm4196_vm0, %v22756_v2 }
 0xd85   :  { %v15438_v60 = vsel %vm4196_vm0, %v15327_v15, 0.0  ;;  %v22767_v56 = vadd.f32 %v15431_v43, %v22659_v46  ;;  %v23412_v15 = vld [vmem:[#allocation47_spill] sm:$0xff] }
 0xd86   :  { %v22770_v39 = vadd.f32 %v15438_v60, %v22662_v1  ;;  %v23413_v43 = vld [vmem:[#allocation51_spill] sm:$0xff] }
 0xd87   :  { %17419 = vmatprep.mubr.msk.f32.mxu0 %vm4196_vm0, %v22767_v56 }
 0xd88   :  { %17420 = vmatmul.mubr.msk.f32.gmra.mrb[186].mxu0 %vm4196_vm0, %v22770_v39 }
 0xe3f   :  { %v17400_v16 = vpop.f32.mrb[172].mxu0 }
 0xe40   :  { %v15571_v36 = vadd.f32 %v17400_v16, %v22776_v9  ;;  %v15565_v37 = vpop.f32.mrb[173].mxu0 }
 0xe41   :  { %v15566_v38 = vadd.f32 %v22776_v9, %v15565_v37 }
 0xe42   :  { %v15645_v14 = vmax.f32 %v15571_v36, 0.0 }
 0xe43   :  { %v15644_v46 = vmax.f32 %v15566_v38, 0.0  ;;  %v17403_v24 = vpop.f32.mrb[174].mxu0 }
 0xe44   :  { %v15661_v1 = vadd.f32 %v15645_v14, %v22672_v25  ;;  %v15581_v3 = vadd.f32 %v17403_v24, %v22776_v9  ;;  %v15575_v63 = vpop.f32.mrb[175].mxu0 }
 0xe45   :  { %v15660_v58 = vadd.f32 %v15644_v46, %v22669_v8  ;;  %v15576_v49 = vadd.f32 %v22776_v9, %v15575_v63  ;;  %v23414_v46 = vld [vmem:[#allocation52_spill] sm:$0xff] }
 0xe46   :  { %v15677_v41 = vadd.f32 %v15661_v1, %v23406_v52  ;;  %v15647_v51 = vmax.f32 %v15581_v3, 0.0  ;;  %v23415_v3 = vld [vmem:[#allocation35_spill] sm:$0xff] }
 0xe47   :  { %v15676_v33 = vadd.f32 %v15660_v58, %v23407_v26  ;;  %v15646_v27 = vmax.f32 %v15576_v49, 0.0  ;;  %v17406_v17 = vpop.f32.mrb[176].mxu0  ;;  %v23416_v26 = vld [vmem:[#allocation69_spill] sm:$0xff] }
 0xe48   :  { %15693 = vst.msk [vmem:[#allocation8 + $0x8] sm:$0xff] %vm4196_vm0, %v15677_v41  ;;  %v15663_v59 = vadd.f32 %v15647_v51, %v22686_v30  ;;  %v15591_v25 = vadd.f32 %v17406_v17, %v22776_v9  ;;  %v15585_v11 = vpop.f32.mrb[177].mxu0  ;;  %v23417_v17 = vld [vmem:[#allocation71_spill] sm:$0xff] }
 0xe49   :  { %15692 = vst.msk [vmem:[#allocation8] sm:$0xff] %vm4196_vm0, %v15676_v33  ;;  %v15662_v8 = vadd.f32 %v15646_v27, %v22683_v62  ;;  %v15586_v5 = vadd.f32 %v22776_v9, %v15585_v11 }
 0xe4a   :  { %v15679_v42 = vadd.f32 %v15663_v59, %v23408_v28  ;;  %v15649_v7 = vmax.f32 %v15591_v25, 0.0 }
 0xe4b   :  { %v15678_v13 = vadd.f32 %v15662_v8, %v23409_v48  ;;  %v15648_v57 = vmax.f32 %v15586_v5, 0.0  ;;  %v17409_v6 = vpop.f32.mrb[178].mxu0 }
 0xe4c   :  { %15695 = vst.msk [vmem:[#allocation8 + $0x18] sm:$0xff] %vm4196_vm0, %v15679_v42  ;;  %v15665_v30 = vadd.f32 %v15649_v7, %v22700_v34  ;;  %v15601_v50 = vadd.f32 %v17409_v6, %v22776_v9  ;;  %v15595_v29 = vpop.f32.mrb[179].mxu0  ;;  %v23418_v42 = vld [vmem:[#allocation70_spill] sm:$0xff] }
 0xe4d   :  { %15694 = vst.msk [vmem:[#allocation8 + $0x10] sm:$0xff] %vm4196_vm0, %v15678_v13  ;;  %v15664_v62 = vadd.f32 %v15648_v57, %v22697_v4  ;;  %v15596_v32 = vadd.f32 %v22776_v9, %v15595_v29  ;;  %v23419_v13 = vld [vmem:[#allocation67_spill] sm:$0xff]  ;;  %v23421_v29 = vld [vmem:[#allocation73_spill] sm:$0xff] }
 0xe4e   :  { %v15681_v18 = vadd.f32 %v15665_v30, %v23410_v21  ;;  %v15651_v35 = vmax.f32 %v15601_v50, 0.0  ;;  %v23420_v50 = vld [vmem:[#allocation76_spill] sm:$0xff] }
 0xe4f   :  { %v15680_v45 = vadd.f32 %v15664_v62, %v23411_v55  ;;  %v15650_v0 = vmax.f32 %v15596_v32, 0.0  ;;  %v17412_v31 = vpop.f32.mrb[180].mxu0 }
 0xe50   :  { %15697 = vst.msk [vmem:[#allocation8 + $0x28] sm:$0xff] %vm4196_vm0, %v15681_v18  ;;  %v15667_v34 = vadd.f32 %v15651_v35, %v22714_v12  ;;  %v15611_v44 = vadd.f32 %v17412_v31, %v22776_v9  ;;  %v15605_v54 = vpop.f32.mrb[181].mxu0 }
 0xe51   :  { %15696 = vst.msk [vmem:[#allocation8 + $0x20] sm:$0xff] %vm4196_vm0, %v15680_v45  ;;  %v15666_v4 = vadd.f32 %v15650_v0, %v22711_v47  ;;  %v15606_v22 = vadd.f32 %v22776_v9, %v15605_v54 }
 0xe52   :  { %v15683_v40 = vadd.f32 %v15667_v34, %v23412_v15  ;;  %v15653_v10 = vmax.f32 %v15611_v44, 0.0 }
 0xe53   :  { %v15682_v60 = vadd.f32 %v15666_v4, %v23413_v43  ;;  %v15652_v16 = vmax.f32 %v15606_v22, 0.0  ;;  %v17415_v36 = vpop.f32.mrb[182].mxu0 }
 0xe54   :  { %15699 = vst.msk [vmem:[#allocation8 + $0x38] sm:$0xff] %vm4196_vm0, %v15683_v40  ;;  %v15669_v12 = vadd.f32 %v15653_v10, %v22728_v61  ;;  %v15621_v37 = vadd.f32 %v17415_v36, %v22776_v9  ;;  %v15615_v38 = vpop.f32.mrb[183].mxu0 }
 0xe55   :  { %15698 = vst.msk [vmem:[#allocation8 + $0x30] sm:$0xff] %vm4196_vm0, %v15682_v60  ;;  %v15668_v47 = vadd.f32 %v15652_v16, %v22725_v23  ;;  %v15616_v14 = vadd.f32 %v22776_v9, %v15615_v38 }
 0xe56   :  { %v15685_v24 = vadd.f32 %v15669_v12, %v23414_v46  ;;  %v15655_v1 = vmax.f32 %v15621_v37, 0.0 }
 0xe57   :  { %v15684_v63 = vadd.f32 %v15668_v47, %v23415_v3  ;;  %v15654_v58 = vmax.f32 %v15616_v14, 0.0  ;;  %v17418_v49 = vpop.f32.mrb[184].mxu0 }
 0xe58   :  { %15701 = vst.msk [vmem:[#allocation8 + $0x48] sm:$0xff] %vm4196_vm0, %v15685_v24  ;;  %v15671_v61 = vadd.f32 %v15655_v1, %v22742_v19  ;;  %v15631_v52 = vadd.f32 %v17418_v49, %v22776_v9  ;;  %v15625_v41 = vpop.f32.mrb[185].mxu0 }
 0xe59   :  { %15700 = vst.msk [vmem:[#allocation8 + $0x40] sm:$0xff] %vm4196_vm0, %v15684_v63  ;;  %v15670_v23 = vadd.f32 %v15654_v58, %v22739_v53  ;;  %v15626_v51 = vadd.f32 %v22776_v9, %v15625_v41 }
 0xe5a   :  { %v15687_v33 = vadd.f32 %v15671_v61, %v23416_v26  ;;  %v15657_v27 = vmax.f32 %v15631_v52, 0.0 }
 0xe5b   :  { %v15686_v59 = vadd.f32 %v15670_v23, %v23417_v17  ;;  %v15656_v25 = vmax.f32 %v15626_v51, 0.0  ;;  %v17421_v11 = vpop.f32.mrb[186].mxu0 }
 0xe5c   :  { %15703 = vst.msk [vmem:[#allocation8 + $0x58] sm:$0xff] %vm4196_vm0, %v15687_v33  ;;  %v15673_v19 = vadd.f32 %v15657_v27, %v22756_v2  ;;  %v15641_v8 = vadd.f32 %v17421_v11, %v22776_v9  ;;  %v15635_v5 = vpop.f32.mrb[187].mxu0 }
 0xe5d   :  { %15702 = vst.msk [vmem:[#allocation8 + $0x50] sm:$0xff] %vm4196_vm0, %v15686_v59  ;;  %v15672_v53 = vadd.f32 %v15656_v25, %v22753_v20  ;;  %v15636_v28 = vadd.f32 %v22776_v9, %v15635_v5 }
 0xe5e   :  { %v15689_v7 = vadd.f32 %v15673_v19, %v23418_v42  ;;  %v15659_v48 = vmax.f32 %v15641_v8, 0.0 }
 0xe5f   :  { %v15688_v57 = vadd.f32 %v15672_v53, %v23419_v13  ;;  %v15658_v6 = vmax.f32 %v15636_v28, 0.0 }
 0xe60   :  { %15705 = vst.msk [vmem:[#allocation8 + $0x68] sm:$0xff] %vm4196_vm0, %v15689_v7  ;;  %v15675_v30 = vadd.f32 %v15659_v48, %v22770_v39 }
 0xe61   :  { %15704 = vst.msk [vmem:[#allocation8 + $0x60] sm:$0xff] %vm4196_vm0, %v15688_v57  ;;  %v15674_v2 = vadd.f32 %v15658_v6, %v22767_v56 }
 0xe62   :  { %v15691_v20 = vadd.f32 %v15675_v30, %v23420_v50 }
 0xe63   :  { %v15690_v9 = vadd.f32 %v15674_v2, %v23421_v29 }
 0xe64   :  { %15707 = vst.msk [vmem:[#allocation8 + $0x78] sm:$0xff] %vm4196_vm0, %v15691_v20 }
 0xe65   :  { %15706 = vst.msk [vmem:[#allocation8 + $0x70] sm:$0xff] %vm4196_vm0, %v15690_v9 }
 0xe66   :  { %18169 = shalt.err (!%p18166_p0)
}
 0xe67   :  { %s18170_s18 = scalar_lea.hbm %s22864_s7, 2048 }
 0xe68   :  { %p18171_p1 = scmp.ne.s32.totalorder %s22864_s7, %s18170_s18  ;;  %p18174_p2 = scmp.lt.u32.totalorder %s18170_s18, %s22864_s7 }
 0xe6a   :  { %p18176_p3 = pnand %p18174_p2, %p18171_p1 }
 0xe6c   :  { %18179 = shalt.err (!%p18176_p3)
}
 0xe6d   :  { %15719 = dma.vmem_to_hbm [thread:$0]  %s15714_s25, 2048, %s22864_s7, [#allocation4], %s18187_s11, %s18187_s11, %s18188_s12  }
 0xe6e   :  { %18184 = dma.done.wait [#allocation4], 2048  }
 0xe6f   :  { %18185 = vsyncadd [#allocation4], 4294965248 }
 0xe70   :  { %15723 = vsyncpa [#allocation3], 1 }
 0xe71   :  { %15724 = vsyncpa [#allocation6], 1 }
 0xe72   :  { %15725 = vsyncpa [#allocation4], 1 }

</bundles_post_ra>
